<compile_context>
chip_gen: v6e
topology: v6e:2x2x1
jax: 0.10.0
libtpu: 0.0.40
codegen_flags: <defaults>
</compile_context>

<pallas_src>
import functools

import numpy as np

import jax
import jax.numpy as jnp
from jax import lax
from jax.experimental import pallas as pl
from jax.experimental.pallas import tpu as pltpu

EPS = 1e-5
LANE = 128


def _round_up(v, m):
    return ((v + m - 1) // m) * m


def _vmem_limit(need_bytes):
    """Generous headroom over the computed working set, clamped to sane bounds."""
    return int(min(max(2 * need_bytes + (8 << 20), 32 << 20), 100 << 20))


# --------------------------------------------------------------------------
# Kernel 1/2: [optional folded-BN affine + ReLU] -> 3x3 conv (packed-K im2col,
# bf16 hi/lo split matmuls, f32 accumulate) -> raw conv output + per-image
# BN partial stats.  One grid step == `nb` images.
# --------------------------------------------------------------------------
def _conv3x3_bn_stats_kernel(x_ref, sc_ref, sh_ref, whi_ref, wlo_ref, mask_ref,
                             out_ref, stats_ref,
                             *, H, W, C, K_pad, nb, apply_act):
    HW = H * W
    Cp = x_ref.shape[-1]
    G = _round_up(W + 1, 8)            # zero guard rows (8-row aligned)
    inv_hw = 1.0 / float(HW)
    k_tail = K_pad - 9 * C

    mask = mask_ref[...]               # (HW, K_pad) 0/1 f32 conv-padding mask
    w_hi = whi_ref[...]                # (K_pad, Cp) bf16
    w_lo = wlo_ref[...]                # (K_pad, Cp) bf16
    zguard = jnp.zeros((G, Cp), jnp.float32)

    for i in range(nb):
        x_img = x_ref[i]                                           # (HW, Cp)
        if apply_act:   # fold previous BN (scale/shift) + ReLU into this pass
            x_img = jnp.maximum(x_img * sc_ref[...] + sh_ref[...], 0.0)

        # Guarded, spatially-flattened activation: rows [G, G+HW) = the image.
        xg = jnp.concatenate([zguard, x_img, zguard], axis=0)      # (HW+2G, Cp)

        # Packed im2col: column block t holds the row-shifted view for tap
        # (dh, dw); out-of-image taps are zeroed by the mask.
        pieces = []
        for dh in (-1, 0, 1):
            for dw in (-1, 0, 1):
                s = dh * W + dw
                win = xg[G + s:G + s + HW, :]                      # (HW, Cp)
                pieces.append(win[:, :C] if C < Cp else win)
        if k_tail > 0:
            pieces.append(jnp.zeros((HW, k_tail), jnp.float32))
        patch = jnp.concatenate(pieces, axis=1) * mask             # (HW, K_pad)

        # bf16 hi/lo split -> 3 bf16 MXU matmuls with f32 accumulation.
        p_hi = patch.astype(jnp.bfloat16)
        p_lo = (patch - p_hi.astype(jnp.float32)).astype(jnp.bfloat16)
        acc = jnp.dot(p_hi, w_hi, preferred_element_type=jnp.float32)
        acc = acc + jnp.dot(p_lo, w_hi, preferred_element_type=jnp.float32)
        acc = acc + jnp.dot(p_hi, w_lo, preferred_element_type=jnp.float32)

        out_ref[i] = acc

        # Per-image BN partials in f32: mean + centered second moment
        # (combined across images in the wrapper with Chan's formula).
        mean_i = jnp.sum(acc, axis=0, keepdims=True) * inv_hw      # (1, Cp)
        diff = acc - mean_i
        stats_ref[i, 0:1, :] = mean_i
        stats_ref[i, 1:2, :] = jnp.sum(diff * diff, axis=0, keepdims=True)


# --------------------------------------------------------------------------
# Kernel 3: folded bn_b affine + identity residual + ReLU.
# --------------------------------------------------------------------------
def _bn_residual_relu_kernel(b_ref, x_ref, sc_ref, sh_ref, out_ref):
    s = sc_ref[...].reshape(1, 1, -1)
    t = sh_ref[...].reshape(1, 1, -1)
    out_ref[...] = jnp.maximum(x_ref[...] + b_ref[...] * s + t, 0.0)


# --------------------------------------------------------------------------
# pallas_call wrappers
# --------------------------------------------------------------------------
def _conv_pass(x, scale, shift, w_hi, w_lo, mask, *, H, W, C, nb, apply_act):
    N, HW, Cp = x.shape
    K_pad = w_hi.shape[0]
    kernel = functools.partial(_conv3x3_bn_stats_kernel, H=H, W=W, C=C,
                               K_pad=K_pad, nb=nb, apply_act=apply_act)

    act_spec = pl.BlockSpec((nb, HW, Cp), lambda b: (b, 0, 0))
    vec_spec = pl.BlockSpec((1, Cp), lambda b: (0, 0))
    w_spec = pl.BlockSpec((K_pad, Cp), lambda b: (0, 0))
    mask_spec = pl.BlockSpec((HW, K_pad), lambda b: (0, 0))

    act_block = nb * HW * Cp * 4
    need = (2 * 2 * act_block                 # double-buffered in/out blocks
            + 2 * K_pad * Cp * 2              # bf16 weights (hi + lo)
            + HW * K_pad * 4                  # mask
            + HW * K_pad * 8 + HW * Cp * 4)   # patch hi/lo + acc temporaries

    return pl.pallas_call(
        kernel,
        out_shape=(jax.ShapeDtypeStruct((N, HW, Cp), jnp.float32),
                   jax.ShapeDtypeStruct((N, 2, Cp), jnp.float32)),
        grid=(N // nb,),
        in_specs=[act_spec, vec_spec, vec_spec, w_spec, w_spec, mask_spec],
        out_specs=(act_spec, pl.BlockSpec((nb, 2, Cp), lambda b: (b, 0, 0))),
        compiler_params=pltpu.CompilerParams(
            dimension_semantics=("parallel",),
            vmem_limit_bytes=_vmem_limit(need)),
    )(x, scale, shift, w_hi, w_lo, mask)


def _residual_pass(b_raw, x, scale, shift, *, nb):
    N, HW, Cp = x.shape
    act_spec = pl.BlockSpec((nb, HW, Cp), lambda b: (b, 0, 0))
    vec_spec = pl.BlockSpec((1, Cp), lambda b: (0, 0))
    need = 3 * 2 * nb * HW * Cp * 4
    return pl.pallas_call(
        _bn_residual_relu_kernel,
        out_shape=jax.ShapeDtypeStruct((N, HW, Cp), jnp.float32),
        grid=(N // nb,),
        in_specs=[act_spec, act_spec, vec_spec, vec_spec],
        out_specs=act_spec,
        input_output_aliases={0: 0},          # write output over b_raw
        compiler_params=pltpu.CompilerParams(
            dimension_semantics=("parallel",),
            vmem_limit_bytes=_vmem_limit(need)),
    )(b_raw, x, scale, shift)


# --------------------------------------------------------------------------
# Host-side helpers
# --------------------------------------------------------------------------
def _bn_fold(stats, gamma, beta, cp, hw):
    """Combine per-image (mean, M2) partials -> folded BN scale/shift."""
    n = stats.shape[0]
    means = stats[:, 0, :]                                   # (N, Cp)
    m2s = stats[:, 1, :]                                     # (N, Cp)
    mean = jnp.mean(means, axis=0)                           # (Cp,)
    m2 = jnp.sum(m2s, axis=0) + hw * jnp.sum((means - mean[None, :]) ** 2, axis=0)
    var = m2 / (n * hw)                                      # biased (training BN)
    g = jnp.pad(gamma.astype(jnp.float32), (0, cp - gamma.shape[0]))
    b = jnp.pad(beta.astype(jnp.float32), (0, cp - beta.shape[0]))
    scale = g * lax.rsqrt(var + EPS)
    shift = b - mean * scale
    return scale.reshape(1, cp), shift.reshape(1, cp)


def _flatten_split_w(w, C, Cp, K_pad):
    """(3,3,Cin,Cout) HWIO -> packed (K_pad, Cp) rows (kh*3+kw)*C + cin, bf16 hi/lo."""
    w = w.astype(jnp.float32)
    cout = w.shape[3]
    wf = w.reshape(9 * C, cout)
    wf = jnp.pad(wf, ((0, K_pad - 9 * C), (0, Cp - cout)))
    w_hi = wf.astype(jnp.bfloat16)
    w_lo = (wf - w_hi.astype(jnp.float32)).astype(jnp.bfloat16)
    return w_hi, w_lo


def _make_tap_mask(H, W, C, K_pad):
    """(HW, K_pad) 0/1 mask implementing the conv's zero padding (compile time)."""
    hh, ww = np.meshgrid(np.arange(H), np.arange(W), indexing="ij")
    cols = np.zeros((H * W, K_pad), np.float32)
    t = 0
    for dh in (-1, 0, 1):
        for dw in (-1, 0, 1):
            valid = ((hh + dh >= 0) & (hh + dh < H) &
                     (ww + dw >= 0) & (ww + dw < W)).reshape(H * W)
            cols[:, t * C:(t + 1) * C] = valid.astype(np.float32)[:, None]
            t += 1
    return jnp.asarray(cols)


def _pick_nb(N, HW, Cp):
    """Images per grid step: amortize per-step overhead, keep >=2 parallel steps."""
    budget = 2 << 20                       # bytes per activation block
    best = 1
    for nb in range(1, N + 1):
        if N % nb:
            continue
        if N >= 2 and N // nb < 2:         # keep both v7x TensorCores busy
            continue
        if nb * HW * Cp * 4 <= budget:
            best = nb
    return best


@jax.jit
def resnet_basicblock(x_nchw, wa, ga, ba, wb, gb, bb):
    """x_nchw: (N, C, H, W) f32.  Conv weights are HWIO: (3, 3, Cin, Cout)."""
    N, C, H, W = x_nchw.shape
    assert (wa.shape[2] == C and wa.shape[3] == C
            and wb.shape[2] == C and wb.shape[3] == C), (
        "identity residual (downsample=None) requires inplanes == planes")

    HW = H * W
    Cp = _round_up(C, LANE)
    K_pad = max(_round_up(9 * C, LANE), LANE)

    # NCHW -> (N, H*W, Cp): spatially flattened, channels zero-padded to a
    # full 128-lane tile (lane-dense blocks and unmasked stores).
    x = jnp.transpose(x_nchw, (0, 2, 3, 1)).astype(jnp.float32).reshape(N, HW, C)
    xp = jnp.pad(x, ((0, 0), (0, 0), (0, Cp - C)))

    mask = _make_tap_mask(H, W, C, K_pad)
    wa_hi, wa_lo = _flatten_split_w(wa, C, Cp, K_pad)
    wb_hi, wb_lo = _flatten_split_w(wb, C, Cp, K_pad)
    ones_c = jnp.ones((1, Cp), jnp.float32)
    zeros_c = jnp.zeros((1, Cp), jnp.float32)
    nb = _pick_nb(N, HW, Cp)

    # pass 1: conv_a + bn_a partial stats
    a_raw, a_stats = _conv_pass(xp, ones_c, zeros_c, wa_hi, wa_lo, mask,
                                H=H, W=W, C=C, nb=nb, apply_act=False)
    sa, ta = _bn_fold(a_stats, ga, ba, Cp, HW)
    # pass 2: bn_a affine + ReLU + conv_b + bn_b partial stats
    b_raw, b_stats = _conv_pass(a_raw, sa, ta, wb_hi, wb_lo, mask,
                                H=H, W=W, C=C, nb=nb, apply_act=True)
    sb, tb = _bn_fold(b_stats, gb, bb, Cp, HW)
    # pass 3: bn_b affine + identity residual + ReLU (in place over b_raw)
    out = _residual_pass(b_raw, xp, sb, tb, nb=nb)

    out = out.reshape(N, H, W, Cp)[..., :C]
    return jnp.transpose(out, (0, 3, 1, 2))                  # back to NCHW


def reference(x_nchw, wa, ga, ba, wb, gb, bb):
    """Plain-JAX reference mirroring the PyTorch forward (training-mode BN)."""
    def conv(x, w):
        return lax.conv_general_dilated(
            x, w, window_strides=(1, 1), padding=((1, 1), (1, 1)),
            dimension_numbers=('NCHW', 'HWIO', 'NCHW'))

    def bn(x, g, b):
        mean = x.mean(axis=(0, 2, 3), keepdims=True)
        var = x.var(axis=(0, 2, 3), keepdims=True)  # biased
        return ((x - mean) / jnp.sqrt(var + EPS)
                * g.reshape(1, -1, 1, 1) + b.reshape(1, -1, 1, 1))

    y = jax.nn.relu(bn(conv(x_nchw, wa), ga, ba))
    y = bn(conv(y, wb), gb, bb)
    return jax.nn.relu(x_nchw + y)


if __name__ == "__main__":
    # Shapes consistent with the module: inplanes == planes, stride=1,
    # downsample=None (identity residual).
    N, C, H, W = 2, 4, 16, 16
    planes = C

    key = jax.random.PRNGKey(0)
    kx, kwa, kwb, kga, kba, kgb, kbb = jax.random.split(key, 7)

    x = jax.random.normal(kx, (N, C, H, W), dtype=jnp.float32)
    wa = 0.1 * jax.random.normal(kwa, (3, 3, C, planes), dtype=jnp.float32)
    wb = 0.1 * jax.random.normal(kwb, (3, 3, planes, planes), dtype=jnp.float32)
    ga = 1.0 + 0.1 * jax.random.normal(kga, (planes,), dtype=jnp.float32)
    ba = 0.1 * jax.random.normal(kba, (planes,), dtype=jnp.float32)
    gb = 1.0 + 0.1 * jax.random.normal(kgb, (planes,), dtype=jnp.float32)
    bb = 0.1 * jax.random.normal(kbb, (planes,), dtype=jnp.float32)

    out = jax.block_until_ready(resnet_basicblock(x, wa, ga, ba, wb, gb, bb))
    ref = jax.block_until_ready(reference(x, wa, ga, ba, wb, gb, bb))

    assert out.shape == (N, planes, H, W)
    assert jnp.allclose(out, ref, atol=1e-3, rtol=1e-3), (
        f"max abs err {jnp.max(jnp.abs(out - ref))}")
    print("KERNEL_OK")
</pallas_src>

<mosaic_0001>
module attributes {stable_mosaic.version = 11 : i64} {
  func.func @_conv3x3_bn_stats_kernel(%arg0: i32, %arg1: memref<1x256x128xf32, #tpu.memory_space<vmem>>, %arg2: memref<1x128xf32, #tpu.memory_space<vmem>>, %arg3: memref<1x128xf32, #tpu.memory_space<vmem>>, %arg4: memref<128x128xbf16, #tpu.memory_space<vmem>>, %arg5: memref<128x128xbf16, #tpu.memory_space<vmem>>, %arg6: memref<256x128xf32, #tpu.memory_space<vmem>>, %arg7: memref<1x256x128xf32, #tpu.memory_space<vmem>>, %arg8: memref<1x2x128xf32, #tpu.memory_space<vmem>>) attributes {dimension_semantics = [#tpu.dimension_semantics<parallel>], iteration_bounds = array<i64: 2>, scalar_prefetch = 0 : i64, scratch_operands = 0 : i64, tpu.core_type = #tpu.core_type<tc>, window_params = [{transform_indices = @transform_0, window_bounds = array<i64: 1, 256, 128>}, {pipeline_mode = #tpu.pipeline_mode<synchronous>, transform_indices = @transform_1, window_bounds = array<i64: 1, 128>}, {pipeline_mode = #tpu.pipeline_mode<synchronous>, transform_indices = @transform_2, window_bounds = array<i64: 1, 128>}, {pipeline_mode = #tpu.pipeline_mode<synchronous>, transform_indices = @transform_3, window_bounds = array<i64: 128, 128>}, {pipeline_mode = #tpu.pipeline_mode<synchronous>, transform_indices = @transform_4, window_bounds = array<i64: 128, 128>}, {pipeline_mode = #tpu.pipeline_mode<synchronous>, transform_indices = @transform_5, window_bounds = array<i64: 256, 128>}, {transform_indices = @transform_6, window_bounds = array<i64: 1, 256, 128>}, {transform_indices = @transform_7, window_bounds = array<i64: 1, 2, 128>}]} {
    %c0 = arith.constant 0 : index
    %c0_0 = arith.constant 0 : index
    %0 = vector.load %arg6[%c0, %c0_0] : memref<256x128xf32, #tpu.memory_space<vmem>>, vector<256x128xf32>
    %c0_1 = arith.constant 0 : index
    %c0_2 = arith.constant 0 : index
    %1 = vector.load %arg4[%c0_1, %c0_2] : memref<128x128xbf16, #tpu.memory_space<vmem>>, vector<128x128xbf16>
    %c0_3 = arith.constant 0 : index
    %c0_4 = arith.constant 0 : index
    %2 = vector.load %arg5[%c0_3, %c0_4] : memref<128x128xbf16, #tpu.memory_space<vmem>>, vector<128x128xbf16>
    %cst = arith.constant 0.000000e+00 : f32
    %3 = vector.broadcast %cst : f32 to vector<24x128xf32>
    %c0_5 = arith.constant 0 : index
    %c0_6 = arith.constant 0 : index
    %c0_7 = arith.constant 0 : index
    %4 = vector.load %arg1[%c0_5, %c0_6, %c0_7] : memref<1x256x128xf32, #tpu.memory_space<vmem>>, vector<1x256x128xf32>
    %5 = vector.shape_cast %4 : vector<1x256x128xf32> to vector<256x128xf32>
    %6 = tpu.concatenate %3, %5, %3 in 0 : vector<24x128xf32>, vector<256x128xf32>, vector<24x128xf32> -> vector<304x128xf32>
    %7 = vector.extract_strided_slice %6 {offsets = [7, 0], sizes = [256, 128], strides = [1, 1]} : vector<304x128xf32> to vector<256x128xf32>
    %8 = vector.extract_strided_slice %7 {offsets = [0, 0], sizes = [256, 4], strides = [1, 1]} : vector<256x128xf32> to vector<256x4xf32>
    %9 = vector.extract_strided_slice %6 {offsets = [8, 0], sizes = [256, 128], strides = [1, 1]} : vector<304x128xf32> to vector<256x128xf32>
    %10 = vector.extract_strided_slice %9 {offsets = [0, 0], sizes = [256, 4], strides = [1, 1]} : vector<256x128xf32> to vector<256x4xf32>
    %11 = vector.extract_strided_slice %6 {offsets = [9, 0], sizes = [256, 128], strides = [1, 1]} : vector<304x128xf32> to vector<256x128xf32>
    %12 = vector.extract_strided_slice %11 {offsets = [0, 0], sizes = [256, 4], strides = [1, 1]} : vector<256x128xf32> to vector<256x4xf32>
    %13 = vector.extract_strided_slice %6 {offsets = [23, 0], sizes = [256, 128], strides = [1, 1]} : vector<304x128xf32> to vector<256x128xf32>
    %14 = vector.extract_strided_slice %13 {offsets = [0, 0], sizes = [256, 4], strides = [1, 1]} : vector<256x128xf32> to vector<256x4xf32>
    %15 = vector.extract_strided_slice %6 {offsets = [24, 0], sizes = [256, 128], strides = [1, 1]} : vector<304x128xf32> to vector<256x128xf32>
    %16 = vector.extract_strided_slice %15 {offsets = [0, 0], sizes = [256, 4], strides = [1, 1]} : vector<256x128xf32> to vector<256x4xf32>
    %17 = vector.extract_strided_slice %6 {offsets = [25, 0], sizes = [256, 128], strides = [1, 1]} : vector<304x128xf32> to vector<256x128xf32>
    %18 = vector.extract_strided_slice %17 {offsets = [0, 0], sizes = [256, 4], strides = [1, 1]} : vector<256x128xf32> to vector<256x4xf32>
    %19 = vector.extract_strided_slice %6 {offsets = [39, 0], sizes = [256, 128], strides = [1, 1]} : vector<304x128xf32> to vector<256x128xf32>
    %20 = vector.extract_strided_slice %19 {offsets = [0, 0], sizes = [256, 4], strides = [1, 1]} : vector<256x128xf32> to vector<256x4xf32>
    %21 = vector.extract_strided_slice %6 {offsets = [40, 0], sizes = [256, 128], strides = [1, 1]} : vector<304x128xf32> to vector<256x128xf32>
    %22 = vector.extract_strided_slice %21 {offsets = [0, 0], sizes = [256, 4], strides = [1, 1]} : vector<256x128xf32> to vector<256x4xf32>
    %23 = vector.extract_strided_slice %6 {offsets = [41, 0], sizes = [256, 128], strides = [1, 1]} : vector<304x128xf32> to vector<256x128xf32>
    %24 = vector.extract_strided_slice %23 {offsets = [0, 0], sizes = [256, 4], strides = [1, 1]} : vector<256x128xf32> to vector<256x4xf32>
    %cst_8 = arith.constant 0.000000e+00 : f32
    %25 = vector.broadcast %cst_8 : f32 to vector<256x92xf32>
    %26 = tpu.concatenate %8, %10, %12, %14, %16, %18, %20, %22, %24, %25 in 1 : vector<256x4xf32>, vector<256x4xf32>, vector<256x4xf32>, vector<256x4xf32>, vector<256x4xf32>, vector<256x4xf32>, vector<256x4xf32>, vector<256x4xf32>, vector<256x4xf32>, vector<256x92xf32> -> vector<256x128xf32>
    %27 = arith.mulf %26, %0 : vector<256x128xf32>
    %28 = arith.truncf %27 : vector<256x128xf32> to vector<256x128xbf16>
    %29 = arith.extf %28 : vector<256x128xbf16> to vector<256x128xf32>
    %30 = arith.subf %27, %29 : vector<256x128xf32>
    %31 = arith.truncf %30 : vector<256x128xf32> to vector<256x128xbf16>
    %cst_9 = arith.constant dense<0.000000e+00> : vector<256x128xf32>
    %32 = tpu.matmul %28, %1, %cst_9 {dimension_numbers = #tpu.dot_dimension_numbers<[1], [0], [0], [1], [0, 0, 1, 1], [], []>} : vector<256x128xbf16>, vector<128x128xbf16>, vector<256x128xf32> -> vector<256x128xf32>
    %cst_10 = arith.constant dense<0.000000e+00> : vector<256x128xf32>
    %33 = tpu.matmul %31, %1, %cst_10 {dimension_numbers = #tpu.dot_dimension_numbers<[1], [0], [0], [1], [0, 0, 1, 1], [], []>} : vector<256x128xbf16>, vector<128x128xbf16>, vector<256x128xf32> -> vector<256x128xf32>
    %34 = arith.addf %32, %33 : vector<256x128xf32>
    %cst_11 = arith.constant dense<0.000000e+00> : vector<256x128xf32>
    %35 = tpu.matmul %28, %2, %cst_11 {dimension_numbers = #tpu.dot_dimension_numbers<[1], [0], [0], [1], [0, 0, 1, 1], [], []>} : vector<256x128xbf16>, vector<128x128xbf16>, vector<256x128xf32> -> vector<256x128xf32>
    %36 = arith.addf %34, %35 : vector<256x128xf32>
    %c0_12 = arith.constant 0 : index
    %c0_13 = arith.constant 0 : index
    %c0_14 = arith.constant 0 : index
    %37 = vector.load %arg7[%c0_12, %c0_13, %c0_14] : memref<1x256x128xf32, #tpu.memory_space<vmem>>, vector<1x256x128xf32>
    %38 = vector.shape_cast %37 : vector<1x256x128xf32> to vector<256x128xf32>
    %39 = vector.shape_cast %36 : vector<256x128xf32> to vector<1x256x128xf32>
    tpu.vector_store %arg7[%c0_12, %c0_13, %c0_14], %39 {strides = array<i32>} : memref<1x256x128xf32, #tpu.memory_space<vmem>>, vector<1x256x128xf32>,
    %cst_15 = arith.constant dense<0.000000e+00> : vector<128xf32>
    %40 = vector.multi_reduction <add>, %36, %cst_15 [0] : vector<256x128xf32> to vector<128xf32>
    %41 = vector.shape_cast %40 : vector<128xf32> to vector<1x128xf32>
    %cst_16 = arith.constant 3.906250e-03 : f32
    %42 = vector.broadcast %cst_16 : f32 to vector<1x128xf32>
    %43 = arith.mulf %41, %42 : vector<1x128xf32>
    %44 = vector.broadcast %43 : vector<1x128xf32> to vector<256x128xf32>
    %45 = arith.subf %36, %44 : vector<256x128xf32>
    %c0_17 = arith.constant 0 : index
    %c0_18 = arith.constant 0 : index
    %c0_19 = arith.constant 0 : index
    %46 = vector.load %arg8[%c0_17, %c0_18, %c0_19] : memref<1x2x128xf32, #tpu.memory_space<vmem>>, vector<1x1x128xf32>
    %47 = vector.shape_cast %46 : vector<1x1x128xf32> to vector<1x128xf32>
    %48 = vector.shape_cast %43 : vector<1x128xf32> to vector<1x1x128xf32>
    tpu.vector_store %arg8[%c0_17, %c0_18, %c0_19], %48 {strides = array<i32>} : memref<1x2x128xf32, #tpu.memory_space<vmem>>, vector<1x1x128xf32>,
    %49 = arith.mulf %45, %45 : vector<256x128xf32>
    %cst_20 = arith.constant dense<0.000000e+00> : vector<128xf32>
    %50 = vector.multi_reduction <add>, %49, %cst_20 [0] : vector<256x128xf32> to vector<128xf32>
    %51 = vector.shape_cast %50 : vector<128xf32> to vector<1x128xf32>
    %c0_21 = arith.constant 0 : index
    %c1 = arith.constant 1 : index
    %c0_22 = arith.constant 0 : index
    %52 = vector.load %arg8[%c0_21, %c1, %c0_22] : memref<1x2x128xf32, #tpu.memory_space<vmem>>, vector<1x1x128xf32>
    %53 = vector.shape_cast %52 : vector<1x1x128xf32> to vector<1x128xf32>
    %54 = vector.shape_cast %51 : vector<1x128xf32> to vector<1x1x128xf32>
    tpu.vector_store %arg8[%c0_21, %c1, %c0_22], %54 {strides = array<i32>} : memref<1x2x128xf32, #tpu.memory_space<vmem>>, vector<1x1x128xf32>,
    return
  }
  func.func @transform_0(%arg0: i32) -> (i32, i32, i32) {
    %c0_i32 = arith.constant 0 : i32
    %c0_i32_0 = arith.constant 0 : i32
    %c0_i32_1 = arith.constant 0 : i32
    return %arg0, %c0_i32, %c0_i32_0 : i32, i32, i32
  }
  func.func @transform_1(%arg0: i32) -> (i32, i32) {
    %c0_i32 = arith.constant 0 : i32
    %c0_i32_0 = arith.constant 0 : i32
    %c0_i32_1 = arith.constant 0 : i32
    return %c0_i32, %c0_i32_0 : i32, i32
  }
  func.func @transform_2(%arg0: i32) -> (i32, i32) {
    %c0_i32 = arith.constant 0 : i32
    %c0_i32_0 = arith.constant 0 : i32
    %c0_i32_1 = arith.constant 0 : i32
    return %c0_i32, %c0_i32_0 : i32, i32
  }
  func.func @transform_3(%arg0: i32) -> (i32, i32) {
    %c0_i32 = arith.constant 0 : i32
    %c0_i32_0 = arith.constant 0 : i32
    %c0_i32_1 = arith.constant 0 : i32
    return %c0_i32, %c0_i32_0 : i32, i32
  }
  func.func @transform_4(%arg0: i32) -> (i32, i32) {
    %c0_i32 = arith.constant 0 : i32
    %c0_i32_0 = arith.constant 0 : i32
    %c0_i32_1 = arith.constant 0 : i32
    return %c0_i32, %c0_i32_0 : i32, i32
  }
  func.func @transform_5(%arg0: i32) -> (i32, i32) {
    %c0_i32 = arith.constant 0 : i32
    %c0_i32_0 = arith.constant 0 : i32
    %c0_i32_1 = arith.constant 0 : i32
    return %c0_i32, %c0_i32_0 : i32, i32
  }
  func.func @transform_6(%arg0: i32) -> (i32, i32, i32) {
    %c0_i32 = arith.constant 0 : i32
    %c0_i32_0 = arith.constant 0 : i32
    %c0_i32_1 = arith.constant 0 : i32
    return %arg0, %c0_i32, %c0_i32_0 : i32, i32, i32
  }
  func.func @transform_7(%arg0: i32) -> (i32, i32, i32) {
    %c0_i32 = arith.constant 0 : i32
    %c0_i32_0 = arith.constant 0 : i32
    %c0_i32_1 = arith.constant 0 : i32
    return %arg0, %c0_i32, %c0_i32_0 : i32, i32, i32
  }
}

module attributes {stable_mosaic.version = 11 : i64} {
  func.func @_bn_residual_relu_kernel(%arg0: i32, %arg1: memref<1x256x128xf32, #tpu.memory_space<vmem>>, %arg2: memref<1x256x128xf32, #tpu.memory_space<vmem>>, %arg3: memref<1x128xf32, #tpu.memory_space<vmem>>, %arg4: memref<1x128xf32, #tpu.memory_space<vmem>>, %arg5: memref<1x256x128xf32, #tpu.memory_space<vmem>>) attributes {dimension_semantics = [#tpu.dimension_semantics<parallel>], iteration_bounds = array<i64: 2>, scalar_prefetch = 0 : i64, scratch_operands = 0 : i64, tpu.core_type = #tpu.core_type<tc>, window_params = [{transform_indices = @transform_0, window_bounds = array<i64: 1, 256, 128>}, {transform_indices = @transform_1, window_bounds = array<i64: 1, 256, 128>}, {pipeline_mode = #tpu.pipeline_mode<synchronous>, transform_indices = @transform_2, window_bounds = array<i64: 1, 128>}, {pipeline_mode = #tpu.pipeline_mode<synchronous>, transform_indices = @transform_3, window_bounds = array<i64: 1, 128>}, {transform_indices = @transform_4, window_bounds = array<i64: 1, 256, 128>}]} {
    %c0 = arith.constant 0 : index
    %c0_0 = arith.constant 0 : index
    %0 = vector.load %arg3[%c0, %c0_0] : memref<1x128xf32, #tpu.memory_space<vmem>>, vector<1x128xf32>
    %1 = vector.shape_cast %0 : vector<1x128xf32> to vector<1x1x128xf32>
    %c0_1 = arith.constant 0 : index
    %c0_2 = arith.constant 0 : index
    %2 = vector.load %arg4[%c0_1, %c0_2] : memref<1x128xf32, #tpu.memory_space<vmem>>, vector<1x128xf32>
    %3 = vector.shape_cast %2 : vector<1x128xf32> to vector<1x1x128xf32>
    %c0_3 = arith.constant 0 : index
    %c0_4 = arith.constant 0 : index
    %c0_5 = arith.constant 0 : index
    %4 = vector.load %arg2[%c0_3, %c0_4, %c0_5] : memref<1x256x128xf32, #tpu.memory_space<vmem>>, vector<1x256x128xf32>
    %c0_6 = arith.constant 0 : index
    %c0_7 = arith.constant 0 : index
    %c0_8 = arith.constant 0 : index
    %5 = vector.load %arg1[%c0_6, %c0_7, %c0_8] : memref<1x256x128xf32, #tpu.memory_space<vmem>>, vector<1x256x128xf32>
    %6 = vector.broadcast %1 : vector<1x1x128xf32> to vector<1x256x128xf32>
    %7 = arith.mulf %5, %6 : vector<1x256x128xf32>
    %8 = arith.addf %4, %7 : vector<1x256x128xf32>
    %9 = vector.broadcast %3 : vector<1x1x128xf32> to vector<1x256x128xf32>
    %10 = arith.addf %8, %9 : vector<1x256x128xf32>
    %cst = arith.constant 0.000000e+00 : f32
    %11 = vector.broadcast %cst : f32 to vector<1x256x128xf32>
    %12 = arith.maximumf %10, %11 : vector<1x256x128xf32>
    %c0_9 = arith.constant 0 : index
    %c0_10 = arith.constant 0 : index
    %c0_11 = arith.constant 0 : index
    %13 = vector.load %arg5[%c0_9, %c0_10, %c0_11] : memref<1x256x128xf32, #tpu.memory_space<vmem>>, vector<1x256x128xf32>
    tpu.vector_store %arg5[%c0_9, %c0_10, %c0_11], %12 {strides = array<i32>} : memref<1x256x128xf32, #tpu.memory_space<vmem>>, vector<1x256x128xf32>,
    return
  }
  func.func @transform_0(%arg0: i32) -> (i32, i32, i32) {
    %c0_i32 = arith.constant 0 : i32
    %c0_i32_0 = arith.constant 0 : i32
    %c0_i32_1 = arith.constant 0 : i32
    return %arg0, %c0_i32, %c0_i32_0 : i32, i32, i32
  }
  func.func @transform_1(%arg0: i32) -> (i32, i32, i32) {
    %c0_i32 = arith.constant 0 : i32
    %c0_i32_0 = arith.constant 0 : i32
    %c0_i32_1 = arith.constant 0 : i32
    return %arg0, %c0_i32, %c0_i32_0 : i32, i32, i32
  }
  func.func @transform_2(%arg0: i32) -> (i32, i32) {
    %c0_i32 = arith.constant 0 : i32
    %c0_i32_0 = arith.constant 0 : i32
    %c0_i32_1 = arith.constant 0 : i32
    return %c0_i32, %c0_i32_0 : i32, i32
  }
  func.func @transform_3(%arg0: i32) -> (i32, i32) {
    %c0_i32 = arith.constant 0 : i32
    %c0_i32_0 = arith.constant 0 : i32
    %c0_i32_1 = arith.constant 0 : i32
    return %c0_i32, %c0_i32_0 : i32, i32
  }
  func.func @transform_4(%arg0: i32) -> (i32, i32, i32) {
    %c0_i32 = arith.constant 0 : i32
    %c0_i32_0 = arith.constant 0 : i32
    %c0_i32_1 = arith.constant 0 : i32
    return %arg0, %c0_i32, %c0_i32_0 : i32, i32, i32
  }
}

module attributes {stable_mosaic.version = 11 : i64} {
  func.func @_conv3x3_bn_stats_kernel(%arg0: i32, %arg1: memref<1x256x128xf32, #tpu.memory_space<vmem>>, %arg2: memref<1x128xf32, #tpu.memory_space<vmem>>, %arg3: memref<1x128xf32, #tpu.memory_space<vmem>>, %arg4: memref<128x128xbf16, #tpu.memory_space<vmem>>, %arg5: memref<128x128xbf16, #tpu.memory_space<vmem>>, %arg6: memref<256x128xf32, #tpu.memory_space<vmem>>, %arg7: memref<1x256x128xf32, #tpu.memory_space<vmem>>, %arg8: memref<1x2x128xf32, #tpu.memory_space<vmem>>) attributes {dimension_semantics = [#tpu.dimension_semantics<parallel>], iteration_bounds = array<i64: 2>, scalar_prefetch = 0 : i64, scratch_operands = 0 : i64, tpu.core_type = #tpu.core_type<tc>, window_params = [{transform_indices = @transform_0, window_bounds = array<i64: 1, 256, 128>}, {pipeline_mode = #tpu.pipeline_mode<synchronous>, transform_indices = @transform_1, window_bounds = array<i64: 1, 128>}, {pipeline_mode = #tpu.pipeline_mode<synchronous>, transform_indices = @transform_2, window_bounds = array<i64: 1, 128>}, {pipeline_mode = #tpu.pipeline_mode<synchronous>, transform_indices = @transform_3, window_bounds = array<i64: 128, 128>}, {pipeline_mode = #tpu.pipeline_mode<synchronous>, transform_indices = @transform_4, window_bounds = array<i64: 128, 128>}, {pipeline_mode = #tpu.pipeline_mode<synchronous>, transform_indices = @transform_5, window_bounds = array<i64: 256, 128>}, {transform_indices = @transform_6, window_bounds = array<i64: 1, 256, 128>}, {transform_indices = @transform_7, window_bounds = array<i64: 1, 2, 128>}]} {
    %c0 = arith.constant 0 : index
    %c0_0 = arith.constant 0 : index
    %0 = vector.load %arg6[%c0, %c0_0] : memref<256x128xf32, #tpu.memory_space<vmem>>, vector<256x128xf32>
    %c0_1 = arith.constant 0 : index
    %c0_2 = arith.constant 0 : index
    %1 = vector.load %arg4[%c0_1, %c0_2] : memref<128x128xbf16, #tpu.memory_space<vmem>>, vector<128x128xbf16>
    %c0_3 = arith.constant 0 : index
    %c0_4 = arith.constant 0 : index
    %2 = vector.load %arg5[%c0_3, %c0_4] : memref<128x128xbf16, #tpu.memory_space<vmem>>, vector<128x128xbf16>
    %cst = arith.constant 0.000000e+00 : f32
    %3 = vector.broadcast %cst : f32 to vector<24x128xf32>
    %c0_5 = arith.constant 0 : index
    %c0_6 = arith.constant 0 : index
    %c0_7 = arith.constant 0 : index
    %4 = vector.load %arg1[%c0_5, %c0_6, %c0_7] : memref<1x256x128xf32, #tpu.memory_space<vmem>>, vector<1x256x128xf32>
    %5 = vector.shape_cast %4 : vector<1x256x128xf32> to vector<256x128xf32>
    %c0_8 = arith.constant 0 : index
    %c0_9 = arith.constant 0 : index
    %6 = vector.load %arg2[%c0_8, %c0_9] : memref<1x128xf32, #tpu.memory_space<vmem>>, vector<1x128xf32>
    %7 = vector.broadcast %6 : vector<1x128xf32> to vector<256x128xf32>
    %8 = arith.mulf %5, %7 : vector<256x128xf32>
    %c0_10 = arith.constant 0 : index
    %c0_11 = arith.constant 0 : index
    %9 = vector.load %arg3[%c0_10, %c0_11] : memref<1x128xf32, #tpu.memory_space<vmem>>, vector<1x128xf32>
    %10 = vector.broadcast %9 : vector<1x128xf32> to vector<256x128xf32>
    %11 = arith.addf %8, %10 : vector<256x128xf32>
    %cst_12 = arith.constant 0.000000e+00 : f32
    %12 = vector.broadcast %cst_12 : f32 to vector<256x128xf32>
    %13 = arith.maximumf %11, %12 : vector<256x128xf32>
    %14 = tpu.concatenate %3, %13, %3 in 0 : vector<24x128xf32>, vector<256x128xf32>, vector<24x128xf32> -> vector<304x128xf32>
    %15 = vector.extract_strided_slice %14 {offsets = [7, 0], sizes = [256, 128], strides = [1, 1]} : vector<304x128xf32> to vector<256x128xf32>
    %16 = vector.extract_strided_slice %15 {offsets = [0, 0], sizes = [256, 4], strides = [1, 1]} : vector<256x128xf32> to vector<256x4xf32>
    %17 = vector.extract_strided_slice %14 {offsets = [8, 0], sizes = [256, 128], strides = [1, 1]} : vector<304x128xf32> to vector<256x128xf32>
    %18 = vector.extract_strided_slice %17 {offsets = [0, 0], sizes = [256, 4], strides = [1, 1]} : vector<256x128xf32> to vector<256x4xf32>
    %19 = vector.extract_strided_slice %14 {offsets = [9, 0], sizes = [256, 128], strides = [1, 1]} : vector<304x128xf32> to vector<256x128xf32>
    %20 = vector.extract_strided_slice %19 {offsets = [0, 0], sizes = [256, 4], strides = [1, 1]} : vector<256x128xf32> to vector<256x4xf32>
    %21 = vector.extract_strided_slice %14 {offsets = [23, 0], sizes = [256, 128], strides = [1, 1]} : vector<304x128xf32> to vector<256x128xf32>
    %22 = vector.extract_strided_slice %21 {offsets = [0, 0], sizes = [256, 4], strides = [1, 1]} : vector<256x128xf32> to vector<256x4xf32>
    %23 = vector.extract_strided_slice %14 {offsets = [24, 0], sizes = [256, 128], strides = [1, 1]} : vector<304x128xf32> to vector<256x128xf32>
    %24 = vector.extract_strided_slice %23 {offsets = [0, 0], sizes = [256, 4], strides = [1, 1]} : vector<256x128xf32> to vector<256x4xf32>
    %25 = vector.extract_strided_slice %14 {offsets = [25, 0], sizes = [256, 128], strides = [1, 1]} : vector<304x128xf32> to vector<256x128xf32>
    %26 = vector.extract_strided_slice %25 {offsets = [0, 0], sizes = [256, 4], strides = [1, 1]} : vector<256x128xf32> to vector<256x4xf32>
    %27 = vector.extract_strided_slice %14 {offsets = [39, 0], sizes = [256, 128], strides = [1, 1]} : vector<304x128xf32> to vector<256x128xf32>
    %28 = vector.extract_strided_slice %27 {offsets = [0, 0], sizes = [256, 4], strides = [1, 1]} : vector<256x128xf32> to vector<256x4xf32>
    %29 = vector.extract_strided_slice %14 {offsets = [40, 0], sizes = [256, 128], strides = [1, 1]} : vector<304x128xf32> to vector<256x128xf32>
    %30 = vector.extract_strided_slice %29 {offsets = [0, 0], sizes = [256, 4], strides = [1, 1]} : vector<256x128xf32> to vector<256x4xf32>
    %31 = vector.extract_strided_slice %14 {offsets = [41, 0], sizes = [256, 128], strides = [1, 1]} : vector<304x128xf32> to vector<256x128xf32>
    %32 = vector.extract_strided_slice %31 {offsets = [0, 0], sizes = [256, 4], strides = [1, 1]} : vector<256x128xf32> to vector<256x4xf32>
    %cst_13 = arith.constant 0.000000e+00 : f32
    %33 = vector.broadcast %cst_13 : f32 to vector<256x92xf32>
    %34 = tpu.concatenate %16, %18, %20, %22, %24, %26, %28, %30, %32, %33 in 1 : vector<256x4xf32>, vector<256x4xf32>, vector<256x4xf32>, vector<256x4xf32>, vector<256x4xf32>, vector<256x4xf32>, vector<256x4xf32>, vector<256x4xf32>, vector<256x4xf32>, vector<256x92xf32> -> vector<256x128xf32>
    %35 = arith.mulf %34, %0 : vector<256x128xf32>
    %36 = arith.truncf %35 : vector<256x128xf32> to vector<256x128xbf16>
    %37 = arith.extf %36 : vector<256x128xbf16> to vector<256x128xf32>
    %38 = arith.subf %35, %37 : vector<256x128xf32>
    %39 = arith.truncf %38 : vector<256x128xf32> to vector<256x128xbf16>
    %cst_14 = arith.constant dense<0.000000e+00> : vector<256x128xf32>
    %40 = tpu.matmul %36, %1, %cst_14 {dimension_numbers = #tpu.dot_dimension_numbers<[1], [0], [0], [1], [0, 0, 1, 1], [], []>} : vector<256x128xbf16>, vector<128x128xbf16>, vector<256x128xf32> -> vector<256x128xf32>
    %cst_15 = arith.constant dense<0.000000e+00> : vector<256x128xf32>
    %41 = tpu.matmul %39, %1, %cst_15 {dimension_numbers = #tpu.dot_dimension_numbers<[1], [0], [0], [1], [0, 0, 1, 1], [], []>} : vector<256x128xbf16>, vector<128x128xbf16>, vector<256x128xf32> -> vector<256x128xf32>
    %42 = arith.addf %40, %41 : vector<256x128xf32>
    %cst_16 = arith.constant dense<0.000000e+00> : vector<256x128xf32>
    %43 = tpu.matmul %36, %2, %cst_16 {dimension_numbers = #tpu.dot_dimension_numbers<[1], [0], [0], [1], [0, 0, 1, 1], [], []>} : vector<256x128xbf16>, vector<128x128xbf16>, vector<256x128xf32> -> vector<256x128xf32>
    %44 = arith.addf %42, %43 : vector<256x128xf32>
    %c0_17 = arith.constant 0 : index
    %c0_18 = arith.constant 0 : index
    %c0_19 = arith.constant 0 : index
    %45 = vector.load %arg7[%c0_17, %c0_18, %c0_19] : memref<1x256x128xf32, #tpu.memory_space<vmem>>, vector<1x256x128xf32>
    %46 = vector.shape_cast %45 : vector<1x256x128xf32> to vector<256x128xf32>
    %47 = vector.shape_cast %44 : vector<256x128xf32> to vector<1x256x128xf32>
    tpu.vector_store %arg7[%c0_17, %c0_18, %c0_19], %47 {strides = array<i32>} : memref<1x256x128xf32, #tpu.memory_space<vmem>>, vector<1x256x128xf32>,
    %cst_20 = arith.constant dense<0.000000e+00> : vector<128xf32>
    %48 = vector.multi_reduction <add>, %44, %cst_20 [0] : vector<256x128xf32> to vector<128xf32>
    %49 = vector.shape_cast %48 : vector<128xf32> to vector<1x128xf32>
    %cst_21 = arith.constant 3.906250e-03 : f32
    %50 = vector.broadcast %cst_21 : f32 to vector<1x128xf32>
    %51 = arith.mulf %49, %50 : vector<1x128xf32>
    %52 = vector.broadcast %51 : vector<1x128xf32> to vector<256x128xf32>
    %53 = arith.subf %44, %52 : vector<256x128xf32>
    %c0_22 = arith.constant 0 : index
    %c0_23 = arith.constant 0 : index
    %c0_24 = arith.constant 0 : index
    %54 = vector.load %arg8[%c0_22, %c0_23, %c0_24] : memref<1x2x128xf32, #tpu.memory_space<vmem>>, vector<1x1x128xf32>
    %55 = vector.shape_cast %54 : vector<1x1x128xf32> to vector<1x128xf32>
    %56 = vector.shape_cast %51 : vector<1x128xf32> to vector<1x1x128xf32>
    tpu.vector_store %arg8[%c0_22, %c0_23, %c0_24], %56 {strides = array<i32>} : memref<1x2x128xf32, #tpu.memory_space<vmem>>, vector<1x1x128xf32>,
    %57 = arith.mulf %53, %53 : vector<256x128xf32>
    %cst_25 = arith.constant dense<0.000000e+00> : vector<128xf32>
    %58 = vector.multi_reduction <add>, %57, %cst_25 [0] : vector<256x128xf32> to vector<128xf32>
    %59 = vector.shape_cast %58 : vector<128xf32> to vector<1x128xf32>
    %c0_26 = arith.constant 0 : index
    %c1 = arith.constant 1 : index
    %c0_27 = arith.constant 0 : index
    %60 = vector.load %arg8[%c0_26, %c1, %c0_27] : memref<1x2x128xf32, #tpu.memory_space<vmem>>, vector<1x1x128xf32>
    %61 = vector.shape_cast %60 : vector<1x1x128xf32> to vector<1x128xf32>
    %62 = vector.shape_cast %59 : vector<1x128xf32> to vector<1x1x128xf32>
    tpu.vector_store %arg8[%c0_26, %c1, %c0_27], %62 {strides = array<i32>} : memref<1x2x128xf32, #tpu.memory_space<vmem>>, vector<1x1x128xf32>,
    return
  }
  func.func @transform_0(%arg0: i32) -> (i32, i32, i32) {
    %c0_i32 = arith.constant 0 : i32
    %c0_i32_0 = arith.constant 0 : i32
    %c0_i32_1 = arith.constant 0 : i32
    return %arg0, %c0_i32, %c0_i32_0 : i32, i32, i32
  }
  func.func @transform_1(%arg0: i32) -> (i32, i32) {
    %c0_i32 = arith.constant 0 : i32
    %c0_i32_0 = arith.constant 0 : i32
    %c0_i32_1 = arith.constant 0 : i32
    return %c0_i32, %c0_i32_0 : i32, i32
  }
  func.func @transform_2(%arg0: i32) -> (i32, i32) {
    %c0_i32 = arith.constant 0 : i32
    %c0_i32_0 = arith.constant 0 : i32
    %c0_i32_1 = arith.constant 0 : i32
    return %c0_i32, %c0_i32_0 : i32, i32
  }
  func.func @transform_3(%arg0: i32) -> (i32, i32) {
    %c0_i32 = arith.constant 0 : i32
    %c0_i32_0 = arith.constant 0 : i32
    %c0_i32_1 = arith.constant 0 : i32
    return %c0_i32, %c0_i32_0 : i32, i32
  }
  func.func @transform_4(%arg0: i32) -> (i32, i32) {
    %c0_i32 = arith.constant 0 : i32
    %c0_i32_0 = arith.constant 0 : i32
    %c0_i32_1 = arith.constant 0 : i32
    return %c0_i32, %c0_i32_0 : i32, i32
  }
  func.func @transform_5(%arg0: i32) -> (i32, i32) {
    %c0_i32 = arith.constant 0 : i32
    %c0_i32_0 = arith.constant 0 : i32
    %c0_i32_1 = arith.constant 0 : i32
    return %c0_i32, %c0_i32_0 : i32, i32
  }
  func.func @transform_6(%arg0: i32) -> (i32, i32, i32) {
    %c0_i32 = arith.constant 0 : i32
    %c0_i32_0 = arith.constant 0 : i32
    %c0_i32_1 = arith.constant 0 : i32
    return %arg0, %c0_i32, %c0_i32_0 : i32, i32, i32
  }
  func.func @transform_7(%arg0: i32) -> (i32, i32, i32) {
    %c0_i32 = arith.constant 0 : i32
    %c0_i32_0 = arith.constant 0 : i32
    %c0_i32_1 = arith.constant 0 : i32
    return %arg0, %c0_i32, %c0_i32_0 : i32, i32, i32
  }
}

</mosaic_0001>

<bundles_post_ra>
// kernel: resnet_basicblock.5
= control target key start
LH: loop header
LB: loop body
LE: loop exit
PB: predicated region body
PF: predicated region fallthrough
CT: control target
= control target key end

     0   :  { %s582_s15 = smov 0   ;;  %s852_s0 = inlined_call_operand.vmem [shape: f32[2,256,128], index: 0, kind: input, shape index: {}, may-alias: {0,4}]   ;;  %s853_s1 = inlined_call_operand.vmem [shape: f32[2,256,128], index: 1, kind: input, shape index: {}]   ;;  %s854_s2 = inlined_call_operand.vmem [shape: f32[1,128], index: 2, kind: input, shape index: {}]   ;;  %s855_s3 = inlined_call_operand.vmem [shape: f32[1,128], index: 3, kind: input, shape index: {}]   ;;  %s856_s4 = inlined_call_operand.vmem [shape: f32[2,256,128], index: 4, kind: output, shape index: {}, may-alias: {0,4}]  }
   0x1 LB: > { %s523_s16 = sadd.s32 4294967295, %s555_s15   ;;  %p527_p0 = scmp.ge.s32.totalorder %s555_s15, 1  ;;  %s555_s15 = sphi %s582_s15, %s14_s15  }
   0x2   : > { %p172_p1 = scmp.lt.s32.totalorder %s555_s15, 3 }
   0x4   : > { %p173_p2 = pnand %p527_p0, %p172_p1 }
   0x5   : > { %p203_p3 = scmp.lt.s32.totalorder (!%p173_p2), %s523_s16, 1 }
   0x6   : > { %176 = sbr.rel (%p173_p2) target bundleno = 54 (0x36), region = 36 }
   0xb   : > { %s858_s16 = smov (!%p203_p3, %s523_s16), 1  ;;  %v595_v0 = vld [vmem:[%s854_s2] ss:$0 sm:$0xff] }
   0xc   : > { %s590_s17 = sshll.u32 %s858_s16, 8  ;;  %v612_v1 = vld [vmem:[%s855_s3] ss:$0 sm:$0xff] }
   0xd   : > { %s601_s22 = scalar_lea.vmem %s852_s0, %s590_s17  ;;  %s607_s25 = scalar_lea.vmem %s853_s1, %s590_s17 }
   0xe   : > { %v220_v2 = vld [vmem:[%s607_s25] sm:$0xff]  ;;  %v253_v4 = vld [vmem:[%s601_s22 + $0x8] sm:$0xff]  ;;  %v254_v5 = vld [vmem:[%s601_s22 + $0x10] sm:$0xff]  ;;  %s667_s30 = scalar_lea.vmem %s856_s4, %s590_s17 }
   0xf   : > { %v252_v3 = vld [vmem:[%s601_s22] sm:$0xff]  ;;  %v255_v6 = vld [vmem:[%s601_s22 + $0x18] sm:$0xff]  ;;  %v257_v9 = vld [vmem:[%s601_s22 + $0x28] sm:$0xff]  ;;  %v291_v19 = vmul.f32 %v595_v0, %v253_v4  ;;  %v292_v20 = vmul.f32 %v595_v0, %v254_v5 }
  0x10   : > { %v256_v7 = vld [vmem:[%s601_s22 + $0x20] sm:$0xff]  ;;  %v290_v8 = vmul.f32 %v595_v0, %v252_v3  ;;  %v258_v10 = vld [vmem:[%s601_s22 + $0x30] sm:$0xff]  ;;  %v259_v11 = vld [vmem:[%s601_s22 + $0x38] sm:$0xff]  ;;  %v293_v21 = vmul.f32 %v595_v0, %v255_v6  ;;  %v295_v27 = vmul.f32 %v595_v0, %v257_v9 }
  0x11   : > { %v260_v12 = vld [vmem:[%s601_s22 + $0x40] sm:$0xff]  ;;  %v261_v13 = vld [vmem:[%s601_s22 + $0x48] sm:$0xff]  ;;  %v262_v14 = vld [vmem:[%s601_s22 + $0x50] sm:$0xff]  ;;  %v294_v26 = vmul.f32 %v595_v0, %v256_v7  ;;  %v296_v28 = vmul.f32 %v595_v0, %v258_v10  ;;  %v297_v32 = vmul.f32 %v595_v0, %v259_v11 }
  0x12   : > { %v322_v15 = vadd.f32 %v290_v8, %v220_v2  ;;  %v263_v16 = vld [vmem:[%s601_s22 + $0x58] sm:$0xff]  ;;  %v264_v17 = vld [vmem:[%s601_s22 + $0x60] sm:$0xff]  ;;  %v265_v18 = vld [vmem:[%s601_s22 + $0x68] sm:$0xff]  ;;  %v298_v33 = vmul.f32 %v595_v0, %v260_v12  ;;  %v646_v34 = vmul.f32 %v595_v0, %v261_v13  ;;  %v649_v35 = vmul.f32 %v595_v0, %v262_v14 }
  0x13   : > { %v266_v22 = vld [vmem:[%s601_s22 + $0x70] sm:$0xff]  ;;  %v267_v23 = vld [vmem:[%s601_s22 + $0x78] sm:$0xff]  ;;  %v268_v24 = vld [vmem:[%s601_s22 + $0x80] sm:$0xff]  ;;  %v655_v40 = vmul.f32 %v595_v0, %v263_v16  ;;  %v658_v41 = vmul.f32 %v595_v0, %v264_v17  ;;  %v661_v42 = vmul.f32 %v595_v0, %v265_v18 }
  0x14   : > { %v360_v25 = vadd.f32 %v612_v1, %v322_v15  ;;  %v269_v29 = vld [vmem:[%s601_s22 + $0x88] sm:$0xff]  ;;  %v270_v30 = vld [vmem:[%s601_s22 + $0x90] sm:$0xff]  ;;  %v271_v31 = vld [vmem:[%s601_s22 + $0x98] sm:$0xff]  ;;  %v673_v46 = vmul.f32 %v595_v0, %v266_v22  ;;  %v676_v47 = vmul.f32 %v595_v0, %v267_v23  ;;  %v679_v48 = vmul.f32 %v595_v0, %v268_v24 }
  0x15   : > { %v272_v36 = vld [vmem:[%s601_s22 + $0xa0] sm:$0xff]  ;;  %v273_v37 = vld [vmem:[%s601_s22 + $0xa8] sm:$0xff]  ;;  %v274_v38 = vld [vmem:[%s601_s22 + $0xb0] sm:$0xff]  ;;  %v682_v49 = vmul.f32 %v595_v0, %v269_v29  ;;  %v688_v53 = vmul.f32 %v595_v0, %v270_v30  ;;  %v691_v54 = vmul.f32 %v595_v0, %v271_v31 }
  0x16   : > { %v392_v39 = vmax.f32 %v360_v25, 0.0  ;;  %v275_v43 = vld [vmem:[%s601_s22 + $0xb8] sm:$0xff]  ;;  %v276_v44 = vld [vmem:[%s601_s22 + $0xc0] sm:$0xff]  ;;  %v277_v45 = vld [vmem:[%s601_s22 + $0xc8] sm:$0xff]  ;;  %v694_v55 = vmul.f32 %v595_v0, %v272_v36  ;;  %v697_v56 = vmul.f32 %v595_v0, %v273_v37  ;;  %v703_v60 = vmul.f32 %v595_v0, %v274_v38 }
  0x17   : > { %v278_v50 = vld [vmem:[%s601_s22 + $0xd0] sm:$0xff]  ;;  %v279_v51 = vld [vmem:[%s601_s22 + $0xd8] sm:$0xff]  ;;  %v280_v52 = vld [vmem:[%s601_s22 + $0xe0] sm:$0xff]  ;;  %v706_v61 = vmul.f32 %v595_v0, %v275_v43  ;;  %v709_v62 = vmul.f32 %v595_v0, %v276_v44  ;;  %v712_v63 = vmul.f32 %v595_v0, %v277_v45 }
  0x18   : > { %v281_v57 = vld [vmem:[%s601_s22 + $0xe8] sm:$0xff]  ;;  %v282_v58 = vld [vmem:[%s601_s22 + $0xf0] sm:$0xff]  ;;  %v283_v59 = vld [vmem:[%s601_s22 + $0xf8] sm:$0xff]  ;;  %v719_v5 = vmul.f32 %v595_v0, %v278_v50  ;;  %v722_v6 = vmul.f32 %v595_v0, %v279_v51  ;;  %v725_v7 = vmul.f32 %v595_v0, %v280_v52 }
  0x19   : > { %424 = vst [vmem:[%s667_s30] sm:$0xff] %v392_v39  ;;  %v221_v2 = vld [vmem:[%s607_s25 + $0x8] sm:$0xff]  ;;  %v222_v3 = vld [vmem:[%s607_s25 + $0x10] sm:$0xff]  ;;  %v223_v4 = vld [vmem:[%s607_s25 + $0x18] sm:$0xff]  ;;  %v728_v8 = vmul.f32 %v595_v0, %v281_v57  ;;  %v734_v15 = vmul.f32 %v595_v0, %v282_v58  ;;  %v739_v24 = vmul.f32 %v595_v0, %v283_v59 }
  0x1a   : > { %v323_v9 = vadd.f32 %v291_v19, %v221_v2  ;;  %v324_v10 = vadd.f32 %v292_v20, %v222_v3  ;;  %v325_v11 = vadd.f32 %v293_v21, %v223_v4  ;;  %v224_v12 = vld [vmem:[%s607_s25 + $0x20] sm:$0xff]  ;;  %v225_v13 = vld [vmem:[%s607_s25 + $0x28] sm:$0xff]  ;;  %v226_v14 = vld [vmem:[%s607_s25 + $0x30] sm:$0xff] }
  0x1b   : > { %v326_v16 = vadd.f32 %v294_v26, %v224_v12  ;;  %v327_v17 = vadd.f32 %v295_v27, %v225_v13  ;;  %v328_v18 = vadd.f32 %v296_v28, %v226_v14  ;;  %v227_v22 = vld [vmem:[%s607_s25 + $0x38] sm:$0xff]  ;;  %v228_v23 = vld [vmem:[%s607_s25 + $0x40] sm:$0xff]  ;;  %v229_v0 = vld [vmem:[%s607_s25 + $0x48] sm:$0xff] }
  0x1c   : > { %v361_v19 = vadd.f32 %v612_v1, %v323_v9  ;;  %v362_v20 = vadd.f32 %v612_v1, %v324_v10  ;;  %v363_v21 = vadd.f32 %v612_v1, %v325_v11  ;;  %v329_v25 = vadd.f32 %v297_v32, %v227_v22  ;;  %v230_v30 = vld [vmem:[%s607_s25 + $0x50] sm:$0xff]  ;;  %v231_v31 = vld [vmem:[%s607_s25 + $0x58] sm:$0xff]  ;;  %v232_v32 = vld [vmem:[%s607_s25 + $0x60] sm:$0xff] }
  0x1d   : > { %v364_v26 = vadd.f32 %v612_v1, %v326_v16  ;;  %v365_v27 = vadd.f32 %v612_v1, %v327_v17  ;;  %v366_v28 = vadd.f32 %v612_v1, %v328_v18  ;;  %v330_v29 = vadd.f32 %v298_v33, %v228_v23  ;;  %v233_v43 = vld [vmem:[%s607_s25 + $0x68] sm:$0xff]  ;;  %v234_v44 = vld [vmem:[%s607_s25 + $0x70] sm:$0xff]  ;;  %v235_v52 = vld [vmem:[%s607_s25 + $0x78] sm:$0xff] }
  0x1e   : > { %v393_v36 = vmax.f32 %v361_v19, 0.0  ;;  %v394_v37 = vmax.f32 %v362_v20, 0.0  ;;  %v395_v38 = vmax.f32 %v363_v21, 0.0  ;;  %v367_v39 = vadd.f32 %v612_v1, %v329_v25  ;;  %v236_v3 = vld [vmem:[%s607_s25 + $0x80] sm:$0xff]  ;;  %v237_v14 = vld [vmem:[%s607_s25 + $0x88] sm:$0xff]  ;;  %v238_v16 = vld [vmem:[%s607_s25 + $0x90] sm:$0xff] }
  0x1f   : > { %v396_v45 = vmax.f32 %v364_v26, 0.0  ;;  %v397_v33 = vmax.f32 %v365_v27, 0.0  ;;  %v398_v50 = vmax.f32 %v366_v28, 0.0  ;;  %v368_v51 = vadd.f32 %v612_v1, %v330_v29  ;;  %v239_v17 = vld [vmem:[%s607_s25 + $0x98] sm:$0xff]  ;;  %v240_v19 = vld [vmem:[%s607_s25 + $0xa0] sm:$0xff]  ;;  %v241_v20 = vld [vmem:[%s607_s25 + $0xa8] sm:$0xff] }
  0x20   : > { %425 = vst [vmem:[%s667_s30 + $0x8] sm:$0xff] %v393_v36  ;;  %426 = vst [vmem:[%s667_s30 + $0x10] sm:$0xff] %v394_v37  ;;  %v399_v57 = vmax.f32 %v367_v39, 0.0  ;;  %v331_v58 = vadd.f32 %v646_v34, %v229_v0  ;;  %v332_v59 = vadd.f32 %v649_v35, %v230_v30  ;;  %v333_v2 = vadd.f32 %v655_v40, %v231_v31  ;;  %v242_v21 = vld [vmem:[%s607_s25 + $0xb0] sm:$0xff]  ;;  %v243_v28 = vld [vmem:[%s607_s25 + $0xb8] sm:$0xff] }
  0x21   : > { %427 = vst [vmem:[%s667_s30 + $0x18] sm:$0xff] %v395_v38  ;;  %428 = vst [vmem:[%s667_s30 + $0x20] sm:$0xff] %v396_v45  ;;  %v400_v4 = vmax.f32 %v368_v51, 0.0  ;;  %v334_v9 = vadd.f32 %v658_v41, %v232_v32  ;;  %v335_v10 = vadd.f32 %v661_v42, %v233_v43  ;;  %v336_v11 = vadd.f32 %v673_v46, %v234_v44  ;;  %v244_v36 = vld [vmem:[%s607_s25 + $0xc0] sm:$0xff]  ;;  %v245_v45 = vld [vmem:[%s607_s25 + $0xc8] sm:$0xff] }
  0x22   : > { %429 = vst [vmem:[%s667_s30 + $0x28] sm:$0xff] %v397_v33  ;;  %430 = vst [vmem:[%s667_s30 + $0x30] sm:$0xff] %v398_v50  ;;  %v369_v34 = vadd.f32 %v612_v1, %v331_v58  ;;  %v370_v35 = vadd.f32 %v612_v1, %v332_v59  ;;  %v371_v40 = vadd.f32 %v612_v1, %v333_v2  ;;  %v246_v33 = vld [vmem:[%s607_s25 + $0xd0] sm:$0xff]  ;;  %v247_v50 = vld [vmem:[%s607_s25 + $0xd8] sm:$0xff] }
  0x23   : > { %431 = vst [vmem:[%s667_s30 + $0x38] sm:$0xff] %v399_v57  ;;  %v337_v12 = vadd.f32 %v676_v47, %v235_v52  ;;  %432 = vst [vmem:[%s667_s30 + $0x40] sm:$0xff] %v400_v4  ;;  %v372_v13 = vadd.f32 %v612_v1, %v334_v9  ;;  %v373_v41 = vadd.f32 %v612_v1, %v335_v10  ;;  %v248_v58 = vld [vmem:[%s607_s25 + $0xe0] sm:$0xff]  ;;  %v249_v59 = vld [vmem:[%s607_s25 + $0xe8] sm:$0xff] }
  0x24   : > { %v374_v42 = vadd.f32 %v612_v1, %v336_v11  ;;  %v338_v46 = vadd.f32 %v679_v48, %v236_v3  ;;  %v401_v18 = vmax.f32 %v369_v34, 0.0  ;;  %v402_v22 = vmax.f32 %v370_v35, 0.0  ;;  %v250_v2 = vld [vmem:[%s607_s25 + $0xf0] sm:$0xff]  ;;  %v251_v10 = vld [vmem:[%s607_s25 + $0xf8] sm:$0xff] }
  0x25   : > { %v403_v23 = vmax.f32 %v371_v40, 0.0  ;;  %v375_v47 = vadd.f32 %v612_v1, %v337_v12  ;;  %v404_v25 = vmax.f32 %v372_v13, 0.0  ;;  %v405_v48 = vmax.f32 %v373_v41, 0.0 }
  0x26   : > { %v406_v26 = vmax.f32 %v374_v42, 0.0  ;;  %v376_v27 = vadd.f32 %v612_v1, %v338_v46  ;;  %433 = vst [vmem:[%s667_s30 + $0x48] sm:$0xff] %v401_v18  ;;  %434 = vst [vmem:[%s667_s30 + $0x50] sm:$0xff] %v402_v22  ;;  %v339_v0 = vadd.f32 %v682_v49, %v237_v14  ;;  %v340_v30 = vadd.f32 %v688_v53, %v238_v16 }
  0x27   : > { %435 = vst [vmem:[%s667_s30 + $0x58] sm:$0xff] %v403_v23  ;;  %v407_v29 = vmax.f32 %v375_v47, 0.0  ;;  %v341_v31 = vadd.f32 %v691_v54, %v239_v17  ;;  %436 = vst [vmem:[%s667_s30 + $0x60] sm:$0xff] %v404_v25  ;;  %v342_v38 = vadd.f32 %v694_v55, %v240_v19  ;;  %v343_v39 = vadd.f32 %v697_v56, %v241_v20 }
  0x28   : > { %437 = vst [vmem:[%s667_s30 + $0x68] sm:$0xff] %v405_v48  ;;  %438 = vst [vmem:[%s667_s30 + $0x70] sm:$0xff] %v406_v26  ;;  %v408_v37 = vmax.f32 %v376_v27, 0.0  ;;  %v344_v32 = vadd.f32 %v703_v60, %v242_v21  ;;  %v377_v49 = vadd.f32 %v612_v1, %v339_v0  ;;  %v378_v53 = vadd.f32 %v612_v1, %v340_v30 }
  0x29   : > { %439 = vst [vmem:[%s667_s30 + $0x78] sm:$0xff] %v407_v29  ;;  %v379_v54 = vadd.f32 %v612_v1, %v341_v31  ;;  %v345_v43 = vadd.f32 %v706_v61, %v243_v28  ;;  %v380_v44 = vadd.f32 %v612_v1, %v342_v38  ;;  %v381_v55 = vadd.f32 %v612_v1, %v343_v39 }
  0x2a   : > { %440 = vst [vmem:[%s667_s30 + $0x80] sm:$0xff] %v408_v37  ;;  %v382_v56 = vadd.f32 %v612_v1, %v344_v32  ;;  %v346_v60 = vadd.f32 %v709_v62, %v244_v36  ;;  %v409_v51 = vmax.f32 %v377_v49, 0.0  ;;  %v410_v52 = vmax.f32 %v378_v53, 0.0 }
  0x2b   : > { %v411_v57 = vmax.f32 %v379_v54, 0.0  ;;  %v383_v61 = vadd.f32 %v612_v1, %v345_v43  ;;  %v412_v3 = vmax.f32 %v380_v44, 0.0  ;;  %v413_v4 = vmax.f32 %v381_v55, 0.0 }
  0x2c   : > { %v414_v62 = vmax.f32 %v382_v56, 0.0  ;;  %v384_v9 = vadd.f32 %v612_v1, %v346_v60  ;;  %441 = vst [vmem:[%s667_s30 + $0x88] sm:$0xff] %v409_v51  ;;  %442 = vst [vmem:[%s667_s30 + $0x90] sm:$0xff] %v410_v52  ;;  %v347_v34 = vadd.f32 %v712_v63, %v245_v45  ;;  %v348_v35 = vadd.f32 %v719_v5, %v246_v33 }
  0x2d   : > { %443 = vst [vmem:[%s667_s30 + $0x98] sm:$0xff] %v411_v57  ;;  %v415_v11 = vmax.f32 %v383_v61, 0.0  ;;  %v349_v40 = vadd.f32 %v722_v6, %v247_v50  ;;  %444 = vst [vmem:[%s667_s30 + $0xa0] sm:$0xff] %v412_v3  ;;  %v350_v13 = vadd.f32 %v725_v7, %v248_v58  ;;  %v351_v41 = vadd.f32 %v728_v8, %v249_v59 }
  0x2e   : > { %445 = vst [vmem:[%s667_s30 + $0xa8] sm:$0xff] %v413_v4  ;;  %446 = vst [vmem:[%s667_s30 + $0xb0] sm:$0xff] %v414_v62  ;;  %v416_v12 = vmax.f32 %v384_v9, 0.0  ;;  %v352_v42 = vadd.f32 %v734_v15, %v250_v2  ;;  %v385_v46 = vadd.f32 %v612_v1, %v347_v34  ;;  %v386_v63 = vadd.f32 %v612_v1, %v348_v35 }
  0x2f   : > { %447 = vst [vmem:[%s667_s30 + $0xb8] sm:$0xff] %v415_v11  ;;  %v387_v5 = vadd.f32 %v612_v1, %v349_v40  ;;  %v353_v6 = vadd.f32 %v739_v24, %v251_v10  ;;  %v388_v7 = vadd.f32 %v612_v1, %v350_v13  ;;  %v389_v8 = vadd.f32 %v612_v1, %v351_v41 }
  0x30   : > { %448 = vst [vmem:[%s667_s30 + $0xc0] sm:$0xff] %v416_v12  ;;  %v390_v15 = vadd.f32 %v612_v1, %v352_v42  ;;  %v417_v14 = vmax.f32 %v385_v46, 0.0  ;;  %v418_v16 = vmax.f32 %v386_v63, 0.0 }
  0x31   : > { %v419_v17 = vmax.f32 %v387_v5, 0.0  ;;  %v391_v18 = vadd.f32 %v612_v1, %v353_v6  ;;  %v420_v22 = vmax.f32 %v388_v7, 0.0  ;;  %v421_v23 = vmax.f32 %v389_v8, 0.0 }
  0x32   : > { %v422_v47 = vmax.f32 %v390_v15, 0.0  ;;  %449 = vst [vmem:[%s667_s30 + $0xc8] sm:$0xff] %v417_v14  ;;  %450 = vst [vmem:[%s667_s30 + $0xd0] sm:$0xff] %v418_v16 }
  0x33   : > { %451 = vst [vmem:[%s667_s30 + $0xd8] sm:$0xff] %v419_v17  ;;  %v423_v24 = vmax.f32 %v391_v18, 0.0  ;;  %452 = vst [vmem:[%s667_s30 + $0xe0] sm:$0xff] %v420_v22 }
  0x34   : > { %453 = vst [vmem:[%s667_s30 + $0xe8] sm:$0xff] %v421_v23  ;;  %454 = vst [vmem:[%s667_s30 + $0xf0] sm:$0xff] %v422_v47 }
  0x35   : > { %455 = vst [vmem:[%s667_s30 + $0xf8] sm:$0xff] %v423_v24 }
  0x36 PF: > { %s14_s15 = sadd.s32 1, %s555_s15  }
  0x37   : > { %p11_p4 = scmp.ge.s32.totalorder %s14_s15, 4  }
  0x39   :  { %13 = sbr.rel (!%p11_p4) target bundleno = 1 (0x1), region = 69 }

// kernel: resnet_basicblock.3
= control target key start
LH: loop header
LB: loop body
LE: loop exit
PB: predicated region body
PF: predicated region fallthrough
CT: control target
= control target key end

     0   :  { %s3514_s24 = smov 0   ;;  %s6184_s0 = inlined_call_operand.vmem [shape: f32[2,256,128], index: 0, kind: input, shape index: {}]   ;;  %s6185_s1 = inlined_call_operand.vmem [shape: f32[1,128], index: 1, kind: input, shape index: {}]   ;;  %s6186_s2 = inlined_call_operand.vmem [shape: f32[1,128], index: 2, kind: input, shape index: {}]   ;;  %s6187_s3 = inlined_call_operand.vmem [shape: bf16[128,128], index: 3, kind: input, shape index: {}]   ;;  %s6188_s4 = inlined_call_operand.vmem [shape: bf16[128,128], index: 4, kind: input, shape index: {}]   ;;  %s6189_s5 = inlined_call_operand.vmem [shape: f32[256,128], index: 5, kind: input, shape index: {}]   ;;  %s6190_s6 = inlined_call_operand.vmem [shape: f32[2,256,128], index: 6, kind: output, shape index: {0}]   ;;  %s6191_s7 = inlined_call_operand.vmem [shape: f32[2,2,128], index: 7, kind: output, shape index: {1}]  }
   0x1 LB: > { %s3116_s1 = sadd.s32 4294967295, %s3463_s24   ;;  %p3120_p0 = scmp.ge.s32.totalorder %s3463_s24, 1  ;;  %s3463_s24 = sphi %s3514_s24, %s18_s24  }
   0x2   : > { %p240_p1 = scmp.lt.s32.totalorder %s3463_s24, 3 }
   0x4   : > { %p241_p2 = pnand %p3120_p0, %p240_p1 }
   0x6   : > { %244 = sbr.rel (%p241_p2) target bundleno = 1037 (0x40d), region = 44 }
   0xb   : > { %p276_p3 = scmp.lt.s32.totalorder %s3116_s1, 1  ;;  %v6194_v0 = vmov 0.0   ;;  %s3466_s25 = smov 4   ;;  %vm418_vm0 = vcmask 1046528   ;;  %vm581_vm1 = vcmask 1045504   ;;  %vm1342_vm2 = vcmask 31744  }
   0xc   : > { %v3523_v1 = vrot.slane %v6194_v0, 1  ;;  %s3467_s29 = smov 8   ;;  %s3468_s30 = smov 12   ;;  %vm1376_vm3 = vcmask 64512   ;;  %vm1410_vm4 = vcmask 97280   ;;  %vm1444_vm5 = vcmask 130048  }
   0xd   : > { %s6460_s1 = smov (!%p276_p3, %s3116_s1), 1  ;;  %s3469_s8 = smov 16   ;;  %vm1478_vm6 = vcmask 162816   ;;  %vm1512_vm7 = vcmask 195584   ;;  %vm1546_vm8 = vcmask 228352   ;;  %vm1580_vm9 = vcmask 261120  }
   0xe   : > { %6263 = vst [vmem:[#allocation2_spill] sm:$0xff] %v3523_v1  ;;  %v3529_v2 = vpack.i.bf16 %v3523_v1, %v3523_v1  ;;  %s3144_s2 = sshll.u32 %s6460_s1, 8  ;;  %s3470_s9 = smov 20   ;;  %vm1614_vm10 = vcmask 293888   ;;  %vm1909_vm11 = vsmask.f32 4352 }
   0xf   : > { %s3539_s28 = scalar_lea.vmem %s6184_s0, %s3144_s2  ;;  %s3471_s10 = smov 24  }
  0x10   : > { %6264 = vst [vmem:[#allocation3_spill] sm:$0xff] %v3529_v2  ;;  %3396 = vrot.lane.b32.xlu0 %v3529_v2, %s3466_s25  ;;  %v3542_v3 = vld [vmem:[%s3539_s28] sm:$0xff]  ;;  %v3545_v4 = vld [vmem:[%s3539_s28 + $0x8] sm:$0xff]  ;;  %v3548_v5 = vld [vmem:[%s3539_s28 + $0x10] sm:$0xff]  ;;  %s3472_s11 = smov 28   ;;  %s3473_s14 = smov 32  }
  0x11   : > { %v3551_v6 = vrot.slane %v3542_v3, 1  ;;  %v423_v7 = vrot.slane %v3545_v4, 1  ;;  %v3555_v8 = vrot.slane %v3548_v5, 1  ;;  %v3558_v9 = vld [vmem:[%s3539_s28 + $0x18] sm:$0xff]  ;;  %v3562_v11 = vld [vmem:[%s3539_s28 + $0x20] sm:$0xff]  ;;  %v3565_v12 = vld [vmem:[%s3539_s28 + $0x28] sm:$0xff]  ;;  %s5956_s15 = scalar_lea.vmem %s6190_s6, %s3144_s2 }
  0x12   : > { %v427_v10 = vrot.slane %v3558_v9, 1  ;;  %v429_v17 = vrot.slane %v3562_v11, 1  ;;  %v431_v18 = vrot.slane %v3565_v12, 1  ;;  %v3588_v19 = vld [vmem:[%s3539_s28 + $0x30] sm:$0xff]  ;;  %v3591_v20 = vld [vmem:[%s3539_s28 + $0x38] sm:$0xff]  ;;  %v3606_v25 = vld [vmem:[%s3539_s28 + $0x40] sm:$0xff] }
  0x13   : > { %v3569_v13 = vsel %vm418_vm0, %v3551_v6, %v423_v7  ;;  %v422_v14 = vsel %vm418_vm0, %v3523_v1, %v3551_v6  ;;  %v3579_v15 = vsel %vm418_vm0, %v423_v7, %v3555_v8  ;;  %v433_v23 = vrot.slane %v3588_v19, 1  ;;  %v3609_v26 = vld [vmem:[%s3539_s28 + $0x48] sm:$0xff]  ;;  %v365_v31 = vld [vmem:[%s3539_s28 + $0x50] sm:$0xff]  ;;  %v366_v32 = vld [vmem:[%s3539_s28 + $0x58] sm:$0xff]  ;;  %s3125_s2 = sshll.u32 %s6460_s1, 1 }
  0x14   : > { %487 = vrot.lane.b32.xlu1 %v3569_v13, %s3466_s25  ;;  %485 = vrot.lane.b32.xlu0 %v422_v14, %s3466_s25  ;;  %v3583_v16 = vsel %vm418_vm0, %v3555_v8, %v427_v10  ;;  %v3598_v21 = vsel %vm418_vm0, %v427_v10, %v429_v17  ;;  %v3601_v22 = vsel %vm418_vm0, %v429_v17, %v431_v18  ;;  %v435_v24 = vrot.slane %v3591_v20, 1  ;;  %v367_v33 = vld [vmem:[%s3539_s28 + $0x60] sm:$0xff]  ;;  %v3637_v38 = vld [vmem:[%s3539_s28 + $0x68] sm:$0xff] }
  0x15   : > { %v3616_v27 = vsel %vm418_vm0, %v431_v18, %v433_v23  ;;  %v437_v29 = vrot.slane %v3606_v25, 1  ;;  %v439_v30 = vrot.slane %v3609_v26, 1  ;;  %v441_v36 = vrot.slane %v365_v31, 1  ;;  %6267 = vst [vmem:[#allocation6_spill] sm:$0xff] %v3637_v38  ;;  %v3651_v43 = vld [vmem:[%s3539_s28 + $0x70] sm:$0xff]  ;;  %v3654_v44 = vld [vmem:[%s3539_s28 + $0x78] sm:$0xff] }
  0x16   : > { %v3619_v28 = vsel %vm418_vm0, %v433_v23, %v435_v24  ;;  %v443_v37 = vrot.slane %v366_v32, 1  ;;  %v445_v41 = vrot.slane %v367_v33, 1  ;;  %v447_v42 = vrot.slane %v3637_v38, 1  ;;  %v3669_v49 = vld [vmem:[%s3539_s28 + $0x80] sm:$0xff]  ;;  %v3672_v50 = vld [vmem:[%s3539_s28 + $0x88] sm:$0xff]  ;;  %v3687_v55 = vld [vmem:[%s3539_s28 + $0x90] sm:$0xff] }
  0x17   : > { %v3631_v34 = vsel %vm418_vm0, %v435_v24, %v437_v29  ;;  %v3634_v35 = vsel %vm418_vm0, %v437_v29, %v439_v30  ;;  %v3644_v39 = vsel %vm418_vm0, %v439_v30, %v441_v36  ;;  %v449_v47 = vrot.slane %v3651_v43, 1  ;;  %v3690_v56 = vld [vmem:[%s3539_s28 + $0x98] sm:$0xff]  ;;  %v3705_v61 = vld [vmem:[%s3539_s28 + $0xa0] sm:$0xff]  ;;  %v3708_v62 = vld [vmem:[%s3539_s28 + $0xa8] sm:$0xff] }
  0x18   : > { %489 = vrot.lane.b32.xlu1 %v3579_v15, %s3466_s25  ;;  %491 = vrot.lane.b32.xlu0 %v3583_v16, %s3466_s25  ;;  %6265 = vst [vmem:[#allocation4_spill] sm:$0xff] %v3631_v34  ;;  %6266 = vst [vmem:[#allocation5_spill] sm:$0xff] %v3634_v35  ;;  %v3647_v40 = vsel %vm418_vm0, %v441_v36, %v443_v37  ;;  %v3661_v45 = vsel %vm418_vm0, %v443_v37, %v445_v41  ;;  %v451_v48 = vrot.slane %v3654_v44, 1  ;;  %v3723_v17 = vld [vmem:[%s3539_s28 + $0xb0] sm:$0xff]  ;;  %v3726_v18 = vld [vmem:[%s3539_s28 + $0xb8] sm:$0xff] }
  0x19   : > { %6268 = vst [vmem:[#allocation7_spill] sm:$0xff] %v3644_v39  ;;  %6269 = vst [vmem:[#allocation8_spill] sm:$0xff] %v3647_v40  ;;  %v3664_v46 = vsel %vm418_vm0, %v445_v41, %v447_v42  ;;  %v3679_v51 = vsel %vm418_vm0, %v447_v42, %v449_v47  ;;  %v453_v53 = vrot.slane %v3669_v49, 1  ;;  %v455_v54 = vrot.slane %v3672_v50, 1 }
  0x1a   : > { %6270 = vst [vmem:[#allocation9_spill] sm:$0xff] %v3661_v45  ;;  %6271 = vst [vmem:[#allocation10_spill] sm:$0xff] %v3664_v46  ;;  %v3682_v52 = vsel %vm418_vm0, %v449_v47, %v451_v48  ;;  %v457_v59 = vrot.slane %v3687_v55, 1  ;;  %v459_v60 = vrot.slane %v3690_v56, 1  ;;  %v461_v10 = vrot.slane %v3705_v61, 1 }
  0x1b   : > { %6272 = vst [vmem:[#allocation11_spill] sm:$0xff] %v3679_v51  ;;  %6273 = vst [vmem:[#allocation12_spill] sm:$0xff] %v3682_v52  ;;  %v3697_v57 = vsel %vm418_vm0, %v451_v48, %v453_v53  ;;  %v3700_v58 = vsel %vm418_vm0, %v453_v53, %v455_v54  ;;  %v463_v14 = vrot.slane %v3708_v62, 1  ;;  %v465_v23 = vrot.slane %v3723_v17, 1 }
  0x1c   : > { %493 = vrot.lane.b32.xlu1 %v3598_v21, %s3466_s25  ;;  %495 = vrot.lane.b32.xlu0 %v3601_v22, %s3466_s25  ;;  %6274 = vst [vmem:[#allocation13_spill] sm:$0xff] %v3697_v57  ;;  %6275 = vst [vmem:[#allocation14_spill] sm:$0xff] %v3700_v58  ;;  %v3715_v63 = vsel %vm418_vm0, %v455_v54, %v457_v59  ;;  %v3718_v7 = vsel %vm418_vm0, %v457_v59, %v459_v60  ;;  %v6193_v30 = vrot.slane %v3726_v18, 1 }
  0x1d   : > { %v3734_v24 = vsel %vm418_vm0, %v459_v60, %v461_v10  ;;  %v3737_v29 = vsel %vm418_vm0, %v461_v10, %v463_v14  ;;  %v3745_v31 = vsel %vm418_vm0, %v463_v14, %v465_v23  ;;  %v6192_v33 = vrot.slane %v3637_v38, 2 }
  0x1e   : > { %v3750_v32 = vsel %vm418_vm0, %v465_v23, %v6193_v30  ;;  %v612_v36 = vrot.slane %v3651_v43, 2  ;;  %v614_v37 = vrot.slane %v3654_v44, 2  ;;  %v616_v47 = vrot.slane %v3669_v49, 2 }
  0x1f   : > { %v618_v48 = vrot.slane %v3672_v50, 2  ;;  %v620_v59 = vrot.slane %v3687_v55, 2  ;;  %v622_v60 = vrot.slane %v3690_v56, 2  ;;  %v3800_v23 = vrot.slane %v6194_v0, 2 }
  0x20   : > { %497 = vrot.lane.b32.xlu1 %v3616_v27, %s3466_s25  ;;  %499 = vrot.lane.b32.xlu0 %v3619_v28, %s3466_s25  ;;  %v3762_v41 = vsel %vm581_vm1, %v6192_v33, %v612_v36  ;;  %v3765_v42 = vsel %vm581_vm1, %v612_v36, %v614_v37  ;;  %v3774_v53 = vsel %vm581_vm1, %v614_v37, %v616_v47  ;;  %v3803_v36 = vrot.slane %v3542_v3, 2 }
  0x21   : > { %6276 = vst [vmem:[#allocation15_spill] sm:$0xff] %v3762_v41  ;;  %6277 = vst [vmem:[#allocation16_spill] sm:$0xff] %v3765_v42  ;;  %v3777_v54 = vsel %vm581_vm1, %v616_v47, %v618_v48  ;;  %v3786_v10 = vsel %vm581_vm1, %v618_v48, %v620_v59  ;;  %v3789_v14 = vsel %vm581_vm1, %v620_v59, %v622_v60  ;;  %v586_v48 = vrot.slane %v3545_v4, 2 }
  0x22   : > { %6278 = vst [vmem:[#allocation17_spill] sm:$0xff] %v3774_v53  ;;  %6279 = vst [vmem:[#allocation18_spill] sm:$0xff] %v3777_v54  ;;  %v3400_v37 = vpack.i.bf16 %v3800_v23, %v3800_v23  ;;  %v585_v47 = vsel %vm581_vm1, %v3800_v23, %v3803_v36  ;;  %v3827_v33 = vrot.slane %v3548_v5, 2 }
  0x23   : > { %6280 = vst [vmem:[#allocation19_spill] sm:$0xff] %v3800_v23  ;;  %v587_v59 = vsel %vm581_vm1, %v3803_v36, %v586_v48 }
  0x24   : > { %501 = vrot.lane.b32.xlu1 %v3631_v34, %s3466_s25  ;;  %503 = vrot.lane.b32.xlu0 %v3634_v35, %s3466_s25 }
  0x28   : > { %505 = vrot.lane.b32.xlu1 %v3644_v39, %s3466_s25  ;;  %507 = vrot.lane.b32.xlu0 %v3647_v40, %s3466_s25 }
  0x2c   : > { %509 = vrot.lane.b32.xlu1 %v3661_v45, %s3466_s25  ;;  %511 = vrot.lane.b32.xlu0 %v3664_v46, %s3466_s25 }
  0x30   : > { %513 = vrot.lane.b32.xlu1 %v3679_v51, %s3466_s25  ;;  %515 = vrot.lane.b32.xlu0 %v3682_v52, %s3466_s25 }
  0x34   : > { %517 = vrot.lane.b32.xlu1 %v3697_v57, %s3466_s25  ;;  %519 = vrot.lane.b32.xlu0 %v3700_v58, %s3466_s25 }
  0x38   : > { %521 = vrot.lane.b32.xlu1 %v3715_v63, %s3466_s25  ;;  %523 = vrot.lane.b32.xlu0 %v3718_v7, %s3466_s25 }
  0x3c   : > { %525 = vrot.lane.b32.xlu1 %v3734_v24, %s3466_s25  ;;  %527 = vrot.lane.b32.xlu0 %v3737_v29, %s3466_s25 }
  0x40   : > { %529 = vrot.lane.b32.xlu1 %v3745_v31, %s3466_s25  ;;  %531 = vrot.lane.b32.xlu0 %v3750_v32, %s3466_s25 }
  0x44   : > { %678 = vrot.lane.b32.xlu1 %v3762_v41, %s3467_s29  ;;  %680 = vrot.lane.b32.xlu0 %v3765_v42, %s3467_s29  ;;  %v6209_v41 = vrot.slane %v3565_v12, 2 }
  0x48   : > { %682 = vrot.lane.b32.xlu1 %v3774_v53, %s3467_s29  ;;  %684 = vrot.lane.b32.xlu0 %v3777_v54, %s3467_s29 }
  0x4c   : > { %686 = vrot.lane.b32.xlu1 %v3786_v10, %s3467_s29  ;;  %688 = vrot.lane.b32.xlu0 %v3789_v14, %s3467_s29 }
  0x50   : > { %778 = vrot.lane.b32.xlu1 %v3654_v44, %s3468_s30  ;;  %780 = vrot.lane.b32.xlu0 %v3669_v49, %s3468_s30 }
  0x54   : > { %782 = vrot.lane.b32.xlu1 %v3672_v50, %s3468_s30  ;;  %784 = vrot.lane.b32.xlu0 %v3687_v55, %s3468_s30 }
  0x58   : > { %3401 = vrot.lane.b32.xlu1 %v3400_v37, %s3467_s29  ;;  %650 = vrot.lane.b32.xlu0 %v585_v47, %s3467_s29  ;;  %v589_v37 = vsel %vm581_vm1, %v586_v48, %v3827_v33  ;;  %v6195_v47 = vrot.slane %v3558_v9, 2 }
  0x5a   : > { %v3843_v30 = vsel %vm581_vm1, %v3827_v33, %v6195_v47 }
  0x5c   : > { %652 = vrot.lane.b32.xlu1 %v587_v59, %s3467_s29  ;;  %786 = vrot.lane.b32.xlu0 %v3690_v56, %s3468_s30 }
  0x60   : > { %788 = vrot.lane.b32.xlu1 %v3705_v61, %s3468_s30  ;;  %881 = vrot.lane.b32.xlu0 %v3697_v57, %s3469_s8 }
  0x64   : > { %883 = vrot.lane.b32.xlu1 %v3700_v58, %s3469_s8  ;;  %885 = vrot.lane.b32.xlu0 %v3715_v63, %s3469_s8  ;;  %v6202_v58 = vrot.slane %v3708_v62, 2 }
  0x68   : > { %887 = vrot.lane.b32.xlu1 %v3718_v7, %s3469_s8  ;;  %654 = vrot.lane.b32.xlu0 %v589_v37, %s3467_s29 }
  0x6c   : > { %656 = vrot.lane.b32.xlu1 %v3843_v30, %s3467_s29  ;;  %746 = vrot.lane.b32.xlu0 %v6194_v0, %s3468_s30  ;;  %v624_v0 = vrot.slane %v3705_v61, 2 }
  0x70   : > { %748 = vrot.lane.b32.xlu1 %v3542_v3, %s3468_s30  ;;  %750 = vrot.lane.b32.xlu0 %v3545_v4, %s3468_s30 }
  0x74   : > { %752 = vrot.lane.b32.xlu1 %v3548_v5, %s3468_s30  ;;  %889 = vrot.lane.b32.xlu0 %v3734_v24, %s3469_s8 }
  0x78   : > { %891 = vrot.lane.b32.xlu1 %v3737_v29, %s3469_s8  ;;  %983 = vrot.lane.b32.xlu0 %v3774_v53, %s3470_s9  ;;  %v3885_v53 = vsel %vm581_vm1, %v622_v60, %v624_v0 }
  0x7c   : > { %985 = vrot.lane.b32.xlu1 %v3777_v54, %s3470_s9  ;;  %987 = vrot.lane.b32.xlu0 %v3786_v10, %s3470_s9 }
  0x80   : > { %989 = vrot.lane.b32.xlu1 %v3789_v14, %s3470_s9  ;;  %754 = vrot.lane.b32.xlu0 %v3558_v9, %s3468_s30 }
  0x82   : > { %v3869_v48 = vpop.permute.xlu0 %3396 }
  0x84   : > { %756 = vrot.lane.b32.xlu1 %v3562_v11, %s3468_s30  ;;  %849 = vrot.lane.b32.xlu0 %v3551_v6, %s3469_s8 }
  0x86   : > { %v3876_v47 = vpop.permute.xlu1 %487  ;;  %v3878_v54 = vpop.permute.xlu0 %485 }
  0x88   : > { %851 = vrot.lane.b32.xlu1 %v3569_v13, %s3469_s8  ;;  %853 = vrot.lane.b32.xlu0 %v3579_v15, %s3469_s8  ;;  %v3899_v13 = vsel %vm581_vm1, %v624_v0, %v6202_v58 }
  0x8a   : > { %v3888_v57 = vpop.permute.xlu1 %489  ;;  %v3890_v6 = vpop.permute.xlu0 %491 }
  0x8c   : > { %855 = vrot.lane.b32.xlu1 %v3583_v16, %s3469_s8  ;;  %991 = vrot.lane.b32.xlu0 %v3885_v53, %s3470_s9 }
  0x8e   : > { %v3901_v15 = vpop.permute.xlu1 %493  ;;  %v3903_v60 = vpop.permute.xlu0 %495 }
  0x8f   : > { %6281 = vst [vmem:[#allocation20_spill] sm:$0xff] %v3901_v15  ;;  %6282 = vst [vmem:[#allocation21_spill] sm:$0xff] %v3903_v60 }
  0x90   : > { %993 = vrot.lane.b32.xlu1 %v3899_v13, %s3470_s9  ;;  %1082 = vrot.lane.b32.xlu0 %v3672_v50, %s3471_s10 }
  0x92   : > { %v3909_v2 = vpop.permute.xlu1 %497  ;;  %v3911_v1 = vpop.permute.xlu0 %499 }
  0x93   : > { %6283 = vst [vmem:[#allocation22_spill] sm:$0xff] %v3909_v2  ;;  %6284 = vst [vmem:[#allocation23_spill] sm:$0xff] %v3911_v1 }
  0x94   : > { %1084 = vrot.lane.b32.xlu1 %v3687_v55, %s3471_s10  ;;  %1086 = vrot.lane.b32.xlu0 %v3690_v56, %s3471_s10 }
  0x96   : > { %v3917_v0 = vpop.permute.xlu1 %501  ;;  %v3919_v58 = vpop.permute.xlu0 %503 }
  0x97   : > { %6285 = vst [vmem:[#allocation24_spill] sm:$0xff] %v3917_v0  ;;  %6286 = vst [vmem:[#allocation25_spill] sm:$0xff] %v3919_v58 }
  0x98   : > { %1088 = vrot.lane.b32.xlu1 %v3705_v61, %s3471_s10  ;;  %857 = vrot.lane.b32.xlu0 %v3598_v21, %s3469_s8 }
  0x9a   : > { %v3925_v23 = vpop.permute.xlu1 %505  ;;  %v3927_v42 = vpop.permute.xlu0 %507 }
  0x9b   : > { %6287 = vst [vmem:[#allocation26_spill] sm:$0xff] %v3925_v23  ;;  %6288 = vst [vmem:[#allocation27_spill] sm:$0xff] %v3927_v42 }
  0x9c   : > { %859 = vrot.lane.b32.xlu1 %v3601_v22, %s3469_s8  ;;  %951 = vrot.lane.b32.xlu0 %v3803_v36, %s3470_s9 }
  0x9e   : > { %v3933_v56 = vpop.permute.xlu1 %509  ;;  %v3935_v0 = vpop.permute.xlu0 %511 }
  0x9f   : > { %6289 = vst [vmem:[#allocation28_spill] sm:$0xff] %v3933_v56  ;;  %6290 = vst [vmem:[#allocation29_spill] sm:$0xff] %v3935_v0  ;;  %v6291_v56 = vrot.slane %v3558_v9, 2 }
  0xa0   : > { %953 = vrot.lane.b32.xlu1 %v587_v59, %s3470_s9  ;;  %955 = vrot.lane.b32.xlu0 %v589_v37, %s3470_s9  ;;  %v592_v59 = vrot.slane %v3562_v11, 2 }
  0xa2   : > { %v3939_v61 = vpop.permute.xlu1 %513  ;;  %v3941_v58 = vpop.permute.xlu0 %515  ;;  %v3967_v23 = vsel %vm581_vm1, %v6291_v56, %v592_v59 }
  0xa4   : > { %957 = vrot.lane.b32.xlu1 %v3843_v30, %s3470_s9  ;;  %1090 = vrot.lane.b32.xlu0 %v3708_v62, %s3471_s10 }
  0xa6   : > { %v3947_v42 = vpop.permute.xlu1 %517  ;;  %v3949_v36 = vpop.permute.xlu0 %519 }
  0xa8   : > { %1092 = vrot.lane.b32.xlu1 %v3723_v17, %s3471_s10  ;;  %1179 = vrot.lane.b32.xlu0 %v3715_v63, %s3472_s11 }
  0xaa   : > { %v3956_v37 = vpop.permute.xlu1 %521  ;;  %v3958_v0 = vpop.permute.xlu0 %523 }
  0xac   : > { %1181 = vrot.lane.b32.xlu1 %v3718_v7, %s3472_s11  ;;  %1183 = vrot.lane.b32.xlu0 %v3734_v24, %s3472_s11  ;;  %v3981_v7 = vsel %vm581_vm1, %v592_v59, %v6209_v41 }
  0xae   : > { %v3970_v63 = vpop.permute.xlu1 %525  ;;  %v3972_v1 = vpop.permute.xlu0 %527 }
  0xaf   : > { %6292 = vst [vmem:[#allocation30_spill] sm:$0xff] %v3970_v63  ;;  %6293 = vst [vmem:[#allocation31_spill] sm:$0xff] %v3972_v1  ;;  %v628_v1 = vrot.slane %v3723_v17, 2  ;;  %v4078_v63 = vld [vmem:[%s6187_s3 + $0x18] sm:$0xff]  }
  0xb0   : > { %1185 = vrot.lane.b32.xlu1 %v3737_v29, %s3472_s11  ;;  %959 = vrot.lane.b32.xlu0 %v3967_v23, %s3470_s9  ;;  %6301 = vst [vmem:[#allocation39_spill] sm:$0xff] %v4078_v63 }
  0xb2   : > { %v3983_v24 = vpop.permute.xlu1 %529  ;;  %v3985_v56 = vpop.permute.xlu0 %531 }
  0xb3   : > { %6294 = vst [vmem:[#allocation32_spill] sm:$0xff] %v3983_v24  ;;  %6295 = vst [vmem:[#allocation33_spill] sm:$0xff] %v3985_v56 }
  0xb4   : > { %961 = vrot.lane.b32.xlu1 %v3981_v7, %s3470_s9  ;;  %1050 = vrot.lane.b32.xlu0 %v3545_v4, %s3471_s10  ;;  %v4010_v4 = vld [vmem:[%s6187_s3 + $0x38] sm:$0xff]  }
  0xb5   : > { %6296 = vst [vmem:[#allocation34_spill] sm:$0xff] %v4010_v4  ;;  %3362 = vmatprep.subr.bf16.mxu1 %v4010_v4  ;;  %3218 = vmatprep.subr.bf16.mxu0 %v4010_v4 }
  0xb6   : > { %v3991_v2 = vpop.permute.xlu1 %678  ;;  %v3993_v29 = vpop.permute.xlu0 %680  ;;  %3370 = vmatpush3.bf16.msra.mxu1 %v4010_v4  ;;  %3219 = vmatpush3.bf16.msra.mxu0 %v4010_v4 }
  0xb8   : > { %1052 = vrot.lane.b32.xlu1 %v3548_v5, %s3471_s10  ;;  %1054 = vrot.lane.b32.xlu0 %v3558_v9, %s3471_s10  ;;  %v4027_v9 = vld [vmem:[%s6187_s3 + $0x30] sm:$0xff]  }
  0xb9   : > { %6297 = vst [vmem:[#allocation35_spill] sm:$0xff] %v4027_v9  ;;  %3363 = vmatprep.subr.bf16.mxu1 %v4027_v9  ;;  %3220 = vmatprep.subr.bf16.mxu0 %v4027_v9 }
  0xba   : > { %v3999_v59 = vpop.permute.xlu1 %682  ;;  %v4001_v41 = vpop.permute.xlu0 %684  ;;  %3371 = vmatpush3.bf16.msra.mxu1 %v4027_v9  ;;  %3221 = vmatpush3.bf16.msra.mxu0 %v4027_v9  ;;  %v4101_v9 = vld [vmem:[%s6187_s3 + $0x10] sm:$0xff]  }
  0xbb   : > { %6304 = vst [vmem:[#allocation41_spill] sm:$0xff] %v4101_v9 }
  0xbc   : > { %1056 = vrot.lane.b32.xlu1 %v3562_v11, %s3471_s10  ;;  %1187 = vrot.lane.b32.xlu0 %v3745_v31, %s3472_s11 }
  0xbe   : > { %v4012_v52 = vpop.permute.xlu1 %686  ;;  %v4014_v5 = vpop.permute.xlu0 %688 }
  0xc0   : > { %1189 = vrot.lane.b32.xlu1 %v3750_v32, %s3472_s11  ;;  %1278 = vrot.lane.b32.xlu0 %v3786_v10, %s3473_s14  ;;  %v4043_v10 = vld [vmem:[%s6187_s3 + $0x28] sm:$0xff]  }
  0xc1   : > { %6298 = vst [vmem:[#allocation36_spill] sm:$0xff] %v4043_v10  ;;  %3364 = vmatprep.subr.bf16.mxu1 %v4043_v10  ;;  %3222 = vmatprep.subr.bf16.mxu0 %v4043_v10 }
  0xc2   : > { %v4029_v11 = vpop.permute.xlu1 %778  ;;  %v4031_v51 = vpop.permute.xlu0 %780  ;;  %3372 = vmatpush3.bf16.msra.mxu1 %v4043_v10  ;;  %3223 = vmatpush3.bf16.msra.mxu0 %v4043_v10 }
  0xc4   : > { %1280 = vrot.lane.b32.xlu1 %v3789_v14, %s3473_s14  ;;  %1282 = vrot.lane.b32.xlu0 %v3885_v53, %s3473_s14  ;;  %v4060_v14 = vld [vmem:[%s6187_s3 + $0x20] sm:$0xff]  }
  0xc5   : > { %6299 = vst [vmem:[#allocation37_spill] sm:$0xff] %v4060_v14  ;;  %3365 = vmatprep.subr.bf16.mxu1 %v4060_v14  ;;  %3224 = vmatprep.subr.bf16.mxu0 %v4060_v14 }
  0xc6   : > { %v4046_v60 = vpop.permute.xlu1 %782  ;;  %v4048_v15 = vpop.permute.xlu0 %784  ;;  %3373 = vmatpush3.bf16.msra.mxu1 %v4060_v14  ;;  %3225 = vmatpush3.bf16.msra.mxu0 %v4060_v14  ;;  %v6228_v14 = vrot.slane %v3726_v18, 2 }
  0xc7   : > { %3366 = vmatprep.subr.bf16.mxu1 %v4078_v63  ;;  %3226 = vmatprep.subr.bf16.mxu0 %v4078_v63 }
  0xc8   : > { %1284 = vrot.lane.b32.xlu1 %v3899_v13, %s3473_s14  ;;  %1058 = vrot.lane.b32.xlu0 %v3565_v12, %s3471_s10 }
  0xca   : > { %v4063_v56 = vpop.permute.xlu1 %3401  ;;  %v4065_v24 = vpop.permute.xlu0 %650  ;;  %3374 = vmatpush3.bf16.msra.mxu1 %v4078_v63  ;;  %3227 = vmatpush3.bf16.msra.mxu0 %v4078_v63 }
  0xcb   : > { %6300 = vst [vmem:[#allocation38_spill] sm:$0xff] %v4065_v24  ;;  %3367 = vmatprep.subr.bf16.mxu1 %v4101_v9  ;;  %3228 = vmatprep.subr.bf16.mxu0 %v4101_v9 }
  0xcc   : > { %1060 = vrot.lane.b32.xlu1 %v3588_v19, %s3471_s10  ;;  %1147 = vrot.lane.b32.xlu0 %v3555_v8, %s3472_s11  ;;  %v6303_v8 = vrot.slane %v3708_v62, 2 }
  0xce   : > { %v4081_v46 = vpop.permute.xlu1 %652  ;;  %v4083_v45 = vpop.permute.xlu0 %786  ;;  %v4094_v10 = vsel %vm581_vm1, %v6303_v8, %v628_v1  ;;  %3375 = vmatpush3.bf16.msra.mxu1 %v4101_v9  ;;  %v4123_v8 = vld [vmem:[%s6187_s3 + $0x8] sm:$0xff]   ;;  %3229 = vmatpush3.bf16.msra.mxu0 %v4101_v9 }
  0xcf   : > { %6302 = vst [vmem:[#allocation40_spill] sm:$0xff] %v4081_v46  ;;  %6306 = vst [vmem:[#allocation43_spill] sm:$0xff] %v4123_v8  ;;  %3368 = vmatprep.subr.bf16.mxu1 %v4123_v8  ;;  %3230 = vmatprep.subr.bf16.mxu0 %v4123_v8 }
  0xd0   : > { %1149 = vrot.lane.b32.xlu1 %v3583_v16, %s3472_s11  ;;  %1151 = vrot.lane.b32.xlu0 %v3598_v21, %s3472_s11  ;;  %v4117_v21 = vsel %vm581_vm1, %v628_v1, %v6228_v14  ;;  %v4140_v1 = vld [vmem:[%s6187_s3] sm:$0xff]  }
  0xd1   : > { %6307 = vst [vmem:[#allocation44_spill] sm:$0xff] %v4140_v1 }
  0xd2   : > { %v4104_v16 = vpop.permute.xlu1 %788  ;;  %v4106_v40 = vpop.permute.xlu0 %881  ;;  %3376 = vmatpush3.bf16.msra.mxu1 %v4123_v8  ;;  %3231 = vmatpush3.bf16.msra.mxu0 %v4123_v8 }
  0xd3   : > { %6305 = vst [vmem:[#allocation42_spill] sm:$0xff] %v4104_v16  ;;  %3369 = vmatprep.subr.bf16.mxu1 %v4140_v1  ;;  %3232 = vmatprep.subr.bf16.mxu0 %v4140_v1 }
  0xd4   : > { %1153 = vrot.lane.b32.xlu1 %v3601_v22, %s3472_s11  ;;  %1286 = vrot.lane.b32.xlu0 %v4094_v10, %s3473_s14 }
  0xd6   : > { %v4126_v63 = vpop.permute.xlu1 %883  ;;  %v4128_v22 = vpop.permute.xlu0 %885  ;;  %3377 = vmatpush3.bf16.msra.mxu1 %v4140_v1  ;;  %3233 = vmatpush3.bf16.msra.mxu0 %v4140_v1 }
  0xd7   : > { %3266 = vmatprep.subr.bf16.mxu1 %v4010_v4 }
  0xd8   : > { %1288 = vrot.lane.b32.xlu1 %v4117_v21, %s3473_s14  ;;  %690 = vrot.lane.b32.xlu0 %v3885_v53, %s3467_s29 }
  0xda   : > { %v4143_v14 = vpop.permute.xlu1 %887  ;;  %v4145_v9 = vpop.permute.xlu0 %654 }
  0xdb   : > { %6308 = vst [vmem:[#allocation45_spill] sm:$0xff] %v4145_v9 }
  0xdc   : > { %692 = vrot.lane.b32.xlu1 %v3899_v13, %s3467_s29  ;;  %1155 = vrot.lane.b32.xlu0 %v3616_v27, %s3472_s11 }
  0xde   : > { %v4155_v53 = vpop.permute.xlu1 %656  ;;  %v4157_v8 = vpop.permute.xlu0 %746 }
  0xdf   : > { %6309 = vst [vmem:[#allocation46_spill] sm:$0xff] %v4155_v53  ;;  %6310 = vst [vmem:[#allocation47_spill] sm:$0xff] %v4157_v8 }
  0xe0   : > { %1157 = vrot.lane.b32.xlu1 %v3619_v28, %s3472_s11  ;;  %1246 = vrot.lane.b32.xlu0 %v3827_v33, %s3473_s14  ;;  %v596_v33 = vrot.slane %v3588_v19, 2 }
  0xe2   : > { %v4164_v13 = vpop.permute.xlu1 %748  ;;  %v4166_v9 = vpop.permute.xlu0 %750 }
  0xe3   : > { %6311 = vst [vmem:[#allocation48_spill] sm:$0xff] %v4164_v13  ;;  %6312 = vst [vmem:[#allocation49_spill] sm:$0xff] %v4166_v9  ;;  %v6238_v9 = vrot.slane %v3591_v20, 2 }
  0xe4   : > { %1248 = vrot.lane.b32.xlu1 %v3843_v30, %s3473_s14  ;;  %1250 = vrot.lane.b32.xlu0 %v3967_v23, %s3473_s14  ;;  %v6316_v30 = vrot.slane %v3565_v12, 2 }
  0xe6   : > { %v4172_v1 = vpop.permute.xlu1 %752  ;;  %v4174_v53 = vpop.permute.xlu0 %889 }
  0xe7   : > { %6313 = vst [vmem:[#allocation50_spill] sm:$0xff] %v4172_v1  ;;  %6314 = vst [vmem:[#allocation51_spill] sm:$0xff] %v4174_v53  ;;  %v4192_v1 = vsel %vm581_vm1, %v6316_v30, %v596_v33 }
  0xe8   : > { %1252 = vrot.lane.b32.xlu1 %v3981_v7, %s3473_s14  ;;  %694 = vrot.lane.b32.xlu0 %v4094_v10, %s3467_s29 }
  0xea   : > { %v4181_v4 = vpop.permute.xlu1 %891  ;;  %v4183_v39 = vpop.permute.xlu0 %983 }
  0xeb   : > { %6315 = vst [vmem:[#allocation52_spill] sm:$0xff] %v4181_v4 }
  0xec   : > { %696 = vrot.lane.b32.xlu1 %v4117_v21, %s3467_s29  ;;  %790 = vrot.lane.b32.xlu0 %v3708_v62, %s3468_s30  ;;  %v4206_v62 = vsel %vm581_vm1, %v596_v33, %v6238_v9  ;;  %v379_v33 = vld [vmem:[%s3539_s28 + $0xc0] sm:$0xff] }
  0xee   : > { %v4195_v13 = vpop.permute.xlu1 %985  ;;  %v4197_v8 = vpop.permute.xlu0 %987 }
  0xf0   : > { %792 = vrot.lane.b32.xlu1 %v3723_v17, %s3468_s30  ;;  %1254 = vrot.lane.b32.xlu0 %v4192_v1, %s3473_s14 }
  0xf2   : > { %v4208_v46 = vpop.permute.xlu1 %989  ;;  %v4210_v30 = vpop.permute.xlu0 %754 }
  0xf3   : > { %6317 = vst [vmem:[#allocation53_spill] sm:$0xff] %v4210_v30 }
  0xf4   : > { %1256 = vrot.lane.b32.xlu1 %v4206_v62, %s3473_s14  ;;  %658 = vrot.lane.b32.xlu0 %v3967_v23, %s3467_s29 }
  0xf6   : > { %v4216_v24 = vpop.permute.xlu1 %756  ;;  %v4218_v17 = vpop.permute.xlu0 %849 }
  0xf7   : > { %6318 = vst [vmem:[#allocation54_spill] sm:$0xff] %v4216_v24  ;;  %6319 = vst [vmem:[#allocation55_spill] sm:$0xff] %v4218_v17 }
  0xf8   : > { %660 = vrot.lane.b32.xlu1 %v3981_v7, %s3467_s29  ;;  %794 = vrot.lane.b32.xlu0 %v3726_v18, %s3468_s30  ;;  %v469_v7 = vrot.slane %v379_v33, 1 }
  0xfa   : > { %v4225_v9 = vpop.permute.xlu1 %851  ;;  %v4227_v30 = vpop.permute.xlu0 %853 }
  0xfb   : > { %6320 = vst [vmem:[#allocation56_spill] sm:$0xff] %v4225_v9  ;;  %6321 = vst [vmem:[#allocation57_spill] sm:$0xff] %v4227_v30  ;;  %v4245_v30 = vld [vmem:[%s3539_s28 + $0xc8] sm:$0xff] }
  0xfc   : > { %796 = vrot.lane.b32.xlu1 %v379_v33, %s3468_s30  ;;  %893 = vrot.lane.b32.xlu0 %v3745_v31, %s3469_s8  ;;  %v6325_v31 = vrot.slane %v3726_v18, 1 }
  0xfe   : > { %v4232_v23 = vpop.permute.xlu1 %855  ;;  %v4234_v24 = vpop.permute.xlu0 %991 }
  0xff   : > { %6322 = vst [vmem:[#allocation58_spill] sm:$0xff] %v4232_v23  ;;  %6323 = vst [vmem:[#allocation59_spill] sm:$0xff] %v4234_v24  ;;  %v6239_v23 = vrot.slane %v4245_v30, 1 }
 0x100   : > { %895 = vrot.lane.b32.xlu1 %v3750_v32, %s3469_s8  ;;  %662 = vrot.lane.b32.xlu0 %v4192_v1, %s3467_s29  ;;  %v4254_v32 = vsel %vm418_vm0, %v6325_v31, %v469_v7 }
 0x102   : > { %v4240_v17 = vpop.permute.xlu1 %993  ;;  %v4242_v9 = vpop.permute.xlu0 %1082 }
 0x103   : > { %6324 = vst [vmem:[#allocation60_spill] sm:$0xff] %v4240_v17 }
 0x104   : > { %664 = vrot.lane.b32.xlu1 %v4206_v62, %s3467_s29  ;;  %758 = vrot.lane.b32.xlu0 %v3565_v12, %s3468_s30  ;;  %v4268_v12 = vsel %vm418_vm0, %v469_v7, %v6239_v23  ;;  %v632_v7 = vrot.slane %v379_v33, 2 }
 0x106   : > { %v4257_v4 = vpop.permute.xlu1 %1084  ;;  %v4259_v17 = vpop.permute.xlu0 %1086 }
 0x108   : > { %760 = vrot.lane.b32.xlu1 %v3588_v19, %s3468_s30  ;;  %897 = vrot.lane.b32.xlu0 %v4254_v32, %s3469_s8 }
 0x10a   : > { %v4270_v24 = vpop.permute.xlu1 %1088  ;;  %v4272_v31 = vpop.permute.xlu0 %857 }
 0x10b   : > { %6326 = vst [vmem:[#allocation61_spill] sm:$0xff] %v4272_v31 }
 0x10c   : > { %899 = vrot.lane.b32.xlu1 %v4268_v12, %s3469_s8  ;;  %995 = vrot.lane.b32.xlu0 %v4094_v10, %s3470_s9  ;;  %v6331_v10 = vrot.slane %v3726_v18, 2 }
 0x10e   : > { %v4278_v16 = vpop.permute.xlu1 %859  ;;  %v4280_v19 = vpop.permute.xlu0 %951 }
 0x10f   : > { %6327 = vst [vmem:[#allocation62_spill] sm:$0xff] %v4278_v16  ;;  %6328 = vst [vmem:[#allocation63_spill] sm:$0xff] %v4280_v19  ;;  %v4297_v16 = vsel %vm581_vm1, %v6331_v10, %v632_v7 }
 0x110   : > { %997 = vrot.lane.b32.xlu1 %v4117_v21, %s3470_s9  ;;  %762 = vrot.lane.b32.xlu0 %v3591_v20, %s3468_s30  ;;  %v6240_v21 = vrot.slane %v4245_v30, 2 }
 0x112   : > { %v4286_v23 = vpop.permute.xlu1 %953  ;;  %v4288_v31 = vpop.permute.xlu0 %955 }
 0x113   : > { %6329 = vst [vmem:[#allocation64_spill] sm:$0xff] %v4286_v23  ;;  %6330 = vst [vmem:[#allocation65_spill] sm:$0xff] %v4288_v31 }
 0x114   : > { %764 = vrot.lane.b32.xlu1 %v3606_v25, %s3468_s30  ;;  %861 = vrot.lane.b32.xlu0 %v3616_v27, %s3469_s8  ;;  %v4311_v27 = vsel %vm581_vm1, %v632_v7, %v6240_v21 }
 0x116   : > { %v4300_v19 = vpop.permute.xlu1 %957  ;;  %v4302_v53 = vpop.permute.xlu0 %1090 }
 0x117   : > { %6332 = vst [vmem:[#allocation66_spill] sm:$0xff] %v4300_v19  ;;  %6333 = vst [vmem:[#allocation67_spill] sm:$0xff] %v4302_v53  ;;  %v1362_v53 = vsel %vm1342_vm2, %v3669_v49, %v3949_v36  ;;  %v6343_v49 = vrot.slane %v3609_v26, 2 }
 0x118   : > { %863 = vrot.lane.b32.xlu1 %v3619_v28, %s3469_s8  ;;  %999 = vrot.lane.b32.xlu0 %v4297_v16, %s3470_s9 }
 0x11a   : > { %v4313_v31 = vpop.permute.xlu1 %1092  ;;  %v4315_v10 = vpop.permute.xlu0 %1179 }
 0x11b   : > { %6334 = vst [vmem:[#allocation68_spill] sm:$0xff] %v4313_v31 }
 0x11c   : > { %1001 = vrot.lane.b32.xlu1 %v4311_v27, %s3470_s9  ;;  %1094 = vrot.lane.b32.xlu0 %v3726_v18, %s3471_s10 }
 0x11e   : > { %v4321_v28 = vpop.permute.xlu1 %1181  ;;  %v4323_v19 = vpop.permute.xlu0 %1183 }
 0x120   : > { %1096 = vrot.lane.b32.xlu1 %v379_v33, %s3471_s10  ;;  %865 = vrot.lane.b32.xlu0 %v3631_v34, %s3469_s8  ;;  %v4345_v33 = vld [vmem:[%s3539_s28 + $0xd0] sm:$0xff]  ;;  %v6341_v34 = vrot.slane %v3591_v20, 2 }
 0x122   : > { %v4328_v7 = vpop.permute.xlu1 %1185  ;;  %v4330_v21 = vpop.permute.xlu0 %959 }
 0x123   : > { %6335 = vst [vmem:[#allocation69_spill] sm:$0xff] %v4330_v21  ;;  %v600_v21 = vrot.slane %v3606_v25, 2 }
 0x124   : > { %867 = vrot.lane.b32.xlu1 %v3634_v35, %s3469_s8  ;;  %963 = vrot.lane.b32.xlu0 %v4192_v1, %s3470_s9  ;;  %v4355_v1 = vld [vmem:[%s6189_s5 + $0x78] sm:$0xff] }
 0x125   : > { %6340 = vst [vmem:[#allocation74_spill] sm:$0xff] %v4355_v1 }
 0x126   : > { %v4336_v18 = vpop.permute.xlu1 %961  ;;  %v4338_v23 = vpop.permute.xlu0 %1050 }
 0x127   : > { %6336 = vst [vmem:[#allocation70_spill] sm:$0xff] %v4336_v18  ;;  %6337 = vst [vmem:[#allocation71_spill] sm:$0xff] %v4338_v23  ;;  %v4375_v23 = vsel %vm581_vm1, %v6341_v34, %v600_v21 }
 0x128   : > { %965 = vrot.lane.b32.xlu1 %v4206_v62, %s3470_s9  ;;  %1098 = vrot.lane.b32.xlu0 %v4245_v30, %s3471_s10  ;;  %v307_v62 = vld [vmem:[%s6189_s5 + $0x80] sm:$0xff]  ;;  %6342 = vst [vmem:[#allocation75_spill] sm:$0xff] %v4375_v23 }
 0x12a   : > { %v4348_v35 = vpop.permute.xlu1 %1052  ;;  %v4350_v31 = vpop.permute.xlu0 %1054 }
 0x12b   : > { %6338 = vst [vmem:[#allocation72_spill] sm:$0xff] %v4348_v35  ;;  %6339 = vst [vmem:[#allocation73_spill] sm:$0xff] %v4350_v31  ;;  %v1359_v31 = vsel %vm1342_vm2, %v3637_v38, %v3939_v61  ;;  %v1711_v61 = vrot.slane %v307_v62, 1  ;;  %v4381_v38 = vld [vmem:[%s6189_s5 + $0x88] sm:$0xff]  ;;  %v1360_v35 = vsel %vm1342_vm2, %v3651_v43, %v3941_v58  ;;  %v473_v58 = vrot.slane %v4345_v33, 1 }
 0x12c   : > { %1100 = vrot.lane.b32.xlu1 %v4345_v33, %s3471_s10  ;;  %1191 = vrot.lane.b32.xlu0 %v4254_v32, %s3472_s11  ;;  %v1393_v18 = vsel %vm1376_vm3, %v1359_v31, %v3991_v2  ;;  %v1361_v2 = vsel %vm1342_vm2, %v3654_v44, %v3947_v42  ;;  %v309_v44 = vld [vmem:[%s6189_s5 + $0x90] sm:$0xff]  ;;  %v1713_v36 = vrot.slane %v4381_v38, 1 }
 0x12d   : > { %v1427_v34 = vsel %vm1410_vm4, %v1393_v18, %v4029_v11  ;;  %v1394_v11 = vsel %vm1376_vm3, %v1360_v35, %v3993_v29 }
 0x12e   : > { %v4391_v31 = vpop.permute.xlu1 %1056  ;;  %v4393_v62 = vpop.permute.xlu0 %1187  ;;  %v1461_v43 = vsel %vm1444_vm5, %v1427_v34, %v4106_v40  ;;  %v4413_v40 = vsel %vm581_vm1, %v600_v21, %v6343_v49  ;;  %v6344_v34 = vrot.slane %v4355_v1, 1  ;;  %v1428_v21 = vsel %vm1410_vm4, %v1394_v11, %v4031_v51  ;;  %v6412_v1 = vld [vmem:[#allocation6_spill] sm:$0xff] }
 0x12f   : > { %v1495_v42 = vsel %vm1478_vm6, %v1461_v43, %v4183_v39  ;;  %v1395_v39 = vsel %vm1376_vm3, %v1361_v2, %v3999_v59  ;;  %v1715_v2 = vrot.slane %v309_v44, 1  ;;  %v6345_v49 = vrot.slane %v4245_v30, 1 }
 0x130   : > { %1193 = vrot.lane.b32.xlu1 %v4268_v12, %s3472_s11  ;;  %967 = vrot.lane.b32.xlu0 %v4375_v23, %s3470_s9  ;;  %v1529_v18 = vsel %vm1512_vm7, %v1495_v42, %v4242_v9  ;;  %v1712_v43 = vsel %vm418_vm0, %v6344_v34, %v1711_v61  ;;  %v4426_v23 = vld [vmem:[%s3539_s28 + $0xd8] sm:$0xff]  ;;  %v1429_v38 = vsel %vm1410_vm4, %v1395_v39, %v4046_v60 }
 0x131   : > { %v1563_v35 = vsel %vm1546_vm8, %v1529_v18, %v4315_v10  ;;  %v4439_v9 = vld [vmem:[%s6189_s5 + $0x98] sm:$0xff]  ;;  %v1462_v42 = vsel %vm1444_vm5, %v1428_v21, %v4126_v63  ;;  %v1463_v51 = vsel %vm1444_vm5, %v1429_v38, %v4128_v22  ;;  %v4449_v10 = vsel %vm418_vm0, %v6345_v49, %v473_v58 }
 0x132   : > { %v4434_v29 = vpop.permute.xlu1 %1189  ;;  %v1279_v59 = vpop.permute.xlu0 %1278  ;;  %v1496_v44 = vsel %vm1478_vm6, %v1462_v42, %v4195_v13  ;;  %v1497_v11 = vsel %vm1478_vm6, %v1463_v51, %v4197_v8  ;;  %v1714_v63 = vsel %vm418_vm0, %v1711_v61, %v1713_v36  ;;  %v475_v22 = vrot.slane %v4426_v23, 1 }
 0x133   : > { %v1597_v60 = vsel %vm1580_vm9, %v1563_v35, %v1279_v59  ;;  %v1396_v39 = vsel %vm1376_vm3, %v1362_v53, %v4001_v41  ;;  %v1530_v18 = vsel %vm1512_vm7, %v1496_v44, %v4257_v4  ;;  %v1531_v13 = vsel %vm1512_vm7, %v1497_v11, %v4259_v17 }
 0x134   : > { %969 = vrot.lane.b32.xlu1 %v4413_v40, %s3470_s9  ;;  %1062 = vrot.lane.b32.xlu0 %v3591_v20, %s3471_s10  ;;  %v1717_v8 = vrot.slane %v4439_v9, 1  ;;  %v1430_v34 = vsel %vm1410_vm4, %v1396_v39, %v4048_v15  ;;  %v1564_v20 = vsel %vm1546_vm8, %v1530_v18, %v4321_v28  ;;  %v1565_v61 = vsel %vm1546_vm8, %v1531_v13, %v4323_v19 }
 0x135   : > { %v1631_v21 = vsel %vm1614_vm10, %v1597_v60, 0.0  ;;  %v6346_v4 = vunpack.i.h.bf16 %v3869_v48  ;;  %v1464_v17 = vsel %vm1444_vm5, %v1430_v34, %v4143_v14  ;;  %v6347_v28 = vunpack.i.l.bf16 %v3869_v48  ;;  %v311_v48 = vld [vmem:[%s6189_s5 + $0xa0] sm:$0xff] }
 0x136   : > { %v1281_v41 = vpop.permute.xlu1 %1280  ;;  %v1283_v53 = vpop.permute.xlu0 %1282  ;;  %v4492_v59 = vsel %vm1342_vm2, %v3542_v3, %v3876_v47  ;;  %v1498_v9 = vsel %vm1478_vm6, %v1464_v17, %v4208_v46  ;;  %v1792_v47 = vmul.f32 %v1712_v43, %v1631_v21  ;;  %v4509_v46 = vsel %vm418_vm0, %v473_v58, %v475_v22 }
 0x137   : > { %v4478_v38 = vsel %vm1342_vm2, 0.0, %v6346_v4  ;;  %v1598_v15 = vsel %vm1580_vm9, %v1564_v20, %v1281_v41  ;;  %v1599_v35 = vsel %vm1580_vm9, %v1565_v61, %v1283_v53  ;;  %v4487_v19 = vsel %vm1342_vm2, 0.0, %v6347_v28  ;;  %v3427_v61 = vld [vmem:[%s3539_s28 + $0x10] sm:$0xff] }
 0x138   : > { %v1632_v42 = vsel %vm1614_vm10, %v1598_v15, 0.0  ;;  %1064 = vrot.lane.b32.xlu1 %v3606_v25, %s3471_s10  ;;  %1195 = vrot.lane.b32.xlu0 %v4449_v10, %s3472_s11  ;;  %v1532_v3 = vsel %vm1512_vm7, %v1498_v9, %v4270_v24  ;;  %v1716_v51 = vsel %vm418_vm0, %v1713_v36, %v1715_v2  ;;  %v1633_v60 = vsel %vm1614_vm10, %v1599_v35, 0.0  ;;  %v3426_v36 = vld [vmem:[%s3539_s28 + $0x8] sm:$0xff] }
 0x139   : > { %v1793_v14 = vmul.f32 %v1714_v63, %v1632_v42  ;;  %v1566_v25 = vsel %vm1546_vm8, %v1532_v3, %v4328_v7  ;;  %v1718_v49 = vsel %vm418_vm0, %v1715_v2, %v1717_v8  ;;  %v4520_v24 = vsel %vm1342_vm2, 0.0, %v3878_v54  ;;  %v4526_v7 = vld [vmem:[%s6189_s5 + $0xa8] sm:$0xff] }
 0x13a   : > { %v1285_v44 = vpop.permute.xlu1 %1284  ;;  %v4516_v11 = vpop.permute.xlu0 %1058  ;;  %v1719_v63 = vrot.slane %v311_v48, 1  ;;  %v4531_v2 = vsel %vm1342_vm2, %v3426_v36, %v3888_v57  ;;  %v1363_v54 = vsel %vm1342_vm2, %v3672_v50, %v3956_v37  ;;  %v1364_v39 = vsel %vm1342_vm2, %v3687_v55, %v3958_v0  ;;  %v6348_v3 = vld [vmem:[#allocation51_spill] sm:$0xff] }
 0x13b   : > { %v1817_v43 = vpack.c.bf16 %v1793_v14, %v1792_v47  ;;  %v1600_v58 = vsel %vm1580_vm9, %v1566_v25, %v1285_v44  ;;  %v1794_v57 = vmul.f32 %v1716_v51, %v1633_v60  ;;  %v4547_v50 = vsel %vm1342_vm2, %v3427_v61, %v3890_v6  ;;  %v6349_v51 = vld [vmem:[#allocation42_spill] sm:$0xff]  ;;  %v4585_v36 = vld [vmem:[%s3539_s28 + $0x48] sm:$0xff] }
 0x13c   : > { %v1634_v18 = vsel %vm1614_vm10, %v1600_v58, 0.0  ;;  %1197 = vrot.lane.b32.xlu1 %v4509_v46, %s3472_s11  ;;  %1290 = vrot.lane.b32.xlu0 %v4297_v16, %s3473_s14  ;;  %v1397_v55 = vsel %vm1376_vm3, %v1363_v54, %v4012_v52  ;;  %v1398_v0 = vsel %vm1376_vm3, %v1364_v39, %v4014_v5  ;;  %v6246_v41 = vrot.slane %v4526_v7, 1 }
 0x13d   : > { %v1842_v13 = vunpack.c.l.bf16 %v1817_v43  ;;  %v1843_v34 = vunpack.c.h.bf16 %v1817_v43  ;;  %v1795_v20 = vmul.f32 %v1718_v49, %v1634_v18  ;;  %v4559_v15 = vsel %vm418_vm0, %v1717_v8, %v1719_v63  ;;  %v6350_v49 = vld [vmem:[#allocation59_spill] sm:$0xff] }
 0x13e   : > { %v4553_v37 = vpop.permute.xlu1 %1060  ;;  %v4555_v21 = vpop.permute.xlu0 %1147  ;;  %v1431_v6 = vsel %vm1410_vm4, %v1397_v55, %v4083_v45  ;;  %v636_v52 = vrot.slane %v4345_v33, 2  ;;  %v2359_v5 = vshrl.u32 %v1817_v43, 16  ;;  %v2362_v35 = vshll.u32 %v1817_v43, 16 }
 0x13f   : > { %v1875_v53 = vsub.f32 %v1792_v47, %v1842_v13  ;;  %v1876_v4 = vsub.f32 %v1793_v14, %v1843_v34  ;;  %v1818_v17 = vpack.c.bf16 %v1795_v20, %v1794_v57  ;;  %v3404_v48 = vunpack.i.h.bf16 %v4063_v56  ;;  %v6351_v13 = vld [vmem:[#allocation67_spill] sm:$0xff] }
 0x140   : > { %1292 = vrot.lane.b32.xlu1 %v4311_v27, %s3473_s14  ;;  %533 = vrot.lane.b32.xlu0 %v4254_v32, %s3466_s25  ;;  %v1465_v45 = vsel %vm1444_vm5, %v1431_v6, %v6348_v3  ;;  %v1722_v32 = vsel %vm418_vm0, %v1719_v63, %v6246_v41  ;;  %v1432_v60 = vsel %vm1410_vm4, %v1398_v0, %v6349_v51  ;;  %v2361_v63 = vrot.slane %v2359_v5, 3  ;;  %v6354_v3 = vld [vmem:[#allocation60_spill] sm:$0xff] }
 0x141   : > { %v1900_v28 = vpack.c.bf16 %v1876_v4, %v1875_v53  ;;  %v1844_v9 = vunpack.c.l.bf16 %v1818_v17  ;;  %v1845_v42 = vunpack.c.h.bf16 %v1818_v17  ;;  %v2368_v8 = vshrl.u32 %v1818_v17, 16  ;;  %v6355_v51 = vld [vmem:[#allocation4_spill] sm:$0xff] }
 0x142   : > { %v4571_v47 = vpop.permute.xlu1 %1149  ;;  %v4573_v14 = vpop.permute.xlu0 %1151  ;;  %v2371_v25 = vshll.u32 %v1818_v17, 16  ;;  %v1499_v44 = vsel %vm1478_vm6, %v1465_v45, %v6350_v49  ;;  %v2364_v18 = vrot.slane %v2362_v35, 4  ;;  %v6353_v17 = vrot.slane %v4245_v30, 2 }
 0x143   : > { %v1877_v43 = vsub.f32 %v1794_v57, %v1844_v9  ;;  %v1878_v58 = vsub.f32 %v1795_v20, %v1845_v42  ;;  %v1982_v54 = vshrl.u32 %v1900_v28, 16  ;;  %v1985_v39 = vshll.u32 %v1900_v28, 16  ;;  %v6352_v20 = vld [vmem:[#allocation52_spill] sm:$0xff] }
 0x144   : > { %535 = vrot.lane.b32.xlu1 %v4268_v12, %s3466_s25  ;;  %1066 = vrot.lane.b32.xlu0 %v4585_v36, %s3471_s10  ;;  %v1533_v34 = vsel %vm1512_vm7, %v1499_v44, %v6351_v13  ;;  %v2370_v55 = vrot.slane %v2368_v8, 3  ;;  %v2373_v57 = vrot.slane %v2371_v25, 4  ;;  %v1466_v0 = vsel %vm1444_vm5, %v1432_v60, %v6352_v20  ;;  %v4612_v25 = vld [vmem:[%s3539_s28 + $0x50] sm:$0xff] }
 0x145   : > { %v1901_v61 = vpack.c.bf16 %v1878_v58, %v1877_v43  ;;  %v1567_v12 = vsel %vm1546_vm8, %v1533_v34, %v4393_v62  ;;  %v4602_v6 = vsel %vm581_vm1, %v6353_v17, %v636_v52  ;;  %v1984_v5 = vrot.slane %v1982_v54, 3  ;;  %v292_v62 = vld [vmem:[%s6189_s5 + $0x8] sm:$0xff]  ;;  %v4621_v60 = vld [vmem:[%s6189_s5 + $0x10] sm:$0xff]  ;;  %v4633_v34 = vld [vmem:[%s6189_s5] sm:$0xff] }
 0x146   : > { %v4595_v53 = vpop.permute.xlu1 %1153  ;;  %v1287_v4 = vpop.permute.xlu0 %1286  ;;  %v1987_v28 = vrot.slane %v1985_v39, 4  ;;  %v3403_v8 = vunpack.i.l.bf16 %v4063_v56  ;;  %v1500_v45 = vsel %vm1478_vm6, %v1466_v0, %v6354_v3  ;;  %v4623_v49 = vor.u32 %v2364_v18, %v2361_v63  ;;  %v6357_v43 = vld [vmem:[#allocation68_spill] sm:$0xff] }
 0x147   : > { %v1601_v35 = vsel %vm1580_vm9, %v1567_v12, %v1287_v4  ;;  %v1991_v9 = vshrl.u32 %v1901_v61, 16  ;;  %v1994_v42 = vshll.u32 %v1901_v61, 16  ;;  %v4625_v44 = vor.u32 %v2373_v57, %v2370_v55 }
 0x148   : > { %1068 = vrot.lane.b32.xlu1 %v4612_v25, %s3471_s10  ;;  %1159 = vrot.lane.b32.xlu0 %v6355_v51, %s3472_s11  ;;  %6356 = vst [vmem:[#allocation51_spill] sm:$0xff] %v4623_v49  ;;  %v1534_v58 = vsel %vm1512_vm7, %v1500_v45, %v6357_v43  ;;  %v6247_v13 = vrot.slane %v4426_v23, 2  ;;  %v1635_v63 = vsel %vm1614_vm10, %v1601_v35, 0.0  ;;  %v1681_v57 = vrot.slane %v292_v62, 1  ;;  %v6361_v62 = vld [vmem:[#allocation5_spill] sm:$0xff]  ;;  %v6362_v45 = vld [vmem:[#allocation40_spill] sm:$0xff] }
 0x149   : > { %v1993_v54 = vrot.slane %v1991_v9, 3  ;;  %v1996_v39 = vrot.slane %v1994_v42, 4  ;;  %v1568_v61 = vsel %vm1546_vm8, %v1534_v58, %v4434_v29  ;;  %v4643_v20 = vsel %vm1909_vm11, %v4623_v49, %v4625_v44  ;;  %v6360_v29 = vld [vmem:[#allocation38_spill] sm:$0xff]  ;;  %v3432_v49 = vld [vmem:[%s3539_s28 + $0x98] sm:$0xff] }
 0x14a   : > { %v1289_v18 = vpop.permute.xlu1 %1288  ;;  %v4638_v55 = vpop.permute.xlu0 %690  ;;  %6358 = vst [vmem:[#allocation42_spill] sm:$0xff] %v4643_v20  ;;  %v4646_v12 = vor.u32 %v1987_v28, %v1984_v5  ;;  %v1683_v17 = vrot.slane %v4621_v60, 1  ;;  %v1379_v35 = vsel %vm1376_vm3, %v4520_v24, %v6360_v29  ;;  %v1377_v9 = vsel %vm1376_vm3, %v4487_v19, %v3403_v8  ;;  %v4676_v8 = vld [vmem:[%s6189_s5 + $0x18] sm:$0xff]  ;;  %v6368_v29 = vld [vmem:[#allocation63_spill] sm:$0xff]  ;;  %v6382_v60 = vld [vmem:[#allocation46_spill] sm:$0xff] }
 0x14b   : > { %v1602_v0 = vsel %vm1580_vm9, %v1568_v61, %v1289_v18  ;;  %v4648_v4 = vor.u32 %v1996_v39, %v1993_v54  ;;  %v1680_v5 = vrot.slane %v4633_v34, 1  ;;  %v1796_v28 = vmul.f32 %v4559_v15, %v1635_v63  ;;  %v6364_v39 = vld [vmem:[#allocation48_spill] sm:$0xff]  ;;  %v6365_v61 = vld [vmem:[#allocation55_spill] sm:$0xff]  ;;  %v6367_v18 = vld [vmem:[#allocation50_spill] sm:$0xff] }
 0x14c   : > { %6359 = vst [vmem:[#allocation59_spill] sm:$0xff] %v4646_v12  ;;  %v1636_v42 = vsel %vm1614_vm10, %v1602_v0, 0.0  ;;  %1161 = vrot.lane.b32.xlu1 %v6361_v62, %s3472_s11  ;;  %1294 = vrot.lane.b32.xlu0 %v4602_v6, %s3473_s14  ;;  %v4671_v19 = vsel %vm581_vm1, %v636_v52, %v6247_v13  ;;  %v1380_v15 = vsel %vm1376_vm3, %v4492_v59, %v6362_v45  ;;  %v6369_v62 = vld [vmem:[#allocation71_spill] sm:$0xff]  ;;  %v6373_v13 = vld [vmem:[#allocation64_spill] sm:$0xff] }
 0x14d   : > { %v1797_v3 = vmul.f32 %v1722_v32, %v1636_v42  ;;  %v1998_v24 = vsel %vm1909_vm11, %v4646_v12, %v4648_v4  ;;  %v6363_v32 = vld [vmem:[#allocation47_spill] sm:$0xff]  ;;  %v1378_v43 = vsel %vm1376_vm3, %v4478_v38, %v3404_v48  ;;  %v1682_v54 = vsel %vm418_vm0, %v1680_v5, %v1681_v57  ;;  %v6366_v38 = vld [vmem:[#allocation49_spill] sm:$0xff] }
 0x14e   : > { %v1411_v51 = vsel %vm1410_vm4, %v1377_v9, %v6363_v32  ;;  %v4687_v58 = vpop.permute.xlu1 %692  ;;  %3250 = vmatprep.mubr.bf16.mxu1 %v1998_v24  ;;  %v4689_v52 = vpop.permute.xlu0 %1155  ;;  %v1412_v34 = vsel %vm1410_vm4, %v1378_v43, %v6364_v39  ;;  %v4699_v56 = vsel %vm418_vm0, %v1681_v57, %v1683_v17  ;;  %v1413_v48 = vsel %vm1410_vm4, %v1379_v35, %v6366_v38  ;;  %v6370_v32 = vld [vmem:[#allocation56_spill] sm:$0xff] }
 0x14f   : > { %v1445_v59 = vsel %vm1444_vm5, %v1411_v51, %v6365_v61  ;;  %v1819_v63 = vpack.c.bf16 %v1797_v3, %v1796_v28  ;;  %v1414_v0 = vsel %vm1410_vm4, %v1380_v15, %v6367_v18  ;;  %v1685_v42 = vrot.slane %v4676_v8, 1  ;;  %v6371_v51 = vld [vmem:[#allocation57_spill] sm:$0xff]  ;;  %v6372_v18 = vld [vmem:[#allocation58_spill] sm:$0xff] }
 0x150   : > { %v1479_v9 = vsel %vm1478_vm6, %v1445_v59, %v6368_v29  ;;  %1296 = vrot.lane.b32.xlu1 %v4671_v19, %s3473_s14  ;;  %537 = vrot.lane.b32.xlu0 %v4449_v10, %s3466_s25  ;;  %v1446_v15 = vsel %vm1444_vm5, %v1412_v34, %v6370_v32  ;;  %v1447_v43 = vsel %vm1444_vm5, %v1413_v48, %v6371_v51  ;;  %v6374_v32 = vld [vmem:[#allocation65_spill] sm:$0xff]  ;;  %v604_v8 = vrot.slane %v4612_v25, 2 }
 0x151   : > { %v1513_v57 = vsel %vm1512_vm7, %v1479_v9, %v6369_v62  ;;  %v1846_v24 = vunpack.c.l.bf16 %v1819_v63  ;;  %v1847_v45 = vunpack.c.h.bf16 %v1819_v63  ;;  %v2377_v35 = vshrl.u32 %v1819_v63, 16 }
 0x152   : > { %v1547_v39 = vsel %vm1546_vm8, %v1513_v57, %v4555_v21  ;;  %v4720_v61 = vpop.permute.xlu1 %1157  ;;  %v1247_v59 = vpop.permute.xlu0 %1246  ;;  %v2380_v38 = vshll.u32 %v1819_v63, 16  ;;  %v1448_v29 = vsel %vm1444_vm5, %v1414_v0, %v6372_v18  ;;  %v1480_v34 = vsel %vm1478_vm6, %v1446_v15, %v6373_v13  ;;  %v6375_v57 = vld [vmem:[#allocation72_spill] sm:$0xff] }
 0x153   : > { %v1879_v9 = vsub.f32 %v1796_v28, %v1846_v24  ;;  %v1880_v62 = vsub.f32 %v1797_v3, %v1847_v45  ;;  %v1581_v41 = vsel %vm1580_vm9, %v1547_v39, %v1247_v59  ;;  %v1481_v48 = vsel %vm1478_vm6, %v1447_v43, %v6374_v32  ;;  %v6376_v3 = vld [vmem:[#allocation73_spill] sm:$0xff]  ;;  %v6377_v45 = vld [vmem:[#allocation66_spill] sm:$0xff] }
 0x154   : > { %539 = vrot.lane.b32.xlu1 %v4509_v46, %s3466_s25  ;;  %698 = vrot.lane.b32.xlu0 %v4297_v16, %s3467_s29  ;;  %v2379_v21 = vrot.slane %v2377_v35, 3  ;;  %v2382_v63 = vrot.slane %v2380_v38, 4  ;;  %v1514_v28 = vsel %vm1512_vm7, %v1480_v34, %v6375_v57  ;;  %v1515_v0 = vsel %vm1512_vm7, %v1481_v48, %v6376_v3  ;;  %v6381_v3 = vld [vmem:[#allocation53_spill] sm:$0xff] }
 0x155   : > { %v1902_v24 = vpack.c.bf16 %v1880_v62, %v1879_v9  ;;  %v1615_v13 = vsel %vm1614_vm10, %v1581_v41, 0.0  ;;  %v1482_v15 = vsel %vm1478_vm6, %v1448_v29, %v6377_v45  ;;  %v1548_v51 = vsel %vm1546_vm8, %v1514_v28, %v4571_v47  ;;  %v4751_v41 = vld [vmem:[%s6189_s5 + $0x20] sm:$0xff]  ;;  %v6378_v62 = vld [vmem:[#allocation7_spill] sm:$0xff]  ;;  %v6383_v45 = vld [vmem:[#allocation61_spill] sm:$0xff] }
 0x156   : > { %v1549_v16 = vsel %vm1546_vm8, %v1515_v0, %v4573_v14  ;;  %v1249_v35 = vpop.permute.xlu1 %1248  ;;  %v1251_v43 = vpop.permute.xlu0 %1250  ;;  %v4744_v39 = vor.u32 %v2382_v63, %v2379_v21  ;;  %v1516_v47 = vsel %vm1512_vm7, %v1482_v15, %v4391_v31  ;;  %v1776_v29 = vmul.f32 %v1680_v5, %v1615_v13  ;;  %v6380_v31 = vld [vmem:[#allocation45_spill] sm:$0xff] }
 0x157   : > { %v1582_v59 = vsel %vm1580_vm9, %v1548_v51, %v1249_v35  ;;  %v1583_v38 = vsel %vm1580_vm9, %v1549_v16, %v1251_v43  ;;  %v2000_v18 = vshrl.u32 %v1902_v24, 16  ;;  %v2003_v9 = vshll.u32 %v1902_v24, 16  ;;  %v6384_v35 = vld [vmem:[#allocation8_spill] sm:$0xff]  ;;  %v6385_v43 = vld [vmem:[#allocation75_spill] sm:$0xff] }
 0x158   : > { %v1616_v14 = vsel %vm1614_vm10, %v1582_v59, 0.0  ;;  %700 = vrot.lane.b32.xlu1 %v4311_v27, %s3467_s29  ;;  %1163 = vrot.lane.b32.xlu0 %v6378_v62, %s3472_s11  ;;  %v4763_v34 = vsel %vm1909_vm11, %v4625_v44, %v4744_v39  ;;  %v1617_v48 = vsel %vm1614_vm10, %v1583_v38, 0.0  ;;  %v1381_v5 = vsel %vm1376_vm3, %v4531_v2, %v6380_v31 }
 0x159   : > { %6379 = vst [vmem:[#allocation67_spill] sm:$0xff] %v4763_v34  ;;  %v1777_v32 = vmul.f32 %v1682_v54, %v1616_v14  ;;  %v2002_v21 = vrot.slane %v2000_v18, 3  ;;  %v2005_v63 = vrot.slane %v2003_v9, 4  ;;  %v1550_v27 = vsel %vm1546_vm8, %v1516_v47, %v4595_v53  ;;  %v4787_v53 = vld [vmem:[%s6189_s5 + $0x28] sm:$0xff]  ;;  %v6386_v9 = vld [vmem:[#allocation54_spill] sm:$0xff]  ;;  %v6387_v14 = vld [vmem:[#allocation69_spill] sm:$0xff] }
 0x15a   : > { %v1686_v57 = vsel %vm418_vm0, %v1683_v17, %v1685_v42  ;;  %v1253_v44 = vpop.permute.xlu1 %1252  ;;  %v4776_v28 = vpop.permute.xlu0 %694  ;;  %v1687_v54 = vrot.slane %v4751_v41, 1  ;;  %v1415_v0 = vsel %vm1410_vm4, %v1381_v5, %v6381_v3  ;;  %v1382_v17 = vsel %vm1376_vm3, %v4547_v50, %v6382_v60  ;;  %v6389_v3 = vld [vmem:[#allocation62_spill] sm:$0xff] }
 0x15b   : > { %v1809_v24 = vpack.c.bf16 %v1777_v32, %v1776_v29  ;;  %v1584_v2 = vsel %vm1580_vm9, %v1550_v27, %v1253_v44  ;;  %v4782_v13 = vor.u32 %v2005_v63, %v2002_v21  ;;  %v1449_v15 = vsel %vm1444_vm5, %v1415_v0, %v6383_v45 }
 0x15c   : > { %v1778_v51 = vmul.f32 %v4699_v56, %v1617_v48  ;;  %v1618_v16 = vsel %vm1614_vm10, %v1584_v2, 0.0  ;;  %1165 = vrot.lane.b32.xlu1 %v6384_v35, %s3472_s11  ;;  %1258 = vrot.lane.b32.xlu0 %v6385_v43, %s3473_s14  ;;  %v1416_v47 = vsel %vm1410_vm4, %v1382_v17, %v6386_v9  ;;  %v1483_v56 = vsel %vm1478_vm6, %v1449_v15, %v6387_v14  ;;  %v6390_v17 = vld [vmem:[#allocation35_spill] sm:$0xff]  ;;  %v6391_v15 = vld [vmem:[#allocation70_spill] sm:$0xff] }
 0x15d   : > { %v1826_v59 = vunpack.c.l.bf16 %v1809_v24  ;;  %v1827_v38 = vunpack.c.h.bf16 %v1809_v24  ;;  %v1779_v18 = vmul.f32 %v1686_v57, %v1618_v16  ;;  %v2007_v50 = vsel %vm1909_vm11, %v4648_v4, %v4782_v13  ;;  %v6388_v57 = vld [vmem:[#allocation34_spill] sm:$0xff] }
 0x15e   : > { %v4807_v48 = vpop.permute.xlu1 %696  ;;  %3251 = vmatmul.mubr.bf16.vlgmr.msra.gmra.mxu1 %v2007_v50  ;;  %v4809_v21 = vpop.permute.xlu0 %790  ;;  %v1688_v63 = vsel %vm418_vm0, %v1685_v42, %v1687_v54  ;;  %v6248_v31 = vrot.slane %v4787_v53, 1  ;;  %v2288_v44 = vshrl.u32 %v1809_v24, 16  ;;  %v1450_v0 = vsel %vm1444_vm5, %v1416_v47, %v6389_v3  ;;  %v4835_v50 = vld [vmem:[%s3539_s28 + $0x58] sm:$0xff] }
 0x15f   : > { %v1859_v4 = vsub.f32 %v1776_v29, %v1826_v59  ;;  %v1860_v5 = vsub.f32 %v1777_v32, %v1827_v38  ;;  %v1810_v27 = vpack.c.bf16 %v1779_v18, %v1778_v51  ;;  %3267 = vmatpush3.bf16.msra.mxu1 %v6388_v57  ;;  %v1517_v2 = vsel %vm1512_vm7, %v1483_v56, %v4516_v11 }
 0x160   : > { %1260 = vrot.lane.b32.xlu1 %v4413_v40, %s3473_s14  ;;  %702 = vrot.lane.b32.xlu0 %v4602_v6, %s3467_s29  ;;  %v2291_v42 = vshll.u32 %v1809_v24, 16  ;;  %v1484_v16 = vsel %vm1478_vm6, %v1450_v0, %v6391_v15  ;;  %v1551_v11 = vsel %vm1546_vm8, %v1517_v2, %v4689_v52  ;;  %v6250_v9 = vrot.slane %v4835_v50, 2 }
 0x161   : > { %v1892_v29 = vpack.c.bf16 %v1860_v5, %v1859_v4  ;;  %v1828_v32 = vunpack.c.l.bf16 %v1810_v27  ;;  %v1829_v60 = vunpack.c.h.bf16 %v1810_v27  ;;  %3268 = vmatprep.subr.bf16.mxu1 %v6390_v17  ;;  %v2296_v45 = vshrl.u32 %v1810_v27, 16 }
 0x162   : > { %v4832_v59 = vpop.permute.xlu1 %792  ;;  %v1255_v38 = vpop.permute.xlu0 %1254  ;;  %v2299_v24 = vshll.u32 %v1810_v27, 16  ;;  %v2290_v4 = vrot.slane %v2288_v44, 3  ;;  %v2293_v57 = vrot.slane %v2291_v42, 4  ;;  %v1518_v27 = vsel %vm1512_vm7, %v1484_v16, %v4553_v37  ;;  %v6393_v44 = vld [vmem:[#allocation36_spill] sm:$0xff] }
 0x163   : > { %v1861_v47 = vsub.f32 %v1778_v51, %v1828_v32  ;;  %v1862_v14 = vsub.f32 %v1779_v18, %v1829_v60  ;;  %v1585_v56 = vsel %vm1580_vm9, %v1551_v11, %v1255_v38  ;;  %3269 = vmatpush3.bf16.msra.mxu1 %v6390_v17  ;;  %v1911_v52 = vshrl.u32 %v1892_v29, 16 }
 0x164   : > { %704 = vrot.lane.b32.xlu1 %v4671_v19, %s3467_s29  ;;  %798 = vrot.lane.b32.xlu0 %v4245_v30, %s3468_s30  ;;  %v1914_v5 = vshll.u32 %v1892_v29, 16  ;;  %v2298_v3 = vrot.slane %v2296_v45, 3  ;;  %v6392_v18 = vrot.slane %v3609_v26, 2  ;;  %v2301_v2 = vrot.slane %v2299_v24, 4 }
 0x165   : > { %v1893_v51 = vpack.c.bf16 %v1862_v14, %v1861_v47  ;;  %3270 = vmatprep.subr.bf16.mxu1 %v6393_v44  ;;  %v1552_v32 = vsel %vm1546_vm8, %v1518_v27, %v4720_v61  ;;  %v1619_v30 = vsel %vm1614_vm10, %v1585_v56, 0.0  ;;  %v1690_v37 = vsel %vm418_vm0, %v1687_v54, %v6248_v31  ;;  %v6394_v14 = vld [vmem:[#allocation37_spill] sm:$0xff] }
 0x166   : > { %v4849_v0 = vsel %vm581_vm1, %v6392_v18, %v604_v8  ;;  %v1257_v42 = vpop.permute.xlu1 %1256  ;;  %v4860_v29 = vpop.permute.xlu0 %658  ;;  %v1913_v26 = vrot.slane %v1911_v52, 3  ;;  %v1916_v17 = vrot.slane %v1914_v5, 4  ;;  %v4872_v41 = vsel %vm581_vm1, %v604_v8, %v6250_v9 }
 0x167   : > { %v1586_v60 = vsel %vm1580_vm9, %v1552_v32, %v1257_v42  ;;  %v1919_v45 = vshrl.u32 %v1893_v51, 16  ;;  %v1922_v15 = vshll.u32 %v1893_v51, 16  ;;  %3271 = vmatpush3.bf16.msra.mxu1 %v6393_v44  ;;  %v2294_v54 = vor.u32 %v2293_v57, %v2290_v4  ;;  %v6396_v57 = vld [vmem:[#allocation39_spill] sm:$0xff] }
 0x168   : > { %v1620_v61 = vsel %vm1614_vm10, %v1586_v60, 0.0  ;;  %800 = vrot.lane.b32.xlu1 %v4345_v33, %s3468_s30  ;;  %1262 = vrot.lane.b32.xlu0 %v4849_v0, %s3473_s14  ;;  %v2302_v16 = vor.u32 %v2301_v2, %v2298_v3  ;;  %v1780_v11 = vmul.f32 %v1688_v63, %v1619_v30  ;;  %v1917_v27 = vor.u32 %v1916_v17, %v1913_v26  ;;  %v4899_v26 = vld [vmem:[%s3539_s28 + $0xe0] sm:$0xff]  ;;  %v6397_v60 = vld [vmem:[#allocation41_spill] sm:$0xff] }
 0x169   : > { %v1781_v38 = vmul.f32 %v1690_v37, %v1620_v61  ;;  %v1921_v24 = vrot.slane %v1919_v45, 3  ;;  %v1924_v47 = vrot.slane %v1922_v15, 4  ;;  %3272 = vmatprep.subr.bf16.mxu1 %v6394_v14 }
 0x16a   : > { %v4875_v56 = vpop.permute.xlu1 %660  ;;  %v4877_v52 = vpop.permute.xlu0 %794  ;;  %v4880_v33 = vsel %vm1909_vm11, %v2294_v54, %v2302_v16 }
 0x16b   : > { %6395 = vst [vmem:[#allocation52_spill] sm:$0xff] %v4880_v33  ;;  %v1811_v5 = vpack.c.bf16 %v1781_v38, %v1780_v11  ;;  %v1925_v51 = vor.u32 %v1924_v47, %v1921_v24  ;;  %3273 = vmatpush3.bf16.msra.mxu1 %v6394_v14  ;;  %v6400_v24 = vld [vmem:[#allocation43_spill] sm:$0xff] }
 0x16c   : > { %1264 = vrot.lane.b32.xlu1 %v4872_v41, %s3473_s14  ;;  %666 = vrot.lane.b32.xlu0 %v6385_v43, %s3467_s29 }
 0x16d   : > { %v1830_v63 = vunpack.c.l.bf16 %v1811_v5  ;;  %v1831_v8 = vunpack.c.h.bf16 %v1811_v5  ;;  %v1926_v4 = vsel %vm1909_vm11, %v1917_v27, %v1925_v51  ;;  %3274 = vmatprep.subr.bf16.mxu1 %v6396_v57  ;;  %v2305_v3 = vshrl.u32 %v1811_v5, 16  ;;  %v6402_v27 = vld [vmem:[#allocation44_spill] sm:$0xff] }
 0x16e   : > { %v4889_v18 = vpop.permute.xlu1 %796  ;;  %3234 = vmatprep.mubr.bf16.mxu0 %v1926_v4  ;;  %v4891_v44 = vpop.permute.xlu0 %893  ;;  %v2308_v2 = vshll.u32 %v1811_v5, 16  ;;  %v4938_v4 = vld [vmem:[%s3539_s28 + $0xe8] sm:$0xff] }
 0x16f   : > { %v1863_v32 = vsub.f32 %v1780_v11, %v1830_v63  ;;  %v1864_v30 = vsub.f32 %v1781_v38, %v1831_v8  ;;  %3275 = vmatpush3.bf16.msra.mxu1 %v6396_v57  ;;  %v2307_v43 = vrot.slane %v2305_v3, 3 }
 0x170   : > { %668 = vrot.lane.b32.xlu1 %v4413_v40, %s3467_s29  ;;  %802 = vrot.lane.b32.xlu0 %v4426_v23, %s3468_s30  ;;  %v2310_v37 = vrot.slane %v2308_v2, 4 }
 0x171   : > { %v1894_v42 = vpack.c.bf16 %v1864_v30, %v1863_v32  ;;  %3276 = vmatprep.subr.bf16.mxu1 %v6397_v60  ;;  %v640_v30 = vrot.slane %v4899_v26, 2 }
 0x172   : > { %v4902_v17 = vpop.permute.xlu1 %895  ;;  %v4904_v45 = vpop.permute.xlu0 %662  ;;  %v4906_v15 = vor.u32 %v2310_v37, %v2307_v43 }
 0x173   : > { %v1928_v61 = vshrl.u32 %v1894_v42, 16  ;;  %v1931_v54 = vshll.u32 %v1894_v42, 16  ;;  %3277 = vmatpush3.bf16.msra.mxu1 %v6397_v60  ;;  %v4987_v42 = vld [vmem:[%s3539_s28 + $0x60] sm:$0xff]  ;;  %v6249_v60 = vrot.slane %v4938_v4, 2 }
 0x174   : > { %6398 = vst [vmem:[#allocation60_spill] sm:$0xff] %v4906_v15  ;;  %804 = vrot.lane.b32.xlu1 %v4899_v26, %s3468_s30  ;;  %901 = vrot.lane.b32.xlu0 %v4449_v10, %s3469_s8  ;;  %v4915_v40 = vsel %vm1909_vm11, %v2302_v16, %v4906_v15  ;;  %v477_v16 = vrot.slane %v4899_v26, 1  ;;  %v608_v31 = vrot.slane %v4987_v42, 2 }
 0x175   : > { %6399 = vst [vmem:[#allocation4_spill] sm:$0xff] %v4915_v40  ;;  %v1930_v11 = vrot.slane %v1928_v61, 3  ;;  %v1933_v38 = vrot.slane %v1931_v54, 4  ;;  %3278 = vmatprep.subr.bf16.mxu1 %v6400_v24  ;;  %v6411_v40 = vld [vmem:[#allocation30_spill] sm:$0xff] }
 0x176   : > { %v4918_v47 = vpop.permute.xlu1 %664  ;;  %v4920_v14 = vpop.permute.xlu0 %758  ;;  %v1365_v12 = vsel %vm1342_vm2, %v3432_v49, %v6411_v40 }
 0x177   : > { %v4922_v5 = vor.u32 %v1933_v38, %v1930_v11  ;;  %3279 = vmatpush3.bf16.msra.mxu1 %v6400_v24  ;;  %v1399_v33 = vsel %vm1376_vm3, %v1365_v12, %v4638_v55  ;;  %v313_v55 = vld [vmem:[%s6189_s5 + $0xb0] sm:$0xff]  ;;  %v3433_v12 = vld [vmem:[%s3539_s28 + $0xa0] sm:$0xff] }
 0x178   : > { %903 = vrot.lane.b32.xlu1 %v4509_v46, %s3469_s8  ;;  %670 = vrot.lane.b32.xlu0 %v4849_v0, %s3467_s29  ;;  %v4948_v46 = vsel %vm418_vm0, %v475_v22, %v477_v16 }
 0x179   : > { %6401 = vst [vmem:[#allocation68_spill] sm:$0xff] %v4922_v5  ;;  %v1935_v10 = vsel %vm1909_vm11, %v1925_v51, %v4922_v5  ;;  %3280 = vmatprep.subr.bf16.mxu1 %v6402_v27  ;;  %v4951_v51 = vrot.slane %v4938_v4, 1  ;;  %v6413_v5 = vrot.slane %v6412_v1, 2  ;;  %v5089_v1 = vld [vmem:[%s6189_s5 + $0xb8] sm:$0xff] }
 0x17a   : > { %v4933_v63 = vpop.permute.xlu1 %760  ;;  %3235 = vmatmul.mubr.bf16.vlgmr.msra.gmra.mxu0 %v1935_v10  ;;  %v4935_v8 = vpop.permute.xlu0 %897  ;;  %v6406_v10 = vld [vmem:[#allocation9_spill] sm:$0xff] }
 0x17b   : > { %3281 = vmatpush3.bf16.msra.mxu1 %v6402_v27  ;;  %v5070_v15 = vsel %vm581_vm1, %v608_v31, %v6413_v5 }
 0x17c   : > { %672 = vrot.lane.b32.xlu1 %v4872_v41, %s3467_s29  ;;  %766 = vrot.lane.b32.xlu0 %v4585_v36, %s3468_s30  ;;  %v4963_v36 = vsel %vm418_vm0, %v477_v16, %v4951_v51 }
 0x17e   : > { %v4953_v57 = vpop.permute.xlu1 %899  ;;  %v4955_v3 = vpop.permute.xlu0 %995 }
 0x180   : > { %768 = vrot.lane.b32.xlu1 %v4612_v25, %s3468_s30  ;;  %905 = vrot.lane.b32.xlu0 %v4948_v46, %s3469_s8 }
 0x182   : > { %v4965_v22 = vpop.permute.xlu1 %997  ;;  %v4967_v2 = vpop.permute.xlu0 %762 }
 0x184   : > { %907 = vrot.lane.b32.xlu1 %v4963_v36, %s3469_s8  ;;  %1003 = vrot.lane.b32.xlu0 %v4602_v6, %s3470_s9  ;;  %v6404_v6 = vrot.slane %v4426_v23, 2 }
 0x186   : > { %v4973_v32 = vpop.permute.xlu1 %764  ;;  %v4975_v25 = vpop.permute.xlu0 %861 }
 0x187   : > { %6403 = vst [vmem:[#allocation38_spill] sm:$0xff] %v4973_v32 }
 0x188   : > { %1005 = vrot.lane.b32.xlu1 %v4671_v19, %s3470_s9  ;;  %770 = vrot.lane.b32.xlu0 %v4835_v50, %s3468_s30  ;;  %v4996_v19 = vsel %vm581_vm1, %v6404_v6, %v640_v30 }
 0x18a   : > { %v4982_v43 = vpop.permute.xlu1 %863  ;;  %v4984_v37 = vpop.permute.xlu0 %999 }
 0x18c   : > { %772 = vrot.lane.b32.xlu1 %v4987_v42, %s3468_s30  ;;  %869 = vrot.lane.b32.xlu0 %v6378_v62, %s3469_s8  ;;  %v5008_v62 = vsel %vm581_vm1, %v640_v30, %v6249_v60  ;;  %v6407_v30 = vld [vmem:[#allocation10_spill] sm:$0xff] }
 0x18e   : > { %v4999_v61 = vpop.permute.xlu1 %1001  ;;  %v1095_v54 = vpop.permute.xlu0 %1094 }
 0x190   : > { %871 = vrot.lane.b32.xlu1 %v6384_v35, %s3469_s8  ;;  %1007 = vrot.lane.b32.xlu0 %v4996_v19, %s3470_s9 }
 0x192   : > { %v1097_v11 = vpop.permute.xlu1 %1096  ;;  %v5010_v38 = vpop.permute.xlu0 %865 }
 0x194   : > { %1009 = vrot.lane.b32.xlu1 %v5008_v62, %s3470_s9  ;;  %1102 = vrot.lane.b32.xlu0 %v4426_v23, %s3471_s10 }
 0x196   : > { %v5016_v24 = vpop.permute.xlu1 %867  ;;  %v5018_v35 = vpop.permute.xlu0 %963 }
 0x197   : > { %6405 = vst [vmem:[#allocation5_spill] sm:$0xff] %v5016_v24  ;;  %v5079_v24 = vld [vmem:[%s3539_s28 + $0xf8] sm:$0xff] }
 0x198   : > { %1104 = vrot.lane.b32.xlu1 %v4899_v26, %s3471_s10  ;;  %873 = vrot.lane.b32.xlu0 %v6406_v10, %s3469_s8  ;;  %v5039_v26 = vld [vmem:[%s3539_s28 + $0xf0] sm:$0xff] }
 0x19a   : > { %v5024_v16 = vpop.permute.xlu1 %965  ;;  %v5026_v27 = vpop.permute.xlu0 %1098 }
 0x19c   : > { %875 = vrot.lane.b32.xlu1 %v6407_v30, %s3469_s8  ;;  %971 = vrot.lane.b32.xlu0 %v4849_v0, %s3470_s9  ;;  %v6409_v0 = vrot.slane %v4835_v50, 2 }
 0x19e   : > { %v5032_v23 = vpop.permute.xlu1 %1100  ;;  %v1192_v6 = vpop.permute.xlu0 %1191 }
 0x1a0   : > { %973 = vrot.lane.b32.xlu1 %v4872_v41, %s3470_s9  ;;  %1106 = vrot.lane.b32.xlu0 %v4938_v4, %s3471_s10  ;;  %v5051_v41 = vsel %vm581_vm1, %v6409_v0, %v608_v31  ;;  %v845_v0 = vrot.slane %v5039_v26, 1 }
 0x1a2   : > { %v1194_v60 = vpop.permute.xlu1 %1193  ;;  %v5042_v9 = vpop.permute.xlu0 %967  ;;  %v5105_v5 = vsel %vm418_vm0, %v4951_v51, %v845_v0 }
 0x1a3   : > { %6408 = vst [vmem:[#allocation40_spill] sm:$0xff] %v5042_v9 }
 0x1a4   : > { %1108 = vrot.lane.b32.xlu1 %v5039_v26, %s3471_s10  ;;  %1199 = vrot.lane.b32.xlu0 %v4948_v46, %s3472_s11 }
 0x1a6   : > { %v5053_v34 = vpop.permute.xlu1 %969  ;;  %v5055_v20 = vpop.permute.xlu0 %1062 }
 0x1a7   : > { %6410 = vst [vmem:[#allocation47_spill] sm:$0xff] %v5053_v34  ;;  %v1433_v34 = vsel %vm1410_vm4, %v1399_v33, %v4809_v21  ;;  %v6414_v21 = vld [vmem:[#allocation31_spill] sm:$0xff] }
 0x1a8   : > { %1201 = vrot.lane.b32.xlu1 %v4963_v36, %s3472_s11  ;;  %975 = vrot.lane.b32.xlu0 %v5051_v41, %s3470_s9  ;;  %v1467_v32 = vsel %vm1444_vm5, %v1433_v34, %v4891_v44  ;;  %v1366_v31 = vsel %vm1342_vm2, %v3433_v12, %v6414_v21  ;;  %v5108_v12 = vrot.slane %v5079_v24, 1 }
 0x1a9   : > { %v1501_v33 = vsel %vm1478_vm6, %v1467_v32, %v4955_v3  ;;  %v1400_v34 = vsel %vm1376_vm3, %v1366_v31, %v4687_v58  ;;  %v6260_v58 = vrot.slane %v5089_v1, 1 }
 0x1aa   : > { %v5074_v49 = vpop.permute.xlu1 %1064  ;;  %v5076_v40 = vpop.permute.xlu0 %1195  ;;  %v1535_v44 = vsel %vm1512_vm7, %v1501_v33, %v1095_v54  ;;  %6415 = vst [vmem:[#allocation48_spill] sm:$0xff] %v5108_v12  ;;  %v1434_v3 = vsel %vm1410_vm4, %v1400_v34, %v4832_v59 }
 0x1ab   : > { %v1569_v32 = vsel %vm1546_vm8, %v1535_v44, %v1192_v6  ;;  %v1468_v54 = vsel %vm1444_vm5, %v1434_v3, %v4902_v17  ;;  %v5128_v6 = vsel %vm418_vm0, %v845_v0, %v5108_v12  ;;  %v644_v12 = vrot.slane %v5039_v26, 2 }
 0x1ac   : > { %977 = vrot.lane.b32.xlu1 %v5070_v15, %s3470_s9  ;;  %1070 = vrot.lane.b32.xlu0 %v4835_v50, %s3471_s10  ;;  %v1723_v50 = vrot.slane %v313_v55, 1  ;;  %v1502_v33 = vsel %vm1478_vm6, %v1468_v54, %v4965_v22  ;;  %v3434_v54 = vld [vmem:[%s3539_s28 + $0xa8] sm:$0xff] }
 0x1ad   : > { %v1536_v59 = vsel %vm1512_vm7, %v1502_v33, %v1097_v11 }
 0x1ae   : > { %v5113_v21 = vpop.permute.xlu1 %1197  ;;  %v1291_v9 = vpop.permute.xlu0 %1290  ;;  %v1570_v17 = vsel %vm1546_vm8, %v1536_v59, %v1194_v60 }
 0x1af   : > { %v1603_v31 = vsel %vm1580_vm9, %v1569_v32, %v1291_v9  ;;  %v6416_v9 = vrot.slane %v4526_v7, 1 }
 0x1b0   : > { %1072 = vrot.lane.b32.xlu1 %v4987_v42, %s3471_s10  ;;  %1203 = vrot.lane.b32.xlu0 %v5105_v5, %s3472_s11  ;;  %v1637_v22 = vsel %vm1614_vm10, %v1603_v31, 0.0  ;;  %v1726_v42 = vsel %vm418_vm0, %v1723_v50, %v6260_v58  ;;  %v6417_v31 = vld [vmem:[#allocation32_spill] sm:$0xff] }
 0x1b1   : > { %v1724_v55 = vsel %vm418_vm0, %v6416_v9, %v1723_v50  ;;  %v1367_v33 = vsel %vm1342_vm2, %v3434_v54, %v6417_v31  ;;  %v6418_v54 = vld [vmem:[#allocation33_spill] sm:$0xff] }
 0x1b2   : > { %v1293_v34 = vpop.permute.xlu1 %1292  ;;  %v5138_v44 = vpop.permute.xlu0 %533  ;;  %v1798_v7 = vmul.f32 %v1724_v55, %v1637_v22  ;;  %v1401_v59 = vsel %vm1376_vm3, %v1367_v33, %v4776_v28 }
 0x1b3   : > { %v1604_v11 = vsel %vm1580_vm9, %v1570_v17, %v1293_v34  ;;  %v1435_v22 = vsel %vm1410_vm4, %v1401_v59, %v4877_v52  ;;  %v5176_v52 = vld [vmem:[%s6189_s5 + $0xc8] sm:$0xff] }
 0x1b4   : > { %v1638_v0 = vsel %vm1614_vm10, %v1604_v11, 0.0  ;;  %1205 = vrot.lane.b32.xlu1 %v5128_v6, %s3472_s11  ;;  %1298 = vrot.lane.b32.xlu0 %v4996_v19, %s3473_s14  ;;  %v315_v11 = vld [vmem:[%s6189_s5 + $0xc0] sm:$0xff]  ;;  %v1469_v31 = vsel %vm1444_vm5, %v1435_v22, %v4935_v8 }
 0x1b5   : > { %v1799_v60 = vmul.f32 %v1726_v42, %v1638_v0  ;;  %v1503_v59 = vsel %vm1478_vm6, %v1469_v31, %v4984_v37 }
 0x1b6   : > { %v5146_v3 = vpop.permute.xlu1 %535  ;;  %v5148_v32 = vpop.permute.xlu0 %1066 }
 0x1b7   : > { %v1820_v50 = vpack.c.bf16 %v1799_v60, %v1798_v7 }
 0x1b8   : > { %1300 = vrot.lane.b32.xlu1 %v5008_v62, %s3473_s14  ;;  %541 = vrot.lane.b32.xlu0 %v4948_v46, %s3466_s25  ;;  %v3435_v46 = vld [vmem:[%s3539_s28 + $0xb0] sm:$0xff] }
 0x1b9   : > { %v1848_v17 = vunpack.c.l.bf16 %v1820_v50  ;;  %v1849_v9 = vunpack.c.h.bf16 %v1820_v50  ;;  %v2386_v55 = vshrl.u32 %v1820_v50, 16  ;;  %v2389_v0 = vshll.u32 %v1820_v50, 16  ;;  %v5184_v50 = vld [vmem:[%s3539_s28 + $0x68] sm:$0xff] }
 0x1ba   : > { %v5161_v42 = vpop.permute.xlu1 %1068  ;;  %v5163_v34 = vpop.permute.xlu0 %1159  ;;  %v1368_v28 = vsel %vm1342_vm2, %v3435_v46, %v6418_v54 }
 0x1bb   : > { %v1881_v33 = vsub.f32 %v1798_v7, %v1848_v17  ;;  %v1882_v58 = vsub.f32 %v1799_v60, %v1849_v9  ;;  %v2388_v8 = vrot.slane %v2386_v55, 3  ;;  %v2391_v7 = vrot.slane %v2389_v0, 4 }
 0x1bc   : > { %543 = vrot.lane.b32.xlu1 %v4963_v36, %s3466_s25  ;;  %1074 = vrot.lane.b32.xlu0 %v5184_v50, %s3471_s10  ;;  %v1402_v60 = vsel %vm1376_vm3, %v1368_v28, %v4807_v48  ;;  %v1537_v17 = vsel %vm1512_vm7, %v1503_v59, %v5026_v27  ;;  %v1727_v9 = vrot.slane %v315_v11, 1  ;;  %v1729_v55 = vrot.slane %v5176_v52, 1  ;;  %v5207_v28 = vld [vmem:[%s3539_s28 + $0x70] sm:$0xff] }
 0x1bd   : > { %v1903_v37 = vpack.c.bf16 %v1882_v58, %v1881_v33  ;;  %v1436_v22 = vsel %vm1410_vm4, %v1402_v60, %v4889_v18  ;;  %v1571_v36 = vsel %vm1546_vm8, %v1537_v17, %v5076_v40  ;;  %v5199_v0 = vor.u32 %v2391_v7, %v2388_v8 }
 0x1be   : > { %v5196_v46 = vpop.permute.xlu1 %1161  ;;  %v1295_v54 = vpop.permute.xlu0 %1294  ;;  %v1470_v48 = vsel %vm1444_vm5, %v1436_v22, %v4953_v57  ;;  %v6419_v40 = vrot.slane %v4938_v4, 2  ;;  %v948_v8 = vrot.slane %v5079_v24, 2  ;;  %v6420_v7 = vrot.slane %v5089_v1, 1 }
 0x1bf   : > { %v1605_v27 = vsel %vm1580_vm9, %v1571_v36, %v1295_v54  ;;  %v2009_v58 = vshrl.u32 %v1903_v37, 16  ;;  %v2012_v11 = vshll.u32 %v1903_v37, 16  ;;  %v1504_v18 = vsel %vm1478_vm6, %v1470_v48, %v4999_v61 }
 0x1c0   : > { %1076 = vrot.lane.b32.xlu1 %v5207_v28, %s3471_s10  ;;  %1167 = vrot.lane.b32.xlu0 %v6406_v10, %s3472_s11  ;;  %v5216_v31 = vsel %vm581_vm1, %v6419_v40, %v644_v12  ;;  %v5221_v57 = vsel %vm1909_vm11, %v4744_v39, %v5199_v0  ;;  %v1538_v61 = vsel %vm1512_vm7, %v1504_v18, %v5032_v23  ;;  %v1639_v17 = vsel %vm1614_vm10, %v1605_v27, 0.0  ;;  %v6421_v18 = vld [vmem:[#allocation20_spill] sm:$0xff] }
 0x1c1   : > { %v2011_v33 = vrot.slane %v2009_v58, 3  ;;  %v2014_v59 = vrot.slane %v2012_v11, 4  ;;  %v1572_v10 = vsel %vm1546_vm8, %v1538_v61, %v5113_v21  ;;  %v1728_v60 = vsel %vm418_vm0, %v6420_v7, %v1727_v9  ;;  %v3438_v11 = vld [vmem:[%s3539_s28 + $0x18] sm:$0xff] }
 0x1c2   : > { %v1730_v39 = vsel %vm418_vm0, %v1727_v9, %v1729_v55  ;;  %v1297_v37 = vpop.permute.xlu1 %1296  ;;  %v5235_v23 = vpop.permute.xlu0 %537  ;;  %v1800_v1 = vmul.f32 %v1728_v60, %v1639_v17  ;;  %v5251_v48 = vsel %vm581_vm1, %v644_v12, %v948_v8  ;;  %v1349_v40 = vsel %vm1342_vm2, %v3438_v11, %v6421_v18  ;;  %v297_v60 = vld [vmem:[%s6189_s5 + $0x30] sm:$0xff] }
 0x1c3   : > { %v1606_v22 = vsel %vm1580_vm9, %v1572_v10, %v1297_v37  ;;  %v5238_v36 = vor.u32 %v2014_v59, %v2011_v33  ;;  %v5280_v37 = vld [vmem:[%s6189_s5 + $0x38] sm:$0xff]  ;;  %v1691_v18 = vrot.slane %v297_v60, 1 }
 0x1c4   : > { %v1640_v21 = vsel %vm1614_vm10, %v1606_v22, 0.0  ;;  %1169 = vrot.lane.b32.xlu1 %v6407_v30, %s3472_s11  ;;  %1302 = vrot.lane.b32.xlu0 %v5216_v31, %s3473_s14  ;;  %v6422_v22 = vld [vmem:[#allocation21_spill] sm:$0xff] }
 0x1c5   : > { %v1801_v54 = vmul.f32 %v1730_v39, %v1640_v21  ;;  %v2016_v9 = vsel %vm1909_vm11, %v4782_v13, %v5238_v36  ;;  %v1383_v13 = vsel %vm1376_vm3, %v1349_v40, %v4860_v29 }
 0x1c6   : > { %v5253_v27 = vpop.permute.xlu1 %539  ;;  %3254 = vmatprep.mubr.bf16.mxu1 %v2016_v9  ;;  %v5255_v58 = vpop.permute.xlu0 %698  ;;  %v1417_v59 = vsel %vm1410_vm4, %v1383_v13, %v4920_v14  ;;  %v3439_v14 = vld [vmem:[%s3539_s28 + $0x20] sm:$0xff]  ;;  %v1693_v13 = vrot.slane %v5280_v37, 1 }
 0x1c7   : > { %v1821_v30 = vpack.c.bf16 %v1801_v54, %v1800_v1  ;;  %v1350_v21 = vsel %vm1342_vm2, %v3439_v14, %v6422_v22  ;;  %v6426_v22 = vrot.slane %v4787_v53, 1  ;;  %v3441_v53 = vld [vmem:[%s3539_s28 + $0x30] sm:$0xff] }
 0x1c8   : > { %1304 = vrot.lane.b32.xlu1 %v5251_v48, %s3473_s14  ;;  %545 = vrot.lane.b32.xlu0 %v4951_v51, %s3466_s25  ;;  %v1451_v51 = vsel %vm1444_vm5, %v1417_v59, %v4975_v25  ;;  %v6423_v59 = vld [vmem:[#allocation11_spill] sm:$0xff] }
 0x1c9   : > { %v1850_v12 = vunpack.c.l.bf16 %v1821_v30  ;;  %v1851_v61 = vunpack.c.h.bf16 %v1821_v30  ;;  %v2395_v33 = vshrl.u32 %v1821_v30, 16  ;;  %v2398_v17 = vshll.u32 %v1821_v30, 16 }
 0x1ca   : > { %v5268_v10 = vpop.permute.xlu1 %700  ;;  %v5270_v7 = vpop.permute.xlu0 %1163  ;;  %v1485_v9 = vsel %vm1478_vm6, %v1451_v51, %v5018_v35 }
 0x1cb   : > { %v1883_v39 = vsub.f32 %v1800_v1, %v1850_v12  ;;  %v1884_v29 = vsub.f32 %v1801_v54, %v1851_v61  ;;  %v2397_v25 = vrot.slane %v2395_v33, 3  ;;  %v2400_v1 = vrot.slane %v2398_v17, 4  ;;  %v6425_v17 = vld [vmem:[#allocation22_spill] sm:$0xff] }
 0x1cc   : > { %706 = vrot.lane.b32.xlu1 %v4996_v19, %s3467_s29  ;;  %708 = vrot.lane.b32.xlu0 %v5008_v62, %s3467_s29  ;;  %v1384_v54 = vsel %vm1376_vm3, %v1350_v21, %v4875_v56  ;;  %v1519_v30 = vsel %vm1512_vm7, %v1485_v9, %v5055_v20  ;;  %v1692_v21 = vsel %vm418_vm0, %v6426_v22, %v1691_v18 }
 0x1cd   : > { %v1904_v11 = vpack.c.bf16 %v1884_v29, %v1883_v39  ;;  %v1418_v35 = vsel %vm1410_vm4, %v1384_v54, %v4933_v63  ;;  %v1553_v19 = vsel %vm1546_vm8, %v1519_v30, %v5163_v34  ;;  %v5302_v12 = vor.u32 %v2400_v1, %v2397_v25  ;;  %v6424_v34 = vld [vmem:[#allocation12_spill] sm:$0xff]  ;;  %v6427_v30 = vld [vmem:[#allocation23_spill] sm:$0xff] }
 0x1ce   : > { %v5299_v40 = vpop.permute.xlu1 %1165  ;;  %v1259_v62 = vpop.permute.xlu0 %1258  ;;  %v1452_v56 = vsel %vm1444_vm5, %v1418_v35, %v4982_v43  ;;  %v3440_v43 = vld [vmem:[%s3539_s28 + $0x28] sm:$0xff]  ;;  %v1694_v9 = vsel %vm418_vm0, %v1691_v18, %v1693_v13 }
 0x1cf   : > { %v1587_v20 = vsel %vm1580_vm9, %v1553_v19, %v1259_v62  ;;  %v2018_v61 = vshrl.u32 %v1904_v11, 16  ;;  %v2021_v33 = vshll.u32 %v1904_v11, 16  ;;  %v1486_v63 = vsel %vm1478_vm6, %v1452_v56, %v5024_v16 }
 0x1d0   : > { %1171 = vrot.lane.b32.xlu1 %v6423_v59, %s3472_s11  ;;  %1173 = vrot.lane.b32.xlu0 %v6424_v34, %s3472_s11  ;;  %v5316_v60 = vsel %vm1909_vm11, %v5199_v0, %v5302_v12  ;;  %v1351_v51 = vsel %vm1342_vm2, %v3440_v43, %v6425_v17  ;;  %v1520_v39 = vsel %vm1512_vm7, %v1486_v63, %v5074_v49  ;;  %v1621_v0 = vsel %vm1614_vm10, %v1587_v20, 0.0  ;;  %v3443_v63 = vld [vmem:[%s3539_s28 + $0xd0] sm:$0xff] }
 0x1d1   : > { %v2020_v16 = vrot.slane %v2018_v61, 3  ;;  %v2023_v29 = vrot.slane %v2021_v33, 4  ;;  %v1554_v14 = vsel %vm1546_vm8, %v1520_v39, %v5196_v46  ;;  %v1385_v49 = vsel %vm1376_vm3, %v1351_v51, %v4904_v45  ;;  %v3442_v45 = vld [vmem:[%s3539_s28 + $0xb8] sm:$0xff]  ;;  %v6428_v51 = vld [vmem:[#allocation40_spill] sm:$0xff] }
 0x1d2   : > { %v1261_v25 = vpop.permute.xlu1 %1260  ;;  %v5332_v1 = vpop.permute.xlu0 %702  ;;  %v1352_v11 = vsel %vm1342_vm2, %v3441_v53, %v6427_v30  ;;  %v1419_v35 = vsel %vm1410_vm4, %v1385_v49, %v4967_v2  ;;  %v1369_v19 = vsel %vm1342_vm2, %v3442_v45, %v5138_v44  ;;  %v1782_v62 = vmul.f32 %v1692_v21, %v1621_v0  ;;  %v299_v2 = vld [vmem:[%s6189_s5 + $0x40] sm:$0xff]  ;;  %v6430_v53 = vld [vmem:[#allocation5_spill] sm:$0xff] }
 0x1d3   : > { %v1588_v54 = vsel %vm1580_vm9, %v1554_v14, %v1261_v25  ;;  %v5337_v46 = vor.u32 %v2023_v29, %v2020_v16  ;;  %v1386_v61 = vsel %vm1376_vm3, %v1352_v11, %v4918_v47  ;;  %v1453_v33 = vsel %vm1444_vm5, %v1419_v35, %v5010_v38  ;;  %v5378_v38 = vld [vmem:[%s6189_s5 + $0x48] sm:$0xff]  ;;  %v3444_v14 = vld [vmem:[%s3539_s28 + $0xc0] sm:$0xff] }
 0x1d4   : > { %v1622_v18 = vsel %vm1614_vm10, %v1588_v54, 0.0  ;;  %1266 = vrot.lane.b32.xlu1 %v5051_v41, %s3473_s14  ;;  %1268 = vrot.lane.b32.xlu0 %v5070_v15, %s3473_s14  ;;  %v1372_v44 = vsel %vm1342_vm2, %v3443_v63, %v5253_v27  ;;  %v1403_v43 = vsel %vm1376_vm3, %v1369_v19, %v5255_v58  ;;  %v1487_v39 = vsel %vm1478_vm6, %v1453_v33, %v6428_v51  ;;  %v6429_v27 = vld [vmem:[#allocation38_spill] sm:$0xff] }
 0x1d5   : > { %v1783_v56 = vmul.f32 %v1694_v9, %v1622_v18  ;;  %v2025_v20 = vsel %vm1909_vm11, %v5238_v36, %v5337_v46  ;;  %v1420_v58 = vsel %vm1410_vm4, %v1386_v61, %v6429_v27  ;;  %v1370_v22 = vsel %vm1342_vm2, %v3444_v14, %v5146_v3  ;;  %v3445_v27 = vld [vmem:[%s3539_s28 + $0xc8] sm:$0xff] }
 0x1d6   : > { %v705_v17 = vpop.permute.xlu1 %704  ;;  %3255 = vmatmul.mubr.bf16.gmra.mxu1 %v2025_v20  ;;  %v799_v36 = vpop.permute.xlu0 %798  ;;  %v1521_v21 = vsel %vm1512_vm7, %v1487_v39, %v5148_v32  ;;  %v1695_v0 = vrot.slane %v299_v2, 1  ;;  %v1454_v30 = vsel %vm1444_vm5, %v1420_v58, %v6430_v53  ;;  %v1404_v3 = vsel %vm1376_vm3, %v1370_v22, %v5268_v10  ;;  %v6431_v2 = vld [vmem:[#allocation47_spill] sm:$0xff]  ;;  %v6434_v58 = vld [vmem:[#allocation60_spill] sm:$0xff] }
 0x1d7   : > { %v1812_v16 = vpack.c.bf16 %v1783_v56, %v1782_v62  ;;  %v5370_v29 = vsel %vm1376_vm3, %v1372_v44, %v705_v17  ;;  %v5373_v47 = vsel %vm1410_vm4, %v1403_v43, %v799_v36  ;;  %v1555_v32 = vsel %vm1546_vm8, %v1521_v21, %v5270_v7  ;;  %v6432_v10 = vld [vmem:[#allocation15_spill] sm:$0xff] }
 0x1d8   : > { %710 = vrot.lane.b32.xlu1 %v5216_v31, %s3467_s29  ;;  %806 = vrot.lane.b32.xlu0 %v4938_v4, %s3468_s30  ;;  %v1697_v18 = vrot.slane %v5378_v38, 1  ;;  %v1488_v61 = vsel %vm1478_vm6, %v1454_v30, %v6431_v2  ;;  %v1696_v63 = vsel %vm418_vm0, %v1693_v13, %v1695_v0  ;;  %v1371_v37 = vsel %vm1342_vm2, %v3445_v27, %v5235_v23 }
 0x1d9   : > { %v1832_v9 = vunpack.c.l.bf16 %v1812_v16  ;;  %v1833_v25 = vunpack.c.h.bf16 %v1812_v16  ;;  %v2314_v49 = vshrl.u32 %v1812_v16, 16  ;;  %v2317_v54 = vshll.u32 %v1812_v16, 16 }
 0x1da   : > { %v801_v11 = vpop.permute.xlu1 %800  ;;  %v1263_v35 = vpop.permute.xlu0 %1262 }
 0x1db   : > { %v1865_v45 = vsub.f32 %v1782_v62, %v1832_v9  ;;  %v1866_v4 = vsub.f32 %v1783_v56, %v1833_v25  ;;  %v5399_v19 = vsel %vm1410_vm4, %v1404_v3, %v801_v11  ;;  %v1589_v20 = vsel %vm1580_vm9, %v1555_v32, %v1263_v35  ;;  %v6435_v32 = vld [vmem:[#allocation68_spill] sm:$0xff] }
 0x1dc   : > { %808 = vrot.lane.b32.xlu1 %v5039_v26, %s3468_s30  ;;  %1270 = vrot.lane.b32.xlu0 %v6432_v10, %s3473_s14  ;;  %v2316_v7 = vrot.slane %v2314_v49, 3  ;;  %v2319_v33 = vrot.slane %v2317_v54, 4  ;;  %v1522_v62 = vsel %vm1512_vm7, %v1488_v61, %v5161_v42  ;;  %v1623_v43 = vsel %vm1614_vm10, %v1589_v20, 0.0 }
 0x1dd   : > { %v1895_v56 = vpack.c.bf16 %v1866_v4, %v1865_v45  ;;  %v1556_v44 = vsel %vm1546_vm8, %v1522_v62, %v5299_v40  ;;  %v1698_v26 = vsel %vm418_vm0, %v1695_v0, %v1697_v18  ;;  %v6433_v40 = vld [vmem:[#allocation16_spill] sm:$0xff]  ;;  %v1784_v22 = vmul.f32 %v1696_v63, %v1623_v43 }
 0x1de   : > { %v1265_v17 = vpop.permute.xlu1 %1264  ;;  %v667_v36 = vpop.permute.xlu0 %666  ;;  %v2320_v51 = vor.u32 %v2319_v33, %v2316_v7  ;;  %v1405_v25 = vsel %vm1376_vm3, %v1371_v37, %v5332_v1 }
 0x1df   : > { %v1590_v39 = vsel %vm1580_vm9, %v1556_v44, %v1265_v17  ;;  %v1937_v42 = vshrl.u32 %v1895_v56, 16  ;;  %v1940_v16 = vshll.u32 %v1895_v56, 16 }
 0x1e0   : > { %v1624_v13 = vsel %vm1614_vm10, %v1590_v39, 0.0  ;;  %1272 = vrot.lane.b32.xlu1 %v6433_v40, %s3473_s14  ;;  %674 = vrot.lane.b32.xlu0 %v5051_v41, %s3467_s29  ;;  %v5430_v14 = vsel %vm1909_vm11, %v6434_v58, %v2320_v51 }
 0x1e1   : > { %v1785_v21 = vmul.f32 %v1698_v26, %v1624_v13  ;;  %v1939_v0 = vrot.slane %v1937_v42, 3  ;;  %v1942_v9 = vrot.slane %v1940_v16, 4  ;;  %v6438_v13 = vld [vmem:[#allocation25_spill] sm:$0xff] }
 0x1e2   : > { %v669_v23 = vpop.permute.xlu1 %668  ;;  %v803_v49 = vpop.permute.xlu0 %802 }
 0x1e3   : > { %v1813_v54 = vpack.c.bf16 %v1785_v21, %v1784_v22  ;;  %v1439_v53 = vsel %vm1410_vm4, %v1405_v25, %v803_v49  ;;  %v1943_v30 = vor.u32 %v1942_v9, %v1939_v0 }
 0x1e4   : > { %676 = vrot.lane.b32.xlu1 %v5070_v15, %s3467_s29  ;;  %810 = vrot.lane.b32.xlu0 %v5079_v24, %s3468_s30  ;;  %s6116_s29 = scalar_lea.vmem %s6191_s7, %s3125_s2 }
 0x1e5   : > { %v1834_v41 = vunpack.c.l.bf16 %v1813_v54  ;;  %v1835_v3 = vunpack.c.h.bf16 %v1813_v54  ;;  %v1944_v11 = vsel %vm1909_vm11, %v6435_v32, %v1943_v30  ;;  %v2323_v35 = vshrl.u32 %v1813_v54, 16 }
 0x1e6   : > { %v805_v45 = vpop.permute.xlu1 %804  ;;  %3238 = vmatprep.mubr.bf16.mxu0 %v1944_v11  ;;  %v5441_v1 = vpop.permute.xlu0 %901  ;;  %v2326_v4 = vshll.u32 %v1813_v54, 16  ;;  %v6441_v11 = vmov 0.0  }
 0x1e7   : > { %v1867_v20 = vsub.f32 %v1784_v22, %v1834_v41  ;;  %v1868_v2 = vsub.f32 %v1785_v21, %v1835_v3  ;;  %v1440_v15 = vsel %vm1410_vm4, %v5370_v29, %v805_v45  ;;  %v2325_v61 = vrot.slane %v2323_v35, 3  ;;  %v6436_v29 = vld [vmem:[#allocation24_spill] sm:$0xff]  ;;  %v6442_v35 = vld [vmem:[#allocation27_spill] sm:$0xff] }
 0x1e8   : > { %909 = vrot.lane.b32.xlu1 %v5105_v5, %s3469_s8  ;;  %911 = vrot.lane.b32.xlu0 %v5128_v6, %s3469_s8  ;;  %v2328_v7 = vrot.slane %v2326_v4, 4  ;;  %v3446_v6 = vld [vmem:[%s3539_s28 + $0x38] sm:$0xff] }
 0x1e9   : > { %v1896_v33 = vpack.c.bf16 %v1868_v2, %v1867_v20  ;;  %v1353_v26 = vsel %vm1342_vm2, %v3446_v6, %v6436_v29  ;;  %v3419_v29 = vld [vmem:[%s6188_s4 + $0x30] sm:$0xff]  }
 0x1ea   : > { %v5449_v62 = vpop.permute.xlu1 %903  ;;  %v671_v56 = vpop.permute.xlu0 %670  ;;  %v5451_v63 = vor.u32 %v2328_v7, %v2325_v61  ;;  %v1387_v42 = vsel %vm1376_vm3, %v1353_v26, %v667_v36  ;;  %v3450_v26 = vld [vmem:[%s3539_s28 + $0x78] sm:$0xff] }
 0x1eb   : > { %v1946_v44 = vshrl.u32 %v1896_v33, 16  ;;  %v1949_v43 = vshll.u32 %v1896_v33, 16 }
 0x1ec   : > { %774 = vrot.lane.b32.xlu1 %v5184_v50, %s3468_s30  ;;  %776 = vrot.lane.b32.xlu0 %v5207_v28, %s3468_s30  ;;  %v5459_v5 = vsel %vm1909_vm11, %v2320_v51, %v5451_v63  ;;  %v6437_v28 = vld [vmem:[#allocation48_spill] sm:$0xff]  ;;  %v3447_v51 = vld [vmem:[%s3539_s28 + $0x40] sm:$0xff] }
 0x1ed   : > { %v1948_v17 = vrot.slane %v1946_v44, 3  ;;  %v1951_v39 = vrot.slane %v1949_v43, 4  ;;  %v1354_v58 = vsel %vm1342_vm2, %v3447_v51, %v6438_v13  ;;  %v3418_v44 = vld [vmem:[%s6188_s4 + $0x38] sm:$0xff]   ;;  %v3421_v13 = vld [vmem:[%s6188_s4 + $0x20] sm:$0xff]  }
 0x1ee   : > { %v673_v16 = vpop.permute.xlu1 %672  ;;  %v767_v27 = vpop.permute.xlu0 %766  ;;  %v1388_v22 = vsel %vm1376_vm3, %v1354_v58, %v669_v23  ;;  %3314 = vmatprep.subr.bf16.mxu0 %v3418_v44  ;;  %v6445_v58 = vld [vmem:[#allocation13_spill] sm:$0xff] }
 0x1ef   : > { %v1421_v37 = vsel %vm1410_vm4, %v1387_v42, %v767_v27  ;;  %v5466_v50 = vor.u32 %v1951_v39, %v1948_v17  ;;  %3315 = vmatpush3.bf16.msra.mxu0 %v3418_v44  ;;  %v3451_v17 = vld [vmem:[%s3539_s28 + $0x80] sm:$0xff]  ;;  %v3420_v27 = vld [vmem:[%s6188_s4 + $0x28] sm:$0xff]   ;;  %v1472_v44 = vsel %vm1444_vm5, %v5399_v19, %v5449_v62 }
 0x1f0   : > { %913 = vrot.lane.b32.xlu1 %v6437_v28, %s3469_s8  ;;  %1011 = vrot.lane.b32.xlu0 %v5216_v31, %s3470_s9  ;;  %v6439_v31 = vld [vmem:[#allocation19_spill] sm:$0xff] }
 0x1f1   : > { %v1953_v36 = vsel %vm1909_vm11, %v1943_v30, %v5466_v50  ;;  %v950_v23 = vsel %vm581_vm1, %v948_v8, %v6439_v31  ;;  %3316 = vmatprep.subr.bf16.mxu0 %v3419_v29 }
 0x1f2   : > { %v769_v21 = vpop.permute.xlu1 %768  ;;  %3239 = vmatmul.mubr.bf16.gmra.mxu0 %v1953_v36  ;;  %v906_v0 = vpop.permute.xlu0 %905  ;;  %v6446_v36 = vld [vmem:[#allocation14_spill] sm:$0xff] }
 0x1f3   : > { %v1422_v9 = vsel %vm1410_vm4, %v1388_v22, %v769_v21  ;;  %v5480_v25 = vsel %vm1444_vm5, %v1439_v53, %v906_v0  ;;  %v6440_v53 = vld [vmem:[#allocation26_spill] sm:$0xff]  ;;  %3317 = vmatpush3.bf16.msra.mxu0 %v3419_v29  ;;  %v3422_v0 = vld [vmem:[%s6188_s4 + $0x18] sm:$0xff]  }
 0x1f4   : > { %1013 = vrot.lane.b32.xlu1 %v5251_v48, %s3470_s9  ;;  %877 = vrot.lane.b32.xlu0 %v6423_v59, %s3469_s8  ;;  %v3448_v48 = vld [vmem:[%s3539_s28 + $0x48] sm:$0xff] }
 0x1f5   : > { %v1355_v59 = vsel %vm1342_vm2, %v3448_v48, %v6440_v53  ;;  %3318 = vmatprep.subr.bf16.mxu0 %v3420_v27  ;;  %v3423_v48 = vld [vmem:[%s6188_s4 + $0x10] sm:$0xff]  }
 0x1f6   : > { %v908_v49 = vpop.permute.xlu1 %907  ;;  %v5490_v54 = vpop.permute.xlu0 %1003  ;;  %v1389_v41 = vsel %vm1376_vm3, %v1355_v59, %v671_v56 }
 0x1f7   : > { %v5493_v30 = vsel %vm1444_vm5, %v1440_v15, %v908_v49  ;;  %3319 = vmatpush3.bf16.msra.mxu0 %v3420_v27 }
 0x1f8   : > { %879 = vrot.lane.b32.xlu1 %v6424_v34, %s3469_s8  ;;  %1015 = vrot.lane.b32.xlu0 %v950_v23, %s3470_s9  ;;  %v3449_v34 = vld [vmem:[%s3539_s28 + $0x50] sm:$0xff] }
 0x1f9   : > { %v1356_v45 = vsel %vm1342_vm2, %v3449_v34, %v6442_v35  ;;  %3320 = vmatprep.subr.bf16.mxu0 %v3421_v13 }
 0x1fa   : > { %v5502_v3 = vpop.permute.xlu1 %1005  ;;  %v771_v8 = vpop.permute.xlu0 %770  ;;  %v1390_v4 = vsel %vm1376_vm3, %v1356_v45, %v673_v16  ;;  %v317_v45 = vld [vmem:[%s6189_s5 + $0xd0] sm:$0xff] }
 0x1fb   : > { %v1423_v32 = vsel %vm1410_vm4, %v1389_v41, %v771_v8  ;;  %3321 = vmatpush3.bf16.msra.mxu0 %v3421_v13  ;;  %v3424_v41 = vld [vmem:[%s6188_s4 + $0x8] sm:$0xff]  }
 0x1fc   : > { %1110 = vrot.lane.b32.xlu1 %v5079_v24, %s3471_s10  ;;  %1112 = vrot.lane.b32.xlu0 %v6441_v11, %s3471_s10  ;;  %v6443_v24 = vld [vmem:[#allocation2_spill] sm:$0xff] }
 0x1fd   : > { %v1146_v7 = vsel %vm418_vm0, %v6437_v28, %v6443_v24  ;;  %3322 = vmatprep.subr.bf16.mxu0 %v3422_v0 }
 0x1fe   : > { %v773_v20 = vpop.permute.xlu1 %772  ;;  %v870_v2 = vpop.permute.xlu0 %869 }
 0x1ff   : > { %v1424_v15 = vsel %vm1410_vm4, %v1390_v4, %v773_v20  ;;  %v5515_v61 = vsel %vm1444_vm5, %v1421_v37, %v870_v2  ;;  %3323 = vmatpush3.bf16.msra.mxu0 %v3422_v0  ;;  %v318_v4 = vld [vmem:[%s6189_s5 + $0xd8] sm:$0xff]  ;;  %v1471_v20 = vsel %vm1444_vm5, %v5373_v47, %v5441_v1 }
 0x200   : > { %979 = vrot.lane.b32.xlu1 %v6432_v10, %s3470_s9  ;;  %981 = vrot.lane.b32.xlu0 %v6433_v40, %s3470_s9  ;;  %v6444_v10 = vld [vmem:[#allocation3_spill] sm:$0xff]  ;;  %v1505_v2 = vsel %vm1478_vm6, %v1471_v20, %v5490_v54 }
 0x201   : > { %3324 = vmatprep.subr.bf16.mxu0 %v3423_v48 }
 0x202   : > { %v872_v33 = vpop.permute.xlu1 %871  ;;  %v5524_v56 = vpop.permute.xlu0 %1007 }
 0x203   : > { %v5530_v43 = vsel %vm1444_vm5, %v1422_v9, %v872_v33  ;;  %v6447_v9 = vld [vmem:[#allocation17_spill] sm:$0xff]  ;;  %3325 = vmatpush3.bf16.msra.mxu0 %v3423_v48  ;;  %v1733_v33 = vrot.slane %v318_v4, 1  ;;  %v1507_v20 = vsel %vm1478_vm6, %v5480_v25, %v5524_v56 }
 0x204   : > { %1207 = vrot.lane.b32.xlu1 %v1146_v7, %s3472_s11  ;;  %3406 = vrot.lane.b32.xlu0 %v6444_v10, %s3472_s11  ;;  %v1731_v7 = vrot.slane %v317_v45, 1 }
 0x205   : > { %3326 = vmatprep.subr.bf16.mxu0 %v3424_v41 }
 0x206   : > { %v5535_v40 = vpop.permute.xlu1 %1009  ;;  %v1103_v6 = vpop.permute.xlu0 %1102  ;;  %v1734_v19 = vsel %vm418_vm0, %v1731_v7, %v1733_v33 }
 0x207   : > { %3327 = vmatpush3.bf16.msra.mxu0 %v3424_v41  ;;  %v319_v41 = vld [vmem:[%s6189_s5 + $0xe0] sm:$0xff] }
 0x208   : > { %1078 = vrot.lane.b32.xlu1 %v3450_v26, %s3471_s10  ;;  %1080 = vrot.lane.b32.xlu0 %v3451_v17, %s3471_s10  ;;  %v1506_v26 = vsel %vm1478_vm6, %v1472_v44, %v5502_v3  ;;  %v1735_v44 = vrot.slane %v319_v41, 1 }
 0x20a   : > { %v1105_v39 = vpop.permute.xlu1 %1104  ;;  %v874_v42 = vpop.permute.xlu0 %873 }
 0x20b   : > { %v5545_v16 = vsel %vm1444_vm5, %v1423_v32, %v874_v42  ;;  %v3425_v32 = vld [vmem:[%s6188_s4] sm:$0xff]   ;;  %v1540_v1 = vsel %vm1512_vm7, %v1506_v26, %v1105_v39 }
 0x20c   : > { %1306 = vrot.lane.b32.xlu1 %v950_v23, %s3473_s14  ;;  %1308 = vrot.lane.b32.xlu0 %v6439_v31, %s3473_s14  ;;  %v6448_v31 = vld [vmem:[#allocation18_spill] sm:$0xff] }
 0x20d   : > { %3328 = vmatprep.subr.bf16.mxu0 %v3425_v32 }
 0x20e   : > { %v876_v37 = vpop.permute.xlu1 %875  ;;  %v5553_v28 = vpop.permute.xlu0 %971  ;;  %3329 = vmatpush3.bf16.msra.mxu0 %v3425_v32  ;;  %v5637_v32 = vld [vmem:[%s6189_s5 + $0xe8] sm:$0xff] }
 0x20f   : > { %v5556_v51 = vsel %vm1444_vm5, %v1424_v15, %v876_v37  ;;  %v1539_v15 = vsel %vm1512_vm7, %v1505_v2, %v1103_v6  ;;  %v1732_v6 = vsel %vm418_vm0, %v1729_v55, %v1731_v7 }
 0x210   : > { %1175 = vrot.lane.b32.xlu1 %v6445_v58, %s3472_s11  ;;  %1177 = vrot.lane.b32.xlu0 %v6446_v36, %s3472_s11 }
 0x212   : > { %v5565_v22 = vpop.permute.xlu1 %973  ;;  %v5567_v21 = vpop.permute.xlu0 %1106 }
 0x214   : > { %1274 = vrot.lane.b32.xlu1 %v6447_v9, %s3473_s14  ;;  %1276 = vrot.lane.b32.xlu0 %v6448_v31, %s3473_s14 }
 0x216   : > { %v5576_v23 = vpop.permute.xlu1 %1108  ;;  %v1200_v49 = vpop.permute.xlu0 %1199 }
 0x217   : > { %v1573_v10 = vsel %vm1546_vm8, %v1539_v15, %v1200_v49  ;;  %v1541_v15 = vsel %vm1512_vm7, %v1507_v20, %v5567_v21 }
 0x21a   : > { %v1202_v53 = vpop.permute.xlu1 %1201  ;;  %v5581_v59 = vpop.permute.xlu0 %975 }
 0x21b   : > { %v1574_v54 = vsel %vm1546_vm8, %v1540_v1, %v1202_v53 }
 0x21e   : > { %v5586_v8 = vpop.permute.xlu1 %977  ;;  %v5591_v11 = vpop.permute.xlu0 %1070 }
 0x222   : > { %v5593_v34 = vpop.permute.xlu1 %1072  ;;  %v1204_v35 = vpop.permute.xlu0 %1203 }
 0x223   : > { %v1575_v26 = vsel %vm1546_vm8, %v1541_v15, %v1204_v35 }
 0x226   : > { %v1206_v24 = vpop.permute.xlu1 %1205  ;;  %v1299_v29 = vpop.permute.xlu0 %1298 }
 0x227   : > { %v1607_v47 = vsel %vm1580_vm9, %v1573_v10, %v1299_v29  ;;  %v1737_v10 = vrot.slane %v5637_v32, 1 }
 0x228   : > { %v1641_v17 = vsel %vm1614_vm10, %v1607_v47, 0.0 }
 0x229   : > { %v1802_v37 = vmul.f32 %v1732_v6, %v1641_v17  ;;  %v1508_v6 = vsel %vm1478_vm6, %v5493_v30, %v5535_v40  ;;  %v1738_v30 = vsel %vm418_vm0, %v1735_v44, %v1737_v10 }
 0x22a   : > { %v1301_v62 = vpop.permute.xlu1 %1300  ;;  %v5622_v27 = vpop.permute.xlu0 %541  ;;  %v1542_v21 = vsel %vm1512_vm7, %v1508_v6, %v5576_v23 }
 0x22b   : > { %v1608_v42 = vsel %vm1580_vm9, %v1574_v54, %v1301_v62  ;;  %v1576_v35 = vsel %vm1546_vm8, %v1542_v21, %v1206_v24  ;;  %v1736_v62 = vsel %vm418_vm0, %v1733_v33, %v1735_v44  ;;  %v301_v33 = vld [vmem:[%s6189_s5 + $0x50] sm:$0xff] }
 0x22c   : > { %v1642_v3 = vsel %vm1614_vm10, %v1608_v42, 0.0 }
 0x22d   : > { %v1803_v13 = vmul.f32 %v1734_v19, %v1642_v3 }
 0x22e   : > { %v5625_v39 = vpop.permute.xlu1 %543  ;;  %v5627_v36 = vpop.permute.xlu0 %1074 }
 0x22f   : > { %v1822_v58 = vpack.c.bf16 %v1803_v13, %v1802_v37 }
 0x231   : > { %v1852_v52 = vunpack.c.l.bf16 %v1822_v58  ;;  %v1853_v55 = vunpack.c.h.bf16 %v1822_v58  ;;  %v2404_v0 = vshrl.u32 %v1822_v58, 16  ;;  %v2407_v9 = vshll.u32 %v1822_v58, 16 }
 0x232   : > { %v5629_v31 = vpop.permute.xlu1 %1076  ;;  %v1168_v53 = vpop.permute.xlu0 %1167 }
 0x233   : > { %v1885_v49 = vsub.f32 %v1802_v37, %v1852_v52  ;;  %v1886_v48 = vsub.f32 %v1803_v13, %v1853_v55  ;;  %v2406_v45 = vrot.slane %v2404_v0, 3  ;;  %v2409_v4 = vrot.slane %v2407_v9, 4  ;;  %v5678_v9 = vld [vmem:[%s6189_s5 + $0x58] sm:$0xff] }
 0x234   : > { %v1701_v20 = vrot.slane %v5678_v9, 1 }
 0x235   : > { %v1905_v2 = vpack.c.bf16 %v1886_v48, %v1885_v49  ;;  %v2410_v29 = vor.u32 %v2409_v4, %v2406_v45  ;;  %v1699_v49 = vrot.slane %v301_v33, 1  ;;  %v1491_v33 = vsel %vm1478_vm6, %v5545_v16, %v5581_v59 }
 0x236   : > { %v1170_v7 = vpop.permute.xlu1 %1169  ;;  %v1303_v47 = vpop.permute.xlu0 %1302  ;;  %v1525_v9 = vsel %vm1512_vm7, %v1491_v33, %v5627_v36  ;;  %v1492_v16 = vsel %vm1478_vm6, %v5556_v51, %v5586_v8 }
 0x237   : > { %v2027_v1 = vshrl.u32 %v1905_v2, 16  ;;  %v2030_v54 = vshll.u32 %v1905_v2, 16  ;;  %v1609_v25 = vsel %vm1580_vm9, %v1575_v26, %v1303_v47  ;;  %v5652_v56 = vsel %vm1909_vm11, %v5302_v12, %v2410_v29 }
 0x238   : > { %v1643_v42 = vsel %vm1614_vm10, %v1609_v25, 0.0  ;;  %v1489_v47 = vsel %vm1478_vm6, %v5515_v61, %v5553_v28  ;;  %v1700_v21 = vsel %vm418_vm0, %v1697_v18, %v1699_v49  ;;  %v1702_v61 = vsel %vm418_vm0, %v1699_v49, %v1701_v20 }
 0x239   : > { %v2029_v17 = vrot.slane %v2027_v1, 3  ;;  %v2032_v19 = vrot.slane %v2030_v54, 4  ;;  %v1804_v13 = vmul.f32 %v1736_v62, %v1643_v42  ;;  %v1490_v54 = vsel %vm1478_vm6, %v5530_v43, %v5565_v22 }
 0x23a   : > { %v1305_v40 = vpop.permute.xlu1 %1304  ;;  %v5663_v12 = vpop.permute.xlu0 %545  ;;  %v1523_v6 = vsel %vm1512_vm7, %v1489_v47, %v5591_v11 }
 0x23b   : > { %v1610_v3 = vsel %vm1580_vm9, %v1576_v35, %v1305_v40  ;;  %v2033_v37 = vor.u32 %v2032_v19, %v2029_v17  ;;  %v1524_v17 = vsel %vm1512_vm7, %v1490_v54, %v5593_v34  ;;  %v1557_v19 = vsel %vm1546_vm8, %v1523_v6, %v1168_v53 }
 0x23c   : > { %v1644_v23 = vsel %vm1614_vm10, %v1610_v3, 0.0  ;;  %v1558_v43 = vsel %vm1546_vm8, %v1524_v17, %v1170_v7  ;;  %v1526_v6 = vsel %vm1512_vm7, %v1492_v16, %v5629_v31 }
 0x23d   : > { %v1805_v58 = vmul.f32 %v1738_v30, %v1644_v23  ;;  %v2034_v24 = vsel %vm1909_vm11, %v5337_v46, %v2033_v37 }
 0x23e   : > { %v5671_v52 = vpop.permute.xlu1 %706  ;;  %3258 = vmatprep.mubr.bf16.mxu1 %v2034_v24  ;;  %v5673_v0 = vpop.permute.xlu0 %708 }
 0x23f   : > { %v1823_v55 = vpack.c.bf16 %v1805_v58, %v1804_v13 }
 0x241   : > { %v1854_v48 = vunpack.c.l.bf16 %v1823_v55  ;;  %v1855_v41 = vunpack.c.h.bf16 %v1823_v55  ;;  %v2413_v45 = vshrl.u32 %v1823_v55, 16  ;;  %v2416_v46 = vshll.u32 %v1823_v55, 16 }
 0x242   : > { %v1172_v4 = vpop.permute.xlu1 %1171  ;;  %v1174_v44 = vpop.permute.xlu0 %1173 }
 0x243   : > { %v1887_v2 = vsub.f32 %v1804_v13, %v1854_v48  ;;  %v1888_v15 = vsub.f32 %v1805_v58, %v1855_v41  ;;  %v2415_v26 = vrot.slane %v2413_v45, 3  ;;  %v2418_v1 = vrot.slane %v2416_v46, 4  ;;  %v303_v13 = vld [vmem:[%s6189_s5 + $0x60] sm:$0xff]  ;;  %v5715_v58 = vld [vmem:[%s6189_s5 + $0x68] sm:$0xff] }
 0x244   : > { %v1703_v48 = vrot.slane %v303_v13, 1  ;;  %v1705_v41 = vrot.slane %v5715_v58, 1  ;;  %v1559_v59 = vsel %vm1546_vm8, %v1525_v9, %v1172_v4  ;;  %v1560_v17 = vsel %vm1546_vm8, %v1526_v6, %v1174_v44 }
 0x245   : > { %v1906_v25 = vpack.c.bf16 %v1888_v15, %v1887_v2  ;;  %v5696_v28 = vor.u32 %v2418_v1, %v2415_v26 }
 0x246   : > { %v1267_v35 = vpop.permute.xlu1 %1266  ;;  %v1269_v11 = vpop.permute.xlu0 %1268  ;;  %v1706_v51 = vsel %vm418_vm0, %v1703_v48, %v1705_v41 }
 0x247   : > { %v1591_v22 = vsel %vm1580_vm9, %v1557_v19, %v1267_v35  ;;  %v2036_v62 = vshrl.u32 %v1906_v25, 16  ;;  %v2039_v42 = vshll.u32 %v1906_v25, 16  ;;  %v1592_v18 = vsel %vm1580_vm9, %v1558_v43, %v1269_v11 }
 0x248   : > { %v1625_v38 = vsel %vm1614_vm10, %v1591_v22, 0.0  ;;  %v5704_v34 = vsel %vm1909_vm11, %v2410_v29, %v5696_v28  ;;  %v1626_v30 = vsel %vm1614_vm10, %v1592_v18, 0.0  ;;  %v1704_v25 = vsel %vm418_vm0, %v1701_v20, %v1703_v48 }
 0x249   : > { %v1786_v53 = vmul.f32 %v1700_v21, %v1625_v38  ;;  %v2038_v40 = vrot.slane %v2036_v62, 3  ;;  %v2041_v3 = vrot.slane %v2039_v42, 4  ;;  %v1787_v23 = vmul.f32 %v1702_v61, %v1626_v30 }
 0x24a   : > { %v5707_v7 = vpop.permute.xlu1 %710  ;;  %v5717_v24 = vpop.permute.xlu0 %806 }
 0x24b   : > { %v5719_v29 = vor.u32 %v2041_v3, %v2038_v40  ;;  %v1814_v55 = vpack.c.bf16 %v1787_v23, %v1786_v53 }
 0x24d   : > { %v2043_v49 = vsel %vm1909_vm11, %v2033_v37, %v5719_v29  ;;  %v1836_v45 = vunpack.c.l.bf16 %v1814_v55  ;;  %v1837_v46 = vunpack.c.h.bf16 %v1814_v55  ;;  %v2332_v15 = vshrl.u32 %v1814_v55, 16 }
 0x24e   : > { %v5729_v2 = vpop.permute.xlu1 %808  ;;  %3259 = vmatmul.mubr.bf16.gmra.mxu1 %v2043_v49  ;;  %v2335_v26 = vshll.u32 %v1814_v55, 16  ;;  %v1271_v36 = vpop.permute.xlu0 %1270 }
 0x24f   : > { %v1869_v47 = vsub.f32 %v1786_v53, %v1836_v45  ;;  %v1870_v1 = vsub.f32 %v1787_v23, %v1837_v46  ;;  %v1593_v37 = vsel %vm1580_vm9, %v1559_v59, %v1271_v36  ;;  %v2334_v54 = vrot.slane %v2332_v15, 3 }
 0x250   : > { %v2337_v21 = vrot.slane %v2335_v26, 4  ;;  %v1627_v35 = vsel %vm1614_vm10, %v1593_v37, 0.0 }
 0x251   : > { %v1897_v19 = vpack.c.bf16 %v1870_v1, %v1869_v47  ;;  %v1788_v11 = vmul.f32 %v1704_v25, %v1627_v35 }
 0x252   : > { %v1273_v8 = vpop.permute.xlu1 %1272  ;;  %v5745_v61 = vpop.permute.xlu0 %674  ;;  %v2338_v43 = vor.u32 %v2337_v21, %v2334_v54 }
 0x253   : > { %v1594_v4 = vsel %vm1580_vm9, %v1560_v17, %v1273_v8  ;;  %v1955_v22 = vshrl.u32 %v1897_v19, 16  ;;  %v1958_v20 = vshll.u32 %v1897_v19, 16 }
 0x254   : > { %v1628_v31 = vsel %vm1614_vm10, %v1594_v4, 0.0  ;;  %v5750_v44 = vsel %vm1909_vm11, %v5451_v63, %v2338_v43 }
 0x255   : > { %v1789_v62 = vmul.f32 %v1706_v51, %v1628_v31  ;;  %v1957_v38 = vrot.slane %v1955_v22, 3  ;;  %v1960_v18 = vrot.slane %v1958_v20, 4  ;;  %v321_v22 = vld [vmem:[%s6189_s5 + $0xf0] sm:$0xff]  ;;  %v322_v20 = vld [vmem:[%s6189_s5 + $0xf8] sm:$0xff] }
 0x256   : > { %v5752_v42 = vpop.permute.xlu1 %676  ;;  %v811_v30 = vpop.permute.xlu0 %810 }
 0x257   : > { %v1815_v53 = vpack.c.bf16 %v1789_v62, %v1788_v11  ;;  %v1961_v40 = vor.u32 %v1960_v18, %v1957_v38  ;;  %v3452_v18 = vld [vmem:[%s3539_s28 + $0x58] sm:$0xff] }
 0x259   : > { %v1838_v3 = vunpack.c.l.bf16 %v1815_v53  ;;  %v1839_v23 = vunpack.c.h.bf16 %v1815_v53  ;;  %v2341_v13 = vshrl.u32 %v1815_v53, 16  ;;  %v2344_v33 = vshll.u32 %v1815_v53, 16  ;;  %v6449_v53 = vld [vmem:[#allocation28_spill] sm:$0xff] }
 0x25a   : > { %v910_v55 = vpop.permute.xlu1 %909  ;;  %v1962_v9 = vsel %vm1909_vm11, %v5466_v50, %v1961_v40  ;;  %v912_v63 = vpop.permute.xlu0 %911 }
 0x25b   : > { %v1871_v49 = vsub.f32 %v1788_v11, %v1838_v3  ;;  %v1872_v48 = vsub.f32 %v1789_v62, %v1839_v23  ;;  %3242 = vmatprep.mubr.bf16.mxu0 %v1962_v9  ;;  %v2343_v45 = vrot.slane %v2341_v13, 3  ;;  %v2346_v46 = vrot.slane %v2344_v33, 4  ;;  %v3453_v3 = vld [vmem:[%s3539_s28 + $0xd8] sm:$0xff]  ;;  %v3454_v13 = vld [vmem:[%s3539_s28 + $0xe0] sm:$0xff] }
 0x25c   : > { %v1739_v62 = vrot.slane %v321_v22, 1  ;;  %v1373_v23 = vsel %vm1342_vm2, %v3453_v3, %v5622_v27  ;;  %v1374_v33 = vsel %vm1342_vm2, %v3454_v13, %v5625_v39  ;;  %v1741_v9 = vrot.slane %v322_v20, 1 }
 0x25d   : > { %v1898_v15 = vpack.c.bf16 %v1872_v48, %v1871_v49  ;;  %v5758_v16 = vor.u32 %v2346_v46, %v2343_v45  ;;  %v3455_v49 = vld [vmem:[%s3539_s28 + $0x60] sm:$0xff]  ;;  %v6450_v48 = vld [vmem:[#allocation29_spill] sm:$0xff]  ;;  %v3456_v46 = vld [vmem:[%s3539_s28 + $0xe8] sm:$0xff] }
 0x25e   : > { %v5756_v26 = vpop.permute.xlu1 %774  ;;  %v5760_v59 = vpop.permute.xlu0 %776  ;;  %v1358_v45 = vsel %vm1342_vm2, %v3455_v49, %v6450_v48  ;;  %v1742_v32 = vsel %vm418_vm0, %v1739_v62, %v1741_v9 }
 0x25f   : > { %v1964_v36 = vshrl.u32 %v1898_v15, 16  ;;  %v1967_v47 = vshll.u32 %v1898_v15, 16  ;;  %v5764_v1 = vsel %vm1909_vm11, %v2338_v43, %v5758_v16  ;;  %v1375_v15 = vsel %vm1342_vm2, %v3456_v46, %v5663_v12 }
 0x260   : > { %v1409_v27 = vsel %vm1376_vm3, %v1375_v15, %v5707_v7  ;;  %v1740_v12 = vsel %vm418_vm0, %v1737_v10, %v1739_v62 }
 0x261   : > { %v1966_v50 = vrot.slane %v1964_v36, 3  ;;  %v1969_v37 = vrot.slane %v1967_v47, 4  ;;  %v1407_v36 = vsel %vm1376_vm3, %v1373_v23, %v5671_v52  ;;  %v1408_v47 = vsel %vm1376_vm3, %v1374_v33, %v5673_v0  ;;  %v305_v52 = vld [vmem:[%s6189_s5 + $0x70] sm:$0xff] }
 0x262   : > { %v914_v54 = vpop.permute.xlu1 %913  ;;  %v1012_v6 = vpop.permute.xlu0 %1011  ;;  %v1441_v39 = vsel %vm1410_vm4, %v1407_v36, %v5717_v24  ;;  %v1443_v0 = vsel %vm1410_vm4, %v1409_v27, %v811_v30  ;;  %v1707_v30 = vrot.slane %v305_v52, 1  ;;  %v6451_v52 = vld [vmem:[#allocation74_spill] sm:$0xff] }
 0x263   : > { %v5766_v25 = vor.u32 %v1969_v37, %v1966_v50  ;;  %v1442_v50 = vsel %vm1410_vm4, %v1408_v47, %v5729_v2  ;;  %v1477_v2 = vsel %vm1444_vm5, %v1443_v0, %v914_v54 }
 0x264   : > { %v1476_v24 = vsel %vm1444_vm5, %v1442_v50, %v912_v63 }
 0x265   : > { %v1971_v21 = vsel %vm1909_vm11, %v1961_v40, %v5766_v25  ;;  %v1357_v40 = vsel %vm1342_vm2, %v3452_v18, %v6449_v53 }
 0x266   : > { %v1014_v17 = vpop.permute.xlu1 %1013  ;;  %3243 = vmatmul.mubr.bf16.gmra.mxu0 %v1971_v21  ;;  %v5770_v19 = vpop.permute.xlu0 %877  ;;  %v1475_v21 = vsel %vm1444_vm5, %v1441_v39, %v910_v55  ;;  %v1391_v55 = vsel %vm1376_vm3, %v1357_v40, %v5745_v61 }
 0x267   : > { %v1509_v18 = vsel %vm1478_vm6, %v1475_v21, %v1012_v6  ;;  %v1510_v10 = vsel %vm1478_vm6, %v1476_v24, %v1014_v17  ;;  %v1392_v6 = vsel %vm1376_vm3, %v1358_v45, %v5752_v42  ;;  %v1425_v61 = vsel %vm1410_vm4, %v1391_v55, %v5756_v26 }
 0x268   : > { %v1426_v13 = vsel %vm1410_vm4, %v1392_v6, %v5760_v59  ;;  %v1459_v48 = vsel %vm1444_vm5, %v1425_v61, %v5770_v19 }
 0x26a   : > { %v5772_v35 = vpop.permute.xlu1 %879  ;;  %v1016_v51 = vpop.permute.xlu0 %1015 }
 0x26b   : > { %v1511_v53 = vsel %vm1478_vm6, %v1477_v2, %v1016_v51  ;;  %v1460_v26 = vsel %vm1444_vm5, %v1426_v13, %v5772_v35 }
 0x26e   : > { %v1111_v8 = vpop.permute.xlu1 %1110  ;;  %v1113_v4 = vpop.permute.xlu0 %1112 }
 0x26f   : > { %v1543_v3 = vsel %vm1512_vm7, %v1509_v18, %v1111_v8  ;;  %v1545_v63 = vsel %vm1512_vm7, %v1511_v53, %v1113_v4 }
 0x272   : > { %v5774_v43 = vpop.permute.xlu1 %979  ;;  %v5776_v31 = vpop.permute.xlu0 %981 }
 0x273   : > { %v1493_v36 = vsel %vm1478_vm6, %v1459_v48, %v5774_v43  ;;  %v1494_v59 = vsel %vm1478_vm6, %v1460_v26, %v5776_v31  ;;  %v6452_v43 = vrot.slane %v6451_v52, 1 }
 0x275   : > { %v1710_v0 = vsel %vm418_vm0, %v1707_v30, %v6452_v43 }
 0x276   : > { %v1208_v11 = vpop.permute.xlu1 %1207  ;;  %v3407_v38 = vpop.permute.xlu0 %3406 }
 0x277   : > { %v3409_v7 = vunpack.i.h.bf16 %v3407_v38  ;;  %v3408_v22 = vunpack.i.l.bf16 %v3407_v38  ;;  %v1544_v38 = vsel %vm1512_vm7, %v1510_v10, %v1113_v4  ;;  %v1577_v54 = vsel %vm1546_vm8, %v1543_v3, %v1208_v11 }
 0x279   : > { %v1578_v51 = vsel %vm1546_vm8, %v1544_v38, %v3408_v22  ;;  %v1579_v8 = vsel %vm1546_vm8, %v1545_v63, %v3409_v7 }
 0x27a   : > { %v1079_v37 = vpop.permute.xlu1 %1078  ;;  %v1081_v20 = vpop.permute.xlu0 %1080 }
 0x27b   : > { %v1527_v27 = vsel %vm1512_vm7, %v1493_v36, %v1079_v37  ;;  %v1528_v39 = vsel %vm1512_vm7, %v1494_v59, %v1081_v20 }
 0x27e   : > { %v1307_v23 = vpop.permute.xlu1 %1306  ;;  %v1309_v62 = vpop.permute.xlu0 %1308 }
 0x27f   : > { %v1611_v17 = vsel %vm1580_vm9, %v1577_v54, %v1307_v23  ;;  %v1612_v4 = vsel %vm1580_vm9, %v1578_v51, %v1309_v62  ;;  %v1613_v11 = vsel %vm1580_vm9, %v1579_v8, %v1309_v62 }
 0x280   : > { %v1645_v40 = vsel %vm1614_vm10, %v1611_v17, 0.0  ;;  %v1646_v33 = vsel %vm1614_vm10, %v1612_v4, 0.0  ;;  %v1647_v49 = vsel %vm1614_vm10, %v1613_v11, 0.0 }
 0x281   : > { %v1806_v42 = vmul.f32 %v1740_v12, %v1645_v40  ;;  %v1807_v45 = vmul.f32 %v1742_v32, %v1646_v33  ;;  %v1808_v46 = vmul.f32 %v1741_v9, %v1647_v49  ;;  %v1708_v9 = vsel %vm418_vm0, %v1705_v41, %v1707_v30 }
 0x282   : > { %v1176_v15 = vpop.permute.xlu1 %1175  ;;  %v1178_v47 = vpop.permute.xlu0 %1177 }
 0x283   : > { %v1824_v50 = vpack.c.bf16 %v1807_v45, %v1806_v42  ;;  %v1825_v12 = vpack.c.bf16 %v1808_v46, %v1808_v46  ;;  %v1561_v19 = vsel %vm1546_vm8, %v1527_v27, %v1176_v15  ;;  %v1562_v35 = vsel %vm1546_vm8, %v1528_v39, %v1178_v47 }
 0x285   : > { %v1856_v31 = vunpack.c.l.bf16 %v1824_v50  ;;  %v1857_v21 = vunpack.c.h.bf16 %v1824_v50  ;;  %v1858_v7 = vunpack.c.l.bf16 %v1825_v12  ;;  %v2422_v22 = vshrl.u32 %v1824_v50, 16 }
 0x286   : > { %v1275_v37 = vpop.permute.xlu1 %1274  ;;  %v1277_v24 = vpop.permute.xlu0 %1276  ;;  %v2425_v2 = vshll.u32 %v1824_v50, 16  ;;  %v2431_v18 = vshrl.u32 %v1825_v12, 16  ;;  %v2434_v32 = vshll.u32 %v1825_v12, 16  ;;  %v6453_v12 = vld [vmem:[#allocation52_spill] sm:$0xff] }
 0x287   : > { %v1595_v20 = vsel %vm1580_vm9, %v1561_v19, %v1275_v37  ;;  %v1889_v10 = vsub.f32 %v1806_v42, %v1856_v31  ;;  %v1890_v53 = vsub.f32 %v1807_v45, %v1857_v21  ;;  %v1891_v58 = vsub.f32 %v1808_v46, %v1858_v7  ;;  %v6454_v31 = vld [vmem:[#allocation59_spill] sm:$0xff] }
 0x288   : > { %v1629_v41 = vsel %vm1614_vm10, %v1595_v20, 0.0  ;;  %v1596_v55 = vsel %vm1580_vm9, %v1562_v35, %v1277_v24  ;;  %v2424_v30 = vrot.slane %v2422_v22, 3  ;;  %v2427_v38 = vrot.slane %v2425_v2, 4  ;;  %v6456_v2 = vld [vmem:[#allocation51_spill] sm:$0xff] }
 0x289   : > { %v1790_v3 = vmul.f32 %v1708_v9, %v1629_v41  ;;  %v1907_v63 = vpack.c.bf16 %v1890_v53, %v1889_v10  ;;  %v1908_v54 = vpack.c.bf16 %v1891_v58, %v1891_v58  ;;  %v1630_v23 = vsel %vm1614_vm10, %v1596_v55, 0.0 }
 0x28a   : > { %v2433_v6 = vrot.slane %v2431_v18, 3  ;;  %v1791_v17 = vmul.f32 %v1710_v0, %v1630_v23  ;;  %v2428_v62 = vor.u32 %v2427_v38, %v2424_v30  ;;  %v2436_v51 = vrot.slane %v2434_v32, 4  ;;  %v6457_v32 = vld [vmem:[#allocation42_spill] sm:$0xff] }
 0x28b   : > { %v2054_v8 = vshrl.u32 %v1908_v54, 16  ;;  %v2057_v61 = vshll.u32 %v1908_v54, 16  ;;  %v2045_v40 = vshrl.u32 %v1907_v63, 16  ;;  %v2048_v4 = vshll.u32 %v1907_v63, 16 }
 0x28c   : > { %v1816_v11 = vpack.c.bf16 %v1791_v17, %v1790_v3  ;;  %v5867_v13 = vsel %vm1909_vm11, %v5696_v28, %v2428_v62  ;;  %v2437_v42 = vor.u32 %v2436_v51, %v2433_v6 }
 0x28d   : > { %v2047_v33 = vrot.slane %v2045_v40, 3  ;;  %v2050_v49 = vrot.slane %v2048_v4, 4  ;;  %v2056_v48 = vrot.slane %v2054_v8, 3  ;;  %v2059_v26 = vrot.slane %v2057_v61, 4 }
 0x28e   : > { %v1840_v45 = vunpack.c.l.bf16 %v1816_v11  ;;  %v1841_v46 = vunpack.c.h.bf16 %v1816_v11  ;;  %v2438_v59 = vsel %vm1909_vm11, %v2428_v62, %v2437_v42  ;;  %v2350_v7 = vshrl.u32 %v1816_v11, 16 }
 0x28f   : > { %v2051_v15 = vor.u32 %v2050_v49, %v2047_v33  ;;  %v2060_v36 = vor.u32 %v2059_v26, %v2056_v48  ;;  %v2353_v37 = vshll.u32 %v1816_v11, 16 }
 0x290   : > { %v1873_v47 = vsub.f32 %v1790_v3, %v1840_v45  ;;  %v1874_v27 = vsub.f32 %v1791_v17, %v1841_v46  ;;  %v2352_v22 = vrot.slane %v2350_v7, 3 }
 0x291   : > { %v2052_v39 = vsel %vm1909_vm11, %v5719_v29, %v2051_v15  ;;  %v2061_v50 = vsel %vm1909_vm11, %v2051_v15, %v2060_v36  ;;  %v6455_v29 = vld [vmem:[#allocation4_spill] sm:$0xff]  ;;  %v2355_v20 = vrot.slane %v2353_v37, 4 }
 0x292   : > { %v1899_v28 = vpack.c.bf16 %v1874_v27, %v1873_v47  ;;  %3262 = vmatprep.mubr.bf16.mxu1 %v2052_v39 }
 0x293   : > { %3263 = vmatmul.mubr.bf16.gmra.mxu1 %v2061_v50 }
 0x294   : > { %3282 = vmatprep.mubr.bf16.mxu1 %v6453_v12  ;;  %v1973_v19 = vshrl.u32 %v1899_v28, 16  ;;  %v1976_v35 = vshll.u32 %v1899_v28, 16 }
 0x296   : > { %v1975_v9 = vrot.slane %v1973_v19, 3  ;;  %v1978_v52 = vrot.slane %v1976_v35, 4 }
 0x298   : > { %v1979_v43 = vor.u32 %v1978_v52, %v1975_v9 }
 0x29a   : > { %v1980_v0 = vsel %vm1909_vm11, %v5766_v25, %v1979_v43  ;;  %v1989_v21 = vsel %vm1909_vm11, %v1979_v43, %v6454_v31  ;;  %v2356_v25 = vor.u32 %v2355_v20, %v2352_v22 }
 0x29b   : > { %3246 = vmatprep.mubr.bf16.mxu0 %v1980_v0  ;;  %3283 = vmatmul.mubr.bf16.vlgmr.msra.gmra.mxu1 %v6455_v29 }
 0x29c   : > { %3247 = vmatmul.mubr.bf16.gmra.mxu0 %v1989_v21  ;;  %3286 = vmatprep.mubr.bf16.mxu1 %v5430_v14  ;;  %v2357_v24 = vsel %vm1909_vm11, %v5758_v16, %v2356_v25  ;;  %v2366_v18 = vsel %vm1909_vm11, %v2356_v25, %v6456_v2 }
 0x29d   : > { %3330 = vmatprep.mubr.bf16.mxu0 %v6453_v12 }
 0x2a3   : > { %3287 = vmatmul.mubr.bf16.gmra.mxu1 %v5459_v5 }
 0x2a4   : > { %3331 = vmatmul.mubr.bf16.vlgmr.msra.gmra.mxu0 %v6455_v29  ;;  %3290 = vmatprep.mubr.bf16.mxu1 %v5750_v44 }
 0x2a5   : > { %3334 = vmatprep.mubr.bf16.mxu0 %v5430_v14  ;;  %v6458_v14 = vld [vmem:[#allocation67_spill] sm:$0xff] }
 0x2ab   : > { %3291 = vmatmul.mubr.bf16.gmra.mxu1 %v5764_v1 }
 0x2ac   : > { %3335 = vmatmul.mubr.bf16.gmra.mxu0 %v5459_v5  ;;  %3294 = vmatprep.mubr.bf16.mxu1 %v2357_v24  ;;  %v5907_v5 = vpop.f32.mrf.mxu1 }
 0x2ad   : > { %3338 = vmatprep.mubr.bf16.mxu0 %v5750_v44 }
 0x2ae   : > { %v5909_v44 = vpop.f32.mrf.mxu1 }
 0x2b0   : > { %v5911_v16 = vpop.f32.mrf.mxu1 }
 0x2b3   : > { %3295 = vmatmul.mubr.bf16.gmra.mxu1 %v2366_v18 }
 0x2b4   : > { %3339 = vmatmul.mubr.bf16.gmra.mxu0 %v5764_v1  ;;  %3298 = vmatprep.mubr.bf16.mxu1 %v6457_v32  ;;  %v5913_v1 = vpop.f32.mrf.mxu1 }
 0x2b5   : > { %3342 = vmatprep.mubr.bf16.mxu0 %v2357_v24 }
 0x2b6   : > { %v5915_v10 = vpop.f32.mrf.mxu1 }
 0x2bb   : > { %3299 = vmatmul.mubr.bf16.gmra.mxu1 %v6458_v14 }
 0x2bc   : > { %3343 = vmatmul.mubr.bf16.gmra.mxu0 %v2366_v18  ;;  %3302 = vmatprep.mubr.bf16.mxu1 %v5221_v57 }
 0x2bd   : > { %3346 = vmatprep.mubr.bf16.mxu0 %v6457_v32 }
 0x2c3   : > { %3303 = vmatmul.mubr.bf16.gmra.mxu1 %v5316_v60 }
 0x2c4   : > { %3347 = vmatmul.mubr.bf16.gmra.mxu0 %v6458_v14  ;;  %3306 = vmatprep.mubr.bf16.mxu1 %v5652_v56 }
 0x2c5   : > { %3350 = vmatprep.mubr.bf16.mxu0 %v5221_v57  ;;  %v3236_v57 = vpop.f32.mrf.mxu0 }
 0x2cb   : > { %3307 = vmatmul.mubr.bf16.gmra.mxu1 %v5704_v34 }
 0x2cc   : > { %3351 = vmatmul.mubr.bf16.gmra.mxu0 %v5316_v60  ;;  %3310 = vmatprep.mubr.bf16.mxu1 %v5867_v13  ;;  %v2160_v60 = vpop.f32.mrf.mxu0 }
 0x2cd   : > { %3354 = vmatprep.mubr.bf16.mxu0 %v5652_v56  ;;  %v5917_v56 = vpop.f32.mrf.mxu1 }
 0x2ce   : > { %v3237_v53 = vpop.f32.mrf.mxu0 }
 0x2d0   : > { %v2163_v58 = vpop.f32.mrf.mxu0 }
 0x2d2   : > { %v3240_v41 = vpop.f32.mrf.mxu0 }
 0x2d3   : > { %3311 = vmatmul.mubr.bf16.gmra.mxu1 %v2438_v59 }
 0x2d4   : > { %3355 = vmatmul.mubr.bf16.gmra.mxu0 %v5704_v34  ;;  %v5919_v34 = vpop.f32.mrf.mxu1  ;;  %v2176_v55 = vpop.f32.mrf.mxu0 }
 0x2d5   : > { %3358 = vmatprep.mubr.bf16.mxu0 %v5867_v13 }
 0x2d6   : > { %v5921_v3 = vpop.f32.mrf.mxu1  ;;  %v3241_v38 = vpop.f32.mrf.mxu0 }
 0x2d8   : > { %v2179_v54 = vpop.f32.mrf.mxu0 }
 0x2dc   : > { %3359 = vmatmul.mubr.bf16.gmra.mxu0 %v2438_v59 }
 0x30e   : > { %v5923_v30 = vpop.f32.mrf.mxu1 }
 0x310   : > { %v5925_v63 = vpop.f32.mrf.mxu1 }
 0x312   : > { %v5927_v23 = vpop.f32.mrf.mxu1 }
 0x314   : > { %v5929_v17 = vpop.f32.mrf.mxu1 }
 0x326   : > { %v3244_v6 = vpop.f32.mrf.mxu0 }
 0x328   : > { %v2192_v62 = vpop.f32.mrf.mxu0 }
 0x32a   : > { %v5935_v61 = vpop.f32.mrf.mxu0 }
 0x32c   : > { %v5941_v11 = vpop.f32.mrf.mxu0 }
 0x353   : > { %v5931_v51 = vpop.f32.mrf.mxu1 }
 0x355   : > { %v5933_v8 = vpop.f32.mrf.mxu1 }
 0x357   : > { %v5937_v40 = vpop.f32.mrf.mxu1 }
 0x359   : > { %v5939_v4 = vpop.f32.mrf.mxu1 }
 0x35b   : > { %v3284_v13 = vpop.f32.mrf.mxu1 }
 0x35c   : > { %v5943_v42 = vpop.f32.mrf.mxu0  ;;  %v2498_v15 = vadd.f32 %v3284_v13, %v3236_v57 }
 0x35d   : > { %v2489_v33 = vpop.f32.mrf.mxu1 }
 0x35e   : > { %v5945_v49 = vpop.f32.mrf.mxu0  ;;  %v2490_v47 = vadd.f32 %v2489_v33, %v2160_v60 }
 0x35f   : > { %v3285_v48 = vpop.f32.mrf.mxu1 }
 0x360   : > { %v5947_v26 = vpop.f32.mrf.mxu0  ;;  %v2501_v28 = vadd.f32 %v3285_v48, %v3237_v53 }
 0x361   : > { %v2492_v45 = vpop.f32.mrf.mxu1 }
 0x362   : > { %v5949_v46 = vpop.f32.mrf.mxu0  ;;  %v2493_v9 = vadd.f32 %v2492_v45, %v2163_v58 }
 0x363   : > { %v3288_v36 = vpop.f32.mrf.mxu1 }
 0x364   : > { %v3332_v59 = vpop.f32.mrf.mxu0  ;;  %v2514_v31 = vadd.f32 %v3288_v36, %v3240_v41 }
 0x365   : > { %v5958_v27 = vadd.f32 %v3332_v59, %v2498_v15  ;;  %v2505_v39 = vpop.f32.mrf.mxu1 }
 0x366   : > { %v2698_v50 = vpop.f32.mrf.mxu0  ;;  %v2506_v37 = vadd.f32 %v2505_v39, %v2176_v55 }
 0x367   : > { %2859 = vst [vmem:[%s5956_s15 + $0x10] sm:$0xff] %v5958_v27  ;;  %v5962_v12 = vadd.f32 %v2698_v50, %v2490_v47  ;;  %v3289_v19 = vpop.f32.mrf.mxu1 }
 0x368   : > { %v3333_v35 = vpop.f32.mrf.mxu0  ;;  %v2517_v2 = vadd.f32 %v3289_v19, %v3241_v38 }
 0x369   : > { %2857 = vst [vmem:[%s5956_s15] sm:$0xff] %v5962_v12  ;;  %v5966_v52 = vadd.f32 %v3333_v35, %v2501_v28  ;;  %v2508_v43 = vpop.f32.mrf.mxu1 }
 0x36a   : > { %v2701_v0 = vpop.f32.mrf.mxu0  ;;  %v2509_v60 = vadd.f32 %v2508_v43, %v2179_v54 }
 0x36b   : > { %2860 = vst [vmem:[%s5956_s15 + $0x18] sm:$0xff] %v5966_v52  ;;  %v5970_v21 = vadd.f32 %v2701_v0, %v2493_v9  ;;  %v3292_v29 = vpop.f32.mrf.mxu1 }
 0x36c   : > { %v3336_v7 = vpop.f32.mrf.mxu0  ;;  %v2530_v38 = vadd.f32 %v3292_v29, %v3244_v6 }
 0x36d   : > { %2858 = vst [vmem:[%s5956_s15 + $0x8] sm:$0xff] %v5970_v21  ;;  %v2889_v22 = vadd.f32 %v5970_v21, %v5962_v12  ;;  %v5976_v20 = vadd.f32 %v3336_v7, %v2514_v31  ;;  %v2521_v25 = vpop.f32.mrf.mxu1 }
 0x36e   : > { %v2714_v24 = vpop.f32.mrf.mxu0  ;;  %v2522_v54 = vadd.f32 %v2521_v25, %v2192_v62 }
 0x36f   : > { %v2890_v18 = vadd.f32 %v2889_v22, %v5958_v27  ;;  %2863 = vst [vmem:[%s5956_s15 + $0x30] sm:$0xff] %v5976_v20  ;;  %v5981_v32 = vadd.f32 %v2714_v24, %v2506_v37  ;;  %v3293_v14 = vpop.f32.mrf.mxu1 }
 0x370   : > { %v3337_v57 = vpop.f32.mrf.mxu0  ;;  %v2533_v6 = vadd.f32 %v3293_v14, %v5935_v61 }
 0x371   : > { %2861 = vst [vmem:[%s5956_s15 + $0x20] sm:$0xff] %v5981_v32  ;;  %v2891_v53 = vadd.f32 %v2890_v18, %v5966_v52  ;;  %v5986_v58 = vadd.f32 %v3337_v57, %v2517_v2  ;;  %v2524_v41 = vpop.f32.mrf.mxu1 }
 0x372   : > { %v2717_v55 = vpop.f32.mrf.mxu0  ;;  %v2525_v19 = vadd.f32 %v2524_v41, %v5941_v11 }
 0x373   : > { %v2892_v13 = vadd.f32 %v2891_v53, %v5981_v32  ;;  %2864 = vst [vmem:[%s5956_s15 + $0x38] sm:$0xff] %v5986_v58  ;;  %v5991_v33 = vadd.f32 %v2717_v55, %v2509_v60  ;;  %v3296_v48 = vpop.f32.mrf.mxu1 }
 0x374   : > { %v3340_v45 = vpop.f32.mrf.mxu0  ;;  %v2546_v0 = vadd.f32 %v3296_v48, %v5943_v42 }
 0x375   : > { %2862 = vst [vmem:[%s5956_s15 + $0x28] sm:$0xff] %v5991_v33  ;;  %v2893_v15 = vadd.f32 %v2892_v13, %v5991_v33  ;;  %v5996_v36 = vadd.f32 %v3340_v45, %v2530_v38  ;;  %v2537_v59 = vpop.f32.mrf.mxu1 }
 0x376   : > { %v2730_v47 = vpop.f32.mrf.mxu0  ;;  %v2538_v37 = vadd.f32 %v2537_v59, %v5945_v49 }
 0x377   : > { %v2894_v39 = vadd.f32 %v2893_v15, %v5976_v20  ;;  %2867 = vst [vmem:[%s5956_s15 + $0x50] sm:$0xff] %v5996_v36  ;;  %v6002_v50 = vadd.f32 %v2730_v47, %v2522_v54  ;;  %v3297_v28 = vpop.f32.mrf.mxu1 }
 0x378   : > { %v3341_v62 = vpop.f32.mrf.mxu0  ;;  %v2549_v2 = vadd.f32 %v3297_v28, %v5947_v26 }
 0x379   : > { %2865 = vst [vmem:[%s5956_s15 + $0x40] sm:$0xff] %v6002_v50  ;;  %v2895_v35 = vadd.f32 %v2894_v39, %v5986_v58  ;;  %v6008_v9 = vadd.f32 %v3341_v62, %v2533_v6  ;;  %v2540_v43 = vpop.f32.mrf.mxu1 }
 0x37a   : > { %v2733_v61 = vpop.f32.mrf.mxu0  ;;  %v2541_v60 = vadd.f32 %v2540_v43, %v5949_v46 }
 0x37b   : > { %v2896_v31 = vadd.f32 %v2895_v35, %v6002_v50  ;;  %2868 = vst [vmem:[%s5956_s15 + $0x58] sm:$0xff] %v6008_v9  ;;  %v6014_v29 = vadd.f32 %v2733_v61, %v2525_v19  ;;  %v3300_v7 = vpop.f32.mrf.mxu1 }
 0x37c   : > { %v3344_v11 = vpop.f32.mrf.mxu0  ;;  %v2562_v38 = vadd.f32 %v3300_v7, %v5907_v5 }
 0x37d   : > { %2866 = vst [vmem:[%s5956_s15 + $0x48] sm:$0xff] %v6014_v29  ;;  %v2897_v22 = vadd.f32 %v2896_v31, %v6014_v29  ;;  %v6020_v25 = vadd.f32 %v3344_v11, %v2546_v0  ;;  %v2553_v24 = vpop.f32.mrf.mxu1 }
 0x37e   : > { %v2746_v42 = vpop.f32.mrf.mxu0  ;;  %v2554_v54 = vadd.f32 %v2553_v24, %v5909_v44 }
 0x37f   : > { %v2898_v18 = vadd.f32 %v2897_v22, %v5996_v36  ;;  %2871 = vst [vmem:[%s5956_s15 + $0x70] sm:$0xff] %v6020_v25  ;;  %v6026_v14 = vadd.f32 %v2746_v42, %v2538_v37  ;;  %v3301_v57 = vpop.f32.mrf.mxu1 }
 0x380   : > { %v3345_v49 = vpop.f32.mrf.mxu0  ;;  %v2565_v6 = vadd.f32 %v3301_v57, %v5911_v16 }
 0x381   : > { %2869 = vst [vmem:[%s5956_s15 + $0x60] sm:$0xff] %v6026_v14  ;;  %v2899_v53 = vadd.f32 %v2898_v18, %v6008_v9  ;;  %v6032_v41 = vadd.f32 %v3345_v49, %v2549_v2  ;;  %v2556_v55 = vpop.f32.mrf.mxu1 }
 0x382   : > { %v2749_v26 = vpop.f32.mrf.mxu0  ;;  %v2557_v19 = vadd.f32 %v2556_v55, %v5913_v1 }
 0x383   : > { %v2900_v13 = vadd.f32 %v2899_v53, %v6026_v14  ;;  %2872 = vst [vmem:[%s5956_s15 + $0x78] sm:$0xff] %v6032_v41  ;;  %v6038_v48 = vadd.f32 %v2749_v26, %v2541_v60  ;;  %v3304_v45 = vpop.f32.mrf.mxu1 }
 0x384   : > { %v3348_v46 = vpop.f32.mrf.mxu0  ;;  %v2578_v0 = vadd.f32 %v3304_v45, %v5915_v10 }
 0x385   : > { %2870 = vst [vmem:[%s5956_s15 + $0x68] sm:$0xff] %v6038_v48  ;;  %v2901_v15 = vadd.f32 %v2900_v13, %v6038_v48  ;;  %v6044_v59 = vadd.f32 %v3348_v46, %v2562_v38  ;;  %v2569_v47 = vpop.f32.mrf.mxu1 }
 0x386   : > { %v2762_v5 = vpop.f32.mrf.mxu0  ;;  %v2570_v37 = vadd.f32 %v2569_v47, %v5917_v56 }
 0x387   : > { %v2902_v39 = vadd.f32 %v2901_v15, %v6020_v25  ;;  %2875 = vst [vmem:[%s5956_s15 + $0x90] sm:$0xff] %v6044_v59  ;;  %v6050_v28 = vadd.f32 %v2762_v5, %v2554_v54  ;;  %v3305_v62 = vpop.f32.mrf.mxu1 }
 0x388   : > { %v3349_v44 = vpop.f32.mrf.mxu0  ;;  %v2581_v2 = vadd.f32 %v3305_v62, %v5919_v34 }
 0x389   : > { %2873 = vst [vmem:[%s5956_s15 + $0x80] sm:$0xff] %v6050_v28  ;;  %v2903_v35 = vadd.f32 %v2902_v39, %v6032_v41  ;;  %v6056_v43 = vadd.f32 %v3349_v44, %v2565_v6  ;;  %v2572_v61 = vpop.f32.mrf.mxu1 }
 0x38a   : > { %v2765_v16 = vpop.f32.mrf.mxu0  ;;  %v2573_v60 = vadd.f32 %v2572_v61, %v5921_v3 }
 0x38b   : > { %v2904_v31 = vadd.f32 %v2903_v35, %v6050_v28  ;;  %2876 = vst [vmem:[%s5956_s15 + $0x98] sm:$0xff] %v6056_v43  ;;  %v6062_v7 = vadd.f32 %v2765_v16, %v2557_v19  ;;  %v3308_v11 = vpop.f32.mrf.mxu1 }
 0x38c   : > { %v3352_v1 = vpop.f32.mrf.mxu0  ;;  %v2594_v38 = vadd.f32 %v3308_v11, %v5923_v30 }
 0x38d   : > { %2874 = vst [vmem:[%s5956_s15 + $0x88] sm:$0xff] %v6062_v7  ;;  %v2905_v22 = vadd.f32 %v2904_v31, %v6062_v7  ;;  %v6068_v24 = vadd.f32 %v3352_v1, %v2578_v0  ;;  %v2585_v42 = vpop.f32.mrf.mxu1 }
 0x38e   : > { %v2778_v10 = vpop.f32.mrf.mxu0  ;;  %v2586_v54 = vadd.f32 %v2585_v42, %v5925_v63 }
 0x38f   : > { %v2906_v18 = vadd.f32 %v2905_v22, %v6044_v59  ;;  %2879 = vst [vmem:[%s5956_s15 + $0xb0] sm:$0xff] %v6068_v24  ;;  %v6074_v57 = vadd.f32 %v2778_v10, %v2570_v37  ;;  %v3309_v49 = vpop.f32.mrf.mxu1 }
 0x390   : > { %v3353_v56 = vpop.f32.mrf.mxu0  ;;  %v2597_v6 = vadd.f32 %v3309_v49, %v5927_v23 }
 0x391   : > { %2877 = vst [vmem:[%s5956_s15 + $0xa0] sm:$0xff] %v6074_v57  ;;  %v2907_v53 = vadd.f32 %v2906_v18, %v6056_v43  ;;  %v6080_v55 = vadd.f32 %v3353_v56, %v2581_v2  ;;  %v2588_v26 = vpop.f32.mrf.mxu1 }
 0x392   : > { %v2781_v34 = vpop.f32.mrf.mxu0  ;;  %v2589_v63 = vadd.f32 %v2588_v26, %v5929_v17 }
 0x393   : > { %v2908_v13 = vadd.f32 %v2907_v53, %v6074_v57  ;;  %2880 = vst [vmem:[%s5956_s15 + $0xb8] sm:$0xff] %v6080_v55  ;;  %v6086_v45 = vadd.f32 %v2781_v34, %v2573_v60  ;;  %v3312_v46 = vpop.f32.mrf.mxu1 }
 0x394   : > { %v3356_v3 = vpop.f32.mrf.mxu0  ;;  %v2610_v0 = vadd.f32 %v3312_v46, %v5931_v51 }
 0x395   : > { %2878 = vst [vmem:[%s5956_s15 + $0xa8] sm:$0xff] %v6086_v45  ;;  %v2909_v15 = vadd.f32 %v2908_v13, %v6086_v45  ;;  %v6092_v47 = vadd.f32 %v3356_v3, %v2594_v38  ;;  %v2601_v5 = vpop.f32.mrf.mxu1 }
 0x396   : > { %v2794_v30 = vpop.f32.mrf.mxu0  ;;  %v2602_v1 = vadd.f32 %v2601_v5, %v5933_v8 }
 0x397   : > { %v2910_v39 = vadd.f32 %v2909_v15, %v6068_v24  ;;  %2883 = vst [vmem:[%s5956_s15 + $0xd0] sm:$0xff] %v6092_v47  ;;  %v2849_v62 = vadd.f32 %v2794_v30, %v2586_v54  ;;  %v3313_v61 = vpop.f32.mrf.mxu1 }
 0x398   : > { %v3357_v44 = vpop.f32.mrf.mxu0  ;;  %v2613_v10 = vadd.f32 %v3313_v61, %v5937_v40 }
 0x399   : > { %2881 = vst [vmem:[%s5956_s15 + $0xc0] sm:$0xff] %v2849_v62  ;;  %v2911_v19 = vadd.f32 %v2910_v39, %v6080_v55  ;;  %v2852_v35 = vadd.f32 %v3357_v44, %v2597_v6  ;;  %v2604_v22 = vpop.f32.mrf.mxu1 }
 0x39a   : > { %v2797_v16 = vpop.f32.mrf.mxu0  ;;  %v2605_v49 = vadd.f32 %v2604_v22, %v5939_v4 }
 0x39b   : > { %v2912_v31 = vadd.f32 %v2911_v19, %v2849_v62  ;;  %2884 = vst [vmem:[%s5956_s15 + $0xd8] sm:$0xff] %v2852_v35  ;;  %v2850_v23 = vadd.f32 %v2797_v16, %v2589_v63 }
 0x39c   : > { %v3360_v11 = vpop.f32.mrf.mxu0 }
 0x39d   : > { %2882 = vst [vmem:[%s5956_s15 + $0xc8] sm:$0xff] %v2850_v23  ;;  %v2913_v37 = vadd.f32 %v2912_v31, %v2850_v23  ;;  %v2855_v17 = vadd.f32 %v3360_v11, %v2610_v0 }
 0x39e   : > { %v2810_v42 = vpop.f32.mrf.mxu0 }
 0x39f   : > { %v2914_v2 = vadd.f32 %v2913_v37, %v6092_v47  ;;  %2887 = vst [vmem:[%s5956_s15 + $0xf0] sm:$0xff] %v2855_v17  ;;  %v2853_v51 = vadd.f32 %v2810_v42, %v2602_v1 }
 0x3a0   : > { %v3361_v18 = vpop.f32.mrf.mxu0 }
 0x3a1   : > { %2885 = vst [vmem:[%s5956_s15 + $0xe0] sm:$0xff] %v2853_v51  ;;  %v2915_v56 = vadd.f32 %v2914_v2, %v2852_v35  ;;  %v2856_v8 = vadd.f32 %v3361_v18, %v2613_v10 }
 0x3a2   : > { %v2813_v60 = vpop.f32.mrf.mxu0 }
 0x3a3   : > { %v2916_v53 = vadd.f32 %v2915_v56, %v2853_v51  ;;  %2888 = vst [vmem:[%s5956_s15 + $0xf8] sm:$0xff] %v2856_v8  ;;  %v2854_v26 = vadd.f32 %v2813_v60, %v2605_v49 }
 0x3a5   : > { %2886 = vst [vmem:[%s5956_s15 + $0xe8] sm:$0xff] %v2854_v26  ;;  %v2917_v34 = vadd.f32 %v2916_v53, %v2854_v26 }
 0x3a7   : > { %v2918_v38 = vadd.f32 %v2917_v34, %v2855_v17 }
 0x3a9   : > { %v2919_v13 = vadd.f32 %v2918_v38, %v2856_v8 }
 0x3ab   : > { %v2920_v40 = vrot.slane %v2919_v13, 4 }
 0x3ad   : > { %v2921_v46 = vadd.f32 %v2920_v40, %v2919_v13 }
 0x3af   : > { %v2922_v3 = vrot.slane %v2921_v46, 2 }
 0x3b1   : > { %v2923_v54 = vadd.f32 %v2922_v3, %v2921_v46 }
 0x3b3   : > { %v2924_v15 = vrot.slane %v2923_v54, 1 }
 0x3b5   : > { %v2925_v5 = vadd.f32 %v2924_v15, %v2923_v54 }
 0x3b7   : > { %v2926_v4 = vmul.f32 0.00390625, %v2925_v5 }
 0x3b9   : > { %2959 = vst [vmem:[%s6116_s29] sm:$0x1] %v2926_v4  ;;  %v2936_v30 = vsub.f32 %v6014_v29, %v2926_v4  ;;  %v2938_v6 = vsub.f32 %v6008_v9, %v2926_v4  ;;  %v2939_v39 = vsub.f32 %v6026_v14, %v2926_v4  ;;  %v2940_v44 = vsub.f32 %v6038_v48, %v2926_v4 }
 0x3ba   : > { %v2941_v63 = vsub.f32 %v6020_v25, %v2926_v4  ;;  %v2942_v19 = vsub.f32 %v6032_v41, %v2926_v4  ;;  %v2943_v61 = vsub.f32 %v6050_v28, %v2926_v4  ;;  %v2944_v16 = vsub.f32 %v6062_v7, %v2926_v4 }
 0x3bb   : > { %v2945_v0 = vsub.f32 %v6044_v59, %v2926_v4  ;;  %v2946_v31 = vsub.f32 %v6056_v43, %v2926_v4  ;;  %v2947_v29 = vsub.f32 %v6074_v57, %v2926_v4  ;;  %v2948_v9 = vsub.f32 %v6086_v45, %v2926_v4 }
 0x3bc   : > { %v2949_v14 = vsub.f32 %v6068_v24, %v2926_v4  ;;  %v6133_v48 = vsub.f32 %v6080_v55, %v2926_v4  ;;  %v6135_v25 = vsub.f32 %v2849_v62, %v2926_v4  ;;  %v6137_v41 = vsub.f32 %v2850_v23, %v2926_v4 }
 0x3bd   : > { %v6140_v28 = vsub.f32 %v6092_v47, %v2926_v4  ;;  %v6142_v7 = vsub.f32 %v2852_v35, %v2926_v4  ;;  %v6144_v59 = vsub.f32 %v2853_v51, %v2926_v4  ;;  %v6146_v43 = vsub.f32 %v2854_v26, %v2926_v4 }
 0x3be   : > { %v6148_v57 = vsub.f32 %v2855_v17, %v2926_v4  ;;  %v6150_v45 = vsub.f32 %v2856_v8, %v2926_v4  ;;  %v2927_v24 = vsub.f32 %v5962_v12, %v2926_v4  ;;  %v2928_v55 = vsub.f32 %v5970_v21, %v2926_v4 }
 0x3bf   : > { %v2929_v62 = vsub.f32 %v5958_v27, %v2926_v4  ;;  %v2930_v47 = vsub.f32 %v5966_v52, %v2926_v4  ;;  %v2931_v35 = vsub.f32 %v5981_v32, %v2926_v4  ;;  %v2932_v22 = vsub.f32 %v5991_v33, %v2926_v4 }
 0x3c0   : > { %v2960_v23 = vmul.f32 %v2927_v24, %v2927_v24  ;;  %v2961_v11 = vmul.f32 %v2928_v55, %v2928_v55  ;;  %v2933_v10 = vsub.f32 %v5976_v20, %v2926_v4  ;;  %v2934_v21 = vsub.f32 %v5986_v58, %v2926_v4 }
 0x3c1   : > { %v2962_v1 = vmul.f32 %v2929_v62, %v2929_v62  ;;  %v2963_v17 = vmul.f32 %v2930_v47, %v2930_v47  ;;  %v2964_v2 = vmul.f32 %v2931_v35, %v2931_v35  ;;  %v2965_v51 = vmul.f32 %v2932_v22, %v2932_v22 }
 0x3c2   : > { %v2992_v37 = vadd.f32 %v2961_v11, %v2960_v23  ;;  %v2935_v18 = vsub.f32 %v6002_v50, %v2926_v4  ;;  %v2966_v49 = vmul.f32 %v2933_v10, %v2933_v10  ;;  %v2967_v56 = vmul.f32 %v2934_v21, %v2934_v21 }
 0x3c3   : > { %v2937_v8 = vsub.f32 %v5996_v36, %v2926_v4  ;;  %v2969_v53 = vmul.f32 %v2936_v30, %v2936_v30  ;;  %v2971_v38 = vmul.f32 %v2938_v6, %v2938_v6  ;;  %v2972_v40 = vmul.f32 %v2939_v39, %v2939_v39 }
 0x3c4   : > { %v2993_v42 = vadd.f32 %v2992_v37, %v2962_v1  ;;  %v2968_v60 = vmul.f32 %v2935_v18, %v2935_v18  ;;  %v2973_v46 = vmul.f32 %v2940_v44, %v2940_v44  ;;  %v2974_v54 = vmul.f32 %v2941_v63, %v2941_v63 }
 0x3c5   : > { %v2970_v34 = vmul.f32 %v2937_v8, %v2937_v8  ;;  %v2975_v15 = vmul.f32 %v2942_v19, %v2942_v19  ;;  %v2976_v24 = vmul.f32 %v2943_v61, %v2943_v61  ;;  %v2977_v62 = vmul.f32 %v2944_v16, %v2944_v16 }
 0x3c6   : > { %v2994_v12 = vadd.f32 %v2993_v42, %v2963_v17  ;;  %v2978_v4 = vmul.f32 %v2945_v0, %v2945_v0  ;;  %v2979_v30 = vmul.f32 %v2946_v31, %v2946_v31  ;;  %v2980_v47 = vmul.f32 %v2947_v29, %v2947_v29 }
 0x3c7   : > { %v2981_v6 = vmul.f32 %v2948_v9, %v2948_v9  ;;  %v2982_v39 = vmul.f32 %v2949_v14, %v2949_v14  ;;  %v2983_v44 = vmul.f32 %v6133_v48, %v6133_v48  ;;  %v2984_v19 = vmul.f32 %v6135_v25, %v6135_v25 }
 0x3c8   : > { %v2995_v27 = vadd.f32 %v2994_v12, %v2964_v2  ;;  %v2985_v16 = vmul.f32 %v6137_v41, %v6137_v41  ;;  %v2986_v31 = vmul.f32 %v6140_v28, %v6140_v28  ;;  %v2987_v9 = vmul.f32 %v6142_v7, %v6142_v7 }
 0x3c9   : > { %v2988_v48 = vmul.f32 %v6144_v59, %v6144_v59  ;;  %v2989_v25 = vmul.f32 %v6146_v43, %v6146_v43  ;;  %v2990_v41 = vmul.f32 %v6148_v57, %v6148_v57  ;;  %v2991_v28 = vmul.f32 %v6150_v45, %v6150_v45 }
 0x3ca   : > { %v2996_v52 = vadd.f32 %v2995_v27, %v2965_v51 }
 0x3cc   : > { %v2997_v32 = vadd.f32 %v2996_v52, %v2966_v49 }
 0x3ce   : > { %v2998_v33 = vadd.f32 %v2997_v32, %v2967_v56 }
 0x3d0   : > { %v2999_v26 = vadd.f32 %v2998_v33, %v2968_v60 }
 0x3d2   : > { %v3000_v20 = vadd.f32 %v2999_v26, %v2969_v53 }
 0x3d4   : > { %v3001_v13 = vadd.f32 %v3000_v20, %v2970_v34 }
 0x3d6   : > { %v3002_v58 = vadd.f32 %v3001_v13, %v2971_v38 }
 0x3d8   : > { %v3003_v3 = vadd.f32 %v3002_v58, %v2972_v40 }
 0x3da   : > { %v3004_v50 = vadd.f32 %v3003_v3, %v2973_v46 }
 0x3dc   : > { %v3005_v5 = vadd.f32 %v3004_v50, %v2974_v54 }
 0x3de   : > { %v3006_v55 = vadd.f32 %v3005_v5, %v2975_v15 }
 0x3e0   : > { %v3007_v36 = vadd.f32 %v3006_v55, %v2976_v24 }
 0x3e2   : > { %v3008_v23 = vadd.f32 %v3007_v36, %v2977_v62 }
 0x3e4   : > { %v3009_v11 = vadd.f32 %v3008_v23, %v2978_v4 }
 0x3e6   : > { %v3010_v35 = vadd.f32 %v3009_v11, %v2979_v30 }
 0x3e8   : > { %v3011_v1 = vadd.f32 %v3010_v35, %v2980_v47 }
 0x3ea   : > { %v3012_v37 = vadd.f32 %v3011_v1, %v2981_v6 }
 0x3ec   : > { %v3013_v63 = vadd.f32 %v3012_v37, %v2982_v39 }
 0x3ee   : > { %v3014_v61 = vadd.f32 %v3013_v63, %v2983_v44 }
 0x3f0   : > { %v3015_v0 = vadd.f32 %v3014_v61, %v2984_v19 }
 0x3f2   : > { %v3016_v29 = vadd.f32 %v3015_v0, %v2985_v16 }
 0x3f4   : > { %v3017_v14 = vadd.f32 %v3016_v29, %v2986_v31 }
 0x3f6   : > { %v3018_v22 = vadd.f32 %v3017_v14, %v2987_v9 }
 0x3f8   : > { %v3019_v17 = vadd.f32 %v3018_v22, %v2988_v48 }
 0x3fa   : > { %v3020_v42 = vadd.f32 %v3019_v17, %v2989_v25 }
 0x3fc   : > { %v3021_v10 = vadd.f32 %v3020_v42, %v2990_v41 }
 0x3fe   : > { %v3022_v2 = vadd.f32 %v3021_v10, %v2991_v28 }
 0x400   : > { %v3023_v7 = vrot.slane %v3022_v2, 4 }
 0x402   : > { %v3024_v12 = vadd.f32 %v3023_v7, %v3022_v2 }
 0x404   : > { %v3025_v21 = vrot.slane %v3024_v12, 2 }
 0x406   : > { %v3026_v51 = vadd.f32 %v3025_v21, %v3024_v12 }
 0x408   : > { %v3027_v27 = vrot.slane %v3026_v51, 1 }
 0x40a   : > { %v3028_v59 = vadd.f32 %v3027_v27, %v3026_v51 }
 0x40c   : > { %3029 = vst [vmem:[%s6116_s29 + $0x1] sm:$0x1] %v3028_v59 }
 0x40d PF: > { %s18_s24 = sadd.s32 1, %s3463_s24  }
 0x40e   : > { %p15_p4 = scmp.ge.s32.totalorder %s18_s24, 4  }
 0x410   :  { %17 = sbr.rel (!%p15_p4) target bundleno = 1 (0x1), region = 86 }

// kernel: resnet_basicblock.4
= control target key start
LH: loop header
LB: loop body
LE: loop exit
PB: predicated region body
PF: predicated region fallthrough
CT: control target
= control target key end

     0   :  { %s3600_s24 = smov 0   ;;  %s6342_s0 = inlined_call_operand.vmem [shape: f32[2,256,128], index: 0, kind: input, shape index: {}]   ;;  %s6343_s1 = inlined_call_operand.vmem [shape: f32[1,128], index: 1, kind: input, shape index: {}]   ;;  %s6344_s2 = inlined_call_operand.vmem [shape: f32[1,128], index: 2, kind: input, shape index: {}]   ;;  %s6345_s3 = inlined_call_operand.vmem [shape: bf16[128,128], index: 3, kind: input, shape index: {}]   ;;  %s6346_s4 = inlined_call_operand.vmem [shape: bf16[128,128], index: 4, kind: input, shape index: {}]   ;;  %s6347_s5 = inlined_call_operand.vmem [shape: f32[256,128], index: 5, kind: input, shape index: {}]   ;;  %s6348_s6 = inlined_call_operand.vmem [shape: f32[2,256,128], index: 6, kind: output, shape index: {0}]   ;;  %s6349_s7 = inlined_call_operand.vmem [shape: f32[2,2,128], index: 7, kind: output, shape index: {1}]  }
   0x1 LB: > { %s3226_s25 = sadd.s32 4294967295, %s3549_s24   ;;  %p3230_p0 = scmp.ge.s32.totalorder %s3549_s24, 1  ;;  %s3549_s24 = sphi %s3600_s24, %s18_s24  }
   0x2   : > { %p240_p1 = scmp.lt.s32.totalorder %s3549_s24, 3 }
   0x4   : > { %p241_p2 = pnand %p3230_p0, %p240_p1 }
   0x6   : > { %244 = sbr.rel (%p241_p2) target bundleno = 1043 (0x413), region = 44 }
   0xb   : > { %p276_p3 = scmp.lt.s32.totalorder %s3226_s25, 1  ;;  %v6352_v0 = vmov 0.0   ;;  %v3620_v3 = vld [vmem:[%s6343_s1] ss:$0 sm:$0xff]  ;;  %s3552_s8 = smov 4   ;;  %vm528_vm0 = vcmask 1046528  }
   0xc   : > { %v3609_v1 = vrot.slane %v6352_v0, 1  ;;  %v3626_v4 = vld [vmem:[%s6344_s2] ss:$0 sm:$0xff]  ;;  %vm691_vm1 = vcmask 1045504   ;;  %s3553_s12 = smov 8   ;;  %s3554_s13 = smov 12  }
   0xd   : > { %s6714_s25 = smov (!%p276_p3, %s3226_s25), 1  ;;  %s3555_s14 = smov 16   ;;  %vm1452_vm2 = vcmask 31744   ;;  %vm1486_vm3 = vcmask 64512   ;;  %vm1520_vm4 = vcmask 97280   ;;  %vm1554_vm5 = vcmask 130048  }
   0xe   : > { %6452 = vst [vmem:[#allocation2_spill] sm:$0xff] %v3609_v1  ;;  %v3615_v2 = vpack.i.bf16 %v3609_v1, %v3609_v1  ;;  %s3256_s28 = sshll.u32 %s6714_s25, 8  ;;  %s3556_s15 = smov 20   ;;  %vm1588_vm6 = vcmask 162816   ;;  %vm1622_vm7 = vcmask 195584   ;;  %vm1656_vm8 = vcmask 228352  }
   0xf   : > { %s3635_s11 = scalar_lea.vmem %s6342_s0, %s3256_s28  ;;  %s3557_s16 = smov 24   ;;  %vm1690_vm9 = vcmask 261120   ;;  %vm1724_vm10 = vcmask 293888   ;;  %vm2019_vm11 = vsmask.f32 4352 }
  0x10   : > { %6453 = vst [vmem:[#allocation3_spill] sm:$0xff] %v3615_v2  ;;  %3508 = vrot.lane.b32.xlu0 %v3615_v2, %s3552_s8  ;;  %v355_v5 = vld [vmem:[%s3635_s11] sm:$0xff]  ;;  %v356_v6 = vld [vmem:[%s3635_s11 + $0x8] sm:$0xff]  ;;  %v357_v7 = vld [vmem:[%s3635_s11 + $0x10] sm:$0xff]  ;;  %s3558_s17 = smov 28   ;;  %s3559_s20 = smov 32  }
  0x11   : > { %v394_v8 = vmul.f32 %v3620_v3, %v355_v5  ;;  %v395_v9 = vmul.f32 %v3620_v3, %v356_v6  ;;  %v396_v10 = vmul.f32 %v3620_v3, %v357_v7  ;;  %v358_v11 = vld [vmem:[%s3635_s11 + $0x18] sm:$0xff]  ;;  %v359_v12 = vld [vmem:[%s3635_s11 + $0x20] sm:$0xff]  ;;  %v360_v13 = vld [vmem:[%s3635_s11 + $0x28] sm:$0xff] }
  0x12   : > { %v397_v14 = vmul.f32 %v3620_v3, %v358_v11  ;;  %v398_v15 = vmul.f32 %v3620_v3, %v359_v12  ;;  %v399_v16 = vmul.f32 %v3620_v3, %v360_v13  ;;  %v361_v17 = vld [vmem:[%s3635_s11 + $0x30] sm:$0xff]  ;;  %v362_v18 = vld [vmem:[%s3635_s11 + $0x38] sm:$0xff]  ;;  %v363_v38 = vld [vmem:[%s3635_s11 + $0x40] sm:$0xff] }
  0x13   : > { %v433_v19 = vadd.f32 %v3626_v4, %v394_v8  ;;  %v434_v20 = vadd.f32 %v3626_v4, %v395_v9  ;;  %v435_v21 = vadd.f32 %v3626_v4, %v396_v10  ;;  %v400_v22 = vmul.f32 %v3620_v3, %v361_v17  ;;  %v364_v39 = vld [vmem:[%s3635_s11 + $0x48] sm:$0xff]  ;;  %v365_v41 = vld [vmem:[%s3635_s11 + $0x50] sm:$0xff]  ;;  %v366_v42 = vld [vmem:[%s3635_s11 + $0x58] sm:$0xff] }
  0x14   : > { %v436_v23 = vadd.f32 %v3626_v4, %v397_v14  ;;  %v437_v24 = vadd.f32 %v3626_v4, %v398_v15  ;;  %v438_v25 = vadd.f32 %v3626_v4, %v399_v16  ;;  %v401_v26 = vmul.f32 %v3620_v3, %v362_v18  ;;  %v367_v43 = vld [vmem:[%s3635_s11 + $0x60] sm:$0xff]  ;;  %v368_v48 = vld [vmem:[%s3635_s11 + $0x68] sm:$0xff]  ;;  %v369_v57 = vld [vmem:[%s3635_s11 + $0x70] sm:$0xff] }
  0x15   : > { %v3659_v27 = vmax.f32 %v433_v19, 0.0  ;;  %v3661_v28 = vmax.f32 %v434_v20, 0.0  ;;  %v3663_v29 = vmax.f32 %v435_v21, 0.0  ;;  %v439_v30 = vadd.f32 %v3626_v4, %v400_v22  ;;  %v370_v11 = vld [vmem:[%s3635_s11 + $0x78] sm:$0xff]  ;;  %v371_v18 = vld [vmem:[%s3635_s11 + $0x80] sm:$0xff] }
  0x16   : > { %v3666_v31 = vmax.f32 %v436_v23, 0.0  ;;  %v3668_v32 = vmax.f32 %v437_v24, 0.0  ;;  %v3670_v33 = vmax.f32 %v438_v25, 0.0  ;;  %v440_v34 = vadd.f32 %v3626_v4, %v401_v26  ;;  %v372_v23 = vld [vmem:[%s3635_s11 + $0x88] sm:$0xff] }
  0x17   : > { %v3674_v35 = vrot.slane %v3659_v27, 1  ;;  %v533_v36 = vrot.slane %v3661_v28, 1  ;;  %v3678_v37 = vrot.slane %v3663_v29, 1  ;;  %v3694_v47 = vmax.f32 %v439_v30, 0.0 }
  0x18   : > { %6454 = vst [vmem:[#allocation4_spill] sm:$0xff] %v3666_v31  ;;  %6455 = vst [vmem:[#allocation5_spill] sm:$0xff] %v3668_v32  ;;  %v537_v40 = vrot.slane %v3666_v31, 1  ;;  %v539_v46 = vrot.slane %v3668_v32, 1  ;;  %v541_v50 = vrot.slane %v3670_v33, 1  ;;  %v3705_v51 = vmax.f32 %v440_v34, 0.0 }
  0x19   : > { %6456 = vst [vmem:[#allocation6_spill] sm:$0xff] %v3670_v33  ;;  %v3688_v44 = vsel %vm528_vm0, %v3674_v35, %v533_v36  ;;  %v532_v45 = vsel %vm528_vm0, %v3609_v1, %v3674_v35  ;;  %6457 = vst [vmem:[#allocation7_spill] sm:$0xff] %v3694_v47  ;;  %v3702_v49 = vsel %vm528_vm0, %v533_v36, %v3678_v37  ;;  %v543_v62 = vrot.slane %v3694_v47, 1 }
  0x1a   : > { %597 = vrot.lane.b32.xlu1 %v3688_v44, %s3552_s8  ;;  %595 = vrot.lane.b32.xlu0 %v532_v45, %s3552_s8  ;;  %6458 = vst [vmem:[#allocation8_spill] sm:$0xff] %v3705_v51  ;;  %v3709_v52 = vsel %vm528_vm0, %v3678_v37, %v537_v40  ;;  %v402_v53 = vmul.f32 %v3620_v3, %v363_v38  ;;  %v545_v8 = vrot.slane %v3705_v51, 1  ;;  %v696_v1 = vrot.slane %v3661_v28, 2 }
  0x1b   : > { %v403_v54 = vmul.f32 %v3620_v3, %v364_v39  ;;  %v404_v55 = vmul.f32 %v3620_v3, %v365_v41  ;;  %v405_v56 = vmul.f32 %v3620_v3, %v366_v42  ;;  %v3717_v58 = vsel %vm528_vm0, %v537_v40, %v539_v46  ;;  %v373_v42 = vld [vmem:[%s3635_s11 + $0x90] sm:$0xff] }
  0x1c   : > { %v441_v59 = vadd.f32 %v3626_v4, %v402_v53  ;;  %v406_v61 = vmul.f32 %v3620_v3, %v367_v43  ;;  %v407_v6 = vmul.f32 %v3620_v3, %v368_v48  ;;  %v3731_v7 = vsel %vm528_vm0, %v539_v46, %v541_v50  ;;  %v374_v43 = vld [vmem:[%s3635_s11 + $0x98] sm:$0xff] }
  0x1d   : > { %v442_v60 = vadd.f32 %v3626_v4, %v403_v54  ;;  %v443_v63 = vadd.f32 %v3626_v4, %v404_v55  ;;  %v444_v5 = vadd.f32 %v3626_v4, %v405_v56  ;;  %v408_v13 = vmul.f32 %v3620_v3, %v369_v57 }
  0x1e   : > { %599 = vrot.lane.b32.xlu1 %v3702_v49, %s3552_s8  ;;  %601 = vrot.lane.b32.xlu0 %v3709_v52, %s3552_s8  ;;  %v3734_v9 = vmax.f32 %v441_v59, 0.0  ;;  %v445_v12 = vadd.f32 %v3626_v4, %v406_v61  ;;  %v446_v16 = vadd.f32 %v3626_v4, %v407_v6  ;;  %v409_v17 = vmul.f32 %v3620_v3, %v370_v11  ;;  %v376_v61 = vld [vmem:[%s3635_s11 + $0xa8] sm:$0xff] }
  0x1f   : > { %v3736_v10 = vmax.f32 %v442_v60, 0.0  ;;  %v3745_v14 = vmax.f32 %v443_v63, 0.0  ;;  %v3747_v15 = vmax.f32 %v444_v5, 0.0  ;;  %v3753_v19 = vsel %vm528_vm0, %v541_v50, %v543_v62  ;;  %v375_v60 = vld [vmem:[%s3635_s11 + $0xa0] sm:$0xff] }
  0x20   : > { %6459 = vst [vmem:[#allocation9_spill] sm:$0xff] %v3734_v9  ;;  %v3756_v20 = vsel %vm528_vm0, %v543_v62, %v545_v8  ;;  %v547_v21 = vrot.slane %v3734_v9, 1  ;;  %v3761_v24 = vmax.f32 %v445_v12, 0.0  ;;  %v447_v25 = vadd.f32 %v3626_v4, %v408_v13  ;;  %v377_v12 = vld [vmem:[%s3635_s11 + $0xb0] sm:$0xff] }
  0x21   : > { %6460 = vst [vmem:[#allocation10_spill] sm:$0xff] %v3736_v10  ;;  %6461 = vst [vmem:[#allocation11_spill] sm:$0xff] %v3745_v14  ;;  %v549_v22 = vrot.slane %v3736_v10, 1  ;;  %v551_v26 = vrot.slane %v3745_v14, 1  ;;  %v553_v30 = vrot.slane %v3747_v15, 1  ;;  %v3770_v34 = vmax.f32 %v446_v16, 0.0 }
  0x22   : > { %603 = vrot.lane.b32.xlu1 %v3717_v58, %s3552_s8  ;;  %605 = vrot.lane.b32.xlu0 %v3731_v7, %s3552_s8  ;;  %6462 = vst [vmem:[#allocation12_spill] sm:$0xff] %v3747_v15  ;;  %6463 = vst [vmem:[#allocation13_spill] sm:$0xff] %v3761_v24  ;;  %v448_v36 = vadd.f32 %v3626_v4, %v409_v17  ;;  %v3774_v38 = vsel %vm528_vm0, %v545_v8, %v547_v21  ;;  %v555_v45 = vrot.slane %v3761_v24, 1 }
  0x23   : > { %6464 = vst [vmem:[#allocation14_spill] sm:$0xff] %v3770_v34  ;;  %6465 = vst [vmem:[#allocation15_spill] sm:$0xff] %v3774_v38  ;;  %v3777_v39 = vsel %vm528_vm0, %v547_v21, %v549_v22  ;;  %v410_v40 = vmul.f32 %v3620_v3, %v371_v18  ;;  %v411_v41 = vmul.f32 %v3620_v3, %v372_v23  ;;  %v3784_v46 = vmax.f32 %v447_v25, 0.0  ;;  %v378_v21 = vld [vmem:[%s3635_s11 + $0xb8] sm:$0xff] }
  0x24   : > { %6466 = vst [vmem:[#allocation16_spill] sm:$0xff] %v3777_v39  ;;  %v3791_v48 = vsel %vm528_vm0, %v549_v22, %v551_v26  ;;  %v557_v50 = vrot.slane %v3770_v34, 1  ;;  %v3794_v53 = vmax.f32 %v448_v36, 0.0  ;;  %v412_v54 = vmul.f32 %v3620_v3, %v373_v42 }
  0x25   : > { %6467 = vst [vmem:[#allocation17_spill] sm:$0xff] %v3791_v48  ;;  %v3798_v55 = vsel %vm528_vm0, %v551_v26, %v553_v30  ;;  %v449_v56 = vadd.f32 %v3626_v4, %v410_v40  ;;  %v450_v57 = vadd.f32 %v3626_v4, %v411_v41  ;;  %v413_v59 = vmul.f32 %v3620_v3, %v374_v43 }
  0x26   : > { %607 = vrot.lane.b32.xlu1 %v3753_v19, %s3552_s8  ;;  %609 = vrot.lane.b32.xlu0 %v3756_v20, %s3552_s8  ;;  %6468 = vst [vmem:[#allocation18_spill] sm:$0xff] %v3794_v53  ;;  %6469 = vst [vmem:[#allocation19_spill] sm:$0xff] %v3798_v55  ;;  %v3806_v62 = vsel %vm528_vm0, %v553_v30, %v555_v45  ;;  %v559_v63 = vrot.slane %v3784_v46, 1  ;;  %v561_v5 = vrot.slane %v3794_v53, 1 }
  0x27   : > { %6470 = vst [vmem:[#allocation20_spill] sm:$0xff] %v3806_v62  ;;  %v451_v6 = vadd.f32 %v3626_v4, %v412_v54  ;;  %v414_v8 = vmul.f32 %v3620_v3, %v375_v60  ;;  %v415_v11 = vmul.f32 %v3620_v3, %v376_v61  ;;  %v3819_v13 = vsel %vm528_vm0, %v555_v45, %v557_v50 }
  0x28   : > { %6471 = vst [vmem:[#allocation21_spill] sm:$0xff] %v3819_v13  ;;  %v3821_v16 = vmax.f32 %v449_v56, 0.0  ;;  %v3823_v17 = vmax.f32 %v450_v57, 0.0  ;;  %v452_v18 = vadd.f32 %v3626_v4, %v413_v59  ;;  %v3828_v22 = vsel %vm528_vm0, %v557_v50, %v559_v63 }
  0x29   : > { %6473 = vst [vmem:[#allocation23_spill] sm:$0xff] %v3828_v22  ;;  %v416_v23 = vmul.f32 %v3620_v3, %v377_v12  ;;  %v3836_v25 = vsel %vm528_vm0, %v559_v63, %v561_v5  ;;  %v3838_v26 = vmax.f32 %v451_v6, 0.0  ;;  %v453_v30 = vadd.f32 %v3626_v4, %v414_v8 }
  0x2a   : > { %611 = vrot.lane.b32.xlu1 %v3774_v38, %s3552_s8  ;;  %613 = vrot.lane.b32.xlu0 %v3777_v39, %s3552_s8  ;;  %6472 = vst [vmem:[#allocation22_spill] sm:$0xff] %v3821_v16  ;;  %6474 = vst [vmem:[#allocation24_spill] sm:$0xff] %v3836_v25  ;;  %v454_v36 = vadd.f32 %v3626_v4, %v415_v11  ;;  %v563_v40 = vrot.slane %v3821_v16, 1  ;;  %v565_v41 = vrot.slane %v3823_v17, 1  ;;  %v3844_v42 = vmax.f32 %v452_v18, 0.0 }
  0x2b   : > { %v417_v43 = vmul.f32 %v3620_v3, %v378_v21  ;;  %v567_v45 = vrot.slane %v3838_v26, 1  ;;  %v3852_v50 = vmax.f32 %v453_v30, 0.0  ;;  %v455_v56 = vadd.f32 %v3626_v4, %v416_v23 }
  0x2c   : > { %6475 = vst [vmem:[#allocation25_spill] sm:$0xff] %v3844_v42  ;;  %v3854_v54 = vmax.f32 %v454_v36, 0.0  ;;  %v3858_v57 = vsel %vm528_vm0, %v561_v5, %v563_v40  ;;  %v3861_v59 = vsel %vm528_vm0, %v563_v40, %v565_v41  ;;  %v569_v60 = vrot.slane %v3844_v42, 1 }
  0x2d   : > { %6476 = vst [vmem:[#allocation26_spill] sm:$0xff] %v3852_v50  ;;  %6478 = vst [vmem:[#allocation28_spill] sm:$0xff] %v3858_v57  ;;  %v456_v61 = vadd.f32 %v3626_v4, %v417_v43  ;;  %v571_v63 = vrot.slane %v3852_v50, 1  ;;  %v3870_v6 = vmax.f32 %v455_v56, 0.0  ;;  %v3873_v5 = vsel %vm528_vm0, %v565_v41, %v567_v45 }
  0x2e   : > { %615 = vrot.lane.b32.xlu1 %v3791_v48, %s3552_s8  ;;  %617 = vrot.lane.b32.xlu0 %v3798_v55, %s3552_s8  ;;  %6477 = vst [vmem:[#allocation27_spill] sm:$0xff] %v3854_v54  ;;  %6479 = vst [vmem:[#allocation29_spill] sm:$0xff] %v3861_v59  ;;  %v3876_v8 = vsel %vm528_vm0, %v567_v45, %v569_v60  ;;  %v573_v11 = vrot.slane %v3854_v54, 1  ;;  %v6350_v41 = vrot.slane %v3770_v34, 2  ;;  %v722_v43 = vrot.slane %v3784_v46, 2 }
  0x2f   : > { %6480 = vst [vmem:[#allocation30_spill] sm:$0xff] %v3870_v6  ;;  %v3879_v12 = vmax.f32 %v456_v61, 0.0  ;;  %v575_v18 = vrot.slane %v3870_v6, 1  ;;  %v3887_v21 = vsel %vm528_vm0, %v569_v60, %v571_v63  ;;  %v724_v45 = vrot.slane %v3794_v53, 2 }
  0x30   : > { %v3890_v23 = vsel %vm528_vm0, %v571_v63, %v573_v11  ;;  %v3915_v56 = vsel %vm691_vm1, %v6350_v41, %v722_v43  ;;  %v726_v61 = vrot.slane %v3821_v16, 2  ;;  %v728_v63 = vrot.slane %v3823_v17, 2 }
  0x31   : > { %6481 = vst [vmem:[#allocation31_spill] sm:$0xff] %v3879_v12  ;;  %v6351_v30 = vrot.slane %v3879_v12, 1  ;;  %v3898_v36 = vsel %vm528_vm0, %v573_v11, %v575_v18  ;;  %6482 = vst [vmem:[#allocation32_spill] sm:$0xff] %v3915_v56  ;;  %v3918_v60 = vsel %vm691_vm1, %v722_v43, %v724_v45  ;;  %v730_v43 = vrot.slane %v3838_v26, 2 }
  0x32   : > { %619 = vrot.lane.b32.xlu1 %v3806_v62, %s3552_s8  ;;  %621 = vrot.lane.b32.xlu0 %v3819_v13, %s3552_s8  ;;  %6483 = vst [vmem:[#allocation33_spill] sm:$0xff] %v3918_v60  ;;  %v3927_v11 = vsel %vm691_vm1, %v724_v45, %v726_v61  ;;  %v732_v41 = vrot.slane %v3844_v42, 2  ;;  %v6486_v45 = vmov 0.0   ;;  %v738_v55 = vrot.slane %v3870_v6, 2 }
  0x33   : > { %v3903_v40 = vsel %vm528_vm0, %v575_v18, %v6351_v30  ;;  %6484 = vst [vmem:[#allocation34_spill] sm:$0xff] %v3927_v11  ;;  %v3930_v18 = vsel %vm691_vm1, %v726_v61, %v728_v63  ;;  %v3939_v30 = vsel %vm691_vm1, %v728_v63, %v730_v43  ;;  %v3953_v61 = vrot.slane %v6486_v45, 2 }
  0x34   : > { %6485 = vst [vmem:[#allocation35_spill] sm:$0xff] %v3930_v18  ;;  %v3942_v0 = vsel %vm691_vm1, %v730_v43, %v732_v41  ;;  %v3956_v63 = vrot.slane %v3659_v27, 2 }
  0x35   : > { %6487 = vst [vmem:[#allocation36_spill] sm:$0xff] %v3953_v61  ;;  %v3512_v43 = vpack.i.bf16 %v3953_v61, %v3953_v61 }
  0x36   : > { %623 = vrot.lane.b32.xlu1 %v3828_v22, %s3552_s8  ;;  %625 = vrot.lane.b32.xlu0 %v3836_v25, %s3552_s8  ;;  %v695_v2 = vsel %vm691_vm1, %v3953_v61, %v3956_v63  ;;  %v3980_v61 = vrot.slane %v3663_v29, 2 }
  0x3a   : > { %627 = vrot.lane.b32.xlu1 %v3858_v57, %s3552_s8  ;;  %629 = vrot.lane.b32.xlu0 %v3861_v59, %s3552_s8 }
  0x3e   : > { %631 = vrot.lane.b32.xlu1 %v3873_v5, %s3552_s8  ;;  %633 = vrot.lane.b32.xlu0 %v3876_v8, %s3552_s8 }
  0x42   : > { %635 = vrot.lane.b32.xlu1 %v3887_v21, %s3552_s8  ;;  %637 = vrot.lane.b32.xlu0 %v3890_v23, %s3552_s8 }
  0x46   : > { %639 = vrot.lane.b32.xlu1 %v3898_v36, %s3552_s8  ;;  %641 = vrot.lane.b32.xlu0 %v3903_v40, %s3552_s8 }
  0x4a   : > { %788 = vrot.lane.b32.xlu1 %v3915_v56, %s3553_s12  ;;  %790 = vrot.lane.b32.xlu0 %v3918_v60, %s3553_s12  ;;  %v697_v60 = vsel %vm691_vm1, %v3956_v63, %v696_v1 }
  0x4e   : > { %792 = vrot.lane.b32.xlu1 %v3927_v11, %s3553_s12  ;;  %794 = vrot.lane.b32.xlu0 %v3930_v18, %s3553_s12 }
  0x52   : > { %796 = vrot.lane.b32.xlu1 %v3939_v30, %s3553_s12  ;;  %798 = vrot.lane.b32.xlu0 %v3942_v0, %s3553_s12 }
  0x56   : > { %888 = vrot.lane.b32.xlu1 %v3794_v53, %s3554_s13  ;;  %890 = vrot.lane.b32.xlu0 %v3821_v16, %s3554_s13 }
  0x5a   : > { %892 = vrot.lane.b32.xlu1 %v3823_v17, %s3554_s13  ;;  %894 = vrot.lane.b32.xlu0 %v3838_v26, %s3554_s13 }
  0x5e   : > { %3513 = vrot.lane.b32.xlu1 %v3512_v43, %s3553_s12  ;;  %760 = vrot.lane.b32.xlu0 %v695_v2, %s3553_s12  ;;  %v699_v2 = vsel %vm691_vm1, %v696_v1, %v3980_v61  ;;  %v6361_v43 = vrot.slane %v3666_v31, 2 }
  0x62   : > { %762 = vrot.lane.b32.xlu1 %v697_v60, %s3553_s12  ;;  %896 = vrot.lane.b32.xlu0 %v3844_v42, %s3554_s13 }
  0x66   : > { %898 = vrot.lane.b32.xlu1 %v3852_v50, %s3554_s13  ;;  %991 = vrot.lane.b32.xlu0 %v3858_v57, %s3555_s14  ;;  %v3996_v57 = vsel %vm691_vm1, %v3980_v61, %v6361_v43  ;;  %v734_v43 = vrot.slane %v3852_v50, 2 }
  0x6a   : > { %993 = vrot.lane.b32.xlu1 %v3861_v59, %s3555_s14  ;;  %995 = vrot.lane.b32.xlu0 %v3873_v5, %s3555_s14  ;;  %v4038_v59 = vsel %vm691_vm1, %v732_v41, %v734_v43 }
  0x6e   : > { %997 = vrot.lane.b32.xlu1 %v3876_v8, %s3555_s14  ;;  %764 = vrot.lane.b32.xlu0 %v699_v2, %s3553_s12 }
  0x72   : > { %766 = vrot.lane.b32.xlu1 %v3996_v57, %s3553_s12  ;;  %856 = vrot.lane.b32.xlu0 %v6486_v45, %s3554_s13  ;;  %v6372_v45 = vrot.slane %v3854_v54, 2 }
  0x76   : > { %858 = vrot.lane.b32.xlu1 %v3659_v27, %s3554_s13  ;;  %860 = vrot.lane.b32.xlu0 %v3661_v28, %s3554_s13 }
  0x7a   : > { %862 = vrot.lane.b32.xlu1 %v3663_v29, %s3554_s13  ;;  %999 = vrot.lane.b32.xlu0 %v3887_v21, %s3555_s14 }
  0x7e   : > { %1001 = vrot.lane.b32.xlu1 %v3890_v23, %s3555_s14  ;;  %1093 = vrot.lane.b32.xlu0 %v3927_v11, %s3556_s15 }
  0x82   : > { %1095 = vrot.lane.b32.xlu1 %v3930_v18, %s3556_s15  ;;  %1097 = vrot.lane.b32.xlu0 %v3939_v30, %s3556_s15  ;;  %v4022_v1 = vpop.permute.xlu0 %3508 }
  0x86   : > { %1099 = vrot.lane.b32.xlu1 %v3942_v0, %s3556_s15  ;;  %864 = vrot.lane.b32.xlu0 %v3666_v31, %s3554_s13 }
  0x8a   : > { %866 = vrot.lane.b32.xlu1 %v3668_v32, %s3554_s13  ;;  %959 = vrot.lane.b32.xlu0 %v3674_v35, %s3555_s14 }
  0x8c   : > { %v4029_v18 = vpop.permute.xlu1 %597  ;;  %v4031_v11 = vpop.permute.xlu0 %595 }
  0x8e   : > { %961 = vrot.lane.b32.xlu1 %v3688_v44, %s3555_s14  ;;  %963 = vrot.lane.b32.xlu0 %v3702_v49, %s3555_s14  ;;  %v4052_v44 = vsel %vm691_vm1, %v734_v43, %v6372_v45 }
  0x90   : > { %v4041_v56 = vpop.permute.xlu1 %599  ;;  %v4043_v35 = vpop.permute.xlu0 %601 }
  0x92   : > { %965 = vrot.lane.b32.xlu1 %v3709_v52, %s3555_s14  ;;  %1101 = vrot.lane.b32.xlu0 %v4038_v59, %s3556_s15 }
  0x94   : > { %v4054_v49 = vpop.permute.xlu1 %603  ;;  %v4056_v41 = vpop.permute.xlu0 %605 }
  0x95   : > { %6488 = vst [vmem:[#allocation37_spill] sm:$0xff] %v4054_v49  ;;  %6489 = vst [vmem:[#allocation38_spill] sm:$0xff] %v4056_v41 }
  0x96   : > { %1103 = vrot.lane.b32.xlu1 %v4052_v44, %s3556_s15  ;;  %1192 = vrot.lane.b32.xlu0 %v3823_v17, %s3557_s16 }
  0x98   : > { %v4062_v25 = vpop.permute.xlu1 %607  ;;  %v4064_v22 = vpop.permute.xlu0 %609 }
  0x99   : > { %6490 = vst [vmem:[#allocation39_spill] sm:$0xff] %v4062_v25  ;;  %6491 = vst [vmem:[#allocation40_spill] sm:$0xff] %v4064_v22 }
  0x9a   : > { %1194 = vrot.lane.b32.xlu1 %v3838_v26, %s3557_s16  ;;  %1196 = vrot.lane.b32.xlu0 %v3844_v42, %s3557_s16 }
  0x9c   : > { %v4070_v43 = vpop.permute.xlu1 %611  ;;  %v4072_v45 = vpop.permute.xlu0 %613 }
  0x9d   : > { %6492 = vst [vmem:[#allocation41_spill] sm:$0xff] %v4070_v43  ;;  %6493 = vst [vmem:[#allocation42_spill] sm:$0xff] %v4072_v45 }
  0x9e   : > { %1198 = vrot.lane.b32.xlu1 %v3852_v50, %s3557_s16  ;;  %967 = vrot.lane.b32.xlu0 %v3717_v58, %s3555_s14  ;;  %v6375_v50 = vrot.slane %v3670_v33, 2 }
  0xa0   : > { %v4078_v41 = vpop.permute.xlu1 %615  ;;  %v4080_v25 = vpop.permute.xlu0 %617 }
  0xa1   : > { %6494 = vst [vmem:[#allocation43_spill] sm:$0xff] %v4078_v41  ;;  %6495 = vst [vmem:[#allocation44_spill] sm:$0xff] %v4080_v25 }
  0xa2   : > { %969 = vrot.lane.b32.xlu1 %v3731_v7, %s3555_s14  ;;  %1061 = vrot.lane.b32.xlu0 %v3956_v63, %s3556_s15 }
  0xa4   : > { %v4086_v22 = vpop.permute.xlu1 %619  ;;  %v4088_v43 = vpop.permute.xlu0 %621 }
  0xa5   : > { %6496 = vst [vmem:[#allocation45_spill] sm:$0xff] %v4086_v22  ;;  %6497 = vst [vmem:[#allocation46_spill] sm:$0xff] %v4088_v43  ;;  %v6498_v22 = vrot.slane %v3666_v31, 2 }
  0xa6   : > { %1063 = vrot.lane.b32.xlu1 %v697_v60, %s3556_s15  ;;  %1065 = vrot.lane.b32.xlu0 %v699_v2, %s3556_s15  ;;  %v702_v60 = vrot.slane %v3668_v32, 2 }
  0xa8   : > { %v4092_v45 = vpop.permute.xlu1 %623  ;;  %v4094_v49 = vpop.permute.xlu0 %625  ;;  %v4120_v41 = vsel %vm691_vm1, %v6498_v22, %v702_v60 }
  0xaa   : > { %1067 = vrot.lane.b32.xlu1 %v3996_v57, %s3556_s15  ;;  %1200 = vrot.lane.b32.xlu0 %v3854_v54, %s3557_s16 }
  0xac   : > { %v4100_v25 = vpop.permute.xlu1 %627  ;;  %v4102_v63 = vpop.permute.xlu0 %629 }
  0xae   : > { %1202 = vrot.lane.b32.xlu1 %v3870_v6, %s3557_s16  ;;  %1289 = vrot.lane.b32.xlu0 %v3873_v5, %s3558_s17 }
  0xb0   : > { %v4109_v2 = vpop.permute.xlu1 %631  ;;  %v4111_v43 = vpop.permute.xlu0 %633 }
  0xb2   : > { %1291 = vrot.lane.b32.xlu1 %v3876_v8, %s3558_s17  ;;  %1293 = vrot.lane.b32.xlu0 %v3887_v21, %s3558_s17  ;;  %v4134_v8 = vsel %vm691_vm1, %v702_v60, %v6375_v50 }
  0xb4   : > { %v4123_v5 = vpop.permute.xlu1 %635  ;;  %v4125_v42 = vpop.permute.xlu0 %637 }
  0xb5   : > { %6499 = vst [vmem:[#allocation47_spill] sm:$0xff] %v4123_v5  ;;  %6500 = vst [vmem:[#allocation48_spill] sm:$0xff] %v4125_v42 }
  0xb6   : > { %1295 = vrot.lane.b32.xlu1 %v3890_v23, %s3558_s17  ;;  %1069 = vrot.lane.b32.xlu0 %v4120_v41, %s3556_s15 }
  0xb8   : > { %v4136_v21 = vpop.permute.xlu1 %639  ;;  %v4138_v22 = vpop.permute.xlu0 %641 }
  0xb9   : > { %6501 = vst [vmem:[#allocation49_spill] sm:$0xff] %v4136_v21  ;;  %6502 = vst [vmem:[#allocation50_spill] sm:$0xff] %v4138_v22  ;;  %v4163_v22 = vld [vmem:[%s6345_s3 + $0x38] sm:$0xff]  }
  0xba   : > { %1071 = vrot.lane.b32.xlu1 %v4134_v8, %s3556_s15  ;;  %1160 = vrot.lane.b32.xlu0 %v3661_v28, %s3557_s16  ;;  %6503 = vst [vmem:[#allocation51_spill] sm:$0xff] %v4163_v22 }
  0xbb   : > { %3474 = vmatprep.subr.bf16.mxu1 %v4163_v22  ;;  %3330 = vmatprep.subr.bf16.mxu0 %v4163_v22 }
  0xbc   : > { %v4144_v42 = vpop.permute.xlu1 %788  ;;  %v4146_v23 = vpop.permute.xlu0 %790  ;;  %3482 = vmatpush3.bf16.msra.mxu1 %v4163_v22  ;;  %3331 = vmatpush3.bf16.msra.mxu0 %v4163_v22 }
  0xbe   : > { %1162 = vrot.lane.b32.xlu1 %v3663_v29, %s3557_s16  ;;  %1164 = vrot.lane.b32.xlu0 %v3666_v31, %s3557_s16 }
  0xc0   : > { %v4152_v60 = vpop.permute.xlu1 %792  ;;  %v4154_v50 = vpop.permute.xlu0 %794 }
  0xc2   : > { %1166 = vrot.lane.b32.xlu1 %v3668_v32, %s3557_s16  ;;  %1297 = vrot.lane.b32.xlu0 %v3898_v36, %s3558_s17  ;;  %v4180_v32 = vld [vmem:[%s6345_s3 + $0x30] sm:$0xff]  }
  0xc3   : > { %6506 = vst [vmem:[#allocation54_spill] sm:$0xff] %v4180_v32  ;;  %3475 = vmatprep.subr.bf16.mxu1 %v4180_v32  ;;  %3332 = vmatprep.subr.bf16.mxu0 %v4180_v32 }
  0xc4   : > { %v4165_v21 = vpop.permute.xlu1 %796  ;;  %v4167_v5 = vpop.permute.xlu0 %798  ;;  %3483 = vmatpush3.bf16.msra.mxu1 %v4180_v32  ;;  %3333 = vmatpush3.bf16.msra.mxu0 %v4180_v32 }
  0xc5   : > { %6504 = vst [vmem:[#allocation52_spill] sm:$0xff] %v4165_v21  ;;  %6505 = vst [vmem:[#allocation53_spill] sm:$0xff] %v4167_v5  ;;  %v380_v21 = vld [vmem:[%s3635_s11 + $0xc8] sm:$0xff] }
  0xc6   : > { %1299 = vrot.lane.b32.xlu1 %v3903_v40, %s3558_s17  ;;  %1388 = vrot.lane.b32.xlu0 %v3939_v30, %s3559_s20  ;;  %v4196_v30 = vld [vmem:[%s6345_s3 + $0x28] sm:$0xff]  }
  0xc7   : > { %6507 = vst [vmem:[#allocation55_spill] sm:$0xff] %v4196_v30  ;;  %3476 = vmatprep.subr.bf16.mxu1 %v4196_v30  ;;  %3334 = vmatprep.subr.bf16.mxu0 %v4196_v30 }
  0xc8   : > { %v4182_v31 = vpop.permute.xlu1 %888  ;;  %v4184_v13 = vpop.permute.xlu0 %890  ;;  %3484 = vmatpush3.bf16.msra.mxu1 %v4196_v30  ;;  %3335 = vmatpush3.bf16.msra.mxu0 %v4196_v30  ;;  %v4231_v30 = vld [vmem:[%s6345_s3 + $0x18] sm:$0xff]  }
  0xc9   : > { %6511 = vst [vmem:[#allocation59_spill] sm:$0xff] %v4231_v30 }
  0xca   : > { %1390 = vrot.lane.b32.xlu1 %v3942_v0, %s3559_s20  ;;  %1392 = vrot.lane.b32.xlu0 %v4038_v59, %s3559_s20  ;;  %v4213_v0 = vld [vmem:[%s6345_s3 + $0x20] sm:$0xff]  }
  0xcb   : > { %6508 = vst [vmem:[#allocation56_spill] sm:$0xff] %v4213_v0  ;;  %3477 = vmatprep.subr.bf16.mxu1 %v4213_v0  ;;  %3336 = vmatprep.subr.bf16.mxu0 %v4213_v0 }
  0xcc   : > { %v4199_v62 = vpop.permute.xlu1 %892  ;;  %v4201_v24 = vpop.permute.xlu0 %894  ;;  %3485 = vmatpush3.bf16.msra.mxu1 %v4213_v0  ;;  %3337 = vmatpush3.bf16.msra.mxu0 %v4213_v0  ;;  %v6400_v0 = vrot.slane %v3879_v12, 2 }
  0xcd   : > { %3478 = vmatprep.subr.bf16.mxu1 %v4231_v30  ;;  %3338 = vmatprep.subr.bf16.mxu0 %v4231_v30 }
  0xce   : > { %1394 = vrot.lane.b32.xlu1 %v4052_v44, %s3559_s20  ;;  %1168 = vrot.lane.b32.xlu0 %v3670_v33, %s3557_s16 }
  0xd0   : > { %v4216_v15 = vpop.permute.xlu1 %3513  ;;  %v4218_v32 = vpop.permute.xlu0 %760  ;;  %3486 = vmatpush3.bf16.msra.mxu1 %v4231_v30  ;;  %3339 = vmatpush3.bf16.msra.mxu0 %v4231_v30 }
  0xd1   : > { %6509 = vst [vmem:[#allocation57_spill] sm:$0xff] %v4216_v15  ;;  %6510 = vst [vmem:[#allocation58_spill] sm:$0xff] %v4218_v32 }
  0xd2   : > { %1170 = vrot.lane.b32.xlu1 %v3694_v47, %s3557_s16  ;;  %1257 = vrot.lane.b32.xlu0 %v3678_v37, %s3558_s17  ;;  %v6514_v37 = vrot.slane %v3854_v54, 2 }
  0xd4   : > { %v4234_v48 = vpop.permute.xlu1 %762  ;;  %v4236_v14 = vpop.permute.xlu0 %896  ;;  %v4247_v32 = vsel %vm691_vm1, %v6514_v37, %v738_v55  ;;  %v4276_v37 = vld [vmem:[%s6345_s3 + $0x8] sm:$0xff]  }
  0xd5   : > { %6512 = vst [vmem:[#allocation60_spill] sm:$0xff] %v4234_v48  ;;  %6513 = vst [vmem:[#allocation61_spill] sm:$0xff] %v4236_v14  ;;  %v4254_v48 = vld [vmem:[%s6345_s3 + $0x10] sm:$0xff]  }
  0xd6   : > { %1259 = vrot.lane.b32.xlu1 %v3709_v52, %s3558_s17  ;;  %1261 = vrot.lane.b32.xlu0 %v3717_v58, %s3558_s17  ;;  %6515 = vst [vmem:[#allocation62_spill] sm:$0xff] %v4254_v48  ;;  %v4270_v58 = vsel %vm691_vm1, %v738_v55, %v6400_v0  ;;  %6517 = vst [vmem:[#allocation64_spill] sm:$0xff] %v4276_v37  ;;  %v4293_v55 = vld [vmem:[%s6345_s3] sm:$0xff]  }
  0xd7   : > { %3479 = vmatprep.subr.bf16.mxu1 %v4254_v48  ;;  %3340 = vmatprep.subr.bf16.mxu0 %v4254_v48  ;;  %6518 = vst [vmem:[#allocation65_spill] sm:$0xff] %v4293_v55 }
  0xd8   : > { %v4257_v52 = vpop.permute.xlu1 %898  ;;  %v4259_v14 = vpop.permute.xlu0 %991  ;;  %3487 = vmatpush3.bf16.msra.mxu1 %v4254_v48  ;;  %3341 = vmatpush3.bf16.msra.mxu0 %v4254_v48 }
  0xd9   : > { %6516 = vst [vmem:[#allocation63_spill] sm:$0xff] %v4257_v52  ;;  %3480 = vmatprep.subr.bf16.mxu1 %v4276_v37  ;;  %3342 = vmatprep.subr.bf16.mxu0 %v4276_v37 }
  0xda   : > { %1263 = vrot.lane.b32.xlu1 %v3731_v7, %s3558_s17  ;;  %1396 = vrot.lane.b32.xlu0 %v4247_v32, %s3559_s20 }
  0xdc   : > { %v4279_v30 = vpop.permute.xlu1 %993  ;;  %v4281_v7 = vpop.permute.xlu0 %995  ;;  %3488 = vmatpush3.bf16.msra.mxu1 %v4276_v37  ;;  %3343 = vmatpush3.bf16.msra.mxu0 %v4276_v37 }
  0xdd   : > { %3481 = vmatprep.subr.bf16.mxu1 %v4293_v55  ;;  %3344 = vmatprep.subr.bf16.mxu0 %v4293_v55 }
  0xde   : > { %1398 = vrot.lane.b32.xlu1 %v4270_v58, %s3559_s20  ;;  %800 = vrot.lane.b32.xlu0 %v4038_v59, %s3553_s12 }
  0xe0   : > { %v4296_v0 = vpop.permute.xlu1 %997  ;;  %v4298_v48 = vpop.permute.xlu0 %764  ;;  %3489 = vmatpush3.bf16.msra.mxu1 %v4293_v55  ;;  %3345 = vmatpush3.bf16.msra.mxu0 %v4293_v55 }
  0xe1   : > { %6519 = vst [vmem:[#allocation66_spill] sm:$0xff] %v4298_v48  ;;  %3378 = vmatprep.subr.bf16.mxu1 %v4163_v22 }
  0xe2   : > { %802 = vrot.lane.b32.xlu1 %v4052_v44, %s3553_s12  ;;  %1265 = vrot.lane.b32.xlu0 %v3753_v19, %s3558_s17 }
  0xe4   : > { %v4308_v59 = vpop.permute.xlu1 %766  ;;  %v4310_v37 = vpop.permute.xlu0 %856 }
  0xe5   : > { %6520 = vst [vmem:[#allocation67_spill] sm:$0xff] %v4308_v59  ;;  %6521 = vst [vmem:[#allocation68_spill] sm:$0xff] %v4310_v37  ;;  %v379_v37 = vld [vmem:[%s3635_s11 + $0xc0] sm:$0xff] }
  0xe6   : > { %1267 = vrot.lane.b32.xlu1 %v3756_v20, %s3558_s17  ;;  %1356 = vrot.lane.b32.xlu0 %v3980_v61, %s3559_s20  ;;  %v706_v61 = vrot.slane %v3694_v47, 2 }
  0xe8   : > { %v4317_v44 = vpop.permute.xlu1 %858  ;;  %v4319_v48 = vpop.permute.xlu0 %860 }
  0xe9   : > { %6522 = vst [vmem:[#allocation69_spill] sm:$0xff] %v4317_v44  ;;  %6523 = vst [vmem:[#allocation70_spill] sm:$0xff] %v4319_v48  ;;  %v6408_v44 = vrot.slane %v3705_v51, 2 }
  0xea   : > { %1358 = vrot.lane.b32.xlu1 %v3996_v57, %s3559_s20  ;;  %1360 = vrot.lane.b32.xlu0 %v4120_v41, %s3559_s20  ;;  %v6527_v57 = vrot.slane %v3670_v33, 2 }
  0xec   : > { %v4325_v55 = vpop.permute.xlu1 %862  ;;  %v4327_v22 = vpop.permute.xlu0 %999 }
  0xed   : > { %6524 = vst [vmem:[#allocation71_spill] sm:$0xff] %v4325_v55  ;;  %6525 = vst [vmem:[#allocation72_spill] sm:$0xff] %v4327_v22  ;;  %v4345_v55 = vsel %vm691_vm1, %v6527_v57, %v706_v61  ;;  %v4361_v57 = vsel %vm691_vm1, %v706_v61, %v6408_v44  ;;  %v419_v44 = vmul.f32 %v3620_v3, %v380_v21 }
  0xee   : > { %1362 = vrot.lane.b32.xlu1 %v4134_v8, %s3559_s20  ;;  %804 = vrot.lane.b32.xlu0 %v4247_v32, %s3553_s12 }
  0xf0   : > { %v4334_v59 = vpop.permute.xlu1 %1001  ;;  %v4336_v48 = vpop.permute.xlu0 %1093 }
  0xf1   : > { %6526 = vst [vmem:[#allocation73_spill] sm:$0xff] %v4334_v59 }
  0xf2   : > { %806 = vrot.lane.b32.xlu1 %v4270_v58, %s3553_s12  ;;  %900 = vrot.lane.b32.xlu0 %v3854_v54, %s3554_s13  ;;  %v418_v54 = vmul.f32 %v3620_v3, %v379_v37 }
  0xf4   : > { %v4349_v52 = vpop.permute.xlu1 %1095  ;;  %v4351_v59 = vpop.permute.xlu0 %1097 }
  0xf6   : > { %902 = vrot.lane.b32.xlu1 %v3870_v6, %s3554_s13  ;;  %1364 = vrot.lane.b32.xlu0 %v4345_v55, %s3559_s20  ;;  %v457_v6 = vadd.f32 %v3626_v4, %v418_v54  ;;  %v458_v54 = vadd.f32 %v3626_v4, %v419_v44 }
  0xf8   : > { %v4363_v22 = vpop.permute.xlu1 %1099  ;;  %v4365_v15 = vpop.permute.xlu0 %864  ;;  %v4381_v61 = vmax.f32 %v457_v6, 0.0  ;;  %v4402_v21 = vmax.f32 %v458_v54, 0.0 }
  0xf9   : > { %6528 = vst [vmem:[#allocation74_spill] sm:$0xff] %v4365_v15 }
  0xfa   : > { %1366 = vrot.lane.b32.xlu1 %v4361_v57, %s3559_s20  ;;  %768 = vrot.lane.b32.xlu0 %v4120_v41, %s3553_s12  ;;  %6531 = vst [vmem:[#allocation77_spill] sm:$0xff] %v4381_v61  ;;  %v579_v6 = vrot.slane %v4381_v61, 1  ;;  %6536 = vst [vmem:[#allocation82_spill] sm:$0xff] %v4402_v21  ;;  %v6411_v44 = vrot.slane %v4402_v21, 1 }
  0xfc   : > { %v4372_v5 = vpop.permute.xlu1 %866  ;;  %v4374_v37 = vpop.permute.xlu0 %959 }
  0xfd   : > { %6529 = vst [vmem:[#allocation75_spill] sm:$0xff] %v4372_v5  ;;  %6530 = vst [vmem:[#allocation76_spill] sm:$0xff] %v4374_v37 }
  0xfe   : > { %770 = vrot.lane.b32.xlu1 %v4134_v8, %s3553_s12  ;;  %904 = vrot.lane.b32.xlu0 %v3879_v12, %s3554_s13 }
 0x100   : > { %v4384_v15 = vpop.permute.xlu1 %961  ;;  %v4386_v41 = vpop.permute.xlu0 %963 }
 0x101   : > { %6532 = vst [vmem:[#allocation78_spill] sm:$0xff] %v4384_v15  ;;  %6533 = vst [vmem:[#allocation79_spill] sm:$0xff] %v4386_v41 }
 0x102   : > { %906 = vrot.lane.b32.xlu1 %v4381_v61, %s3554_s13  ;;  %1003 = vrot.lane.b32.xlu0 %v3898_v36, %s3555_s14  ;;  %v6538_v36 = vrot.slane %v3879_v12, 1 }
 0x104   : > { %v4393_v8 = vpop.permute.xlu1 %965  ;;  %v4395_v5 = vpop.permute.xlu0 %1101 }
 0x105   : > { %6534 = vst [vmem:[#allocation80_spill] sm:$0xff] %v4393_v8  ;;  %6535 = vst [vmem:[#allocation81_spill] sm:$0xff] %v4395_v5 }
 0x106   : > { %1005 = vrot.lane.b32.xlu1 %v3903_v40, %s3555_s14  ;;  %772 = vrot.lane.b32.xlu0 %v4345_v55, %s3553_s12  ;;  %v4415_v40 = vsel %vm528_vm0, %v6538_v36, %v579_v6 }
 0x108   : > { %v4404_v41 = vpop.permute.xlu1 %1103  ;;  %v4406_v15 = vpop.permute.xlu0 %1192 }
 0x109   : > { %6537 = vst [vmem:[#allocation83_spill] sm:$0xff] %v4404_v41 }
 0x10a   : > { %774 = vrot.lane.b32.xlu1 %v4361_v57, %s3553_s12  ;;  %868 = vrot.lane.b32.xlu0 %v3670_v33, %s3554_s13  ;;  %v4429_v33 = vsel %vm528_vm0, %v579_v6, %v6411_v44  ;;  %v742_v6 = vrot.slane %v4381_v61, 2 }
 0x10c   : > { %v4418_v8 = vpop.permute.xlu1 %1194  ;;  %v4420_v54 = vpop.permute.xlu0 %1196 }
 0x10e   : > { %870 = vrot.lane.b32.xlu1 %v3694_v47, %s3554_s13  ;;  %1007 = vrot.lane.b32.xlu0 %v4415_v40, %s3555_s14 }
 0x110   : > { %v4431_v37 = vpop.permute.xlu1 %1198  ;;  %v4433_v36 = vpop.permute.xlu0 %967 }
 0x111   : > { %6539 = vst [vmem:[#allocation84_spill] sm:$0xff] %v4433_v36 }
 0x112   : > { %1009 = vrot.lane.b32.xlu1 %v4429_v33, %s3555_s14  ;;  %1105 = vrot.lane.b32.xlu0 %v4247_v32, %s3556_s15  ;;  %v6544_v32 = vrot.slane %v3879_v12, 2 }
 0x114   : > { %v4439_v41 = vpop.permute.xlu1 %969  ;;  %v4441_v47 = vpop.permute.xlu0 %1061 }
 0x115   : > { %6540 = vst [vmem:[#allocation85_spill] sm:$0xff] %v4439_v41  ;;  %6541 = vst [vmem:[#allocation86_spill] sm:$0xff] %v4441_v47  ;;  %v6412_v41 = vrot.slane %v4402_v21, 2 }
 0x116   : > { %1107 = vrot.lane.b32.xlu1 %v4270_v58, %s3556_s15  ;;  %872 = vrot.lane.b32.xlu0 %v3705_v51, %s3554_s13  ;;  %v4459_v58 = vsel %vm691_vm1, %v6544_v32, %v742_v6 }
 0x118   : > { %v4448_v44 = vpop.permute.xlu1 %1063  ;;  %v4450_v36 = vpop.permute.xlu0 %1065 }
 0x119   : > { %6542 = vst [vmem:[#allocation87_spill] sm:$0xff] %v4448_v44  ;;  %6543 = vst [vmem:[#allocation88_spill] sm:$0xff] %v4450_v36 }
 0x11a   : > { %874 = vrot.lane.b32.xlu1 %v3734_v9, %s3554_s13  ;;  %971 = vrot.lane.b32.xlu0 %v3753_v19, %s3555_s14  ;;  %v4473_v19 = vsel %vm691_vm1, %v742_v6, %v6412_v41 }
 0x11b   : > { %6547 = vst [vmem:[#allocation91_spill] sm:$0xff] %v4473_v19 }
 0x11c   : > { %v4462_v47 = vpop.permute.xlu1 %1067  ;;  %v4464_v5 = vpop.permute.xlu0 %1200 }
 0x11d   : > { %6545 = vst [vmem:[#allocation89_spill] sm:$0xff] %v4462_v47  ;;  %6546 = vst [vmem:[#allocation90_spill] sm:$0xff] %v4464_v5 }
 0x11e   : > { %973 = vrot.lane.b32.xlu1 %v3756_v20, %s3555_s14  ;;  %1109 = vrot.lane.b32.xlu0 %v4459_v58, %s3556_s15  ;;  %v381_v20 = vld [vmem:[%s3635_s11 + $0xd0] sm:$0xff] }
 0x11f   : > { %v420_v6 = vmul.f32 %v3620_v3, %v381_v20  ;;  %v307_v20 = vld [vmem:[%s6347_s5 + $0x80] sm:$0xff] }
 0x120   : > { %v4475_v36 = vpop.permute.xlu1 %1202  ;;  %v4477_v32 = vpop.permute.xlu0 %1289 }
 0x121   : > { %6548 = vst [vmem:[#allocation92_spill] sm:$0xff] %v4475_v36 }
 0x122   : > { %1111 = vrot.lane.b32.xlu1 %v4473_v19, %s3556_s15  ;;  %1204 = vrot.lane.b32.xlu0 %v3879_v12, %s3557_s16  ;;  %v459_v12 = vadd.f32 %v3626_v4, %v420_v6  ;;  %v382_v19 = vld [vmem:[%s3635_s11 + $0xd8] sm:$0xff] }
 0x123   : > { %v4518_v4 = vld [vmem:[%s6347_s5 + $0x78] sm:$0xff] }
 0x124   : > { %v4484_v47 = vpop.permute.xlu1 %1291  ;;  %v4486_v44 = vpop.permute.xlu0 %1293  ;;  %v4512_v3 = vmax.f32 %v459_v12, 0.0  ;;  %6553 = vst [vmem:[#allocation97_spill] sm:$0xff] %v4518_v4 }
 0x126   : > { %1206 = vrot.lane.b32.xlu1 %v4381_v61, %s3557_s16  ;;  %975 = vrot.lane.b32.xlu0 %v3774_v38, %s3555_s14  ;;  %v3511_v38 = vunpack.i.h.bf16 %v4022_v1  ;;  %6552 = vst [vmem:[#allocation96_spill] sm:$0xff] %v4512_v3 }
 0x128   : > { %v4493_v41 = vpop.permute.xlu1 %1295  ;;  %v4495_v36 = vpop.permute.xlu0 %1069 }
 0x129   : > { %6549 = vst [vmem:[#allocation93_spill] sm:$0xff] %v4495_v36  ;;  %v4534_v36 = vsel %vm1452_vm2, 0.0, %v3511_v38 }
 0x12a   : > { %977 = vrot.lane.b32.xlu1 %v3777_v39, %s3555_s14  ;;  %1073 = vrot.lane.b32.xlu0 %v4345_v55, %s3556_s15  ;;  %v710_v55 = vrot.slane %v3734_v9, 2  ;;  %6557 = vst [vmem:[#allocation101_spill] sm:$0xff] %v4534_v36  ;;  %v1469_v39 = vsel %vm1452_vm2, %v3770_v34, %v4092_v45  ;;  %v308_v45 = vld [vmem:[%s6347_s5 + $0x88] sm:$0xff] }
 0x12c   : > { %v4502_v5 = vpop.permute.xlu1 %1071  ;;  %v4504_v61 = vpop.permute.xlu0 %1160 }
 0x12d   : > { %6550 = vst [vmem:[#allocation94_spill] sm:$0xff] %v4502_v5  ;;  %6551 = vst [vmem:[#allocation95_spill] sm:$0xff] %v4504_v61  ;;  %v1503_v61 = vsel %vm1486_vm3, %v1469_v39, %v4144_v42  ;;  %v1470_v39 = vsel %vm1452_vm2, %v3784_v46, %v4094_v49  ;;  %v1471_v42 = vsel %vm1452_vm2, %v3794_v53, %v4100_v25  ;;  %v309_v25 = vld [vmem:[%s6347_s5 + $0x90] sm:$0xff]  ;;  %v583_v49 = vrot.slane %v4512_v3, 1 }
 0x12e   : > { %1075 = vrot.lane.b32.xlu1 %v4361_v57, %s3556_s15  ;;  %1208 = vrot.lane.b32.xlu0 %v4402_v21, %s3557_s16  ;;  %v4526_v57 = vld [vmem:[%s6343_s1] ss:$0 sm:$0xff]  ;;  %v1537_v38 = vsel %vm1520_vm4, %v1503_v61, %v4182_v31  ;;  %v6559_v31 = vrot.slane %v4518_v4, 1  ;;  %v6560_v61 = vrot.slane %v3736_v10, 2  ;;  %v1504_v53 = vsel %vm1486_vm3, %v1470_v39, %v4146_v23  ;;  %v4606_v4 = vld [vmem:[%s6347_s5 + $0x98] sm:$0xff] }
 0x12f   : > { %6554 = vst [vmem:[#allocation98_spill] sm:$0xff] %v4526_v57  ;;  %v421_v6 = vmul.f32 %v4526_v57, %v382_v19  ;;  %v1821_v57 = vrot.slane %v307_v20, 1  ;;  %v4559_v19 = vld [vmem:[%s6344_s2] ss:$0 sm:$0xff] }
 0x130   : > { %v4529_v12 = vpop.permute.xlu1 %1162  ;;  %v4531_v5 = vpop.permute.xlu0 %1164 }
 0x131   : > { %6555 = vst [vmem:[#allocation99_spill] sm:$0xff] %v4529_v12  ;;  %6556 = vst [vmem:[#allocation100_spill] sm:$0xff] %v4531_v5  ;;  %v6558_v5 = vrot.slane %v3705_v51, 2  ;;  %v460_v20 = vadd.f32 %v4559_v19, %v421_v6  ;;  %v1571_v6 = vsel %vm1554_vm5, %v1537_v38, %v4259_v14  ;;  %v1822_v14 = vsel %vm528_vm0, %v6559_v31, %v1821_v57 }
 0x132   : > { %1210 = vrot.lane.b32.xlu1 %v4512_v3, %s3557_s16  ;;  %1301 = vrot.lane.b32.xlu0 %v4415_v40, %s3558_s17  ;;  %v4595_v38 = vsel %vm691_vm1, %v710_v55, %v6560_v61 }
 0x133   : > { %v4551_v12 = vsel %vm691_vm1, %v6558_v5, %v710_v55  ;;  %v1472_v5 = vsel %vm1452_vm2, %v3821_v16, %v4102_v63  ;;  %v1605_v63 = vsel %vm1588_vm6, %v1571_v6, %v4336_v48  ;;  %v1823_v16 = vrot.slane %v308_v45, 1 }
 0x134   : > { %v4573_v34 = vpop.permute.xlu1 %1166  ;;  %v4575_v36 = vpop.permute.xlu0 %1297  ;;  %v1505_v48 = vsel %vm1486_vm3, %v1471_v42, %v4152_v60  ;;  %v1639_v6 = vsel %vm1622_vm7, %v1605_v63, %v4406_v15  ;;  %v4608_v31 = vmax.f32 %v460_v20, 0.0  ;;  %v1538_v55 = vsel %vm1520_vm4, %v1504_v53, %v4184_v13 }
 0x135   : > { %v1539_v45 = vsel %vm1520_vm4, %v1505_v48, %v4199_v62  ;;  %v1673_v23 = vsel %vm1656_vm8, %v1639_v6, %v4477_v32  ;;  %v1825_v15 = vrot.slane %v309_v25, 1  ;;  %v1572_v42 = vsel %vm1554_vm5, %v1538_v55, %v4279_v30 }
 0x136   : > { %1303 = vrot.lane.b32.xlu1 %v4429_v33, %s3558_s17  ;;  %1077 = vrot.lane.b32.xlu0 %v4551_v12, %s3556_s15  ;;  %6561 = vst [vmem:[#allocation102_spill] sm:$0xff] %v4608_v31  ;;  %v1573_v20 = vsel %vm1554_vm5, %v1539_v45, %v4281_v7  ;;  %v6562_v53 = vrot.slane %v4402_v21, 1  ;;  %v1606_v62 = vsel %vm1588_vm6, %v1572_v42, %v4349_v52  ;;  %v1827_v7 = vrot.slane %v4606_v4, 1 }
 0x137   : > { %v1607_v32 = vsel %vm1588_vm6, %v1573_v20, %v4351_v59  ;;  %v1824_v30 = vsel %vm528_vm0, %v1821_v57, %v1823_v16  ;;  %v1506_v25 = vsel %vm1486_vm3, %v1472_v5, %v4154_v50  ;;  %v1640_v61 = vsel %vm1622_vm7, %v1606_v62, %v4418_v8 }
 0x138   : > { %v4616_v60 = vpop.permute.xlu1 %1299  ;;  %v1389_v39 = vpop.permute.xlu0 %1388  ;;  %v4626_v13 = vsel %vm528_vm0, %v6562_v53, %v583_v49  ;;  %v1641_v52 = vsel %vm1622_vm7, %v1607_v32, %v4420_v54  ;;  %v6428_v59 = vrot.slane %v4608_v31, 1  ;;  %v1540_v48 = vsel %vm1520_vm4, %v1506_v25, %v4201_v24 }
 0x139   : > { %v1707_v63 = vsel %vm1690_vm9, %v1673_v23, %v1389_v39  ;;  %v1674_v6 = vsel %vm1656_vm8, %v1640_v61, %v4484_v47  ;;  %v1675_v4 = vsel %vm1656_vm8, %v1641_v52, %v4486_v44  ;;  %v6563_v8 = vunpack.i.l.bf16 %v4022_v1  ;;  %v311_v47 = vld [vmem:[%s6347_s5 + $0xa0] sm:$0xff] }
 0x13a   : > { %1079 = vrot.lane.b32.xlu1 %v4595_v38, %s3556_s15  ;;  %1172 = vrot.lane.b32.xlu0 %v3705_v51, %s3557_s16  ;;  %v1741_v57 = vsel %vm1724_vm10, %v1707_v63, 0.0  ;;  %v1574_v54 = vsel %vm1554_vm5, %v1540_v48, %v4296_v0  ;;  %v4667_v44 = vsel %vm1452_vm2, %v3659_v27, %v4029_v18  ;;  %v1826_v0 = vsel %vm528_vm0, %v1823_v16, %v1825_v15  ;;  %v4687_v16 = vld [vmem:[%s6347_s5 + $0xa8] sm:$0xff] }
 0x13b   : > { %v4655_v55 = vsel %vm1452_vm2, 0.0, %v6563_v8  ;;  %v1608_v1 = vsel %vm1588_vm6, %v1574_v54, %v4363_v22  ;;  %v1902_v42 = vmul.f32 %v1822_v14, %v1741_v57  ;;  %v4682_v27 = vsel %vm528_vm0, %v583_v49, %v6428_v59 }
 0x13c   : > { %v1391_v50 = vpop.permute.xlu1 %1390  ;;  %v1393_v5 = vpop.permute.xlu0 %1392  ;;  %v1642_v39 = vsel %vm1622_vm7, %v1608_v1, %v4431_v37  ;;  %v1828_v63 = vsel %vm528_vm0, %v1825_v15, %v1827_v7  ;;  %v1829_v53 = vrot.slane %v311_v47, 1  ;;  %v1455_v49 = vsel %vm1452_vm2, 0.0, %v4031_v11  ;;  %v6568_v1 = vld [vmem:[#allocation91_spill] sm:$0xff] }
 0x13d   : > { %v1708_v24 = vsel %vm1690_vm9, %v1674_v6, %v1391_v50  ;;  %v1709_v45 = vsel %vm1690_vm9, %v1675_v4, %v1393_v5  ;;  %v1676_v18 = vsel %vm1656_vm8, %v1642_v39, %v4493_v41  ;;  %v4700_v62 = vsel %vm1452_vm2, %v3661_v28, %v4041_v56 }
 0x13e   : > { %v1742_v23 = vsel %vm1724_vm10, %v1708_v24, 0.0  ;;  %1174 = vrot.lane.b32.xlu1 %v3734_v9, %s3557_s16  ;;  %1305 = vrot.lane.b32.xlu0 %v4626_v13, %s3558_s17  ;;  %v1743_v22 = vsel %vm1724_vm10, %v1709_v45, 0.0  ;;  %v1473_v41 = vsel %vm1452_vm2, %v3823_v17, %v4109_v2  ;;  %v1474_v15 = vsel %vm1452_vm2, %v3838_v26, %v4111_v43  ;;  %v6564_v26 = vld [vmem:[#allocation52_spill] sm:$0xff]  ;;  %v6565_v2 = vld [vmem:[#allocation53_spill] sm:$0xff]  ;;  %v6567_v45 = vld [vmem:[#allocation58_spill] sm:$0xff] }
 0x13f   : > { %v1903_v20 = vmul.f32 %v1824_v30, %v1742_v23  ;;  %v6426_v28 = vrot.slane %v4687_v16, 1  ;;  %v1904_v61 = vmul.f32 %v1826_v0, %v1743_v22  ;;  %v4718_v17 = vsel %vm1452_vm2, %v3663_v29, %v4043_v35  ;;  %v6566_v29 = vld [vmem:[#allocation57_spill] sm:$0xff] }
 0x140   : > { %v1395_v37 = vpop.permute.xlu1 %1394  ;;  %v4693_v14 = vpop.permute.xlu0 %1168  ;;  %v1507_v43 = vsel %vm1486_vm3, %v1473_v41, %v6564_v26  ;;  %v1508_v48 = vsel %vm1486_vm3, %v1474_v15, %v6565_v2  ;;  %v4729_v57 = vsel %vm528_vm0, %v1827_v7, %v1829_v53  ;;  %v746_v54 = vrot.slane %v4512_v3, 2  ;;  %v6569_v23 = vld [vmem:[#allocation61_spill] sm:$0xff]  ;;  %v6573_v26 = vld [vmem:[#allocation63_spill] sm:$0xff]  ;;  %v6574_v2 = vld [vmem:[#allocation90_spill] sm:$0xff] }
 0x141   : > { %v1927_v32 = vpack.c.bf16 %v1903_v20, %v1902_v42  ;;  %v1710_v30 = vsel %vm1690_vm9, %v1676_v18, %v1395_v37  ;;  %v3516_v35 = vunpack.i.h.bf16 %v6566_v29  ;;  %v3515_v24 = vunpack.i.l.bf16 %v6566_v29  ;;  %v6570_v18 = vld [vmem:[#allocation72_spill] sm:$0xff]  ;;  %v6571_v41 = vld [vmem:[#allocation81_spill] sm:$0xff] }
 0x142   : > { %v1744_v25 = vsel %vm1724_vm10, %v1710_v30, 0.0  ;;  %1307 = vrot.lane.b32.xlu1 %v4682_v27, %s3558_s17  ;;  %1400 = vrot.lane.b32.xlu0 %v4459_v58, %s3559_s20  ;;  %v4736_v47 = vsel %vm1486_vm3, %v1455_v49, %v6567_v45  ;;  %v4745_v7 = vsel %vm528_vm0, %v1829_v53, %v6426_v28  ;;  %v1541_v0 = vsel %vm1520_vm4, %v1507_v43, %v6569_v23 }
 0x143   : > { %v1952_v56 = vunpack.c.l.bf16 %v1927_v32  ;;  %v1953_v11 = vunpack.c.h.bf16 %v1927_v32  ;;  %v1905_v52 = vmul.f32 %v1828_v63, %v1744_v25  ;;  %v1575_v22 = vsel %vm1554_vm5, %v1541_v0, %v6570_v18 }
 0x144   : > { %v4724_v6 = vpop.permute.xlu1 %1170  ;;  %v4726_v4 = vpop.permute.xlu0 %1257  ;;  %v2472_v49 = vshll.u32 %v1927_v32, 16  ;;  %v1609_v53 = vsel %vm1588_vm6, %v1575_v22, %v6571_v41  ;;  %v1542_v43 = vsel %vm1520_vm4, %v1508_v48, %v6573_v26  ;;  %v292_v48 = vld [vmem:[%s6347_s5 + $0x8] sm:$0xff] }
 0x145   : > { %v1985_v50 = vsub.f32 %v1902_v42, %v1952_v56  ;;  %v1986_v5 = vsub.f32 %v1903_v20, %v1953_v11  ;;  %v1928_v8 = vpack.c.bf16 %v1905_v52, %v1904_v61  ;;  %v6572_v56 = vrot.slane %v4402_v21, 2  ;;  %v6577_v26 = vld [vmem:[#allocation11_spill] sm:$0xff] }
 0x146   : > { %1402 = vrot.lane.b32.xlu1 %v6568_v1, %s3559_s20  ;;  %643 = vrot.lane.b32.xlu0 %v4415_v40, %s3552_s8  ;;  %v2469_v40 = vshrl.u32 %v1927_v32, 16  ;;  %v2474_v22 = vrot.slane %v2472_v49, 4  ;;  %v6579_v49 = vld [vmem:[#allocation92_spill] sm:$0xff] }
 0x147   : > { %v2010_v39 = vpack.c.bf16 %v1986_v5, %v1985_v50  ;;  %v1954_v42 = vunpack.c.l.bf16 %v1928_v8  ;;  %v1955_v20 = vunpack.c.h.bf16 %v1928_v8  ;;  %v2478_v30 = vshrl.u32 %v1928_v8, 16 }
 0x148   : > { %v4751_v63 = vpop.permute.xlu1 %1259  ;;  %v4753_v37 = vpop.permute.xlu0 %1261  ;;  %v4762_v11 = vsel %vm691_vm1, %v6572_v56, %v746_v54  ;;  %v1643_v50 = vsel %vm1622_vm7, %v1609_v53, %v6574_v2  ;;  %v2481_v0 = vshll.u32 %v1928_v8, 16  ;;  %v2471_v18 = vrot.slane %v2469_v40, 3  ;;  %v6576_v56 = vld [vmem:[#allocation83_spill] sm:$0xff] }
 0x149   : > { %v1987_v15 = vsub.f32 %v1904_v61, %v1954_v42  ;;  %v1988_v25 = vsub.f32 %v1905_v52, %v1955_v20  ;;  %v2092_v32 = vshrl.u32 %v2010_v39, 16  ;;  %v2095_v61 = vshll.u32 %v2010_v39, 16  ;;  %v6575_v52 = vld [vmem:[#allocation73_spill] sm:$0xff]  ;;  %v4784_v39 = vld [vmem:[%s6347_s5 + $0x10] sm:$0xff] }
 0x14a   : > { %645 = vrot.lane.b32.xlu1 %v4429_v33, %s3552_s8  ;;  %1176 = vrot.lane.b32.xlu0 %v3736_v10, %s3557_s16  ;;  %v1576_v5 = vsel %vm1554_vm5, %v1542_v43, %v6575_v52  ;;  %v1677_v45 = vsel %vm1656_vm8, %v1643_v50, %v4575_v36  ;;  %v2480_v41 = vrot.slane %v2478_v30, 3  ;;  %v6578_v43 = vld [vmem:[#allocation15_spill] sm:$0xff]  ;;  %v6427_v2 = vrot.slane %v4608_v31, 2  ;;  %v4799_v52 = vld [vmem:[%s6347_s5] sm:$0xff] }
 0x14b   : > { %v2011_v23 = vpack.c.bf16 %v1988_v25, %v1987_v15  ;;  %v2094_v20 = vrot.slane %v2092_v32, 3  ;;  %v2097_v53 = vrot.slane %v2095_v61, 4  ;;  %v1610_v8 = vsel %vm1588_vm6, %v1576_v5, %v6576_v56 }
 0x14c   : > { %v4779_v42 = vpop.permute.xlu1 %1263  ;;  %v1397_v33 = vpop.permute.xlu0 %1396  ;;  %v1791_v50 = vrot.slane %v292_v48, 1  ;;  %v2483_v40 = vrot.slane %v2481_v0, 4  ;;  %v1644_v30 = vsel %vm1622_vm7, %v1610_v8, %v6579_v49  ;;  %v6429_v5 = vrot.slane %v4784_v39, 1 }
 0x14d   : > { %v1711_v36 = vsel %vm1690_vm9, %v1677_v45, %v1397_v33  ;;  %v2101_v15 = vshrl.u32 %v2011_v23, 16  ;;  %v2104_v25 = vshll.u32 %v2011_v23, 16  ;;  %v1678_v45 = vsel %vm1656_vm8, %v1644_v30, %v4616_v60  ;;  %v6582_v60 = vld [vmem:[#allocation101_spill] sm:$0xff] }
 0x14e   : > { %1178 = vrot.lane.b32.xlu1 %v6577_v26, %s3557_s16  ;;  %1269 = vrot.lane.b32.xlu0 %v6578_v43, %s3558_s17  ;;  %v1745_v23 = vsel %vm1724_vm10, %v1711_v36, 0.0  ;;  %v4807_v0 = vor.u32 %v2474_v22, %v2471_v18  ;;  %v4809_v56 = vor.u32 %v2483_v40, %v2480_v41  ;;  %v4814_v8 = vor.u32 %v2097_v53, %v2094_v20  ;;  %v6583_v18 = vld [vmem:[#allocation16_spill] sm:$0xff]  ;;  %v4848_v41 = vld [vmem:[%s6347_s5 + $0x18] sm:$0xff] }
 0x14f   : > { %v2103_v32 = vrot.slane %v2101_v15, 3  ;;  %v2106_v61 = vrot.slane %v2104_v25, 4  ;;  %v1487_v15 = vsel %vm1486_vm3, %v4655_v55, %v3515_v24  ;;  %v1488_v36 = vsel %vm1486_vm3, %v6582_v60, %v3516_v35  ;;  %v6585_v53 = vld [vmem:[#allocation60_spill] sm:$0xff]  ;;  %v6590_v60 = vld [vmem:[#allocation70_spill] sm:$0xff] }
 0x150   : > { %v1399_v33 = vpop.permute.xlu1 %1398  ;;  %v4805_v48 = vpop.permute.xlu0 %800  ;;  %6580 = vst [vmem:[#allocation52_spill] sm:$0xff] %v4807_v0  ;;  %6581 = vst [vmem:[#allocation53_spill] sm:$0xff] %v4814_v8  ;;  %v1790_v55 = vrot.slane %v4799_v52, 1  ;;  %v4831_v24 = vsel %vm2019_vm11, %v4807_v0, %v4809_v56  ;;  %v1906_v29 = vmul.f32 %v4729_v57, %v1745_v23  ;;  %v4843_v22 = vsel %vm691_vm1, %v746_v54, %v6427_v2  ;;  %v6587_v52 = vld [vmem:[#allocation66_spill] sm:$0xff]  ;;  %v6596_v2 = vld [vmem:[#allocation80_spill] sm:$0xff] }
 0x151   : > { %v1712_v25 = vsel %vm1690_vm9, %v1678_v45, %v1399_v33  ;;  %v4816_v43 = vor.u32 %v2106_v61, %v2103_v32  ;;  %6584 = vst [vmem:[#allocation57_spill] sm:$0xff] %v4831_v24  ;;  %v1490_v57 = vsel %vm1486_vm3, %v4667_v44, %v6585_v53  ;;  %v4863_v61 = vsel %vm528_vm0, %v1791_v50, %v6429_v5  ;;  %v6588_v44 = vld [vmem:[#allocation69_spill] sm:$0xff]  ;;  %v6589_v33 = vld [vmem:[#allocation76_spill] sm:$0xff] }
 0x152   : > { %v1746_v49 = vsel %vm1724_vm10, %v1712_v25, 0.0  ;;  %1271 = vrot.lane.b32.xlu1 %v6583_v18, %s3558_s17  ;;  %1404 = vrot.lane.b32.xlu0 %v4762_v11, %s3559_s20  ;;  %v1792_v54 = vsel %vm528_vm0, %v1790_v55, %v1791_v50  ;;  %v4868_v45 = vsel %vm1486_vm3, %v4700_v62, %v6587_v52  ;;  %v1522_v23 = vsel %vm1520_vm4, %v1488_v36, %v6588_v44  ;;  %v6591_v18 = vld [vmem:[#allocation71_spill] sm:$0xff]  ;;  %v6594_v44 = vld [vmem:[#allocation78_spill] sm:$0xff] }
 0x153   : > { %v1907_v20 = vmul.f32 %v4745_v7, %v1746_v49  ;;  %v2108_v35 = vsel %vm2019_vm11, %v4814_v8, %v4816_v43  ;;  %v6586_v7 = vld [vmem:[#allocation68_spill] sm:$0xff]  ;;  %v1523_v49 = vsel %vm1520_vm4, %v4736_v47, %v6590_v60  ;;  %v1524_v50 = vsel %vm1520_vm4, %v1490_v57, %v6591_v18  ;;  %v6593_v36 = vld [vmem:[#allocation95_spill] sm:$0xff] }
 0x154   : > { %v1521_v40 = vsel %vm1520_vm4, %v1487_v15, %v6586_v7  ;;  %v4855_v30 = vpop.permute.xlu1 %802  ;;  %3362 = vmatprep.mubr.bf16.mxu1 %v2108_v35  ;;  %v4857_v32 = vpop.permute.xlu0 %1265  ;;  %v6592_v35 = vld [vmem:[#allocation86_spill] sm:$0xff]  ;;  %v1556_v57 = vsel %vm1554_vm5, %v1522_v23, %v6594_v44  ;;  %v1558_v59 = vsel %vm1554_vm5, %v1524_v50, %v6596_v2  ;;  %v6597_v62 = vld [vmem:[#allocation87_spill] sm:$0xff]  ;;  %v6598_v44 = vld [vmem:[#allocation88_spill] sm:$0xff] }
 0x155   : > { %v1555_v15 = vsel %vm1554_vm5, %v1521_v40, %v6589_v33  ;;  %v1929_v25 = vpack.c.bf16 %v1907_v20, %v1906_v29  ;;  %v6595_v33 = vld [vmem:[#allocation79_spill] sm:$0xff]  ;;  %v1590_v23 = vsel %vm1588_vm6, %v1556_v57, %v6597_v62 }
 0x156   : > { %v1589_v53 = vsel %vm1588_vm6, %v1555_v15, %v6592_v35  ;;  %1406 = vrot.lane.b32.xlu1 %v4843_v22, %s3559_s20  ;;  %647 = vrot.lane.b32.xlu0 %v4626_v13, %s3552_s8  ;;  %v1557_v15 = vsel %vm1554_vm5, %v1523_v49, %v6595_v33 }
 0x157   : > { %v1623_v7 = vsel %vm1622_vm7, %v1589_v53, %v6593_v36  ;;  %v1956_v40 = vunpack.c.l.bf16 %v1929_v25  ;;  %v1957_v52 = vunpack.c.h.bf16 %v1929_v25  ;;  %v2487_v47 = vshrl.u32 %v1929_v25, 16 }
 0x158   : > { %v1657_v60 = vsel %vm1656_vm8, %v1623_v7, %v4726_v4  ;;  %v4894_v18 = vpop.permute.xlu1 %1267  ;;  %v1357_v35 = vpop.permute.xlu0 %1356  ;;  %v2490_v28 = vshll.u32 %v1929_v25, 16  ;;  %v1591_v49 = vsel %vm1588_vm6, %v1557_v15, %v6598_v44  ;;  %v6599_v7 = vld [vmem:[#allocation99_spill] sm:$0xff] }
 0x159   : > { %v1989_v53 = vsub.f32 %v1906_v29, %v1956_v40  ;;  %v1990_v36 = vsub.f32 %v1907_v20, %v1957_v52  ;;  %v1691_v5 = vsel %vm1690_vm9, %v1657_v60, %v1357_v35  ;;  %v2489_v4 = vrot.slane %v2487_v47, 3  ;;  %v6600_v29 = vld [vmem:[#allocation100_spill] sm:$0xff]  ;;  %v6601_v40 = vld [vmem:[#allocation89_spill] sm:$0xff] }
 0x15a   : > { %649 = vrot.lane.b32.xlu1 %v4682_v27, %s3552_s8  ;;  %808 = vrot.lane.b32.xlu0 %v4459_v58, %s3553_s12  ;;  %v2492_v25 = vrot.slane %v2490_v28, 4  ;;  %v1624_v2 = vsel %vm1622_vm7, %v1590_v23, %v6599_v7  ;;  %v1625_v20 = vsel %vm1622_vm7, %v1591_v49, %v6600_v29  ;;  %v1725_v62 = vsel %vm1724_vm10, %v1691_v5, 0.0 }
 0x15b   : > { %v2012_v50 = vpack.c.bf16 %v1990_v36, %v1989_v53  ;;  %v1592_v52 = vsel %vm1588_vm6, %v1558_v59, %v6601_v40  ;;  %v1658_v57 = vsel %vm1656_vm8, %v1624_v2, %v4751_v63  ;;  %v1659_v58 = vsel %vm1656_vm8, %v1625_v20, %v4753_v37  ;;  %v295_v59 = vld [vmem:[%s6347_s5 + $0x20] sm:$0xff]  ;;  %v6602_v36 = vld [vmem:[#allocation17_spill] sm:$0xff] }
 0x15c   : > { %v1359_v47 = vpop.permute.xlu1 %1358  ;;  %v1361_v28 = vpop.permute.xlu0 %1360  ;;  %v4918_v33 = vor.u32 %v2492_v25, %v2489_v4  ;;  %v1626_v63 = vsel %vm1622_vm7, %v1592_v52, %v4573_v34  ;;  %v1886_v5 = vmul.f32 %v1790_v55, %v1725_v62  ;;  %v4941_v34 = vld [vmem:[%s6347_s5 + $0x28] sm:$0xff]  ;;  %v6607_v62 = vld [vmem:[#allocation74_spill] sm:$0xff] }
 0x15d   : > { %v1692_v15 = vsel %vm1690_vm9, %v1658_v57, %v1359_v47  ;;  %v1693_v60 = vsel %vm1690_vm9, %v1659_v58, %v1361_v28  ;;  %v2110_v35 = vshrl.u32 %v2012_v50, 16  ;;  %v2113_v53 = vshll.u32 %v2012_v50, 16  ;;  %v6604_v55 = vld [vmem:[#allocation67_spill] sm:$0xff] }
 0x15e   : > { %v1726_v37 = vsel %vm1724_vm10, %v1692_v15, 0.0  ;;  %810 = vrot.lane.b32.xlu1 %v6568_v1, %s3553_s12  ;;  %1273 = vrot.lane.b32.xlu0 %v6602_v36, %s3558_s17  ;;  %v4935_v23 = vsel %vm2019_vm11, %v4809_v56, %v4918_v33  ;;  %v1727_v49 = vsel %vm1724_vm10, %v1693_v60, 0.0  ;;  %v1492_v1 = vsel %vm1486_vm3, %v4718_v17, %v6604_v55  ;;  %v6609_v28 = vld [vmem:[#allocation19_spill] sm:$0xff] }
 0x15f   : > { %6603 = vst [vmem:[#allocation58_spill] sm:$0xff] %v4935_v23  ;;  %v1887_v44 = vmul.f32 %v1792_v54, %v1726_v37  ;;  %v2112_v4 = vrot.slane %v2110_v35, 3  ;;  %v2115_v25 = vrot.slane %v2113_v53, 4  ;;  %v1660_v7 = vsel %vm1656_vm8, %v1626_v63, %v4779_v42  ;;  %v6608_v42 = vld [vmem:[#allocation84_spill] sm:$0xff]  ;;  %v6611_v63 = vld [vmem:[#allocation93_spill] sm:$0xff] }
 0x160   : > { %v6605_v56 = vrot.slane %v4848_v41, 1  ;;  %v6606_v54 = vrot.slane %v4784_v39, 1  ;;  %v1363_v29 = vpop.permute.xlu1 %1362  ;;  %v4953_v20 = vpop.permute.xlu0 %804  ;;  %v1797_v50 = vrot.slane %v295_v59, 1  ;;  %v1525_v40 = vsel %vm1520_vm4, %v4868_v45, %v6607_v62  ;;  %v6610_v59 = vld [vmem:[#allocation75_spill] sm:$0xff] }
 0x161   : > { %v1919_v52 = vpack.c.bf16 %v1887_v44, %v1886_v5  ;;  %v1694_v17 = vsel %vm1690_vm9, %v1660_v7, %v1363_v29  ;;  %v4959_v57 = vor.u32 %v2115_v25, %v2112_v4  ;;  %v1559_v58 = vsel %vm1554_vm5, %v1525_v40, %v6608_v42  ;;  %v6614_v29 = vld [vmem:[#allocation85_spill] sm:$0xff] }
 0x162   : > { %v1796_v2 = vsel %vm528_vm0, %v6606_v54, %v6605_v56  ;;  %v1888_v39 = vmul.f32 %v4863_v61, %v1727_v49  ;;  %v1728_v47 = vsel %vm1724_vm10, %v1694_v17, 0.0  ;;  %1275 = vrot.lane.b32.xlu1 %v6609_v28, %s3558_s17  ;;  %1368 = vrot.lane.b32.xlu0 %v4551_v12, %s3559_s20  ;;  %v6430_v45 = vrot.slane %v4941_v34, 1 }
 0x163   : > { %v1936_v15 = vunpack.c.l.bf16 %v1919_v52  ;;  %v1937_v60 = vunpack.c.h.bf16 %v1919_v52  ;;  %v1889_v35 = vmul.f32 %v1796_v2, %v1728_v47  ;;  %v2117_v53 = vsel %vm2019_vm11, %v4816_v43, %v4959_v57  ;;  %v6613_v2 = vld [vmem:[#allocation51_spill] sm:$0xff] }
 0x164   : > { %v1526_v61 = vsel %vm1520_vm4, %v1492_v1, %v6610_v59  ;;  %v1593_v37 = vsel %vm1588_vm6, %v1559_v58, %v6611_v63  ;;  %v4977_v49 = vpop.permute.xlu1 %806  ;;  %3363 = vmatmul.mubr.bf16.vlgmr.msra.gmra.mxu1 %v2117_v53  ;;  %v4979_v4 = vpop.permute.xlu0 %900  ;;  %v6612_v25 = vmov %v6605_v56  ;;  %v714_v7 = vrot.slane %v6577_v26, 2  ;;  %v6615_v58 = vld [vmem:[#allocation54_spill] sm:$0xff] }
 0x165   : > { %v1798_v55 = vsel %vm528_vm0, %v6612_v25, %v1797_v50  ;;  %v1969_v56 = vsub.f32 %v1886_v5, %v1936_v15  ;;  %v1970_v54 = vsub.f32 %v1887_v44, %v1937_v60  ;;  %v1920_v43 = vpack.c.bf16 %v1889_v35, %v1888_v39  ;;  %3379 = vmatpush3.bf16.msra.mxu1 %v6613_v2  ;;  %v6616_v15 = vld [vmem:[#allocation94_spill] sm:$0xff] }
 0x166   : > { %v2398_v1 = vshrl.u32 %v1919_v52, 16  ;;  %v1560_v62 = vsel %vm1554_vm5, %v1526_v61, %v6614_v29  ;;  %v1627_v40 = vsel %vm1622_vm7, %v1593_v37, %v4693_v14  ;;  %1370 = vrot.lane.b32.xlu1 %v4595_v38, %s3559_s20  ;;  %812 = vrot.lane.b32.xlu0 %v4762_v11, %s3553_s12  ;;  %v1800_v41 = vsel %vm528_vm0, %v1797_v50, %v6430_v45  ;;  %v6617_v61 = vld [vmem:[#allocation12_spill] sm:$0xff] }
 0x167   : > { %v2401_v5 = vshll.u32 %v1919_v52, 16  ;;  %v2002_v44 = vpack.c.bf16 %v1970_v54, %v1969_v56  ;;  %v1938_v17 = vunpack.c.l.bf16 %v1920_v43  ;;  %v1939_v42 = vunpack.c.h.bf16 %v1920_v43  ;;  %3380 = vmatprep.subr.bf16.mxu1 %v6615_v58 }
 0x168   : > { %v2406_v47 = vshrl.u32 %v1920_v43, 16  ;;  %v1594_v14 = vsel %vm1588_vm6, %v1560_v62, %v6616_v15  ;;  %v1661_v60 = vsel %vm1656_vm8, %v1627_v40, %v4857_v32  ;;  %v5002_v53 = vpop.permute.xlu1 %902  ;;  %v1365_v59 = vpop.permute.xlu0 %1364  ;;  %v6431_v63 = vrot.slane %v6617_v61, 2  ;;  %v6619_v40 = vld [vmem:[#allocation55_spill] sm:$0xff] }
 0x169   : > { %v2409_v50 = vshll.u32 %v1920_v43, 16  ;;  %v1971_v52 = vsub.f32 %v1888_v39, %v1938_v17  ;;  %v1972_v37 = vsub.f32 %v1889_v35, %v1939_v42  ;;  %v1695_v25 = vsel %vm1690_vm9, %v1661_v60, %v1365_v59  ;;  %3381 = vmatpush3.bf16.msra.mxu1 %v6615_v58 }
 0x16a   : > { %v2400_v56 = vrot.slane %v2398_v1, 3  ;;  %814 = vrot.lane.b32.xlu1 %v4843_v22, %s3553_s12  ;;  %908 = vrot.lane.b32.xlu0 %v4402_v21, %s3554_s13  ;;  %v2021_v32 = vshrl.u32 %v2002_v44, 16  ;;  %v2024_v54 = vshll.u32 %v2002_v44, 16  ;;  %v2403_v2 = vrot.slane %v2401_v5, 4  ;;  %v383_v1 = vld [vmem:[%s3635_s11 + $0xe0] sm:$0xff] }
 0x16b   : > { %v2408_v29 = vrot.slane %v2406_v47, 3  ;;  %v1628_v43 = vsel %vm1622_vm7, %v1594_v14, %v4724_v6  ;;  %v2003_v39 = vpack.c.bf16 %v1972_v37, %v1971_v52  ;;  %v6618_v35 = vrot.slane %v3736_v10, 2  ;;  %3382 = vmatprep.subr.bf16.mxu1 %v6619_v40 }
 0x16c   : > { %v2411_v17 = vrot.slane %v2409_v50, 4  ;;  %v1662_v42 = vsel %vm1656_vm8, %v1628_v43, %v4894_v18  ;;  %v1729_v44 = vsel %vm1724_vm10, %v1695_v25, 0.0  ;;  %v1367_v5 = vpop.permute.xlu1 %1366  ;;  %v5023_v58 = vpop.permute.xlu0 %768  ;;  %v5028_v6 = vsel %vm691_vm1, %v714_v7, %v6431_v63  ;;  %v6620_v50 = vld [vmem:[#allocation98_spill] sm:$0xff] }
 0x16d   : > { %v5016_v62 = vsel %vm691_vm1, %v6618_v35, %v714_v7  ;;  %v2023_v47 = vrot.slane %v2021_v32, 3  ;;  %v1696_v15 = vsel %vm1690_vm9, %v1662_v42, %v1367_v5  ;;  %v2026_v14 = vrot.slane %v2024_v54, 4  ;;  %3383 = vmatpush3.bf16.msra.mxu1 %v6619_v40  ;;  %v6621_v35 = vld [vmem:[#allocation56_spill] sm:$0xff] }
 0x16e   : > { %v2029_v60 = vshrl.u32 %v2003_v39, 16  ;;  %v2032_v59 = vshll.u32 %v2003_v39, 16  ;;  %v1730_v18 = vsel %vm1724_vm10, %v1696_v15, 0.0  ;;  %910 = vrot.lane.b32.xlu1 %v4512_v3, %s3554_s13  ;;  %1372 = vrot.lane.b32.xlu0 %v5016_v62, %s3559_s20  ;;  %v422_v52 = vmul.f32 %v6620_v50, %v383_v1 }
 0x16f   : > { %v2404_v7 = vor.u32 %v2403_v2, %v2400_v56  ;;  %v2412_v37 = vor.u32 %v2411_v17, %v2408_v29  ;;  %v1890_v25 = vmul.f32 %v1798_v55, %v1729_v44  ;;  %v1891_v32 = vmul.f32 %v1800_v41, %v1730_v18  ;;  %3384 = vmatprep.subr.bf16.mxu1 %v6621_v35  ;;  %v6623_v29 = vld [vmem:[#allocation59_spill] sm:$0xff] }
 0x170   : > { %v2031_v43 = vrot.slane %v2029_v60, 3  ;;  %v2034_v54 = vrot.slane %v2032_v59, 4  ;;  %v5039_v39 = vpop.permute.xlu1 %770  ;;  %v5041_v40 = vpop.permute.xlu0 %904  ;;  %v2027_v15 = vor.u32 %v2026_v14, %v2023_v47  ;;  %v461_v55 = vadd.f32 %v4559_v19, %v422_v52  ;;  %v384_v47 = vld [vmem:[%s3635_s11 + $0xe8] sm:$0xff] }
 0x171   : > { %v5044_v42 = vsel %vm2019_vm11, %v2404_v7, %v2412_v37  ;;  %v1921_v5 = vpack.c.bf16 %v1891_v32, %v1890_v25  ;;  %3385 = vmatpush3.bf16.msra.mxu1 %v6621_v35 }
 0x172   : > { %6622 = vst [vmem:[#allocation91_spill] sm:$0xff] %v5044_v42  ;;  %v2035_v45 = vor.u32 %v2034_v54, %v2031_v43  ;;  %1374 = vrot.lane.b32.xlu1 %v5028_v6, %s3559_s20  ;;  %776 = vrot.lane.b32.xlu0 %v4551_v12, %s3553_s12  ;;  %v5064_v12 = vmax.f32 %v461_v55, 0.0  ;;  %v423_v43 = vmul.f32 %v6620_v50, %v384_v47  ;;  %v6625_v54 = vld [vmem:[#allocation62_spill] sm:$0xff]  ;;  %v6639_v42 = vld [vmem:[#allocation21_spill] sm:$0xff] }
 0x173   : > { %v1940_v41 = vunpack.c.l.bf16 %v1921_v5  ;;  %v1941_v56 = vunpack.c.h.bf16 %v1921_v5  ;;  %3386 = vmatprep.subr.bf16.mxu1 %v6623_v29  ;;  %v2415_v1 = vshrl.u32 %v1921_v5, 16  ;;  %v2418_v14 = vshll.u32 %v1921_v5, 16 }
 0x174   : > { %v2036_v2 = vsel %vm2019_vm11, %v2027_v15, %v2035_v45  ;;  %v5054_v17 = vpop.permute.xlu1 %906  ;;  %v5056_v44 = vpop.permute.xlu0 %1003  ;;  %6624 = vst [vmem:[#allocation61_spill] sm:$0xff] %v5064_v12  ;;  %v3540_v15 = vld [vmem:[%s6345_s3 + $0x10] sm:$0xff]  }
 0x175   : > { %3346 = vmatprep.mubr.bf16.mxu0 %v2036_v2  ;;  %v1973_v60 = vsub.f32 %v1890_v25, %v1940_v41  ;;  %v1974_v59 = vsub.f32 %v1891_v32, %v1941_v56  ;;  %3387 = vmatpush3.bf16.msra.mxu1 %v6623_v29  ;;  %v2417_v18 = vrot.slane %v2415_v1, 3  ;;  %v2420_v52 = vrot.slane %v2418_v14, 4  ;;  %v6628_v29 = vld [vmem:[#allocation64_spill] sm:$0xff] }
 0x176   : > { %778 = vrot.lane.b32.xlu1 %v4595_v38, %s3553_s12  ;;  %912 = vrot.lane.b32.xlu0 %v4608_v31, %s3554_s13  ;;  %v462_v2 = vadd.f32 %v4559_v19, %v423_v43 }
 0x177   : > { %v2004_v7 = vpack.c.bf16 %v1974_v59, %v1973_v60  ;;  %3388 = vmatprep.subr.bf16.mxu1 %v6625_v54  ;;  %v5072_v32 = vor.u32 %v2420_v52, %v2417_v18  ;;  %v587_v60 = vrot.slane %v5064_v12, 1  ;;  %v6631_v18 = vld [vmem:[#allocation65_spill] sm:$0xff] }
 0x178   : > { %v5068_v35 = vpop.permute.xlu1 %1005  ;;  %v5070_v25 = vpop.permute.xlu0 %772  ;;  %v5103_v59 = vmax.f32 %v462_v2, 0.0 }
 0x179   : > { %6626 = vst [vmem:[#allocation72_spill] sm:$0xff] %v5072_v32  ;;  %v2038_v5 = vshrl.u32 %v2004_v7, 16  ;;  %v2041_v38 = vshll.u32 %v2004_v7, 16  ;;  %3389 = vmatpush3.bf16.msra.mxu1 %v3540_v15  ;;  %v5083_v55 = vsel %vm2019_vm11, %v2412_v37, %v5072_v32 }
 0x17a   : > { %914 = vrot.lane.b32.xlu1 %v5064_v12, %s3554_s13  ;;  %1011 = vrot.lane.b32.xlu0 %v4626_v13, %s3555_s14  ;;  %6627 = vst [vmem:[#allocation81_spill] sm:$0xff] %v5083_v55  ;;  %v3541_v13 = vld [vmem:[%s6345_s3 + $0x8] sm:$0xff]   ;;  %v5123_v54 = vrot.slane %v5103_v59, 1 }
 0x17b   : > { %v2040_v41 = vrot.slane %v2038_v5, 3  ;;  %v2043_v56 = vrot.slane %v2041_v38, 4  ;;  %3390 = vmatprep.subr.bf16.mxu1 %v6628_v29 }
 0x17c   : > { %v5087_v1 = vpop.permute.xlu1 %774  ;;  %v5089_v47 = vpop.permute.xlu0 %868  ;;  %v5135_v15 = vsel %vm528_vm0, %v587_v60, %v5123_v54 }
 0x17d   : > { %6629 = vst [vmem:[#allocation63_spill] sm:$0xff] %v5087_v1  ;;  %v5091_v14 = vor.u32 %v2043_v56, %v2040_v41  ;;  %3391 = vmatpush3.bf16.msra.mxu1 %v3541_v13  ;;  %v750_v13 = vrot.slane %v5064_v12, 2 }
 0x17e   : > { %1013 = vrot.lane.b32.xlu1 %v4682_v27, %s3555_s14  ;;  %780 = vrot.lane.b32.xlu0 %v5016_v62, %s3553_s12  ;;  %v3542_v27 = vld [vmem:[%s6345_s3] sm:$0xff]  }
 0x17f   : > { %6630 = vst [vmem:[#allocation90_spill] sm:$0xff] %v5091_v14  ;;  %v2045_v37 = vsel %vm2019_vm11, %v2035_v45, %v5091_v14  ;;  %3392 = vmatprep.subr.bf16.mxu1 %v6631_v18  ;;  %v6632_v45 = vrot.slane %v4608_v31, 1  ;;  %v6634_v18 = vld [vmem:[#allocation13_spill] sm:$0xff] }
 0x180   : > { %v5106_v52 = vpop.permute.xlu1 %870  ;;  %3347 = vmatmul.mubr.bf16.vlgmr.msra.gmra.mxu0 %v2045_v37  ;;  %v5108_v7 = vpop.permute.xlu0 %1007  ;;  %v718_v9 = vrot.slane %v6634_v18, 2 }
 0x181   : > { %3393 = vmatpush3.bf16.msra.mxu1 %v3542_v27  ;;  %v5120_v43 = vsel %vm528_vm0, %v6632_v45, %v587_v60  ;;  %v6435_v27 = vrot.slane %v5103_v59, 2 }
 0x182   : > { %782 = vrot.lane.b32.xlu1 %v5028_v6, %s3553_s12  ;;  %876 = vrot.lane.b32.xlu0 %v3736_v10, %s3554_s13  ;;  %v386_v10 = vld [vmem:[%s3635_s11 + $0xf8] sm:$0xff] }
 0x183   : > { %v425_v51 = vmul.f32 %v6620_v50, %v386_v10  ;;  %v6643_v10 = vld [vmem:[#allocation47_spill] sm:$0xff] }
 0x184   : > { %v5125_v5 = vpop.permute.xlu1 %1009  ;;  %v5127_v38 = vpop.permute.xlu0 %1105 }
 0x186   : > { %878 = vrot.lane.b32.xlu1 %v6577_v26, %s3554_s13  ;;  %1015 = vrot.lane.b32.xlu0 %v5120_v43, %s3555_s14 }
 0x188   : > { %v5137_v41 = vpop.permute.xlu1 %1107  ;;  %v5139_v56 = vpop.permute.xlu0 %872 }
 0x18a   : > { %1017 = vrot.lane.b32.xlu1 %v5135_v15, %s3555_s14  ;;  %1113 = vrot.lane.b32.xlu0 %v4762_v11, %s3556_s15  ;;  %v6635_v11 = vrot.slane %v4608_v31, 2 }
 0x18c   : > { %v5145_v2 = vpop.permute.xlu1 %874  ;;  %v5147_v29 = vpop.permute.xlu0 %971 }
 0x18d   : > { %6633 = vst [vmem:[#allocation73_spill] sm:$0xff] %v5145_v2  ;;  %v6645_v2 = vld [vmem:[#allocation14_spill] sm:$0xff] }
 0x18e   : > { %1115 = vrot.lane.b32.xlu1 %v4843_v22, %s3556_s15  ;;  %880 = vrot.lane.b32.xlu0 %v6617_v61, %s3554_s13  ;;  %v5165_v22 = vsel %vm691_vm1, %v6635_v11, %v750_v13 }
 0x190   : > { %v5154_v37 = vpop.permute.xlu1 %973  ;;  %v5156_v60 = vpop.permute.xlu0 %1109 }
 0x192   : > { %882 = vrot.lane.b32.xlu1 %v6634_v18, %s3554_s13  ;;  %979 = vrot.lane.b32.xlu0 %v6602_v36, %s3555_s14  ;;  %v5177_v36 = vsel %vm691_vm1, %v750_v13, %v6435_v27  ;;  %v6638_v13 = vld [vmem:[#allocation20_spill] sm:$0xff] }
 0x194   : > { %v5168_v45 = vpop.permute.xlu1 %1111  ;;  %v1205_v63 = vpop.permute.xlu0 %1204 }
 0x196   : > { %981 = vrot.lane.b32.xlu1 %v6609_v28, %s3555_s14  ;;  %1117 = vrot.lane.b32.xlu0 %v5165_v22, %s3556_s15  ;;  %v385_v28 = vld [vmem:[%s3635_s11 + $0xf0] sm:$0xff] }
 0x197   : > { %v424_v27 = vmul.f32 %v6620_v50, %v385_v28  ;;  %v6644_v50 = vld [vmem:[#allocation25_spill] sm:$0xff] }
 0x198   : > { %v5179_v23 = vpop.permute.xlu1 %1206  ;;  %v5181_v11 = vpop.permute.xlu0 %975 }
 0x199   : > { %6636 = vst [vmem:[#allocation83_spill] sm:$0xff] %v5181_v11 }
 0x19a   : > { %1119 = vrot.lane.b32.xlu1 %v5177_v36, %s3556_s15  ;;  %1212 = vrot.lane.b32.xlu0 %v4608_v31, %s3557_s16  ;;  %v463_v31 = vadd.f32 %v4559_v19, %v424_v27 }
 0x19c   : > { %v5188_v24 = vpop.permute.xlu1 %977  ;;  %v5190_v0 = vpop.permute.xlu0 %1073  ;;  %v5213_v28 = vmax.f32 %v463_v31, 0.0  ;;  %v464_v31 = vadd.f32 %v4559_v19, %v425_v51 }
 0x19d   : > { %6637 = vst [vmem:[#allocation15_spill] sm:$0xff] %v5188_v24  ;;  %v1475_v24 = vsel %vm1452_vm2, %v6644_v50, %v6643_v10 }
 0x19e   : > { %1214 = vrot.lane.b32.xlu1 %v5064_v12, %s3557_s16  ;;  %983 = vrot.lane.b32.xlu0 %v6638_v13, %s3555_s14  ;;  %v955_v19 = vrot.slane %v5213_v28, 1 }
 0x1a0   : > { %v5197_v55 = vpop.permute.xlu1 %1075  ;;  %v5199_v8 = vpop.permute.xlu0 %1208 }
 0x1a2   : > { %985 = vrot.lane.b32.xlu1 %v6639_v42, %s3555_s14  ;;  %1081 = vrot.lane.b32.xlu0 %v5016_v62, %s3556_s15 }
 0x1a4   : > { %v5206_v26 = vpop.permute.xlu1 %1210  ;;  %v1302_v12 = vpop.permute.xlu0 %1301 }
 0x1a6   : > { %1083 = vrot.lane.b32.xlu1 %v5028_v6, %s3556_s15  ;;  %1216 = vrot.lane.b32.xlu0 %v5103_v59, %s3557_s16  ;;  %v6641_v6 = vrot.slane %v6617_v61, 2 }
 0x1a8   : > { %v1304_v14 = vpop.permute.xlu1 %1303  ;;  %v5217_v62 = vpop.permute.xlu0 %1077  ;;  %v5226_v27 = vsel %vm691_vm1, %v6641_v6, %v718_v9  ;;  %v1509_v6 = vsel %vm1486_vm3, %v1475_v24, %v4805_v48  ;;  %v313_v48 = vld [vmem:[%s6347_s5 + $0xb0] sm:$0xff] }
 0x1a9   : > { %6640 = vst [vmem:[#allocation92_spill] sm:$0xff] %v5217_v62  ;;  %v6646_v62 = vrot.slane %v6645_v2, 2  ;;  %v1543_v10 = vsel %vm1520_vm4, %v1509_v6, %v4979_v4  ;;  %v6647_v24 = vld [vmem:[#allocation48_spill] sm:$0xff] }
 0x1aa   : > { %1218 = vrot.lane.b32.xlu1 %v5213_v28, %s3557_s16  ;;  %1309 = vrot.lane.b32.xlu0 %v5120_v43, %s3558_s17  ;;  %v1577_v11 = vsel %vm1554_vm5, %v1543_v10, %v5056_v44  ;;  %v5280_v10 = vsel %vm528_vm0, %v5123_v54, %v955_v19 }
 0x1ab   : > { %v5245_v51 = vsel %vm691_vm1, %v718_v9, %v6646_v62  ;;  %v5264_v9 = vld [vmem:[%s6347_s5 + $0xb8] sm:$0xff]  ;;  %v6648_v62 = vld [vmem:[#allocation26_spill] sm:$0xff] }
 0x1ac   : > { %v5229_v32 = vpop.permute.xlu1 %1079  ;;  %v5231_v21 = vpop.permute.xlu0 %1172  ;;  %v1476_v4 = vsel %vm1452_vm2, %v6648_v62, %v6647_v24 }
 0x1ad   : > { %6642 = vst [vmem:[#allocation101_spill] sm:$0xff] %v5229_v32  ;;  %v5248_v32 = vmax.f32 %v464_v31, 0.0  ;;  %v1611_v31 = vsel %vm1588_vm6, %v1577_v11, %v5127_v38  ;;  %v1510_v44 = vsel %vm1486_vm3, %v1476_v4, %v4855_v30  ;;  %v6450_v30 = vrot.slane %v5264_v9, 1 }
 0x1ae   : > { %1311 = vrot.lane.b32.xlu1 %v5135_v15, %s3558_s17  ;;  %1085 = vrot.lane.b32.xlu0 %v5226_v27, %s3556_s15  ;;  %v1645_v6 = vsel %vm1622_vm7, %v1611_v31, %v1205_v63  ;;  %v1544_v38 = vsel %vm1520_vm4, %v1510_v44, %v5002_v53 }
 0x1af   : > { %v5283_v24 = vrot.slane %v5248_v32, 1  ;;  %v1679_v11 = vsel %vm1656_vm8, %v1645_v6, %v1302_v12  ;;  %v1578_v63 = vsel %vm1554_vm5, %v1544_v38, %v5068_v35 }
 0x1b0   : > { %v5252_v50 = vpop.permute.xlu1 %1174  ;;  %v5254_v3 = vpop.permute.xlu0 %1305  ;;  %v1612_v31 = vsel %vm1588_vm6, %v1578_v63, %v5137_v41 }
 0x1b1   : > { %v1646_v53 = vsel %vm1622_vm7, %v1612_v31, %v5179_v23  ;;  %v5304_v12 = vsel %vm528_vm0, %v955_v19, %v5283_v24  ;;  %v6651_v31 = vld [vmem:[#allocation27_spill] sm:$0xff] }
 0x1b2   : > { %1087 = vrot.lane.b32.xlu1 %v5245_v51, %s3556_s15  ;;  %1180 = vrot.lane.b32.xlu0 %v6617_v61, %s3557_s16  ;;  %v1833_v61 = vrot.slane %v313_v48, 1  ;;  %v1680_v35 = vsel %vm1656_vm8, %v1646_v53, %v1304_v14 }
 0x1b4   : > { %v5288_v62 = vpop.permute.xlu1 %1307  ;;  %v1401_v1 = vpop.permute.xlu0 %1400  ;;  %v1836_v44 = vsel %vm528_vm0, %v1833_v61, %v6450_v30 }
 0x1b5   : > { %v1713_v4 = vsel %vm1690_vm9, %v1679_v11, %v1401_v1  ;;  %v6649_v1 = vrot.slane %v4687_v16, 1 }
 0x1b6   : > { %1182 = vrot.lane.b32.xlu1 %v6634_v18, %s3557_s16  ;;  %1313 = vrot.lane.b32.xlu0 %v5280_v10, %s3558_s17  ;;  %v1747_v41 = vsel %vm1724_vm10, %v1713_v4, 0.0  ;;  %v6650_v4 = vld [vmem:[#allocation49_spill] sm:$0xff] }
 0x1b7   : > { %v1834_v48 = vsel %vm528_vm0, %v6649_v1, %v1833_v61  ;;  %v1477_v53 = vsel %vm1452_vm2, %v6651_v31, %v6650_v4  ;;  %v6652_v31 = vld [vmem:[#allocation50_spill] sm:$0xff] }
 0x1b8   : > { %v1403_v6 = vpop.permute.xlu1 %1402  ;;  %v5314_v38 = vpop.permute.xlu0 %643  ;;  %v1908_v16 = vmul.f32 %v1834_v48, %v1747_v41 }
 0x1b9   : > { %v1714_v23 = vsel %vm1690_vm9, %v1680_v35, %v1403_v6  ;;  %v1511_v35 = vsel %vm1486_vm3, %v1477_v53, %v4953_v20 }
 0x1ba   : > { %v1748_v19 = vsel %vm1724_vm10, %v1714_v23, 0.0  ;;  %1315 = vrot.lane.b32.xlu1 %v5304_v12, %s3558_s17  ;;  %1408 = vrot.lane.b32.xlu0 %v5165_v22, %s3559_s20 }
 0x1bb   : > { %v1909_v14 = vmul.f32 %v1836_v44, %v1748_v19  ;;  %v1545_v44 = vsel %vm1520_vm4, %v1511_v35, %v5041_v40  ;;  %v315_v19 = vld [vmem:[%s6347_s5 + $0xc0] sm:$0xff]  ;;  %v5352_v40 = vld [vmem:[%s6347_s5 + $0xc8] sm:$0xff] }
 0x1bc   : > { %v5322_v11 = vpop.permute.xlu1 %645  ;;  %v5324_v63 = vpop.permute.xlu0 %1176  ;;  %v1579_v20 = vsel %vm1554_vm5, %v1545_v44, %v5108_v7 }
 0x1bd   : > { %v1930_v61 = vpack.c.bf16 %v1909_v14, %v1908_v16  ;;  %v1613_v35 = vsel %vm1588_vm6, %v1579_v20, %v5156_v60 }
 0x1be   : > { %1410 = vrot.lane.b32.xlu1 %v5177_v36, %s3559_s20  ;;  %651 = vrot.lane.b32.xlu0 %v5120_v43, %s3552_s8  ;;  %v6653_v43 = vld [vmem:[#allocation30_spill] sm:$0xff] }
 0x1bf   : > { %v1958_v1 = vunpack.c.l.bf16 %v1930_v61  ;;  %v1959_v48 = vunpack.c.h.bf16 %v1930_v61  ;;  %v2496_v41 = vshrl.u32 %v1930_v61, 16  ;;  %v2499_v4 = vshll.u32 %v1930_v61, 16 }
 0x1c0   : > { %v5337_v6 = vpop.permute.xlu1 %1178  ;;  %v5339_v23 = vpop.permute.xlu0 %1269  ;;  %v1478_v30 = vsel %vm1452_vm2, %v6653_v43, %v6652_v31  ;;  %v754_v61 = vrot.slane %v5213_v28, 2 }
 0x1c1   : > { %v1991_v53 = vsub.f32 %v1908_v16, %v1958_v1  ;;  %v1992_v18 = vsub.f32 %v1909_v14, %v1959_v48  ;;  %v2498_v31 = vrot.slane %v2496_v41, 3  ;;  %v2501_v7 = vrot.slane %v2499_v4, 4 }
 0x1c2   : > { %653 = vrot.lane.b32.xlu1 %v5135_v15, %s3552_s8  ;;  %1184 = vrot.lane.b32.xlu0 %v6645_v2, %s3557_s16  ;;  %v1512_v16 = vsel %vm1486_vm3, %v1478_v30, %v4977_v49  ;;  %v1647_v14 = vsel %vm1622_vm7, %v1613_v35, %v5199_v8  ;;  %v1837_v48 = vrot.slane %v315_v19, 1  ;;  %v1839_v41 = vrot.slane %v5352_v40, 1 }
 0x1c3   : > { %v2013_v1 = vpack.c.bf16 %v1992_v18, %v1991_v53  ;;  %v1546_v60 = vsel %vm1520_vm4, %v1512_v16, %v5054_v17  ;;  %v1681_v15 = vsel %vm1656_vm8, %v1647_v14, %v5254_v3  ;;  %v5372_v4 = vor.u32 %v2501_v7, %v2498_v31 }
 0x1c4   : > { %v5369_v44 = vpop.permute.xlu1 %1271  ;;  %v1405_v43 = vpop.permute.xlu0 %1404  ;;  %v1580_v49 = vsel %vm1554_vm5, %v1546_v60, %v5125_v5  ;;  %v6654_v3 = vrot.slane %v5103_v59, 2  ;;  %v1058_v35 = vrot.slane %v5248_v32, 2  ;;  %v6655_v31 = vrot.slane %v5264_v9, 1 }
 0x1c5   : > { %v1715_v8 = vsel %vm1690_vm9, %v1681_v15, %v1405_v43  ;;  %v2119_v18 = vshrl.u32 %v2013_v1, 16  ;;  %v2122_v30 = vshll.u32 %v2013_v1, 16  ;;  %v1614_v17 = vsel %vm1588_vm6, %v1580_v49, %v5168_v45 }
 0x1c6   : > { %1186 = vrot.lane.b32.xlu1 %v3784_v46, %s3557_s16  ;;  %1277 = vrot.lane.b32.xlu0 %v6638_v13, %s3558_s17  ;;  %v5386_v19 = vsel %vm691_vm1, %v6654_v3, %v754_v61  ;;  %v5391_v5 = vsel %vm2019_vm11, %v4918_v33, %v5372_v4  ;;  %v1648_v20 = vsel %vm1622_vm7, %v1614_v17, %v5206_v26  ;;  %v1749_v16 = vsel %vm1724_vm10, %v1715_v8, 0.0 }
 0x1c7   : > { %v2121_v45 = vrot.slane %v2119_v18, 3  ;;  %v2124_v53 = vrot.slane %v2122_v30, 4  ;;  %v1682_v13 = vsel %vm1656_vm8, %v1648_v20, %v5288_v62  ;;  %v1838_v7 = vsel %vm528_vm0, %v6655_v31, %v1837_v48  ;;  %v6656_v18 = vld [vmem:[#allocation37_spill] sm:$0xff]  ;;  %v6657_v30 = vld [vmem:[#allocation4_spill] sm:$0xff] }
 0x1c8   : > { %v1840_v33 = vsel %vm528_vm0, %v1837_v48, %v1839_v41  ;;  %v1407_v14 = vpop.permute.xlu1 %1406  ;;  %v5405_v1 = vpop.permute.xlu0 %647  ;;  %v1910_v9 = vmul.f32 %v1838_v7, %v1749_v16  ;;  %v5421_v43 = vsel %vm691_vm1, %v754_v61, %v1058_v35  ;;  %v1459_v17 = vsel %vm1452_vm2, %v6657_v30, %v6656_v18  ;;  %v297_v31 = vld [vmem:[%s6347_s5 + $0x30] sm:$0xff] }
 0x1c9   : > { %v1716_v26 = vsel %vm1690_vm9, %v1682_v13, %v1407_v14  ;;  %v5408_v60 = vor.u32 %v2124_v53, %v2121_v45  ;;  %v6659_v14 = vld [vmem:[#allocation5_spill] sm:$0xff]  ;;  %v1801_v18 = vrot.slane %v297_v31, 1  ;;  %v6662_v31 = vld [vmem:[#allocation39_spill] sm:$0xff] }
 0x1ca   : > { %v1750_v15 = vsel %vm1724_vm10, %v1716_v26, 0.0  ;;  %1279 = vrot.lane.b32.xlu1 %v6639_v42, %s3558_s17  ;;  %1412 = vrot.lane.b32.xlu0 %v5386_v19, %s3559_s20 }
 0x1cb   : > { %v1911_v62 = vmul.f32 %v1840_v33, %v1750_v15  ;;  %v2126_v48 = vsel %vm2019_vm11, %v4959_v57, %v5408_v60  ;;  %v1493_v57 = vsel %vm1486_vm3, %v1459_v17, %v5023_v58  ;;  %v5450_v33 = vld [vmem:[%s6347_s5 + $0x38] sm:$0xff] }
 0x1cc   : > { %v5423_v49 = vpop.permute.xlu1 %649  ;;  %3366 = vmatprep.mubr.bf16.mxu1 %v2126_v48  ;;  %v5425_v8 = vpop.permute.xlu0 %808  ;;  %v1527_v45 = vsel %vm1520_vm4, %v1493_v57, %v5089_v47  ;;  %v6658_v47 = vld [vmem:[#allocation38_spill] sm:$0xff] }
 0x1cd   : > { %v1931_v42 = vpack.c.bf16 %v1911_v62, %v1910_v9  ;;  %v1460_v26 = vsel %vm1452_vm2, %v6659_v14, %v6658_v47  ;;  %v6664_v47 = vrot.slane %v4941_v34, 1  ;;  %v6666_v34 = vld [vmem:[#allocation7_spill] sm:$0xff] }
 0x1ce   : > { %1414 = vrot.lane.b32.xlu1 %v5421_v43, %s3559_s20  ;;  %655 = vrot.lane.b32.xlu0 %v5123_v54, %s3552_s8  ;;  %v1561_v54 = vsel %vm1554_vm5, %v1527_v45, %v5147_v29 }
 0x1cf   : > { %v1960_v61 = vunpack.c.l.bf16 %v1931_v42  ;;  %v1961_v3 = vunpack.c.h.bf16 %v1931_v42  ;;  %v2505_v20 = vshrl.u32 %v1931_v42, 16  ;;  %v2508_v7 = vshll.u32 %v1931_v42, 16 }
 0x1d0   : > { %v5438_v53 = vpop.permute.xlu1 %810  ;;  %v5440_v13 = vpop.permute.xlu0 %1273  ;;  %v1595_v15 = vsel %vm1588_vm6, %v1561_v54, %v5190_v0  ;;  %v1802_v14 = vsel %vm528_vm0, %v6664_v47, %v1801_v18 }
 0x1d1   : > { %v1993_v16 = vsub.f32 %v1910_v9, %v1960_v61  ;;  %v1994_v58 = vsub.f32 %v1911_v62, %v1961_v3  ;;  %v2507_v29 = vrot.slane %v2505_v20, 3  ;;  %v2510_v9 = vrot.slane %v2508_v7, 4  ;;  %v6660_v20 = vld [vmem:[#allocation23_spill] sm:$0xff] }
 0x1d2   : > { %816 = vrot.lane.b32.xlu1 %v5165_v22, %s3553_s12  ;;  %818 = vrot.lane.b32.xlu0 %v5177_v36, %s3553_s12  ;;  %v1494_v62 = vsel %vm1486_vm3, %v1460_v26, %v5039_v39  ;;  %v1629_v48 = vsel %vm1622_vm7, %v1595_v15, %v5231_v21  ;;  %v1803_v36 = vrot.slane %v5450_v33, 1  ;;  %v6677_v33 = vld [vmem:[#allocation82_spill] sm:$0xff] }
 0x1d3   : > { %v2014_v42 = vpack.c.bf16 %v1994_v58, %v1993_v16  ;;  %v1528_v30 = vsel %vm1520_vm4, %v1494_v62, %v5106_v52  ;;  %v1663_v0 = vsel %vm1656_vm8, %v1629_v48, %v5339_v23  ;;  %v5472_v57 = vor.u32 %v2510_v9, %v2507_v29  ;;  %v6661_v23 = vld [vmem:[#allocation24_spill] sm:$0xff] }
 0x1d4   : > { %v5469_v22 = vpop.permute.xlu1 %1275  ;;  %v1369_v17 = vpop.permute.xlu0 %1368  ;;  %v1562_v39 = vsel %vm1554_vm5, %v1528_v30, %v5154_v37  ;;  %v6663_v37 = vld [vmem:[#allocation6_spill] sm:$0xff] }
 0x1d5   : > { %v1697_v21 = vsel %vm1690_vm9, %v1663_v0, %v1369_v17  ;;  %v2128_v61 = vshrl.u32 %v2014_v42, 16  ;;  %v2131_v3 = vshll.u32 %v2014_v42, 16  ;;  %v1596_v52 = vsel %vm1588_vm6, %v1562_v39, %v5197_v55 }
 0x1d6   : > { %1281 = vrot.lane.b32.xlu1 %v6660_v20, %s3558_s17  ;;  %1283 = vrot.lane.b32.xlu0 %v6661_v23, %s3558_s17  ;;  %v5486_v45 = vsel %vm2019_vm11, %v5372_v4, %v5472_v57  ;;  %v1461_v7 = vsel %vm1452_vm2, %v6663_v37, %v6662_v31  ;;  %v1630_v54 = vsel %vm1622_vm7, %v1596_v52, %v5252_v50  ;;  %v1731_v26 = vsel %vm1724_vm10, %v1697_v21, 0.0  ;;  %v6668_v21 = vld [vmem:[#allocation63_spill] sm:$0xff]  ;;  %v6670_v31 = vld [vmem:[#allocation96_spill] sm:$0xff] }
 0x1d7   : > { %v2130_v16 = vrot.slane %v2128_v61, 3  ;;  %v2133_v55 = vrot.slane %v2131_v3, 4  ;;  %v1664_v58 = vsel %vm1656_vm8, %v1630_v54, %v5369_v44  ;;  %v1804_v4 = vsel %vm528_vm0, %v1801_v18, %v1803_v36  ;;  %v6665_v44 = vld [vmem:[#allocation40_spill] sm:$0xff]  ;;  %v6669_v3 = vld [vmem:[#allocation83_spill] sm:$0xff] }
 0x1d8   : > { %v1371_v15 = vpop.permute.xlu1 %1370  ;;  %v5502_v29 = vpop.permute.xlu0 %812  ;;  %v1495_v50 = vsel %vm1486_vm3, %v1461_v7, %v5070_v25  ;;  %v1462_v48 = vsel %vm1452_vm2, %v6666_v34, %v6665_v44  ;;  %v6667_v25 = vld [vmem:[#allocation31_spill] sm:$0xff]  ;;  %v1892_v0 = vmul.f32 %v1802_v14, %v1731_v26  ;;  %v6671_v54 = vld [vmem:[#allocation92_spill] sm:$0xff]  ;;  %v6672_v14 = vld [vmem:[#allocation73_spill] sm:$0xff] }
 0x1d9   : > { %v1698_v9 = vsel %vm1690_vm9, %v1664_v58, %v1371_v15  ;;  %v5507_v62 = vor.u32 %v2133_v55, %v2130_v16  ;;  %v1529_v42 = vsel %vm1520_vm4, %v1495_v50, %v5139_v56  ;;  %v1479_v18 = vsel %vm1452_vm2, %v6667_v25, %v5314_v38  ;;  %v299_v56 = vld [vmem:[%s6347_s5 + $0x40] sm:$0xff]  ;;  %v6673_v26 = vld [vmem:[#allocation77_spill] sm:$0xff] }
 0x1da   : > { %v1732_v30 = vsel %vm1724_vm10, %v1698_v9, 0.0  ;;  %1376 = vrot.lane.b32.xlu1 %v5226_v27, %s3559_s20  ;;  %1378 = vrot.lane.b32.xlu0 %v5245_v51, %s3559_s20  ;;  %v1496_v61 = vsel %vm1486_vm3, %v1462_v48, %v6668_v21  ;;  %v1563_v52 = vsel %vm1554_vm5, %v1529_v42, %v6669_v3  ;;  %v1482_v38 = vsel %vm1452_vm2, %v6670_v31, %v5423_v49  ;;  %v5548_v49 = vld [vmem:[%s6347_s5 + $0x48] sm:$0xff] }
 0x1db   : > { %v1893_v17 = vmul.f32 %v1804_v4, %v1732_v30  ;;  %v2135_v39 = vsel %vm2019_vm11, %v5408_v60, %v5507_v62  ;;  %v1513_v37 = vsel %vm1486_vm3, %v1479_v18, %v5425_v8  ;;  %v1597_v16 = vsel %vm1588_vm6, %v1563_v52, %v6671_v54  ;;  %v6674_v42 = vld [vmem:[#allocation15_spill] sm:$0xff]  ;;  %v6675_v52 = vld [vmem:[#allocation101_spill] sm:$0xff] }
 0x1dc   : > { %v815_v7 = vpop.permute.xlu1 %814  ;;  %3367 = vmatmul.mubr.bf16.gmra.mxu1 %v2135_v39  ;;  %v909_v60 = vpop.permute.xlu0 %908  ;;  %v1530_v8 = vsel %vm1520_vm4, %v1496_v61, %v6672_v14  ;;  %v1480_v4 = vsel %vm1452_vm2, %v6673_v26, %v5322_v11  ;;  %v1631_v15 = vsel %vm1622_vm7, %v1597_v16, %v5324_v63  ;;  %v1805_v50 = vrot.slane %v299_v56, 1 }
 0x1dd   : > { %v1922_v55 = vpack.c.bf16 %v1893_v17, %v1892_v0  ;;  %v5540_v58 = vsel %vm1486_vm3, %v1482_v38, %v815_v7  ;;  %v5543_v47 = vsel %vm1520_vm4, %v1513_v37, %v909_v60  ;;  %v1564_v30 = vsel %vm1554_vm5, %v1530_v8, %v6674_v42 }
 0x1de   : > { %820 = vrot.lane.b32.xlu1 %v5386_v19, %s3553_s12  ;;  %916 = vrot.lane.b32.xlu0 %v5103_v59, %s3554_s13  ;;  %v1514_v11 = vsel %vm1486_vm3, %v1480_v4, %v5438_v53  ;;  %v1665_v63 = vsel %vm1656_vm8, %v1631_v15, %v5440_v13  ;;  %v1807_v39 = vrot.slane %v5548_v49, 1  ;;  %v1598_v31 = vsel %vm1588_vm6, %v1564_v30, %v6675_v52  ;;  %v6676_v53 = vld [vmem:[#allocation32_spill] sm:$0xff] }
 0x1df   : > { %v1942_v9 = vunpack.c.l.bf16 %v1922_v55  ;;  %v1943_v44 = vunpack.c.h.bf16 %v1922_v55  ;;  %v2424_v34 = vshrl.u32 %v1922_v55, 16  ;;  %v2427_v48 = vshll.u32 %v1922_v55, 16  ;;  %v6679_v4 = vld [vmem:[#allocation72_spill] sm:$0xff] }
 0x1e0   : > { %v911_v25 = vpop.permute.xlu1 %910  ;;  %v1373_v18 = vpop.permute.xlu0 %1372  ;;  %v1806_v37 = vsel %vm528_vm0, %v1803_v36, %v1805_v50  ;;  %v1481_v36 = vsel %vm1452_vm2, %v6677_v33, %v5405_v1 }
 0x1e1   : > { %v1975_v21 = vsub.f32 %v1892_v0, %v1942_v9  ;;  %v1976_v61 = vsub.f32 %v1893_v17, %v1943_v44  ;;  %v5569_v56 = vsel %vm1520_vm4, %v1514_v11, %v911_v25  ;;  %v1699_v3 = vsel %vm1690_vm9, %v1665_v63, %v1373_v18  ;;  %v6680_v18 = vld [vmem:[#allocation90_spill] sm:$0xff] }
 0x1e2   : > { %918 = vrot.lane.b32.xlu1 %v5213_v28, %s3554_s13  ;;  %1380 = vrot.lane.b32.xlu0 %v6676_v53, %s3559_s20  ;;  %v2426_v13 = vrot.slane %v2424_v34, 3  ;;  %v2429_v38 = vrot.slane %v2427_v48, 4  ;;  %v1632_v0 = vsel %vm1622_vm7, %v1598_v31, %v5337_v6  ;;  %v1733_v60 = vsel %vm1724_vm10, %v1699_v3, 0.0 }
 0x1e3   : > { %v2005_v17 = vpack.c.bf16 %v1976_v61, %v1975_v21  ;;  %v1666_v7 = vsel %vm1656_vm8, %v1632_v0, %v5469_v22  ;;  %v1808_v28 = vsel %vm528_vm0, %v1805_v50, %v1807_v39  ;;  %v6678_v22 = vld [vmem:[#allocation33_spill] sm:$0xff]  ;;  %v1894_v50 = vmul.f32 %v1806_v37, %v1733_v60 }
 0x1e4   : > { %v1375_v54 = vpop.permute.xlu1 %1374  ;;  %v777_v16 = vpop.permute.xlu0 %776  ;;  %v2430_v55 = vor.u32 %v2429_v38, %v2426_v13  ;;  %v1515_v48 = vsel %vm1486_vm3, %v1481_v36, %v5502_v29 }
 0x1e5   : > { %v1700_v14 = vsel %vm1690_vm9, %v1666_v7, %v1375_v54  ;;  %v2047_v6 = vshrl.u32 %v2005_v17, 16  ;;  %v2050_v8 = vshll.u32 %v2005_v17, 16 }
 0x1e6   : > { %v1734_v26 = vsel %vm1724_vm10, %v1700_v14, 0.0  ;;  %1382 = vrot.lane.b32.xlu1 %v6678_v22, %s3559_s20  ;;  %784 = vrot.lane.b32.xlu0 %v5226_v27, %s3553_s12  ;;  %v5600_v15 = vsel %vm2019_vm11, %v6679_v4, %v2430_v55 }
 0x1e7   : > { %v1895_v9 = vmul.f32 %v1808_v28, %v1734_v26  ;;  %v2049_v44 = vrot.slane %v2047_v6, 3  ;;  %v2052_v34 = vrot.slane %v2050_v8, 4 }
 0x1e8   : > { %v779_v1 = vpop.permute.xlu1 %778  ;;  %v913_v42 = vpop.permute.xlu0 %912 }
 0x1e9   : > { %v1923_v30 = vpack.c.bf16 %v1895_v9, %v1894_v50  ;;  %v1549_v11 = vsel %vm1520_vm4, %v1515_v48, %v913_v42  ;;  %v2053_v63 = vor.u32 %v2052_v34, %v2049_v44 }
 0x1ea   : > { %786 = vrot.lane.b32.xlu1 %v5245_v51, %s3553_s12  ;;  %920 = vrot.lane.b32.xlu0 %v5248_v32, %s3554_s13  ;;  %s6114_s12 = scalar_lea.vmem %s6348_s6, %s3256_s28  ;;  %s3235_s28 = sshll.u32 %s6714_s25, 1 }
 0x1eb   : > { %v1944_v27 = vunpack.c.l.bf16 %v1923_v30  ;;  %v1945_v25 = vunpack.c.h.bf16 %v1923_v30  ;;  %v2054_v21 = vsel %vm2019_vm11, %v6680_v18, %v2053_v63  ;;  %v2433_v61 = vshrl.u32 %v1923_v30, 16 }
 0x1ec   : > { %v915_v3 = vpop.permute.xlu1 %914  ;;  %3350 = vmatprep.mubr.bf16.mxu0 %v2054_v21  ;;  %v5611_v29 = vpop.permute.xlu0 %1011  ;;  %v2436_v52 = vshll.u32 %v1923_v30, 16 }
 0x1ed   : > { %v1977_v31 = vsub.f32 %v1894_v50, %v1944_v27  ;;  %v1978_v13 = vsub.f32 %v1895_v9, %v1945_v25  ;;  %v1550_v38 = vsel %vm1520_vm4, %v5540_v58, %v915_v3  ;;  %v2435_v51 = vrot.slane %v2433_v61, 3  ;;  %v6682_v58 = vld [vmem:[#allocation8_spill] sm:$0xff]  ;;  %v6690_v3 = vld [vmem:[#allocation11_spill] sm:$0xff] }
 0x1ee   : > { %1019 = vrot.lane.b32.xlu1 %v5280_v10, %s3555_s14  ;;  %1021 = vrot.lane.b32.xlu0 %v5304_v12, %s3555_s14  ;;  %v2438_v0 = vrot.slane %v2436_v52, 4  ;;  %v6681_v12 = vld [vmem:[#allocation41_spill] sm:$0xff]  ;;  %v6688_v61 = vmov 0.0  }
 0x1ef   : > { %v2006_v17 = vpack.c.bf16 %v1978_v13, %v1977_v31  ;;  %v1463_v14 = vsel %vm1452_vm2, %v6682_v58, %v6681_v12 }
 0x1f0   : > { %v5619_v37 = vpop.permute.xlu1 %1013  ;;  %v781_v7 = vpop.permute.xlu0 %780  ;;  %v5621_v60 = vor.u32 %v2438_v0, %v2435_v51  ;;  %v1497_v33 = vsel %vm1486_vm3, %v1463_v14, %v777_v16  ;;  %v6693_v14 = vld [vmem:[#allocation18_spill] sm:$0xff] }
 0x1f1   : > { %v2056_v28 = vshrl.u32 %v2006_v17, 16  ;;  %v2059_v54 = vshll.u32 %v2006_v17, 16 }
 0x1f2   : > { %884 = vrot.lane.b32.xlu1 %v6645_v2, %s3554_s13  ;;  %886 = vrot.lane.b32.xlu0 %v3784_v46, %s3554_s13  ;;  %v5629_v10 = vsel %vm2019_vm11, %v2430_v55, %v5621_v60  ;;  %v6683_v46 = vld [vmem:[#allocation42_spill] sm:$0xff]  ;;  %v6684_v55 = vld [vmem:[#allocation9_spill] sm:$0xff] }
 0x1f3   : > { %v2058_v6 = vrot.slane %v2056_v28, 3  ;;  %v2061_v8 = vrot.slane %v2059_v54, 4  ;;  %v1464_v50 = vsel %vm1452_vm2, %v6684_v55, %v6683_v46  ;;  %v3530_v54 = vld [vmem:[%s6346_s4 + $0x38] sm:$0xff]  }
 0x1f4   : > { %v783_v36 = vpop.permute.xlu1 %782  ;;  %v877_v26 = vpop.permute.xlu0 %876  ;;  %v1498_v16 = vsel %vm1486_vm3, %v1464_v50, %v779_v1  ;;  %3426 = vmatprep.subr.bf16.mxu0 %v3530_v54  ;;  %v3533_v50 = vld [vmem:[%s6346_s4 + $0x20] sm:$0xff]  }
 0x1f5   : > { %v1531_v4 = vsel %vm1520_vm4, %v1497_v33, %v877_v26  ;;  %v5636_v2 = vor.u32 %v2061_v8, %v2058_v6  ;;  %3427 = vmatpush3.bf16.msra.mxu0 %v3530_v54  ;;  %v6694_v6 = vld [vmem:[#allocation22_spill] sm:$0xff]  ;;  %v3532_v26 = vld [vmem:[%s6346_s4 + $0x28] sm:$0xff]  }
 0x1f6   : > { %1023 = vrot.lane.b32.xlu1 %v5283_v24, %s3555_s14  ;;  %1121 = vrot.lane.b32.xlu0 %v5386_v19, %s3556_s15  ;;  %v6685_v19 = vld [vmem:[#allocation36_spill] sm:$0xff] }
 0x1f7   : > { %v2063_v9 = vsel %vm2019_vm11, %v2053_v63, %v5636_v2  ;;  %v1060_v30 = vsel %vm691_vm1, %v1058_v35, %v6685_v19 }
 0x1f8   : > { %v879_v44 = vpop.permute.xlu1 %878  ;;  %3351 = vmatmul.mubr.bf16.gmra.mxu0 %v2063_v9  ;;  %v1016_v34 = vpop.permute.xlu0 %1015  ;;  %v6695_v9 = vld [vmem:[#allocation28_spill] sm:$0xff] }
 0x1f9   : > { %v1532_v48 = vsel %vm1520_vm4, %v1498_v16, %v879_v44  ;;  %v5650_v42 = vsel %vm1554_vm5, %v1549_v11, %v1016_v34  ;;  %v6687_v11 = vld [vmem:[#allocation10_spill] sm:$0xff]  ;;  %v6696_v16 = vld [vmem:[#allocation29_spill] sm:$0xff] }
 0x1fa   : > { %1123 = vrot.lane.b32.xlu1 %v5421_v43, %s3556_s15  ;;  %987 = vrot.lane.b32.xlu0 %v6660_v20, %s3555_s14  ;;  %v6686_v43 = vld [vmem:[#allocation43_spill] sm:$0xff] }
 0x1fb   : > { %v1465_v20 = vsel %vm1452_vm2, %v6687_v11, %v6686_v43  ;;  %v3535_v11 = vld [vmem:[%s6346_s4 + $0x10] sm:$0xff]  }
 0x1fc   : > { %v1018_v1 = vpop.permute.xlu1 %1017  ;;  %v5660_v63 = vpop.permute.xlu0 %1113  ;;  %v1499_v25 = vsel %vm1486_vm3, %v1465_v20, %v781_v7 }
 0x1fd   : > { %v5663_v27 = vsel %vm1554_vm5, %v1550_v38, %v1018_v1 }
 0x1fe   : > { %989 = vrot.lane.b32.xlu1 %v6661_v23, %s3555_s14  ;;  %1125 = vrot.lane.b32.xlu0 %v1060_v30, %s3556_s15  ;;  %v6689_v23 = vld [vmem:[#allocation44_spill] sm:$0xff] }
 0x1ff   : > { %v1466_v52 = vsel %vm1452_vm2, %v6690_v3, %v6689_v23 }
 0x200   : > { %v5672_v18 = vpop.permute.xlu1 %1115  ;;  %v881_v35 = vpop.permute.xlu0 %880  ;;  %v1500_v31 = vsel %vm1486_vm3, %v1466_v52, %v783_v36 }
 0x201   : > { %v1533_v21 = vsel %vm1520_vm4, %v1499_v25, %v881_v35  ;;  %v3536_v35 = vld [vmem:[%s6346_s4 + $0x8] sm:$0xff]  }
 0x202   : > { %1220 = vrot.lane.b32.xlu1 %v5248_v32, %s3557_s16  ;;  %1222 = vrot.lane.b32.xlu0 %v6688_v61, %s3557_s16  ;;  %v6691_v32 = vld [vmem:[#allocation2_spill] sm:$0xff] }
 0x203   : > { %v1256_v17 = vsel %vm528_vm0, %v5283_v24, %v6691_v32  ;;  %v3531_v24 = vld [vmem:[%s6346_s4 + $0x30] sm:$0xff]   ;;  %v3537_v61 = vld [vmem:[%s6346_s4] sm:$0xff]  }
 0x204   : > { %v883_v13 = vpop.permute.xlu1 %882  ;;  %v980_v38 = vpop.permute.xlu0 %979  ;;  %3428 = vmatprep.subr.bf16.mxu0 %v3531_v24 }
 0x205   : > { %v1534_v51 = vsel %vm1520_vm4, %v1500_v31, %v883_v13  ;;  %v5685_v0 = vsel %vm1554_vm5, %v1531_v4, %v980_v38  ;;  %3429 = vmatpush3.bf16.msra.mxu0 %v3531_v24  ;;  %v317_v31 = vld [vmem:[%s6347_s5 + $0xd0] sm:$0xff]  ;;  %v318_v13 = vld [vmem:[%s6347_s5 + $0xd8] sm:$0xff]  ;;  %v1581_v38 = vsel %vm1554_vm5, %v5543_v47, %v5611_v29 }
 0x206   : > { %1089 = vrot.lane.b32.xlu1 %v6676_v53, %s3556_s15  ;;  %1091 = vrot.lane.b32.xlu0 %v6678_v22, %s3556_s15  ;;  %v6692_v53 = vld [vmem:[#allocation3_spill] sm:$0xff]  ;;  %v1843_v54 = vrot.slane %v318_v13, 1  ;;  %s6274_s15 = scalar_lea.vmem %s6349_s7, %s3235_s28 }
 0x207   : > { %3430 = vmatprep.subr.bf16.mxu0 %v3532_v26 }
 0x208   : > { %v982_v7 = vpop.permute.xlu1 %981  ;;  %v5694_v28 = vpop.permute.xlu0 %1117 }
 0x209   : > { %v5700_v12 = vsel %vm1554_vm5, %v1532_v48, %v982_v7  ;;  %3431 = vmatpush3.bf16.msra.mxu0 %v3532_v26  ;;  %v3534_v48 = vld [vmem:[%s6346_s4 + $0x18] sm:$0xff]   ;;  %v1841_v7 = vrot.slane %v317_v31, 1  ;;  %v5807_v31 = vld [vmem:[%s6347_s5 + $0xe8] sm:$0xff] }
 0x20a   : > { %1317 = vrot.lane.b32.xlu1 %v1256_v17, %s3558_s17  ;;  %3518 = vrot.lane.b32.xlu0 %v6692_v53, %s3558_s17  ;;  %v1582_v53 = vsel %vm1554_vm5, %v5569_v56, %v5619_v37 }
 0x20b   : > { %3432 = vmatprep.subr.bf16.mxu0 %v3533_v50  ;;  %v1844_v56 = vsel %vm528_vm0, %v1841_v7, %v1843_v54 }
 0x20c   : > { %v5705_v22 = vpop.permute.xlu1 %1119  ;;  %v1213_v58 = vpop.permute.xlu0 %1212 }
 0x20d   : > { %3433 = vmatpush3.bf16.msra.mxu0 %v3533_v50 }
 0x20e   : > { %1188 = vrot.lane.b32.xlu1 %v6693_v14, %s3557_s16  ;;  %1190 = vrot.lane.b32.xlu0 %v6694_v6, %s3557_s16  ;;  %v1616_v6 = vsel %vm1588_vm6, %v1582_v53, %v5672_v18 }
 0x20f   : > { %3434 = vmatprep.subr.bf16.mxu0 %v3534_v48 }
 0x210   : > { %v1215_v8 = vpop.permute.xlu1 %1214  ;;  %v984_v33 = vpop.permute.xlu0 %983 }
 0x211   : > { %v5715_v36 = vsel %vm1554_vm5, %v1533_v21, %v984_v33  ;;  %3435 = vmatpush3.bf16.msra.mxu0 %v3534_v48  ;;  %v1650_v29 = vsel %vm1622_vm7, %v1616_v6, %v1215_v8 }
 0x212   : > { %1416 = vrot.lane.b32.xlu1 %v1060_v30, %s3559_s20  ;;  %1418 = vrot.lane.b32.xlu0 %v6685_v19, %s3559_s20  ;;  %v6697_v19 = vld [vmem:[#allocation34_spill] sm:$0xff]  ;;  %v6698_v30 = vld [vmem:[#allocation35_spill] sm:$0xff] }
 0x213   : > { %3436 = vmatprep.subr.bf16.mxu0 %v3535_v11 }
 0x214   : > { %v986_v4 = vpop.permute.xlu1 %985  ;;  %v5723_v46 = vpop.permute.xlu0 %1081 }
 0x215   : > { %v5726_v55 = vsel %vm1554_vm5, %v1534_v51, %v986_v4  ;;  %3437 = vmatpush3.bf16.msra.mxu0 %v3535_v11  ;;  %v1615_v51 = vsel %vm1588_vm6, %v1581_v38, %v5660_v63 }
 0x216   : > { %1285 = vrot.lane.b32.xlu1 %v6695_v9, %s3558_s17  ;;  %1287 = vrot.lane.b32.xlu0 %v6696_v16, %s3558_s17  ;;  %v1649_v32 = vsel %vm1622_vm7, %v1615_v51, %v1213_v58  ;;  %v1842_v58 = vsel %vm528_vm0, %v1839_v41, %v1841_v7  ;;  %v1617_v51 = vsel %vm1588_vm6, %v5650_v42, %v5694_v28 }
 0x217   : > { %3438 = vmatprep.subr.bf16.mxu0 %v3536_v35 }
 0x218   : > { %v5735_v44 = vpop.permute.xlu1 %1083  ;;  %v5737_v34 = vpop.permute.xlu0 %1216 }
 0x219   : > { %3439 = vmatpush3.bf16.msra.mxu0 %v3536_v35  ;;  %v1651_v7 = vsel %vm1622_vm7, %v1617_v51, %v5737_v34 }
 0x21a   : > { %1384 = vrot.lane.b32.xlu1 %v6697_v19, %s3559_s20  ;;  %1386 = vrot.lane.b32.xlu0 %v6698_v30, %s3559_s20 }
 0x21b   : > { %3440 = vmatprep.subr.bf16.mxu0 %v3537_v61 }
 0x21c   : > { %v5746_v1 = vpop.permute.xlu1 %1218  ;;  %v1310_v43 = vpop.permute.xlu0 %1309 }
 0x21d   : > { %3441 = vmatpush3.bf16.msra.mxu0 %v3537_v61  ;;  %v1683_v24 = vsel %vm1656_vm8, %v1649_v32, %v1310_v43  ;;  %v319_v61 = vld [vmem:[%s6347_s5 + $0xe0] sm:$0xff] }
 0x220   : > { %v1312_v20 = vpop.permute.xlu1 %1311  ;;  %v5751_v25 = vpop.permute.xlu0 %1085 }
 0x221   : > { %v1684_v63 = vsel %vm1656_vm8, %v1650_v29, %v1312_v20 }
 0x224   : > { %v5756_v21 = vpop.permute.xlu1 %1087  ;;  %v5761_v23 = vpop.permute.xlu0 %1180 }
 0x228   : > { %v5763_v3 = vpop.permute.xlu1 %1182  ;;  %v1314_v52 = vpop.permute.xlu0 %1313 }
 0x22c   : > { %v1316_v17 = vpop.permute.xlu1 %1315  ;;  %v1409_v14 = vpop.permute.xlu0 %1408 }
 0x22d   : > { %v1717_v47 = vsel %vm1690_vm9, %v1683_v24, %v1409_v14  ;;  %v1845_v24 = vrot.slane %v319_v61, 1  ;;  %v1847_v14 = vrot.slane %v5807_v31, 1 }
 0x22e   : > { %v1751_v33 = vsel %vm1724_vm10, %v1717_v47, 0.0  ;;  %v1685_v47 = vsel %vm1656_vm8, %v1651_v7, %v1314_v52 }
 0x22f   : > { %v1912_v50 = vmul.f32 %v1842_v58, %v1751_v33  ;;  %v1618_v33 = vsel %vm1588_vm6, %v5663_v27, %v5705_v22  ;;  %v1848_v27 = vsel %vm528_vm0, %v1845_v24, %v1847_v14 }
 0x230   : > { %v1411_v37 = vpop.permute.xlu1 %1410  ;;  %v5792_v4 = vpop.permute.xlu0 %651  ;;  %v1652_v34 = vsel %vm1622_vm7, %v1618_v33, %v5746_v1  ;;  %v1600_v33 = vsel %vm1588_vm6, %v5700_v12, %v5735_v44 }
 0x231   : > { %v1718_v26 = vsel %vm1690_vm9, %v1684_v63, %v1411_v37  ;;  %v1686_v52 = vsel %vm1656_vm8, %v1652_v34, %v1316_v17 }
 0x232   : > { %v1752_v18 = vsel %vm1724_vm10, %v1718_v26, 0.0  ;;  %v1846_v26 = vsel %vm528_vm0, %v1843_v54, %v1845_v24  ;;  %v301_v54 = vld [vmem:[%s6347_s5 + $0x50] sm:$0xff] }
 0x233   : > { %v1913_v9 = vmul.f32 %v1844_v56, %v1752_v18 }
 0x234   : > { %v5795_v8 = vpop.permute.xlu1 %653  ;;  %v5797_v48 = vpop.permute.xlu0 %1184 }
 0x235   : > { %v1932_v16 = vpack.c.bf16 %v1913_v9, %v1912_v50 }
 0x237   : > { %v1962_v40 = vunpack.c.l.bf16 %v1932_v16  ;;  %v1963_v41 = vunpack.c.h.bf16 %v1932_v16  ;;  %v2514_v19 = vshrl.u32 %v1932_v16, 16  ;;  %v2517_v30 = vshll.u32 %v1932_v16, 16 }
 0x238   : > { %v5799_v43 = vpop.permute.xlu1 %1186  ;;  %v1278_v35 = vpop.permute.xlu0 %1277 }
 0x239   : > { %v1995_v11 = vsub.f32 %v1912_v50, %v1962_v40  ;;  %v1996_v20 = vsub.f32 %v1913_v9, %v1963_v41  ;;  %v2516_v13 = vrot.slane %v2514_v19, 3  ;;  %v2519_v38 = vrot.slane %v2517_v30, 4 }
 0x23b   : > { %v2015_v32 = vpack.c.bf16 %v1996_v20, %v1995_v11  ;;  %v2520_v6 = vor.u32 %v2519_v38, %v2516_v13  ;;  %v5848_v11 = vld [vmem:[%s6347_s5 + $0x58] sm:$0xff]  ;;  %v1809_v20 = vrot.slane %v301_v54, 1 }
 0x23c   : > { %v1280_v53 = vpop.permute.xlu1 %1279  ;;  %v1413_v29 = vpop.permute.xlu0 %1412 }
 0x23d   : > { %v2137_v63 = vshrl.u32 %v2015_v32, 16  ;;  %v2140_v58 = vshll.u32 %v2015_v32, 16  ;;  %v1719_v42 = vsel %vm1690_vm9, %v1685_v47, %v1413_v29  ;;  %v5822_v28 = vsel %vm2019_vm11, %v5472_v57, %v2520_v6 }
 0x23e   : > { %v1753_v18 = vsel %vm1724_vm10, %v1719_v42, 0.0  ;;  %v1811_v32 = vrot.slane %v5848_v11, 1 }
 0x23f   : > { %v2139_v56 = vrot.slane %v2137_v63, 3  ;;  %v2142_v37 = vrot.slane %v2140_v58, 4  ;;  %v1914_v16 = vmul.f32 %v1846_v26, %v1753_v18  ;;  %v1599_v63 = vsel %vm1588_vm6, %v5685_v0, %v5723_v46 }
 0x240   : > { %v1415_v22 = vpop.permute.xlu1 %1414  ;;  %v5833_v57 = vpop.permute.xlu0 %655  ;;  %v1633_v42 = vsel %vm1622_vm7, %v1599_v63, %v5761_v23  ;;  %v1812_v0 = vsel %vm528_vm0, %v1809_v20, %v1811_v32 }
 0x241   : > { %v1720_v50 = vsel %vm1690_vm9, %v1686_v52, %v1415_v22  ;;  %v2143_v9 = vor.u32 %v2142_v37, %v2139_v56  ;;  %v1810_v56 = vsel %vm528_vm0, %v1807_v39, %v1809_v20  ;;  %v1634_v37 = vsel %vm1622_vm7, %v1600_v33, %v5763_v3 }
 0x242   : > { %v1754_v1 = vsel %vm1724_vm10, %v1720_v50, 0.0  ;;  %v1667_v52 = vsel %vm1656_vm8, %v1633_v42, %v1278_v35  ;;  %v1668_v12 = vsel %vm1656_vm8, %v1634_v37, %v1280_v53 }
 0x243   : > { %v1915_v40 = vmul.f32 %v1848_v27, %v1754_v1  ;;  %v2144_v17 = vsel %vm2019_vm11, %v5507_v62, %v2143_v9 }
 0x244   : > { %v5841_v41 = vpop.permute.xlu1 %816  ;;  %3370 = vmatprep.mubr.bf16.mxu1 %v2144_v17  ;;  %v5843_v30 = vpop.permute.xlu0 %818  ;;  %v5885_v17 = vld [vmem:[%s6347_s5 + $0x68] sm:$0xff] }
 0x245   : > { %v1933_v19 = vpack.c.bf16 %v1915_v40, %v1914_v16 }
 0x247   : > { %v1964_v61 = vunpack.c.l.bf16 %v1933_v19  ;;  %v1965_v13 = vunpack.c.h.bf16 %v1933_v19  ;;  %v2523_v38 = vshrl.u32 %v1933_v19, 16  ;;  %v2526_v62 = vshll.u32 %v1933_v19, 16 }
 0x248   : > { %v1282_v51 = vpop.permute.xlu1 %1281  ;;  %v1284_v47 = vpop.permute.xlu0 %1283  ;;  %v1601_v19 = vsel %vm1588_vm6, %v5715_v36, %v5751_v25  ;;  %v1602_v36 = vsel %vm1588_vm6, %v5726_v55, %v5756_v21 }
 0x249   : > { %v1997_v7 = vsub.f32 %v1914_v16, %v1964_v61  ;;  %v1998_v24 = vsub.f32 %v1915_v40, %v1965_v13  ;;  %v2525_v29 = vrot.slane %v2523_v38, 3  ;;  %v2528_v58 = vrot.slane %v2526_v62, 4  ;;  %v303_v40 = vld [vmem:[%s6347_s5 + $0x60] sm:$0xff] }
 0x24a   : > { %v1635_v20 = vsel %vm1622_vm7, %v1601_v19, %v5797_v48  ;;  %v1813_v13 = vrot.slane %v303_v40, 1  ;;  %v1815_v38 = vrot.slane %v5885_v17, 1 }
 0x24b   : > { %v2016_v34 = vpack.c.bf16 %v1998_v24, %v1997_v7  ;;  %v5866_v46 = vor.u32 %v2528_v58, %v2525_v29  ;;  %v1669_v25 = vsel %vm1656_vm8, %v1635_v20, %v1282_v51 }
 0x24c   : > { %v1377_v26 = vpop.permute.xlu1 %1376  ;;  %v1379_v23 = vpop.permute.xlu0 %1378  ;;  %v1816_v55 = vsel %vm528_vm0, %v1813_v13, %v1815_v38 }
 0x24d   : > { %v1701_v44 = vsel %vm1690_vm9, %v1667_v52, %v1377_v26  ;;  %v2146_v18 = vshrl.u32 %v2016_v34, 16  ;;  %v2149_v27 = vshll.u32 %v2016_v34, 16  ;;  %v1702_v39 = vsel %vm1690_vm9, %v1668_v12, %v1379_v23 }
 0x24e   : > { %v1735_v49 = vsel %vm1724_vm10, %v1701_v44, 0.0  ;;  %v5874_v3 = vsel %vm2019_vm11, %v2520_v6, %v5866_v46  ;;  %v1736_v22 = vsel %vm1724_vm10, %v1702_v39, 0.0  ;;  %v1636_v34 = vsel %vm1622_vm7, %v1602_v36, %v5799_v43 }
 0x24f   : > { %v1896_v35 = vmul.f32 %v1810_v56, %v1735_v49  ;;  %v2148_v50 = vrot.slane %v2146_v18, 3  ;;  %v2151_v1 = vrot.slane %v2149_v27, 4  ;;  %v1897_v16 = vmul.f32 %v1812_v0, %v1736_v22 }
 0x250   : > { %v5877_v53 = vpop.permute.xlu1 %820  ;;  %v5887_v54 = vpop.permute.xlu0 %916  ;;  %v1814_v56 = vsel %vm528_vm0, %v1811_v32, %v1813_v13  ;;  %v1670_v52 = vsel %vm1656_vm8, %v1636_v34, %v1284_v47 }
 0x251   : > { %v5889_v6 = vor.u32 %v2151_v1, %v2148_v50  ;;  %v1924_v11 = vpack.c.bf16 %v1897_v16, %v1896_v35 }
 0x253   : > { %v2153_v61 = vsel %vm2019_vm11, %v2143_v9, %v5889_v6  ;;  %v1946_v62 = vunpack.c.l.bf16 %v1924_v11  ;;  %v1947_v7 = vunpack.c.h.bf16 %v1924_v11  ;;  %v2442_v29 = vshrl.u32 %v1924_v11, 16 }
 0x254   : > { %v5899_v24 = vpop.permute.xlu1 %918  ;;  %3371 = vmatmul.mubr.bf16.gmra.mxu1 %v2153_v61  ;;  %v2445_v63 = vshll.u32 %v1924_v11, 16  ;;  %v1381_v48 = vpop.permute.xlu0 %1380 }
 0x255   : > { %v1979_v58 = vsub.f32 %v1896_v35, %v1946_v62  ;;  %v1980_v33 = vsub.f32 %v1897_v16, %v1947_v7  ;;  %v1703_v9 = vsel %vm1690_vm9, %v1669_v25, %v1381_v48  ;;  %v2444_v42 = vrot.slane %v2442_v29, 3 }
 0x256   : > { %v2447_v37 = vrot.slane %v2445_v63, 4  ;;  %v1737_v0 = vsel %vm1724_vm10, %v1703_v9, 0.0 }
 0x257   : > { %v2007_v26 = vpack.c.bf16 %v1980_v33, %v1979_v58  ;;  %v1898_v18 = vmul.f32 %v1814_v56, %v1737_v0 }
 0x258   : > { %v1383_v21 = vpop.permute.xlu1 %1382  ;;  %v5915_v12 = vpop.permute.xlu0 %784  ;;  %v2448_v44 = vor.u32 %v2447_v37, %v2444_v42 }
 0x259   : > { %v1704_v51 = vsel %vm1690_vm9, %v1670_v52, %v1383_v21  ;;  %v2065_v23 = vshrl.u32 %v2007_v26, 16  ;;  %v2068_v32 = vshll.u32 %v2007_v26, 16 }
 0x25a   : > { %v1738_v43 = vsel %vm1724_vm10, %v1704_v51, 0.0  ;;  %v5920_v47 = vsel %vm2019_vm11, %v5621_v60, %v2448_v44 }
 0x25b   : > { %v1899_v27 = vmul.f32 %v1816_v55, %v1738_v43  ;;  %v2067_v39 = vrot.slane %v2065_v23, 3  ;;  %v2070_v35 = vrot.slane %v2068_v32, 4 }
 0x25c   : > { %v5922_v49 = vpop.permute.xlu1 %786  ;;  %v921_v50 = vpop.permute.xlu0 %920 }
 0x25d   : > { %v1925_v22 = vpack.c.bf16 %v1899_v27, %v1898_v18  ;;  %v2071_v1 = vor.u32 %v2070_v35, %v2067_v39 }
 0x25f   : > { %v1948_v16 = vunpack.c.l.bf16 %v1925_v22  ;;  %v1949_v40 = vunpack.c.h.bf16 %v1925_v22  ;;  %v2451_v19 = vshrl.u32 %v1925_v22, 16  ;;  %v2454_v11 = vshll.u32 %v1925_v22, 16  ;;  %v6699_v22 = vld [vmem:[#allocation45_spill] sm:$0xff] }
 0x260   : > { %v1020_v20 = vpop.permute.xlu1 %1019  ;;  %v2072_v61 = vsel %vm2019_vm11, %v5636_v2, %v2071_v1  ;;  %v1022_v60 = vpop.permute.xlu0 %1021 }
 0x261   : > { %v1981_v13 = vsub.f32 %v1898_v18, %v1948_v16  ;;  %v1982_v62 = vsub.f32 %v1899_v27, %v1949_v40  ;;  %3354 = vmatprep.mubr.bf16.mxu0 %v2072_v61  ;;  %v2453_v7 = vrot.slane %v2451_v19, 3  ;;  %v2456_v29 = vrot.slane %v2454_v11, 4  ;;  %v322_v18 = vld [vmem:[%s6347_s5 + $0xf8] sm:$0xff]  ;;  %v6701_v40 = vld [vmem:[#allocation102_spill] sm:$0xff] }
 0x262   : > { %v1483_v19 = vsel %vm1452_vm2, %v6701_v40, %v5792_v4  ;;  %v6702_v11 = vld [vmem:[#allocation61_spill] sm:$0xff] }
 0x263   : > { %v2008_v63 = vpack.c.bf16 %v1982_v62, %v1981_v13  ;;  %v5928_v25 = vor.u32 %v2456_v29, %v2453_v7  ;;  %v1484_v61 = vsel %vm1452_vm2, %v6702_v11, %v5795_v8  ;;  %v1851_v13 = vrot.slane %v322_v18, 1  ;;  %v6703_v62 = vld [vmem:[#allocation46_spill] sm:$0xff]  ;;  %v6704_v7 = vld [vmem:[#allocation13_spill] sm:$0xff] }
 0x264   : > { %v5926_v36 = vpop.permute.xlu1 %884  ;;  %v5930_v48 = vpop.permute.xlu0 %886  ;;  %v1468_v29 = vsel %vm1452_vm2, %v6704_v7, %v6703_v62 }
 0x265   : > { %v2074_v58 = vshrl.u32 %v2008_v63, 16  ;;  %v2077_v33 = vshll.u32 %v2008_v63, 16  ;;  %v5934_v9 = vsel %vm2019_vm11, %v2448_v44, %v5928_v25  ;;  %v321_v44 = vld [vmem:[%s6347_s5 + $0xf0] sm:$0xff]  ;;  %v1485_v63 = vsel %vm1452_vm2, %v5103_v59, %v5833_v57 }
 0x266   : > { %v1849_v39 = vrot.slane %v321_v44, 1  ;;  %v1519_v4 = vsel %vm1486_vm3, %v1485_v63, %v5877_v53  ;;  %v305_v57 = vld [vmem:[%s6347_s5 + $0x70] sm:$0xff] }
 0x267   : > { %v2076_v2 = vrot.slane %v2074_v58, 3  ;;  %v2079_v42 = vrot.slane %v2077_v33, 4  ;;  %v1517_v58 = vsel %vm1486_vm3, %v1483_v19, %v5841_v41  ;;  %v1518_v33 = vsel %vm1486_vm3, %v1484_v61, %v5843_v30 }
 0x268   : > { %v1024_v34 = vpop.permute.xlu1 %1023  ;;  %v1122_v56 = vpop.permute.xlu0 %1121  ;;  %v1551_v8 = vsel %vm1520_vm4, %v1517_v58, %v5887_v54  ;;  %v1850_v59 = vsel %vm528_vm0, %v1847_v14, %v1849_v39  ;;  %v1553_v41 = vsel %vm1520_vm4, %v1519_v4, %v921_v50  ;;  %v1852_v31 = vsel %vm528_vm0, %v1849_v39, %v1851_v13 }
 0x269   : > { %v5936_v37 = vor.u32 %v2079_v42, %v2076_v2  ;;  %v1552_v2 = vsel %vm1520_vm4, %v1518_v33, %v5899_v24  ;;  %v1585_v30 = vsel %vm1554_vm5, %v1551_v8, %v1020_v20  ;;  %v1587_v24 = vsel %vm1554_vm5, %v1553_v41, %v1024_v34 }
 0x26a   : > { %v1586_v54 = vsel %vm1554_vm5, %v1552_v2, %v1022_v60  ;;  %v1619_v18 = vsel %vm1588_vm6, %v1585_v30, %v1122_v56  ;;  %v1817_v50 = vrot.slane %v305_v57, 1  ;;  %v1502_v56 = vsel %vm1486_vm3, %v1468_v29, %v5922_v49 }
 0x26b   : > { %v2081_v52 = vsel %vm2019_vm11, %v2071_v1, %v5936_v37  ;;  %v6700_v1 = vld [vmem:[#allocation12_spill] sm:$0xff]  ;;  %v1536_v19 = vsel %vm1520_vm4, %v1502_v56, %v5930_v48 }
 0x26c   : > { %v1124_v26 = vpop.permute.xlu1 %1123  ;;  %3355 = vmatmul.mubr.bf16.gmra.mxu0 %v2081_v52  ;;  %v988_v0 = vpop.permute.xlu0 %987  ;;  %v1467_v16 = vsel %vm1452_vm2, %v6700_v1, %v6699_v22 }
 0x26d   : > { %v1620_v14 = vsel %vm1588_vm6, %v1586_v54, %v1124_v26  ;;  %v1501_v20 = vsel %vm1486_vm3, %v1467_v16, %v5915_v12 }
 0x26e   : > { %v1535_v12 = vsel %vm1520_vm4, %v1501_v20, %v5926_v36 }
 0x26f   : > { %v1569_v62 = vsel %vm1554_vm5, %v1535_v12, %v988_v0 }
 0x270   : > { %v990_v55 = vpop.permute.xlu1 %989  ;;  %v1126_v21 = vpop.permute.xlu0 %1125 }
 0x271   : > { %v1621_v22 = vsel %vm1588_vm6, %v1587_v24, %v1126_v21  ;;  %v1570_v7 = vsel %vm1554_vm5, %v1536_v19, %v990_v55  ;;  %v1818_v55 = vsel %vm528_vm0, %v1815_v38, %v1817_v50 }
 0x274   : > { %v1221_v51 = vpop.permute.xlu1 %1220  ;;  %v1223_v43 = vpop.permute.xlu0 %1222 }
 0x275   : > { %v1653_v1 = vsel %vm1622_vm7, %v1619_v18, %v1221_v51  ;;  %v1655_v60 = vsel %vm1622_vm7, %v1621_v22, %v1223_v43 }
 0x278   : > { %v1090_v23 = vpop.permute.xlu1 %1089  ;;  %v1092_v32 = vpop.permute.xlu0 %1091 }
 0x279   : > { %v1603_v58 = vsel %vm1588_vm6, %v1569_v62, %v1090_v23  ;;  %v1604_v33 = vsel %vm1588_vm6, %v1570_v7, %v1092_v32 }
 0x27c   : > { %v1318_v27 = vpop.permute.xlu1 %1317  ;;  %v3519_v35 = vpop.permute.xlu0 %3518 }
 0x27d   : > { %v3521_v53 = vunpack.i.h.bf16 %v3519_v35  ;;  %v3520_v52 = vunpack.i.l.bf16 %v3519_v35  ;;  %v1654_v35 = vsel %vm1622_vm7, %v1620_v14, %v1223_v43  ;;  %v1687_v34 = vsel %vm1656_vm8, %v1653_v1, %v1318_v27 }
 0x27f   : > { %v1688_v21 = vsel %vm1656_vm8, %v1654_v35, %v3520_v52  ;;  %v1689_v51 = vsel %vm1656_vm8, %v1655_v60, %v3521_v53 }
 0x280   : > { %v1189_v42 = vpop.permute.xlu1 %1188  ;;  %v1191_v44 = vpop.permute.xlu0 %1190 }
 0x281   : > { %v1637_v8 = vsel %vm1622_vm7, %v1603_v58, %v1189_v42  ;;  %v1638_v48 = vsel %vm1622_vm7, %v1604_v33, %v1191_v44 }
 0x284   : > { %v1417_v40 = vpop.permute.xlu1 %1416  ;;  %v1419_v39 = vpop.permute.xlu0 %1418 }
 0x285   : > { %v1721_v26 = vsel %vm1690_vm9, %v1687_v34, %v1417_v40  ;;  %v1722_v43 = vsel %vm1690_vm9, %v1688_v21, %v1419_v39  ;;  %v1723_v27 = vsel %vm1690_vm9, %v1689_v51, %v1419_v39 }
 0x286   : > { %v1755_v16 = vsel %vm1724_vm10, %v1721_v26, 0.0  ;;  %v1756_v11 = vsel %vm1724_vm10, %v1722_v43, 0.0  ;;  %v1757_v61 = vsel %vm1724_vm10, %v1723_v27, 0.0 }
 0x287   : > { %v1916_v49 = vmul.f32 %v1850_v59, %v1755_v16  ;;  %v1917_v29 = vmul.f32 %v1852_v31, %v1756_v11  ;;  %v1918_v36 = vmul.f32 %v1851_v13, %v1757_v61  ;;  %v6705_v13 = vld [vmem:[#allocation97_spill] sm:$0xff] }
 0x288   : > { %v1286_v63 = vpop.permute.xlu1 %1285  ;;  %v1288_v4 = vpop.permute.xlu0 %1287  ;;  %v6706_v41 = vrot.slane %v6705_v13, 1 }
 0x289   : > { %v1934_v2 = vpack.c.bf16 %v1917_v29, %v1916_v49  ;;  %v1935_v59 = vpack.c.bf16 %v1918_v36, %v1918_v36  ;;  %v1671_v57 = vsel %vm1656_vm8, %v1637_v8, %v1286_v63  ;;  %v1672_v0 = vsel %vm1656_vm8, %v1638_v48, %v1288_v4 }
 0x28a   : > { %v1820_v23 = vsel %vm528_vm0, %v1817_v50, %v6706_v41 }
 0x28b   : > { %v1966_v32 = vunpack.c.l.bf16 %v1934_v2  ;;  %v1967_v30 = vunpack.c.h.bf16 %v1934_v2  ;;  %v1968_v53 = vunpack.c.l.bf16 %v1935_v59  ;;  %v2532_v52 = vshrl.u32 %v1934_v2, 16 }
 0x28c   : > { %v1385_v42 = vpop.permute.xlu1 %1384  ;;  %v1387_v54 = vpop.permute.xlu0 %1386  ;;  %v2535_v24 = vshll.u32 %v1934_v2, 16  ;;  %v2541_v18 = vshrl.u32 %v1935_v59, 16  ;;  %v2544_v31 = vshll.u32 %v1935_v59, 16  ;;  %v6707_v59 = vld [vmem:[#allocation91_spill] sm:$0xff] }
 0x28d   : > { %v1705_v44 = vsel %vm1690_vm9, %v1671_v57, %v1385_v42  ;;  %v1999_v14 = vsub.f32 %v1916_v49, %v1966_v32  ;;  %v2000_v22 = vsub.f32 %v1917_v29, %v1967_v30  ;;  %v2001_v17 = vsub.f32 %v1918_v36, %v1968_v53  ;;  %v6708_v32 = vld [vmem:[#allocation53_spill] sm:$0xff] }
 0x28e   : > { %v1739_v38 = vsel %vm1724_vm10, %v1705_v44, 0.0  ;;  %v1706_v20 = vsel %vm1690_vm9, %v1672_v0, %v1387_v54  ;;  %v2534_v50 = vrot.slane %v2532_v52, 3  ;;  %v2537_v35 = vrot.slane %v2535_v24, 4  ;;  %v6710_v24 = vld [vmem:[#allocation52_spill] sm:$0xff] }
 0x28f   : > { %v1900_v1 = vmul.f32 %v1818_v55, %v1739_v38  ;;  %v2017_v60 = vpack.c.bf16 %v2000_v22, %v1999_v14  ;;  %v2018_v34 = vpack.c.bf16 %v2001_v17, %v2001_v17  ;;  %v1740_v40 = vsel %vm1724_vm10, %v1706_v20, 0.0 }
 0x290   : > { %v2543_v56 = vrot.slane %v2541_v18, 3  ;;  %v1901_v26 = vmul.f32 %v1820_v23, %v1740_v40  ;;  %v2538_v39 = vor.u32 %v2537_v35, %v2534_v50  ;;  %v2546_v21 = vrot.slane %v2544_v31, 4  ;;  %v6711_v31 = vld [vmem:[#allocation57_spill] sm:$0xff] }
 0x291   : > { %v2164_v51 = vshrl.u32 %v2018_v34, 16  ;;  %v2167_v12 = vshll.u32 %v2018_v34, 16  ;;  %v2155_v16 = vshrl.u32 %v2017_v60, 16  ;;  %v2158_v43 = vshll.u32 %v2017_v60, 16 }
 0x292   : > { %v1926_v27 = vpack.c.bf16 %v1901_v26, %v1900_v1  ;;  %v6025_v19 = vsel %vm2019_vm11, %v5866_v46, %v2538_v39  ;;  %v2547_v49 = vor.u32 %v2546_v21, %v2543_v56 }
 0x293   : > { %v2157_v11 = vrot.slane %v2155_v16, 3  ;;  %v2160_v61 = vrot.slane %v2158_v43, 4  ;;  %v2166_v62 = vrot.slane %v2164_v51, 3  ;;  %v2169_v7 = vrot.slane %v2167_v12, 4 }
 0x294   : > { %v1950_v29 = vunpack.c.l.bf16 %v1926_v27  ;;  %v1951_v36 = vunpack.c.h.bf16 %v1926_v27  ;;  %v2548_v33 = vsel %vm2019_vm11, %v2538_v39, %v2547_v49  ;;  %v2460_v53 = vshrl.u32 %v1926_v27, 16 }
 0x295   : > { %v2161_v63 = vor.u32 %v2160_v61, %v2157_v11  ;;  %v2170_v58 = vor.u32 %v2169_v7, %v2166_v62  ;;  %v2463_v42 = vshll.u32 %v1926_v27, 16 }
 0x296   : > { %v1983_v4 = vsub.f32 %v1900_v1, %v1950_v29  ;;  %v1984_v8 = vsub.f32 %v1901_v26, %v1951_v36  ;;  %v2462_v52 = vrot.slane %v2460_v53, 3 }
 0x297   : > { %v2162_v48 = vsel %vm2019_vm11, %v5889_v6, %v2161_v63  ;;  %v2171_v2 = vsel %vm2019_vm11, %v2161_v63, %v2170_v58  ;;  %v6709_v6 = vld [vmem:[#allocation81_spill] sm:$0xff]  ;;  %v2465_v44 = vrot.slane %v2463_v42, 4 }
 0x298   : > { %v2009_v46 = vpack.c.bf16 %v1984_v8, %v1983_v4  ;;  %3374 = vmatprep.mubr.bf16.mxu1 %v2162_v48 }
 0x299   : > { %3375 = vmatmul.mubr.bf16.gmra.mxu1 %v2171_v2 }
 0x29a   : > { %3394 = vmatprep.mubr.bf16.mxu1 %v6707_v59  ;;  %v2083_v57 = vshrl.u32 %v2009_v46, 16  ;;  %v2086_v0 = vshll.u32 %v2009_v46, 16 }
 0x29c   : > { %v2085_v55 = vrot.slane %v2083_v57, 3  ;;  %v2088_v13 = vrot.slane %v2086_v0, 4 }
 0x29e   : > { %v2089_v41 = vor.u32 %v2088_v13, %v2085_v55 }
 0x2a0   : > { %v2090_v23 = vsel %vm2019_vm11, %v5936_v37, %v2089_v41  ;;  %v2099_v30 = vsel %vm2019_vm11, %v2089_v41, %v6708_v32  ;;  %v2466_v37 = vor.u32 %v2465_v44, %v2462_v52 }
 0x2a1   : > { %3358 = vmatprep.mubr.bf16.mxu0 %v2090_v23  ;;  %3395 = vmatmul.mubr.bf16.vlgmr.msra.gmra.mxu1 %v6709_v6 }
 0x2a2   : > { %3359 = vmatmul.mubr.bf16.gmra.mxu0 %v2099_v30  ;;  %3398 = vmatprep.mubr.bf16.mxu1 %v5600_v15  ;;  %v2467_v54 = vsel %vm2019_vm11, %v5928_v25, %v2466_v37  ;;  %v2476_v18 = vsel %vm2019_vm11, %v2466_v37, %v6710_v24 }
 0x2a3   : > { %3442 = vmatprep.mubr.bf16.mxu0 %v6707_v59 }
 0x2a9   : > { %3399 = vmatmul.mubr.bf16.gmra.mxu1 %v5629_v10 }
 0x2aa   : > { %3443 = vmatmul.mubr.bf16.vlgmr.msra.gmra.mxu0 %v6709_v6  ;;  %3402 = vmatprep.mubr.bf16.mxu1 %v5920_v47 }
 0x2ab   : > { %3446 = vmatprep.mubr.bf16.mxu0 %v5600_v15  ;;  %v6712_v15 = vld [vmem:[#allocation58_spill] sm:$0xff] }
 0x2b1   : > { %3403 = vmatmul.mubr.bf16.gmra.mxu1 %v5934_v9 }
 0x2b2   : > { %3447 = vmatmul.mubr.bf16.gmra.mxu0 %v5629_v10  ;;  %3406 = vmatprep.mubr.bf16.mxu1 %v2467_v54  ;;  %v6065_v10 = vpop.f32.mrf.mxu1 }
 0x2b3   : > { %3450 = vmatprep.mubr.bf16.mxu0 %v5920_v47 }
 0x2b4   : > { %v6067_v47 = vpop.f32.mrf.mxu1 }
 0x2b6   : > { %v6069_v25 = vpop.f32.mrf.mxu1 }
 0x2b9   : > { %3407 = vmatmul.mubr.bf16.gmra.mxu1 %v2476_v18 }
 0x2ba   : > { %3451 = vmatmul.mubr.bf16.gmra.mxu0 %v5934_v9  ;;  %3410 = vmatprep.mubr.bf16.mxu1 %v6711_v31  ;;  %v6071_v9 = vpop.f32.mrf.mxu1 }
 0x2bb   : > { %3454 = vmatprep.mubr.bf16.mxu0 %v2467_v54 }
 0x2bc   : > { %v6073_v14 = vpop.f32.mrf.mxu1 }
 0x2c1   : > { %3411 = vmatmul.mubr.bf16.gmra.mxu1 %v6712_v15 }
 0x2c2   : > { %3455 = vmatmul.mubr.bf16.gmra.mxu0 %v2476_v18  ;;  %3414 = vmatprep.mubr.bf16.mxu1 %v5391_v5 }
 0x2c3   : > { %3458 = vmatprep.mubr.bf16.mxu0 %v6711_v31 }
 0x2c9   : > { %3415 = vmatmul.mubr.bf16.gmra.mxu1 %v5486_v45 }
 0x2ca   : > { %3459 = vmatmul.mubr.bf16.gmra.mxu0 %v6712_v15  ;;  %3418 = vmatprep.mubr.bf16.mxu1 %v5822_v28 }
 0x2cb   : > { %3462 = vmatprep.mubr.bf16.mxu0 %v5391_v5  ;;  %v3348_v5 = vpop.f32.mrf.mxu0 }
 0x2d1   : > { %3419 = vmatmul.mubr.bf16.gmra.mxu1 %v5874_v3 }
 0x2d2   : > { %3463 = vmatmul.mubr.bf16.gmra.mxu0 %v5486_v45  ;;  %3422 = vmatprep.mubr.bf16.mxu1 %v6025_v19  ;;  %v2270_v45 = vpop.f32.mrf.mxu0 }
 0x2d3   : > { %3466 = vmatprep.mubr.bf16.mxu0 %v5822_v28  ;;  %v6075_v28 = vpop.f32.mrf.mxu1 }
 0x2d4   : > { %v3349_v22 = vpop.f32.mrf.mxu0 }
 0x2d6   : > { %v2273_v17 = vpop.f32.mrf.mxu0 }
 0x2d8   : > { %v3352_v38 = vpop.f32.mrf.mxu0 }
 0x2d9   : > { %3423 = vmatmul.mubr.bf16.gmra.mxu1 %v2548_v33 }
 0x2da   : > { %3467 = vmatmul.mubr.bf16.gmra.mxu0 %v5874_v3  ;;  %v6077_v3 = vpop.f32.mrf.mxu1  ;;  %v2286_v20 = vpop.f32.mrf.mxu0 }
 0x2db   : > { %3470 = vmatprep.mubr.bf16.mxu0 %v6025_v19 }
 0x2dc   : > { %v6079_v1 = vpop.f32.mrf.mxu1  ;;  %v3353_v35 = vpop.f32.mrf.mxu0 }
 0x2de   : > { %v2289_v34 = vpop.f32.mrf.mxu0 }
 0x2e2   : > { %3471 = vmatmul.mubr.bf16.gmra.mxu0 %v2548_v33 }
 0x314   : > { %v6081_v50 = vpop.f32.mrf.mxu1 }
 0x316   : > { %v6083_v60 = vpop.f32.mrf.mxu1 }
 0x318   : > { %v6085_v40 = vpop.f32.mrf.mxu1 }
 0x31a   : > { %v6087_v26 = vpop.f32.mrf.mxu1 }
 0x32c   : > { %v3356_v56 = vpop.f32.mrf.mxu0 }
 0x32e   : > { %v2302_v39 = vpop.f32.mrf.mxu0 }
 0x330   : > { %v6093_v12 = vpop.f32.mrf.mxu0 }
 0x332   : > { %v6099_v27 = vpop.f32.mrf.mxu0 }
 0x359   : > { %v6089_v21 = vpop.f32.mrf.mxu1 }
 0x35b   : > { %v6091_v51 = vpop.f32.mrf.mxu1 }
 0x35d   : > { %v6095_v16 = vpop.f32.mrf.mxu1 }
 0x35f   : > { %v6097_v43 = vpop.f32.mrf.mxu1 }
 0x361   : > { %v3396_v19 = vpop.f32.mrf.mxu1 }
 0x362   : > { %v6101_v49 = vpop.f32.mrf.mxu0  ;;  %v2608_v63 = vadd.f32 %v3396_v19, %v3348_v5 }
 0x363   : > { %v2599_v11 = vpop.f32.mrf.mxu1 }
 0x364   : > { %v6103_v61 = vpop.f32.mrf.mxu0  ;;  %v2600_v4 = vadd.f32 %v2599_v11, %v2270_v45 }
 0x365   : > { %v3397_v62 = vpop.f32.mrf.mxu1 }
 0x366   : > { %v6105_v7 = vpop.f32.mrf.mxu0  ;;  %v2611_v46 = vadd.f32 %v3397_v62, %v3349_v22 }
 0x367   : > { %v2602_v29 = vpop.f32.mrf.mxu1 }
 0x368   : > { %v6107_v36 = vpop.f32.mrf.mxu0  ;;  %v2603_v55 = vadd.f32 %v2602_v29, %v2273_v17 }
 0x369   : > { %v3400_v58 = vpop.f32.mrf.mxu1 }
 0x36a   : > { %v3444_v33 = vpop.f32.mrf.mxu0  ;;  %v2624_v32 = vadd.f32 %v3400_v58, %v3352_v38 }
 0x36b   : > { %v6116_v8 = vadd.f32 %v3444_v33, %v2608_v63  ;;  %v2615_v48 = vpop.f32.mrf.mxu1 }
 0x36c   : > { %v2808_v2 = vpop.f32.mrf.mxu0  ;;  %v2616_v42 = vadd.f32 %v2615_v48, %v2286_v20 }
 0x36d   : > { %2969 = vst [vmem:[%s6114_s12 + $0x10] sm:$0xff] %v6116_v8  ;;  %v6120_v59 = vadd.f32 %v2808_v2, %v2600_v4  ;;  %v3401_v57 = vpop.f32.mrf.mxu1 }
 0x36e   : > { %v3445_v0 = vpop.f32.mrf.mxu0  ;;  %v2627_v24 = vadd.f32 %v3401_v57, %v3353_v35 }
 0x36f   : > { %2967 = vst [vmem:[%s6114_s12] sm:$0xff] %v6120_v59  ;;  %v6124_v13 = vadd.f32 %v3445_v0, %v2611_v46  ;;  %v2618_v41 = vpop.f32.mrf.mxu1 }
 0x370   : > { %v2811_v23 = vpop.f32.mrf.mxu0  ;;  %v2619_v45 = vadd.f32 %v2618_v41, %v2289_v34 }
 0x371   : > { %2970 = vst [vmem:[%s6114_s12 + $0x18] sm:$0xff] %v6124_v13  ;;  %v6128_v30 = vadd.f32 %v2811_v23, %v2603_v55  ;;  %v3404_v6 = vpop.f32.mrf.mxu1 }
 0x372   : > { %v3448_v53 = vpop.f32.mrf.mxu0  ;;  %v2640_v35 = vadd.f32 %v3404_v6, %v3356_v56 }
 0x373   : > { %2968 = vst [vmem:[%s6114_s12 + $0x8] sm:$0xff] %v6128_v30  ;;  %v2999_v52 = vadd.f32 %v6128_v30, %v6120_v59  ;;  %v6134_v44 = vadd.f32 %v3448_v53, %v2624_v32  ;;  %v2631_v37 = vpop.f32.mrf.mxu1 }
 0x374   : > { %v2824_v54 = vpop.f32.mrf.mxu0  ;;  %v2632_v34 = vadd.f32 %v2631_v37, %v2302_v39 }
 0x375   : > { %v3000_v18 = vadd.f32 %v2999_v52, %v6116_v8  ;;  %2973 = vst [vmem:[%s6114_s12 + $0x30] sm:$0xff] %v6134_v44  ;;  %v6139_v31 = vadd.f32 %v2824_v54, %v2616_v42  ;;  %v3405_v15 = vpop.f32.mrf.mxu1 }
 0x376   : > { %v3449_v5 = vpop.f32.mrf.mxu0  ;;  %v2643_v56 = vadd.f32 %v3405_v15, %v6093_v12 }
 0x377   : > { %2971 = vst [vmem:[%s6114_s12 + $0x20] sm:$0xff] %v6139_v31  ;;  %v3001_v22 = vadd.f32 %v3000_v18, %v6124_v13  ;;  %v6144_v17 = vadd.f32 %v3449_v5, %v2627_v24  ;;  %v2634_v38 = vpop.f32.mrf.mxu1 }
 0x378   : > { %v2827_v20 = vpop.f32.mrf.mxu0  ;;  %v2635_v57 = vadd.f32 %v2634_v38, %v6099_v27 }
 0x379   : > { %v3002_v19 = vadd.f32 %v3001_v22, %v6139_v31  ;;  %2974 = vst [vmem:[%s6114_s12 + $0x38] sm:$0xff] %v6144_v17  ;;  %v6149_v11 = vadd.f32 %v2827_v20, %v2619_v45  ;;  %v3408_v62 = vpop.f32.mrf.mxu1 }
 0x37a   : > { %v3452_v29 = vpop.f32.mrf.mxu0  ;;  %v2656_v23 = vadd.f32 %v3408_v62, %v6101_v49 }
 0x37b   : > { %2972 = vst [vmem:[%s6114_s12 + $0x28] sm:$0xff] %v6149_v11  ;;  %v3003_v63 = vadd.f32 %v3002_v19, %v6149_v11  ;;  %v6154_v58 = vadd.f32 %v3452_v29, %v2640_v35  ;;  %v2647_v33 = vpop.f32.mrf.mxu1 }
 0x37c   : > { %v2840_v4 = vpop.f32.mrf.mxu0  ;;  %v2648_v42 = vadd.f32 %v2647_v33, %v6103_v61 }
 0x37d   : > { %v3004_v48 = vadd.f32 %v3003_v63, %v6134_v44  ;;  %2977 = vst [vmem:[%s6114_s12 + $0x50] sm:$0xff] %v6154_v58  ;;  %v6160_v2 = vadd.f32 %v2840_v4, %v2632_v34  ;;  %v3409_v46 = vpop.f32.mrf.mxu1 }
 0x37e   : > { %v3453_v39 = vpop.f32.mrf.mxu0  ;;  %v2659_v24 = vadd.f32 %v3409_v46, %v6105_v7 }
 0x37f   : > { %2975 = vst [vmem:[%s6114_s12 + $0x40] sm:$0xff] %v6160_v2  ;;  %v3005_v0 = vadd.f32 %v3004_v48, %v6144_v17  ;;  %v6166_v55 = vadd.f32 %v3453_v39, %v2643_v56  ;;  %v2650_v41 = vpop.f32.mrf.mxu1 }
 0x380   : > { %v2843_v12 = vpop.f32.mrf.mxu0  ;;  %v2651_v45 = vadd.f32 %v2650_v41, %v6107_v36 }
 0x381   : > { %v3006_v32 = vadd.f32 %v3005_v0, %v6160_v2  ;;  %2978 = vst [vmem:[%s6114_s12 + $0x58] sm:$0xff] %v6166_v55  ;;  %v6172_v6 = vadd.f32 %v2843_v12, %v2635_v57  ;;  %v3412_v53 = vpop.f32.mrf.mxu1 }
 0x382   : > { %v3456_v27 = vpop.f32.mrf.mxu0  ;;  %v2672_v35 = vadd.f32 %v3412_v53, %v6065_v10 }
 0x383   : > { %2976 = vst [vmem:[%s6114_s12 + $0x48] sm:$0xff] %v6172_v6  ;;  %v3007_v52 = vadd.f32 %v3006_v32, %v6172_v6  ;;  %v6178_v37 = vadd.f32 %v3456_v27, %v2656_v23  ;;  %v2663_v54 = vpop.f32.mrf.mxu1 }
 0x384   : > { %v2856_v49 = vpop.f32.mrf.mxu0  ;;  %v2664_v34 = vadd.f32 %v2663_v54, %v6067_v47 }
 0x385   : > { %v3008_v18 = vadd.f32 %v3007_v52, %v6154_v58  ;;  %2981 = vst [vmem:[%s6114_s12 + $0x70] sm:$0xff] %v6178_v37  ;;  %v6184_v15 = vadd.f32 %v2856_v49, %v2648_v42  ;;  %v3413_v5 = vpop.f32.mrf.mxu1 }
 0x386   : > { %v3457_v61 = vpop.f32.mrf.mxu0  ;;  %v2675_v56 = vadd.f32 %v3413_v5, %v6069_v25 }
 0x387   : > { %2979 = vst [vmem:[%s6114_s12 + $0x60] sm:$0xff] %v6184_v15  ;;  %v3009_v22 = vadd.f32 %v3008_v18, %v6166_v55  ;;  %v6190_v38 = vadd.f32 %v3457_v61, %v2659_v24  ;;  %v2666_v20 = vpop.f32.mrf.mxu1 }
 0x388   : > { %v2859_v7 = vpop.f32.mrf.mxu0  ;;  %v2667_v57 = vadd.f32 %v2666_v20, %v6071_v9 }
 0x389   : > { %v3010_v19 = vadd.f32 %v3009_v22, %v6184_v15  ;;  %2982 = vst [vmem:[%s6114_s12 + $0x78] sm:$0xff] %v6190_v38  ;;  %v6196_v62 = vadd.f32 %v2859_v7, %v2651_v45  ;;  %v3416_v29 = vpop.f32.mrf.mxu1 }
 0x38a   : > { %v3460_v36 = vpop.f32.mrf.mxu0  ;;  %v2688_v23 = vadd.f32 %v3416_v29, %v6073_v14 }
 0x38b   : > { %2980 = vst [vmem:[%s6114_s12 + $0x68] sm:$0xff] %v6196_v62  ;;  %v3011_v63 = vadd.f32 %v3010_v19, %v6196_v62  ;;  %v6202_v33 = vadd.f32 %v3460_v36, %v2672_v35  ;;  %v2679_v4 = vpop.f32.mrf.mxu1 }
 0x38c   : > { %v2872_v10 = vpop.f32.mrf.mxu0  ;;  %v2680_v42 = vadd.f32 %v2679_v4, %v6075_v28 }
 0x38d   : > { %v3012_v48 = vadd.f32 %v3011_v63, %v6178_v37  ;;  %2985 = vst [vmem:[%s6114_s12 + $0x90] sm:$0xff] %v6202_v33  ;;  %v6208_v46 = vadd.f32 %v2872_v10, %v2664_v34  ;;  %v3417_v39 = vpop.f32.mrf.mxu1 }
 0x38e   : > { %v3461_v47 = vpop.f32.mrf.mxu0  ;;  %v2691_v24 = vadd.f32 %v3417_v39, %v6077_v3 }
 0x38f   : > { %2983 = vst [vmem:[%s6114_s12 + $0x80] sm:$0xff] %v6208_v46  ;;  %v3013_v0 = vadd.f32 %v3012_v48, %v6190_v38  ;;  %v6214_v41 = vadd.f32 %v3461_v47, %v2675_v56  ;;  %v2682_v12 = vpop.f32.mrf.mxu1 }
 0x390   : > { %v2875_v25 = vpop.f32.mrf.mxu0  ;;  %v2683_v45 = vadd.f32 %v2682_v12, %v6079_v1 }
 0x391   : > { %v3014_v32 = vadd.f32 %v3013_v0, %v6208_v46  ;;  %2986 = vst [vmem:[%s6114_s12 + $0x98] sm:$0xff] %v6214_v41  ;;  %v6220_v53 = vadd.f32 %v2875_v25, %v2667_v57  ;;  %v3420_v27 = vpop.f32.mrf.mxu1 }
 0x392   : > { %v3464_v9 = vpop.f32.mrf.mxu0  ;;  %v2704_v35 = vadd.f32 %v3420_v27, %v6081_v50 }
 0x393   : > { %2984 = vst [vmem:[%s6114_s12 + $0x88] sm:$0xff] %v6220_v53  ;;  %v3015_v52 = vadd.f32 %v3014_v32, %v6220_v53  ;;  %v6226_v54 = vadd.f32 %v3464_v9, %v2688_v23  ;;  %v2695_v49 = vpop.f32.mrf.mxu1 }
 0x394   : > { %v2888_v14 = vpop.f32.mrf.mxu0  ;;  %v2696_v34 = vadd.f32 %v2695_v49, %v6083_v60 }
 0x395   : > { %v3016_v18 = vadd.f32 %v3015_v52, %v6202_v33  ;;  %2989 = vst [vmem:[%s6114_s12 + $0xb0] sm:$0xff] %v6226_v54  ;;  %v6232_v5 = vadd.f32 %v2888_v14, %v2680_v42  ;;  %v3421_v61 = vpop.f32.mrf.mxu1 }
 0x396   : > { %v3465_v28 = vpop.f32.mrf.mxu0  ;;  %v2707_v56 = vadd.f32 %v3421_v61, %v6085_v40 }
 0x397   : > { %2987 = vst [vmem:[%s6114_s12 + $0xa0] sm:$0xff] %v6232_v5  ;;  %v3017_v22 = vadd.f32 %v3016_v18, %v6214_v41  ;;  %v6238_v20 = vadd.f32 %v3465_v28, %v2691_v24  ;;  %v2698_v7 = vpop.f32.mrf.mxu1 }
 0x398   : > { %v2891_v3 = vpop.f32.mrf.mxu0  ;;  %v2699_v60 = vadd.f32 %v2698_v7, %v6087_v26 }
 0x399   : > { %v3018_v19 = vadd.f32 %v3017_v22, %v6232_v5  ;;  %2990 = vst [vmem:[%s6114_s12 + $0xb8] sm:$0xff] %v6238_v20  ;;  %v6244_v29 = vadd.f32 %v2891_v3, %v2683_v45  ;;  %v3424_v36 = vpop.f32.mrf.mxu1 }
 0x39a   : > { %v3468_v1 = vpop.f32.mrf.mxu0  ;;  %v2720_v23 = vadd.f32 %v3424_v36, %v6089_v21 }
 0x39b   : > { %2988 = vst [vmem:[%s6114_s12 + $0xa8] sm:$0xff] %v6244_v29  ;;  %v3019_v63 = vadd.f32 %v3018_v19, %v6244_v29  ;;  %v6250_v4 = vadd.f32 %v3468_v1, %v2704_v35  ;;  %v2711_v10 = vpop.f32.mrf.mxu1 }
 0x39c   : > { %v2904_v50 = vpop.f32.mrf.mxu0  ;;  %v2712_v9 = vadd.f32 %v2711_v10, %v6091_v51 }
 0x39d   : > { %v3020_v48 = vadd.f32 %v3019_v63, %v6226_v54  ;;  %2993 = vst [vmem:[%s6114_s12 + $0xd0] sm:$0xff] %v6250_v4  ;;  %v2959_v39 = vadd.f32 %v2904_v50, %v2696_v34  ;;  %v3425_v12 = vpop.f32.mrf.mxu1 }
 0x39e   : > { %v3469_v47 = vpop.f32.mrf.mxu0  ;;  %v2723_v14 = vadd.f32 %v3425_v12, %v6095_v16 }
 0x39f   : > { %2991 = vst [vmem:[%s6114_s12 + $0xc0] sm:$0xff] %v2959_v39  ;;  %v3021_v57 = vadd.f32 %v3020_v48, %v6238_v20  ;;  %v2962_v0 = vadd.f32 %v3469_v47, %v2707_v56  ;;  %v2714_v52 = vpop.f32.mrf.mxu1 }
 0x3a0   : > { %v2907_v25 = vpop.f32.mrf.mxu0  ;;  %v2715_v61 = vadd.f32 %v2714_v52, %v6097_v43 }
 0x3a1   : > { %v3022_v32 = vadd.f32 %v3021_v57, %v2959_v39  ;;  %2994 = vst [vmem:[%s6114_s12 + $0xd8] sm:$0xff] %v2962_v0  ;;  %v2960_v40 = vadd.f32 %v2907_v25, %v2699_v60 }
 0x3a2   : > { %v3472_v27 = vpop.f32.mrf.mxu0 }
 0x3a3   : > { %2992 = vst [vmem:[%s6114_s12 + $0xc8] sm:$0xff] %v2960_v40  ;;  %v3023_v42 = vadd.f32 %v3022_v32, %v2960_v40  ;;  %v2965_v26 = vadd.f32 %v3472_v27, %v2720_v23 }
 0x3a4   : > { %v2920_v49 = vpop.f32.mrf.mxu0 }
 0x3a5   : > { %v3024_v24 = vadd.f32 %v3023_v42, %v6250_v4  ;;  %2997 = vst [vmem:[%s6114_s12 + $0xf0] sm:$0xff] %v2965_v26  ;;  %v2963_v21 = vadd.f32 %v2920_v49, %v2712_v9 }
 0x3a6   : > { %v3473_v18 = vpop.f32.mrf.mxu0 }
 0x3a7   : > { %2995 = vst [vmem:[%s6114_s12 + $0xe0] sm:$0xff] %v2963_v21  ;;  %v3025_v28 = vadd.f32 %v3024_v24, %v2962_v0  ;;  %v2966_v51 = vadd.f32 %v3473_v18, %v2723_v14 }
 0x3a8   : > { %v2923_v45 = vpop.f32.mrf.mxu0 }
 0x3a9   : > { %v3026_v22 = vadd.f32 %v3025_v28, %v2963_v21  ;;  %2998 = vst [vmem:[%s6114_s12 + $0xf8] sm:$0xff] %v2966_v51  ;;  %v2964_v7 = vadd.f32 %v2923_v45, %v2715_v61 }
 0x3ab   : > { %2996 = vst [vmem:[%s6114_s12 + $0xe8] sm:$0xff] %v2964_v7  ;;  %v3027_v3 = vadd.f32 %v3026_v22, %v2964_v7 }
 0x3ad   : > { %v3028_v35 = vadd.f32 %v3027_v3, %v2965_v26 }
 0x3af   : > { %v3029_v19 = vadd.f32 %v3028_v35, %v2966_v51 }
 0x3b1   : > { %v3030_v16 = vrot.slane %v3029_v19, 4 }
 0x3b3   : > { %v3031_v36 = vadd.f32 %v3030_v16, %v3029_v19 }
 0x3b5   : > { %v3032_v1 = vrot.slane %v3031_v36, 2 }
 0x3b7   : > { %v3033_v34 = vadd.f32 %v3032_v1, %v3031_v36 }
 0x3b9   : > { %v3034_v63 = vrot.slane %v3033_v34, 1 }
 0x3bb   : > { %v3035_v10 = vadd.f32 %v3034_v63, %v3033_v34 }
 0x3bd   : > { %v3036_v43 = vmul.f32 0.00390625, %v3035_v10 }
 0x3bf   : > { %3069 = vst [vmem:[%s6274_s15] sm:$0x1] %v3036_v43  ;;  %v3046_v50 = vsub.f32 %v6172_v6, %v3036_v43  ;;  %v3048_v56 = vsub.f32 %v6166_v55, %v3036_v43  ;;  %v3049_v48 = vsub.f32 %v6184_v15, %v3036_v43  ;;  %v3050_v47 = vsub.f32 %v6196_v62, %v3036_v43 }
 0x3c0   : > { %v3051_v60 = vsub.f32 %v6178_v37, %v3036_v43  ;;  %v3052_v57 = vsub.f32 %v6190_v38, %v3036_v43  ;;  %v3053_v12 = vsub.f32 %v6208_v46, %v3036_v43  ;;  %v3054_v25 = vsub.f32 %v6220_v53, %v3036_v43 }
 0x3c1   : > { %v3055_v23 = vsub.f32 %v6202_v33, %v3036_v43  ;;  %v3056_v32 = vsub.f32 %v6214_v41, %v3036_v43  ;;  %v3057_v6 = vsub.f32 %v6232_v5, %v3036_v43  ;;  %v3058_v55 = vsub.f32 %v6244_v29, %v3036_v43 }
 0x3c2   : > { %v3059_v15 = vsub.f32 %v6226_v54, %v3036_v43  ;;  %v6291_v62 = vsub.f32 %v6238_v20, %v3036_v43  ;;  %v6293_v37 = vsub.f32 %v2959_v39, %v3036_v43  ;;  %v6295_v38 = vsub.f32 %v2960_v40, %v3036_v43 }
 0x3c3   : > { %v6298_v46 = vsub.f32 %v6250_v4, %v3036_v43  ;;  %v6300_v53 = vsub.f32 %v2962_v0, %v3036_v43  ;;  %v6302_v33 = vsub.f32 %v2963_v21, %v3036_v43  ;;  %v6304_v41 = vsub.f32 %v2964_v7, %v3036_v43 }
 0x3c4   : > { %v6306_v5 = vsub.f32 %v2965_v26, %v3036_v43  ;;  %v6308_v29 = vsub.f32 %v2966_v51, %v3036_v43  ;;  %v3037_v54 = vsub.f32 %v6120_v59, %v3036_v43  ;;  %v3038_v20 = vsub.f32 %v6128_v30, %v3036_v43 }
 0x3c5   : > { %v3039_v39 = vsub.f32 %v6116_v8, %v3036_v43  ;;  %v3040_v4 = vsub.f32 %v6124_v13, %v3036_v43  ;;  %v3041_v0 = vsub.f32 %v6139_v31, %v3036_v43  ;;  %v3042_v52 = vsub.f32 %v6149_v11, %v3036_v43 }
 0x3c6   : > { %v3070_v40 = vmul.f32 %v3037_v54, %v3037_v54  ;;  %v3071_v27 = vmul.f32 %v3038_v20, %v3038_v20  ;;  %v3043_v14 = vsub.f32 %v6134_v44, %v3036_v43  ;;  %v3044_v30 = vsub.f32 %v6144_v17, %v3036_v43 }
 0x3c7   : > { %v3072_v9 = vmul.f32 %v3039_v39, %v3039_v39  ;;  %v3073_v26 = vmul.f32 %v3040_v4, %v3040_v4  ;;  %v3074_v24 = vmul.f32 %v3041_v0, %v3041_v0  ;;  %v3075_v21 = vmul.f32 %v3042_v52, %v3042_v52 }
 0x3c8   : > { %v3102_v42 = vadd.f32 %v3071_v27, %v3070_v40  ;;  %v3045_v18 = vsub.f32 %v6160_v2, %v3036_v43  ;;  %v3076_v61 = vmul.f32 %v3043_v14, %v3043_v14  ;;  %v3077_v28 = vmul.f32 %v3044_v30, %v3044_v30 }
 0x3c9   : > { %v3047_v51 = vsub.f32 %v6154_v58, %v3036_v43  ;;  %v3079_v22 = vmul.f32 %v3046_v50, %v3046_v50  ;;  %v3081_v35 = vmul.f32 %v3048_v56, %v3048_v56  ;;  %v3082_v16 = vmul.f32 %v3049_v48, %v3049_v48 }
 0x3ca   : > { %v3103_v49 = vadd.f32 %v3102_v42, %v3072_v9  ;;  %v3078_v45 = vmul.f32 %v3045_v18, %v3045_v18  ;;  %v3083_v36 = vmul.f32 %v3050_v47, %v3050_v47  ;;  %v3084_v34 = vmul.f32 %v3051_v60, %v3051_v60 }
 0x3cb   : > { %v3080_v3 = vmul.f32 %v3047_v51, %v3047_v51  ;;  %v3085_v63 = vmul.f32 %v3052_v57, %v3052_v57  ;;  %v3086_v54 = vmul.f32 %v3053_v12, %v3053_v12  ;;  %v3087_v39 = vmul.f32 %v3054_v25, %v3054_v25 }
 0x3cc   : > { %v3104_v59 = vadd.f32 %v3103_v49, %v3073_v26  ;;  %v3088_v43 = vmul.f32 %v3055_v23, %v3055_v23  ;;  %v3089_v50 = vmul.f32 %v3056_v32, %v3056_v32  ;;  %v3090_v4 = vmul.f32 %v3057_v6, %v3057_v6 }
 0x3cd   : > { %v3091_v56 = vmul.f32 %v3058_v55, %v3058_v55  ;;  %v3092_v48 = vmul.f32 %v3059_v15, %v3059_v15  ;;  %v3093_v47 = vmul.f32 %v6291_v62, %v6291_v62  ;;  %v3094_v57 = vmul.f32 %v6293_v37, %v6293_v37 }
 0x3ce   : > { %v3105_v8 = vadd.f32 %v3104_v59, %v3074_v24  ;;  %v3095_v25 = vmul.f32 %v6295_v38, %v6295_v38  ;;  %v3096_v32 = vmul.f32 %v6298_v46, %v6298_v46  ;;  %v3097_v55 = vmul.f32 %v6300_v53, %v6300_v53 }
 0x3cf   : > { %v3098_v62 = vmul.f32 %v6302_v33, %v6302_v33  ;;  %v3099_v37 = vmul.f32 %v6304_v41, %v6304_v41  ;;  %v3100_v38 = vmul.f32 %v6306_v5, %v6306_v5  ;;  %v3101_v46 = vmul.f32 %v6308_v29, %v6308_v29 }
 0x3d0   : > { %v3106_v13 = vadd.f32 %v3105_v8, %v3075_v21 }
 0x3d2   : > { %v3107_v31 = vadd.f32 %v3106_v13, %v3076_v61 }
 0x3d4   : > { %v3108_v11 = vadd.f32 %v3107_v31, %v3077_v28 }
 0x3d6   : > { %v3109_v7 = vadd.f32 %v3108_v11, %v3078_v45 }
 0x3d8   : > { %v3110_v44 = vadd.f32 %v3109_v7, %v3079_v22 }
 0x3da   : > { %v3111_v19 = vadd.f32 %v3110_v44, %v3080_v3 }
 0x3dc   : > { %v3112_v17 = vadd.f32 %v3111_v19, %v3081_v35 }
 0x3de   : > { %v3113_v1 = vadd.f32 %v3112_v17, %v3082_v16 }
 0x3e0   : > { %v3114_v2 = vadd.f32 %v3113_v1, %v3083_v36 }
 0x3e2   : > { %v3115_v10 = vadd.f32 %v3114_v2, %v3084_v34 }
 0x3e4   : > { %v3116_v20 = vadd.f32 %v3115_v10, %v3085_v63 }
 0x3e6   : > { %v3117_v58 = vadd.f32 %v3116_v20, %v3086_v54 }
 0x3e8   : > { %v3118_v40 = vadd.f32 %v3117_v58, %v3087_v39 }
 0x3ea   : > { %v3119_v27 = vadd.f32 %v3118_v40, %v3088_v43 }
 0x3ec   : > { %v3120_v0 = vadd.f32 %v3119_v27, %v3089_v50 }
 0x3ee   : > { %v3121_v9 = vadd.f32 %v3120_v0, %v3090_v4 }
 0x3f0   : > { %v3122_v42 = vadd.f32 %v3121_v9, %v3091_v56 }
 0x3f2   : > { %v3123_v60 = vadd.f32 %v3122_v42, %v3092_v48 }
 0x3f4   : > { %v3124_v12 = vadd.f32 %v3123_v60, %v3093_v47 }
 0x3f6   : > { %v3125_v23 = vadd.f32 %v3124_v12, %v3094_v57 }
 0x3f8   : > { %v3126_v6 = vadd.f32 %v3125_v23, %v3095_v25 }
 0x3fa   : > { %v3127_v15 = vadd.f32 %v3126_v6, %v3096_v32 }
 0x3fc   : > { %v3128_v52 = vadd.f32 %v3127_v15, %v3097_v55 }
 0x3fe   : > { %v3129_v26 = vadd.f32 %v3128_v52, %v3098_v62 }
 0x400   : > { %v3130_v49 = vadd.f32 %v3129_v26, %v3099_v37 }
 0x402   : > { %v3131_v14 = vadd.f32 %v3130_v49, %v3100_v38 }
 0x404   : > { %v3132_v24 = vadd.f32 %v3131_v14, %v3101_v46 }
 0x406   : > { %v3133_v53 = vrot.slane %v3132_v24, 4 }
 0x408   : > { %v3134_v59 = vadd.f32 %v3133_v53, %v3132_v24 }
 0x40a   : > { %v3135_v30 = vrot.slane %v3134_v59, 2 }
 0x40c   : > { %v3136_v21 = vadd.f32 %v3135_v30, %v3134_v59 }
 0x40e   : > { %v3137_v8 = vrot.slane %v3136_v21, 1 }
 0x410   : > { %v3138_v33 = vadd.f32 %v3137_v8, %v3136_v21 }
 0x412   : > { %3139 = vst [vmem:[%s6274_s15 + $0x1] sm:$0x1] %v3138_v33 }
 0x413 PF: > { %s18_s24 = sadd.s32 1, %s3549_s24  }
 0x414   : > { %p15_p4 = scmp.ge.s32.totalorder %s18_s24, 4  }
 0x416   :  { %17 = sbr.rel (!%p15_p4) target bundleno = 1 (0x1), region = 86 }

</bundles_post_ra>
